<compile_context>
chip_gen: v7x
topology: tpu7x:2x2x1
jax: 0.10.0
libtpu: 0.0.40
codegen_flags: <defaults>
</compile_context>

<pallas_src>
import functools

import jax
import jax.numpy as jnp
from jax.experimental import pallas as pl
from jax.experimental.pallas import tpu as pltpu

# Real module dimensions (Linear(196608, 4800)); kernel is shape-generic.
IN_FEATURES = 196608
OUT_FEATURES = 4800


def _tpu_defaults():
    """Pick (n_split, tk, vmem_limit_bytes) from the TPU generation."""
    try:
        kind = jax.devices()[0].device_kind.lower()
    except Exception:  # pragma: no cover - be robust off-TPU
        kind = ""
    if "v7" in kind:
        # 64 MiB VMEM, 2 TensorCores: split N across cores, <=56 MiB scoped.
        return 2, 3072, 56 * 1024 * 1024
    # v5e / v6e: 128 MiB VMEM, single TensorCore -> contiguous full-width N.
    return 1, 4096, 96 * 1024 * 1024


def prepare_params(w_t, b, *, tk, n_split):
    """One-time packing of Linear parameters for the streaming kernel.

    w_t : (K, N) f32  -- torch weight transposed (so out = x @ w_t + b)
    b   : (1, N) f32
    Returns:
      w_packed : (n_split, K_pad, tn) bf16, per-core row-contiguous
      b_packed : (n_split, 1, tn)     f32
    """
    K, N = w_t.shape
    k_pad = (-K) % tk
    n_pad = (-N) % (n_split * 128)
    K_pad, N_pad = K + k_pad, N + n_pad
    tn = N_pad // n_split

    wb = w_t.astype(jnp.bfloat16)
    if k_pad or n_pad:
        wb = jnp.pad(wb, ((0, k_pad), (0, n_pad)))
    bb = b.astype(jnp.float32)
    if n_pad:
        bb = jnp.pad(bb, ((0, 0), (0, n_pad)))

    # (K_pad, N_pad) -> (n_split, K_pad, tn): column slab j is contiguous.
    w_packed = wb.reshape(K_pad, n_split, tn).transpose(1, 0, 2)
    b_packed = bb.reshape(1, n_split, tn).transpose(1, 0, 2)
    return w_packed, b_packed


def _linear_kernel(x_ref, w_ref, b_ref, o_ref):
    """x_ref: (B, tk) bf16; w_ref: (tk, tn) bf16; b_ref: (1, tn) f32;
    o_ref: (B, tn) f32, resident across the K reduction axis (grid axis 1)."""
    k = pl.program_id(1)

    @pl.when(k == 0)
    def _():
        # Fresh output block for this N-slab: start from the bias.
        o_ref[...] = jnp.broadcast_to(b_ref[...], o_ref.shape).astype(jnp.float32)

    o_ref[...] += jnp.dot(
        x_ref[...], w_ref[...], preferred_element_type=jnp.float32
    )


@functools.partial(jax.jit, static_argnames=("n_out", "tk", "vmem_limit"))
def nn_net_forward(x, w_packed, b_packed, *, n_out, tk, vmem_limit):
    """Forward of nn.Linear with pre-packed parameters.

    x        : (B, K) f32   -- flattened input (PyTorch Linear input layout)
    w_packed : (n_split, K_pad, tn) bf16  -- from prepare_params
    b_packed : (n_split, 1, tn) f32
    returns (B, n_out) f32
    """
    B, K = x.shape
    n_split, K_pad, tn = w_packed.shape
    N_pad = n_split * tn
    assert K_pad % tk == 0, "padded contraction dim must be a multiple of tk"
    k_pad = K_pad - K

    # x is tiny: cast/pad it per call (cheap); the weight is already packed.
    xb = x.astype(jnp.bfloat16)
    if k_pad:
        xb = jnp.pad(xb, ((0, 0), (0, k_pad)))

    nk = K_pad // tk
    cost = pl.CostEstimate(
        flops=2 * B * K_pad * N_pad,
        transcendentals=0,
        bytes_accessed=(K_pad * N_pad * 2          # bf16 weight stream (dominant)
                        + n_split * B * K_pad * 2  # bf16 x (re-streamed per slab)
                        + B * N_pad * 4            # f32 output
                        + N_pad * 4),              # f32 bias
    )

    out = pl.pallas_call(
        _linear_kernel,
        out_shape=jax.ShapeDtypeStruct((B, N_pad), jnp.float32),
        grid_spec=pltpu.PrefetchScalarGridSpec(
            num_scalar_prefetch=0,
            grid=(n_split, nk),                                   # (N slabs, K tiles)
            in_specs=[
                pl.BlockSpec((B, tk), lambda j, k: (0, k)),       # x: streamed per K tile
                pl.BlockSpec((None, tk, tn), lambda j, k: (j, k, 0)),  # contiguous weight tile
                pl.BlockSpec((None, 1, tn), lambda j, k: (j, 0, 0)),   # bias slab
            ],
            out_specs=pl.BlockSpec((B, tn), lambda j, k: (0, j)),
        ),
        compiler_params=pltpu.CompilerParams(
            dimension_semantics=("parallel", "arbitrary"),
            vmem_limit_bytes=vmem_limit,
        ),
        cost_estimate=cost,
    )(xb, w_packed, b_packed)

    return out[:, :n_out]


if __name__ == "__main__":
    # The real layer's f32 weight is ~3.8 GB, which would OOM a small sandbox
    # host, so exercise the identical kernel at scaled-down (K, N) here.
    # TODO(synk): run at the full 196608x4800 shape on a host with enough RAM.
    B, K, N = 2, 8192, 1024

    n_split, tk, vmem_limit = _tpu_defaults()

    key = jax.random.PRNGKey(0)
    kx, kw, kb = jax.random.split(key, 3)

    # PyTorch Linear default init: U(-1/sqrt(in_features), 1/sqrt(in_features)).
    bound = 1.0 / (K ** 0.5)
    w_t = jax.random.uniform(kw, (K, N), jnp.float32, -bound, bound)
    b = jax.random.uniform(kb, (1, N), jnp.float32, -bound, bound)
    x = jax.random.normal(kx, (B, K), jnp.float32)

    # One-time parameter packing (hoisted out of the forward pass).
    w_packed, b_packed = prepare_params(w_t, b, tk=tk, n_split=n_split)
    w_packed, b_packed = jax.block_until_ready((w_packed, b_packed))

    out = jax.block_until_ready(
        nn_net_forward(x, w_packed, b_packed, n_out=N, tk=tk,
                       vmem_limit=vmem_limit))
    assert out.shape == (B, N) and out.dtype == jnp.float32

    # Reference in the same (bf16 operands, f32 accumulate) numerics.
    # NOTE: bf16 weight streaming is an intentional numerics tradeoff vs the
    # f32 PyTorch Linear; validated here against a matching bf16 reference.
    ref = jax.block_until_ready(
        jnp.dot(x.astype(jnp.bfloat16), w_t.astype(jnp.bfloat16),
                preferred_element_type=jnp.float32) + b)
    assert jnp.allclose(out, ref, rtol=5e-3, atol=5e-3), "mismatch vs reference"

    print("KERNEL_OK")
</pallas_src>

<mosaic_0001>
module attributes {stable_mosaic.version = 11 : i64} {
  func.func @_linear_kernel(%arg0: i32, %arg1: i32, %arg2: memref<2x4096xbf16, #tpu.memory_space<vmem>>, %arg3: memref<1x4096x1024xbf16, #tpu.memory_space<vmem>>, %arg4: memref<1x1x1024xf32, #tpu.memory_space<vmem>>, %arg5: memref<2x1024xf32, #tpu.memory_space<vmem>>) attributes {dimension_semantics = [#tpu.dimension_semantics<parallel>, #tpu.dimension_semantics<arbitrary>], iteration_bounds = array<i64: 1, 2>, scalar_prefetch = 0 : i64, scratch_operands = 0 : i64, tpu.core_type = #tpu.core_type<tc>, window_params = [{transform_indices = @transform_0, window_bounds = array<i64: 2, 4096>}, {transform_indices = @transform_1, window_bounds = array<i64: 1, 4096, 1024>}, {transform_indices = @transform_2, window_bounds = array<i64: 1, 1, 1024>}, {transform_indices = @transform_3, window_bounds = array<i64: 2, 1024>}]} {
    %c0_i32 = arith.constant 0 : i32
    %0 = arith.cmpi eq, %arg1, %c0_i32 : i32
    %1 = arith.extui %0 : i1 to i32
    %c0_i32_0 = arith.constant 0 : i32
    %2 = arith.cmpi ne, %1, %c0_i32_0 : i32
    scf.if %2 {
      %c0_9 = arith.constant 0 : index
      %c0_10 = arith.constant 0 : index
      %c0_11 = arith.constant 0 : index
      %10 = vector.load %arg4[%c0_9, %c0_10, %c0_11] : memref<1x1x1024xf32, #tpu.memory_space<vmem>>, vector<1x1x1024xf32>
      %11 = vector.shape_cast %10 : vector<1x1x1024xf32> to vector<1x1024xf32>
      %12 = vector.shape_cast %11 : vector<1x1024xf32> to vector<1x1024xf32>
      %13 = vector.broadcast %12 : vector<1x1024xf32> to vector<2x1024xf32>
      %c0_12 = arith.constant 0 : index
      %c0_13 = arith.constant 0 : index
      %14 = vector.load %arg5[%c0_12, %c0_13] : memref<2x1024xf32, #tpu.memory_space<vmem>>, vector<2x1024xf32>
      tpu.vector_store %arg5[%c0_12, %c0_13], %13 {strides = array<i32>} : memref<2x1024xf32, #tpu.memory_space<vmem>>, vector<2x1024xf32>,
    } else {
    }
    %c0 = arith.constant 0 : index
    %c0_1 = arith.constant 0 : index
    %3 = vector.load %arg5[%c0, %c0_1] : memref<2x1024xf32, #tpu.memory_space<vmem>>, vector<2x1024xf32>
    %c0_2 = arith.constant 0 : index
    %c0_3 = arith.constant 0 : index
    %4 = vector.load %arg2[%c0_2, %c0_3] : memref<2x4096xbf16, #tpu.memory_space<vmem>>, vector<2x4096xbf16>
    %c0_4 = arith.constant 0 : index
    %c0_5 = arith.constant 0 : index
    %c0_6 = arith.constant 0 : index
    %5 = vector.load %arg3[%c0_4, %c0_5, %c0_6] : memref<1x4096x1024xbf16, #tpu.memory_space<vmem>>, vector<1x4096x1024xbf16>
    %6 = vector.shape_cast %5 : vector<1x4096x1024xbf16> to vector<4096x1024xbf16>
    %cst = arith.constant dense<0.000000e+00> : vector<2x1024xf32>
    %7 = tpu.matmul %4, %6, %cst {dimension_numbers = #tpu.dot_dimension_numbers<[1], [0], [0], [1], [0, 0, 1, 1], [], []>} : vector<2x4096xbf16>, vector<4096x1024xbf16>, vector<2x1024xf32> -> vector<2x1024xf32>
    %8 = arith.addf %3, %7 : vector<2x1024xf32>
    %c0_7 = arith.constant 0 : index
    %c0_8 = arith.constant 0 : index
    %9 = vector.load %arg5[%c0_7, %c0_8] : memref<2x1024xf32, #tpu.memory_space<vmem>>, vector<2x1024xf32>
    tpu.vector_store %arg5[%c0_7, %c0_8], %8 {strides = array<i32>} : memref<2x1024xf32, #tpu.memory_space<vmem>>, vector<2x1024xf32>,
    return
  }
  func.func @transform_0(%arg0: i32, %arg1: i32) -> (i32, i32) {
    %c0_i32 = arith.constant 0 : i32
    %c0_i32_0 = arith.constant 0 : i32
    return %c0_i32, %arg1 : i32, i32
  }
  func.func @transform_1(%arg0: i32, %arg1: i32) -> (i32, i32, i32) {
    %c0_i32 = arith.constant 0 : i32
    %c0_i32_0 = arith.constant 0 : i32
    return %arg0, %arg1, %c0_i32 : i32, i32, i32
  }
  func.func @transform_2(%arg0: i32, %arg1: i32) -> (i32, i32, i32) {
    %c0_i32 = arith.constant 0 : i32
    %c0_i32_0 = arith.constant 0 : i32
    %c0_i32_1 = arith.constant 0 : i32
    return %arg0, %c0_i32, %c0_i32_0 : i32, i32, i32
  }
  func.func @transform_3(%arg0: i32, %arg1: i32) -> (i32, i32) {
    %c0_i32 = arith.constant 0 : i32
    %c0_i32_0 = arith.constant 0 : i32
    return %c0_i32, %arg0 : i32, i32
  }
}

</mosaic_0001>

<bundles_post_ra>
// kernel: nn_net_forward.1
= control target key start
LH: loop header
LB: loop body
LE: loop exit
PB: predicated region body
PF: predicated region fallthrough
CT: control target
= control target key end

     0   :  { %8 = vsyncpa [#allocation3], 0  ;;  %s20862_s0 = inlined_call_operand.hbm [shape: bf16[2,8192], index: 0, kind: input, shape index: {}]   ;;  %s20863_s1 = inlined_call_operand.hbm [shape: bf16[1,8192,1024], index: 1, kind: input, shape index: {}]   ;;  %s20864_s2 = inlined_call_operand.hbm [shape: f32[1,1,1024], index: 2, kind: input, shape index: {}]   ;;  %s20865_s3 = inlined_call_operand.hbm [shape: f32[2,1024], index: 3, kind: output, shape index: {}]  }
   0x1   :  { %10 = vsyncpa [#allocation3 + $0x1], 0 }
   0x2   :  { %11 = vsyncpa [#allocation6], 0 }
   0x3   :  { %13 = vsyncpa [#allocation6 + $0x1], 0 }
   0x4   :  { %14 = vsyncpa [#allocation4], 0  ;;  %s18247_s12 = smov 0   ;;  %s18249_s13 = smov 0  }
   0x5   :  { %s18251_s14 = smov 0   ;;  %s18253_s15 = smov 0  }
   0x6   :  { %s18255_s16 = smov 0   ;;  %s18257_s17 = smov 0  }
   0x7 LB: > { %s18276_s18 = sadd.s32 4294967295, %s18216_s17   ;;  %s39_s19 = sadd.s32 1, %s18204_s14  ;;  %s18216_s17 = sphi %s18257_s17, %s20_s17   ;;  %s18212_s16 = sphi %s18255_s16, %s20886_s16   ;;  %s18208_s15 = sphi %s18253_s15, %s20885_s15   ;;  %s18204_s14 = sphi %s18251_s14, %s20884_s14   ;;  %s18200_s13 = sphi %s18249_s13, %s20883_s13   ;;  %s18196_s12 = sphi %s18247_s12, %s20882_s12  }
   0x8   : > { %p46_p0 = scmp.ne.s32.totalorder %s18204_s14, %s18200_s13  ;;  %p52_p1 = scmp.ne.s32.totalorder %s18200_s13, %s18196_s12 }
   0x9   : > { %p20866_p2 = scmp.eq.s32.totalorder %s18276_s18, 0  ;;  %p15643_p3 = scmp.ge.s32.totalorder %s18216_s17, 1 }
   0xa   : > { %p143_p4 = scmp.lt.s32.totalorder %s18216_s17, 3  ;;  %s18218_s22 = smov [#allocation7]  }
   0xb   : > { %p18287_p5 = por %p20866_p2, %p52_p1  ;;  %s159_s23 = sshll.u32 %s18218_s22, 4  ;;  %s160_s23 = int_to_ptr.vmem [resolvable:$true] %s159_s23 }
   0xc   : > { %p18291_p6 = pnand %p15643_p3, %p143_p4  ;;  %p47_p8 = scmp.eq.s32.totalorder %s18216_s17, 0 }
   0xd   : > { %s20869_s20 = scalar_select %p18287_p5, 1, 0 }
   0xe   : > { %s20870_s21 = scalar_select %p18291_p6, 1, 0 }
   0xf   : > { %p17965_p7 = pneg %p18291_p6  ;;  %s29_s25 = sadd.s32 1, %s18212_s16 }
  0x10   : > { %p18305_p10 = scmp.ge.s32.totalorder %s29_s25, 2  ;;  %p18312_p11 = por %p47_p8, %p46_p0 }
  0x11   : > { %p18300_p9 = pnand %p17965_p7, %p20866_p2  ;;  %s18040_s30 = scalar_lea.hbm %s20864_s2, 128 }
  0x12   : > { %s20872_s26 = scalar_select %p18305_p10, 1, 0 }
  0x13   : > { %s20873_s27 = scalar_select %p18312_p11, 1, 0 }
  0x14   : > { %p18041_p13 = scmp.ne.s32.totalorder %s20864_s2, %s18040_s30  ;;  %p18042_p1 = pneg %p18300_p9 }
  0x15   : > { %p18047_p0 = scmp.lt.u32.totalorder %s18040_s30, %s20864_s2 }
  0x16   : > { %p18043_p3 = pnand %p18042_p1, %p18041_p13 }
  0x18   : > { %p18044_p4 = pneg %p18043_p3 }
  0x1a   : > { %p18049_p7 = pnand %p18047_p0, %p18044_p4 }
  0x1c   : > { %18052 = shalt.err (!%p18049_p7)
}
  0x1d   : > { %s18053_s8 = scalar_lea.vmem %s160_s23, 128  ;;  %p18061_p5 = scmp.lt.s32.totalorder %s160_s23, %s160_s23 }
  0x1e   : > { %p18054_p8 = scmp.ne.s32.totalorder %s160_s23, %s18053_s8  ;;  %p18062_p6 = scmp.lt.s32.totalorder %s18053_s8, %s18053_s8 }
  0x20   : > { %p18056_p2 = pnand %p18054_p8, %p18042_p1  ;;  %p18063_p11 = por %p18062_p6, %p18061_p5 }
  0x22   : > { %p18057_p12 = pneg %p18056_p2 }
  0x24   : > { %p18064_p10 = pnand %p18063_p11, %p18057_p12 }
  0x26   : > { %18067 = shalt.err (!%p18064_p10)
}
  0x27   : > { %17968 = dma.hbm_to_vmem [thread:$0]  (!%p18300_p9), %s20864_s2, 128, %s160_s23, [#allocation6]  }
  0x28   : > { %p20874_p2 = scmp.ne.s32.totalorder %s20872_s26, 0  ;;  %s18338_s11 = sand.u32 1, %s18204_s14  }
  0x29   : > { %s17710_s12 = sshll.u32 %s18212_s16, 9  ;;  %s15646_s24 = sshll.u32 %s18338_s11, 5 }
  0x2a   : > { %s20888_s25 = smov (%p20874_p2, %s29_s25), 0  ;;  %s18347_s30 = scalar_lea.hbm %s20862_s0, %s17710_s12 }
  0x2b   : > { %s36_s22 = ssub.s32 %s18212_s16, %s20888_s25  ;;  %s174_s26 = scalar_lea.vmem [#allocation2], %s15646_s24 }
  0x2c   : > { %p37_p5 = scmp.eq.s32.totalorder %s36_s22, 0  ;;  %s182_s4 = sshll.u32 %s174_s26, 4  ;;  %s18362_s4 = int_to_ptr.vmem [resolvable:$true] %s182_s4 }
  0x2d   : > { %p20875_p6 = scmp.ne.s32.totalorder %s20873_s27, 0  ;;  %p20876_p9 = scmp.lt.s32.totalorder %s18216_s17, 2 }
  0x2e   : > { %s18352_s23 = scalar_select %p37_p5, %s18204_s14, %s39_s19  }
  0x2f   : > { %p18358_p10 = pnand %p20876_p9, %p20875_p6  ;;  %s15649_s6 = sshll.u32 %s18338_s11, 14 }
  0x30   : > { %s171_s7 = scalar_lea.sflag [#allocation3], %s18338_s11  ;;  %s18068_s8 = scalar_lea.hbm %s18347_s30, 512 }
  0x31   : > { %p18069_p11 = scmp.ne.s32.totalorder %s18347_s30, %s18068_s8  ;;  %p18070_p12 = pneg %p18358_p10 }
  0x32   : > { %s18073_s9 = scalar_lea.hbm %s20862_s0, 1024  ;;  %p18074_p3 = scmp.lt.u32.totalorder %s18347_s30, %s20862_s0 }
  0x33   : > { %p18071_p13 = pnand %p18070_p12, %p18069_p11  ;;  %p18075_p4 = scmp.lt.u32.totalorder %s18073_s9, %s18068_s8 }
  0x34   : > { %p18077_p7 = scmp.lt.u32.totalorder %s18068_s8, %s18347_s30 }
  0x35   : > { %p18072_p1 = pneg %p18071_p13  ;;  %p18076_p0 = por %p18075_p4, %p18074_p3 }
  0x37   : > { %p18078_p8 = por %p18077_p7, %p18076_p0 }
  0x39   : > { %p18079_p2 = pnand %p18078_p8, %p18072_p1 }
  0x3b   : > { %18082 = shalt.err (!%p18079_p2)
}
  0x3c   : > { %s18083_s22 = scalar_lea.vmem %s18362_s4, 512  ;;  %s18219_s24 = smov [#allocation2]  }
  0x3d   : > { %p18084_p5 = scmp.ne.s32.totalorder %s18362_s4, %s18083_s22  ;;  %s18088_s28 = sshll.u32 %s18219_s24, 4  ;;  %s18089_s28 = int_to_ptr.vmem [resolvable:$false] %s18088_s28 }
  0x3e   : > { %s18090_s29 = scalar_lea.vmem %s18089_s28, 1024  ;;  %p18091_p11 = scmp.lt.s32.totalorder %s18362_s4, %s18089_s28 }
  0x3f   : > { %p18086_p6 = pnand %p18084_p5, %p18070_p12  ;;  %p18092_p13 = scmp.lt.s32.totalorder %s18090_s29, %s18083_s22 }
  0x41   : > { %p18087_p9 = pneg %p18086_p6  ;;  %p18093_p3 = por %p18092_p13, %p18091_p11 }
  0x43   : > { %p18094_p4 = pnand %p18093_p3, %p18087_p9 }
  0x45   : > { %18097 = shalt.err (!%p18094_p4)
}
  0x46   : > { %17972 = dma.hbm_to_vmem [thread:$0]  (!%p18358_p10), %s18347_s30, 512, %s18362_s4, %s171_s7  }
  0x47   : > { %s17712_s26 = sshll.u32 %s18212_s16, 18  ;;  %s193_s8 = scalar_lea.vmem [#allocation5], %s15649_s6 }
  0x48   : > { %s203_s19 = sshll.u32 %s193_s8, 4  ;;  %s189_s27 = sand.u32 1, %s18216_s17   ;;  %s18394_s19 = int_to_ptr.vmem [resolvable:$true] %s203_s19 }
  0x49   : > { %s18400_s12 = scalar_lea.hbm %s20863_s1, %s17712_s26  ;;  %s18402_s22 = scalar_lea.sflag [#allocation6], %s189_s27 }
  0x4a   : > { %s18098_s24 = scalar_lea.hbm %s18400_s12, 262144  ;;  %s18103_s4 = scalar_lea.hbm %s20863_s1, 524288 }
  0x4b   : > { %p18099_p1 = scmp.ne.s32.totalorder %s18400_s12, %s18098_s24  ;;  %p18104_p8 = scmp.lt.u32.totalorder %s18400_s12, %s20863_s1 }
  0x4c   : > { %p18105_p2 = scmp.lt.u32.totalorder %s18103_s4, %s18098_s24  ;;  %p18107_p6 = scmp.lt.u32.totalorder %s18098_s24, %s18400_s12 }
  0x4d   : > { %p18101_p0 = pnand %p18099_p1, %p18070_p12 }
  0x4e   : > { %p18106_p5 = por %p18105_p2, %p18104_p8 }
  0x4f   : > { %p18102_p7 = pneg %p18101_p0 }
  0x50   : > { %p18108_p9 = por %p18107_p6, %p18106_p5 }
  0x52   : > { %p18109_p11 = pnand %p18108_p9, %p18102_p7 }
  0x54   : > { %18112 = shalt.err (!%p18109_p11)
}
  0x55   : > { %s18113_s28 = scalar_lea.vmem %s18394_s19, 262144  ;;  %s18220_s29 = smov [#allocation5]  }
  0x56   : > { %p18114_p13 = scmp.ne.s32.totalorder %s18394_s19, %s18113_s28  ;;  %s18118_s26 = sshll.u32 %s18220_s29, 4  ;;  %s18119_s26 = int_to_ptr.vmem [resolvable:$false] %s18118_s26 }
  0x57   : > { %s18120_s8 = scalar_lea.vmem %s18119_s26, 524288  ;;  %p18121_p1 = scmp.lt.s32.totalorder %s18394_s19, %s18119_s26 }
  0x58   : > { %p18116_p3 = pnand %p18114_p13, %p18070_p12  ;;  %p18122_p0 = scmp.lt.s32.totalorder %s18120_s8, %s18113_s28 }
  0x5a   : > { %p18117_p4 = pneg %p18116_p3  ;;  %p18123_p8 = por %p18122_p0, %p18121_p1 }
  0x5c   : > { %p18124_p2 = pnand %p18123_p8, %p18117_p4 }
  0x5e   : > { %18127 = shalt.err (!%p18124_p2)
}
  0x5f   : > { %s18221_s27 = smov 512   ;;  %s18222_s9 = smov 32  }
  0x60   : > { %17975 = dma.hbm_to_vmem [thread:$0]  (!%p18358_p10), %s18400_s12, 262144, %s18394_s19, %s18402_s22, %s18221_s27, %s18221_s27, %s18222_s9  }
  0x61   : > { %p20878_p12 = scmp.ne.s32.totalorder %s20870_s21, 0 }
  0x62   : > { %s217_s10 = sand.u32 (!%p20878_p12), 1, %s18200_s13   ;;  %p20879_p7 = scmp.ne.s32.totalorder (!%p20878_p12), %s20869_s20, 0 }
  0x63   : > { %215 = sbr.rel (%p20878_p12) target bundleno = 2420 (0x974), region = 32  ;;  %s15654_s24 = sshll.u32 (!%p20878_p12), %s217_s10, 5 }
  0x64   : > { %s218_s11 = scalar_lea.sflag (!%p20878_p12), [#allocation3], %s217_s10  ;;  %s18431_s30 = scalar_lea.vmem (!%p20878_p12), [#allocation2], %s15654_s24 }
  0x6a   : > { %18179 = dma.done.wait (%p20879_p7), %s218_s11, 512  }
  0x6b   : > { %18181 = vsyncadd (%p20879_p7), %s218_s11, 4294966784  ;;  %s226_s4 = sand.u32 1, %s18276_s18   ;;  %s15655_s5 = sshll.u32 %s217_s10, 14 }
  0x6c   : > { %s227_s19 = scalar_lea.sflag [#allocation6], %s226_s4  ;;  %s18438_s12 = scalar_lea.vmem [#allocation5], %s15655_s5 }
  0x6d   : > { %18183 = dma.done.wait (%p20879_p7), %s227_s19, 262144  }
  0x6e   : > { %18185 = vsyncadd (%p20879_p7), %s227_s19, 4294705152  ;;  %p20880_p10 = scmp.eq.s32.totalorder %s18276_s18, 0 }
  0x70   : > { %18187 = dma.done.wait (%p20880_p10), [#allocation6], 128   ;;  %p20881_p5 = pmov %p20880_p10 }
  0x71   : > { %p15657_p6 = scmp.ne.s32.totalorder %s18208_s15, 0 }
  0x72   : > { %18189 = vsyncadd (%p20881_p5), [#allocation6], 4294967168  ;;  %v266_v0 = vlaneseq (!%p15657_p6)  ;;  %v18223_v1 = vmov (!%p15657_p6), 1983009808   ;;  %v264_v4 = vld [vmem:[#allocation7] sm:$0xff] (!%p15657_p6) }
  0x73   : > { %263 = sbr.rel (%p15657_p6) target bundleno = 132 (0x84), region = 48  ;;  %v301_v2 = vunpack.c.l.s4 (!%p15657_p6), %v18223_v1 }
  0x74   : > { %v267_v3 = vshrl.u32 (!%p15657_p6), %v266_v0, 7 }
  0x75   : > { %v302_v5 = vunpack.c.0.s8 (!%p15657_p6), %v301_v2 }
  0x76   : > { %v268_v6 = vsub.s32 (!%p15657_p6), 0, %v267_v3  ;;  %v272_v7 = vsub.s32 (!%p15657_p6), 1, %v267_v3  ;;  %v276_v8 = vsub.s32 (!%p15657_p6), 2, %v267_v3  ;;  %v280_v9 = vsub.s32 (!%p15657_p6), 3, %v267_v3 }
  0x77   : > { %v305_v10 = vsub.s32 (!%p15657_p6), %v302_v5, %v267_v3  ;;  %v284_v11 = vsub.s32 (!%p15657_p6), 4, %v267_v3  ;;  %v288_v12 = vsub.s32 (!%p15657_p6), 5, %v267_v3  ;;  %v292_v13 = vsub.s32 (!%p15657_p6), 6, %v267_v3 }
  0x78   : > { %v269_v14 = vrot.slane (!%p15657_p6), %v264_v4, %v268_v6  ;;  %v273_v15 = vrot.slane (!%p15657_p6), %v264_v4, %v272_v7  ;;  %v277_v16 = vrot.slane (!%p15657_p6), %v264_v4, %v276_v8  ;;  %v281_v17 = vrot.slane (!%p15657_p6), %v264_v4, %v280_v9 }
  0x79   : > { %v285_v18 = vrot.slane (!%p15657_p6), %v264_v4, %v284_v11  ;;  %v289_v19 = vrot.slane (!%p15657_p6), %v264_v4, %v288_v12  ;;  %v293_v20 = vrot.slane (!%p15657_p6), %v264_v4, %v292_v13  ;;  %v296_v21 = vsub.s32 (!%p15657_p6), 7, %v267_v3 }
  0x7a   : > { %v298_v22 = vcombine.low %v269_v14, %v273_v15  ;;  %v299_v23 = vcombine.low %v277_v16, %v281_v17 }
  0x7b   : > { %v297_v24 = vrot.slane %v264_v4, %v296_v21  ;;  %v315_v25 = vcombine.low %v285_v18, %v289_v19 }
  0x7c   : > { %v306_v26 = vrot.slane %v298_v22, %v305_v10  ;;  %v313_v27 = vrot.slane %v299_v23, %v305_v10 }
  0x7d   : > { %v316_v28 = vcombine.low %v293_v20, %v297_v24  ;;  %v323_v29 = vrot.slane %v315_v25, %v305_v10 }
  0x7e   : > { %v314_v30 = vcombine.low %v306_v26, %v313_v27 }
  0x7f   : > { %v330_v31 = vrot.slane %v316_v28, %v305_v10 }
  0x80   : > { %334 = vst [vmem:[#allocation8] sm:$0xff] %v314_v30 }
  0x81   : > { %v331_v32 = vcombine.low %v323_v29, %v330_v31 }
  0x83   : > { %335 = vst [vmem:[#allocation8 + $0x8] sm:$0xff] %v331_v32 }
  0x84 PF: > { %v342_v33 = vld [vmem:[%s18438_s12] sm:$0xff]  ;;  %v343_v35 = vld [vmem:[%s18438_s12 + $0x8] sm:$0xff]  ;;  %v18224_v1 = vmov 1966171168   ;;  %v2398_v3 = vlaneseq  ;;  %s18226_s15 = smov [#allocation8]   ;;  %p17979_p9 = scmp.eq.s32.totalorder %s18276_s18, 1 }
  0x85   : > { %v346_v34 = vld [vmem:[%s18438_s12 + $0x20] sm:$0xff]  ;;  %v347_v37 = vld [vmem:[%s18438_s12 + $0x28] sm:$0xff]  ;;  %v2396_v2 = vunpack.c.l.s4 %v18224_v1  ;;  %s15544_s20 = sshll.u32 %s18226_s15, 4  ;;  %s15545_s20 = int_to_ptr.vmem [resolvable:$true] %s15544_s20 }
  0x86   : > { %v15659_v36 = vcombine.high %v342_v33, %v346_v34  ;;  %v15658_v38 = vcombine.low %v342_v33, %v346_v34  ;;  %v350_v39 = vld [vmem:[%s18438_s12 + $0x40] sm:$0xff]  ;;  %v15661_v41 = vcombine.high %v343_v35, %v347_v37  ;;  %v15660_v42 = vcombine.low %v343_v35, %v347_v37  ;;  %v351_v44 = vld [vmem:[%s18438_s12 + $0x48] sm:$0xff]  ;;  %s18128_s21 = scalar_lea.vmem %s15545_s20, 256  ;;  %p18135_p4 = scmp.lt.s32.totalorder %s15545_s20, %s15545_s20 }
  0x87   : > { %v354_v40 = vld [vmem:[%s18438_s12 + $0x60] sm:$0xff]  ;;  %v355_v45 = vld [vmem:[%s18438_s12 + $0x68] sm:$0xff]  ;;  %v2397_v12 = vunpack.c.0.s8 %v2396_v2  ;;  %v18471_v13 = vshrl.u32 %v2398_v3, 7  ;;  %p18129_p11 = scmp.ne.s32.totalorder %s15545_s20, %s18128_s21  ;;  %p18136_p1 = scmp.lt.s32.totalorder %s18128_s21, %s18128_s21 }
  0x88   : > { %v15667_v43 = vcombine.high %v350_v39, %v354_v40  ;;  %v358_v46 = vld [vmem:[%s18438_s12 + $0x80] sm:$0xff]  ;;  %12862 = vmatprep.subr.bf16.mxu0 %v15659_v36  ;;  %v15669_v47 = vcombine.high %v351_v44, %v355_v45  ;;  %v359_v49 = vld [vmem:[%s18438_s12 + $0x88] sm:$0xff]  ;;  %13518 = vmatprep.subr.bf16.mxu1 %v15661_v41  ;;  %v15666_v51 = vcombine.low %v350_v39, %v354_v40 }
  0x89   : > { %v362_v48 = vld [vmem:[%s18438_s12 + $0xa0] sm:$0xff]  ;;  %v363_v50 = vld [vmem:[%s18438_s12 + $0xa8] sm:$0xff]  ;;  %12863 = vmatpush1.bf16.msra.mxu0 %v15658_v38  ;;  %13519 = vmatpush1.bf16.msra.mxu1 %v15660_v42  ;;  %v15668_v52 = vcombine.low %v351_v44, %v355_v45  ;;  %v18478_v22 = vsub.s32 %v2397_v12, %v18471_v13  ;;  %p18130_p13 = pnand %p18129_p11, %p17979_p9  ;;  %p18137_p0 = por %p18136_p1, %p18135_p4 }
  0x8a   : > { %12864 = vmatprep.subr.bf16.mxu0 %v15667_v43  ;;  %v15675_v53 = vcombine.high %v358_v46, %v362_v48  ;;  %13520 = vmatprep.subr.bf16.mxu1 %v15669_v47  ;;  %v15677_v54 = vcombine.high %v359_v49, %v363_v50  ;;  %v366_v55 = vld [vmem:[%s18438_s12 + $0xc0] sm:$0xff]  ;;  %v367_v57 = vld [vmem:[%s18438_s12 + $0xc8] sm:$0xff]  ;;  %v15674_v59 = vcombine.low %v358_v46, %v362_v48 }
  0x8b   : > { %v370_v56 = vld [vmem:[%s18438_s12 + $0xe0] sm:$0xff]  ;;  %v371_v58 = vld [vmem:[%s18438_s12 + $0xe8] sm:$0xff]  ;;  %v15676_v60 = vcombine.low %v359_v49, %v363_v50  ;;  %p18131_p3 = pneg %p18130_p13 }
  0x8c   : > { %v15683_v61 = vcombine.high %v366_v55, %v370_v56  ;;  %v15685_v62 = vcombine.high %v367_v57, %v371_v58  ;;  %v374_v63 = vld [vmem:[%s18438_s12 + $0x100] sm:$0xff]  ;;  %v375_v4 = vld [vmem:[%s18438_s12 + $0x108] sm:$0xff]  ;;  %v15682_v6 = vcombine.low %v366_v55, %v370_v56  ;;  %v15684_v7 = vcombine.low %v367_v57, %v371_v58 }
  0x8d   : > { %12865 = vmatpush1.bf16.msra.mxu0 %v15666_v51  ;;  %13521 = vmatpush1.bf16.msra.mxu1 %v15668_v52  ;;  %v378_v0 = vld [vmem:[%s18438_s12 + $0x120] sm:$0xff]  ;;  %v379_v5 = vld [vmem:[%s18438_s12 + $0x128] sm:$0xff]  ;;  %p18138_p8 = pnand %p18137_p0, %p18131_p3 }
  0x8e   : > { %12866 = vmatprep.subr.bf16.mxu0 %v15675_v53  ;;  %13522 = vmatprep.subr.bf16.mxu1 %v15677_v54  ;;  %v15691_v8 = vcombine.high %v374_v63, %v378_v0  ;;  %v15693_v9 = vcombine.high %v375_v4, %v379_v5  ;;  %v382_v10 = vld [vmem:[%s18438_s12 + $0x140] sm:$0xff]  ;;  %v383_v14 = vld [vmem:[%s18438_s12 + $0x148] sm:$0xff]  ;;  %v15690_v16 = vcombine.low %v374_v63, %v378_v0 }
  0x8f   : > { %v386_v11 = vld [vmem:[%s18438_s12 + $0x160] sm:$0xff]  ;;  %v387_v15 = vld [vmem:[%s18438_s12 + $0x168] sm:$0xff]  ;;  %v15692_v17 = vcombine.low %v375_v4, %v379_v5 }
  0x90   : > { %v15699_v18 = vcombine.high %v382_v10, %v386_v11  ;;  %v15701_v19 = vcombine.high %v383_v14, %v387_v15  ;;  %v390_v20 = vld [vmem:[%s18438_s12 + $0x180] sm:$0xff]  ;;  %v391_v23 = vld [vmem:[%s18438_s12 + $0x188] sm:$0xff]  ;;  %v15698_v25 = vcombine.low %v382_v10, %v386_v11  ;;  %v15700_v26 = vcombine.low %v383_v14, %v387_v15 }
  0x91   : > { %12867 = vmatpush1.bf16.msra.mxu0 %v15674_v59  ;;  %13523 = vmatpush1.bf16.msra.mxu1 %v15676_v60  ;;  %v394_v21 = vld [vmem:[%s18438_s12 + $0x1a0] sm:$0xff]  ;;  %v395_v24 = vld [vmem:[%s18438_s12 + $0x1a8] sm:$0xff] }
  0x92   : > { %12868 = vmatprep.subr.bf16.mxu0 %v15683_v61  ;;  %13524 = vmatprep.subr.bf16.mxu1 %v15685_v62  ;;  %v15707_v27 = vcombine.high %v390_v20, %v394_v21  ;;  %v18483_v28 = vld [vmem:[%s18431_s30] sm:$0xff]  ;;  %v15709_v29 = vcombine.high %v391_v23, %v395_v24  ;;  %v399_v33 = vld [vmem:[%s18438_s12 + $0x1c8] sm:$0xff]  ;;  %v15706_v35 = vcombine.low %v390_v20, %v394_v21 }
  0x93   : > { %v398_v30 = vld [vmem:[%s18438_s12 + $0x1c0] sm:$0xff]  ;;  %v18489_v32 = vrot.slane %v18483_v28, %v18478_v22  ;;  %v403_v34 = vld [vmem:[%s18438_s12 + $0x1e8] sm:$0xff]  ;;  %v15708_v37 = vcombine.low %v391_v23, %v395_v24 }
  0x94   : > { %v402_v31 = vld [vmem:[%s18438_s12 + $0x1e0] sm:$0xff]  ;;  %v15717_v39 = vcombine.high %v399_v33, %v403_v34  ;;  %v407_v43 = vld [vmem:[%s18438_s12 + $0x208] sm:$0xff]  ;;  %v15716_v46 = vcombine.low %v399_v33, %v403_v34 }
  0x95   : > { %12869 = vmatpush1.bf16.msra.mxu0 %v15682_v6  ;;  %13525 = vmatpush1.bf16.msra.mxu1 %v15684_v7  ;;  %v2409_v36 = vcombine.high %v18489_v32, %v18489_v32  ;;  %v15715_v38 = vcombine.high %v398_v30, %v402_v31  ;;  %v406_v40 = vld [vmem:[%s18438_s12 + $0x200] sm:$0xff]  ;;  %v411_v44 = vld [vmem:[%s18438_s12 + $0x228] sm:$0xff]  ;;  %v15714_v45 = vcombine.low %v398_v30, %v402_v31 }
  0x96   : > { %12870 = vmatprep.subr.bf16.mxu0 %v15691_v8  ;;  %13526 = vmatprep.subr.bf16.mxu1 %v15693_v9  ;;  %v410_v41 = vld [vmem:[%s18438_s12 + $0x220] sm:$0xff]  ;;  %v15725_v48 = vcombine.high %v407_v43, %v411_v44  ;;  %v415_v51 = vld [vmem:[%s18438_s12 + $0x248] sm:$0xff]  ;;  %v15724_v54 = vcombine.low %v407_v43, %v411_v44 }
  0x97   : > { %v18498_v42 = vrot.slane %v2409_v36, %v18478_v22  ;;  %v15723_v47 = vcombine.high %v406_v40, %v410_v41  ;;  %v414_v49 = vld [vmem:[%s18438_s12 + $0x240] sm:$0xff]  ;;  %v419_v52 = vld [vmem:[%s18438_s12 + $0x268] sm:$0xff]  ;;  %v15722_v53 = vcombine.low %v406_v40, %v410_v41 }
  0x98   : > { %v418_v50 = vld [vmem:[%s18438_s12 + $0x260] sm:$0xff]  ;;  %v15733_v56 = vcombine.high %v415_v51, %v419_v52  ;;  %v423_v59 = vld [vmem:[%s18438_s12 + $0x288] sm:$0xff]  ;;  %v15732_v62 = vcombine.low %v415_v51, %v419_v52 }
  0x99   : > { %12871 = vmatpush1.bf16.msra.mxu0 %v15690_v16  ;;  %13527 = vmatpush1.bf16.msra.mxu1 %v15692_v17  ;;  %v15731_v55 = vcombine.high %v414_v49, %v418_v50  ;;  %v422_v57 = vld [vmem:[%s18438_s12 + $0x280] sm:$0xff]  ;;  %v427_v60 = vld [vmem:[%s18438_s12 + $0x2a8] sm:$0xff]  ;;  %v15730_v61 = vcombine.low %v414_v49, %v418_v50 }
  0x9a   : > { %12872 = vmatprep.subr.bf16.mxu0 %v15699_v18  ;;  %13528 = vmatprep.subr.bf16.mxu1 %v15701_v19  ;;  %v426_v58 = vld [vmem:[%s18438_s12 + $0x2a0] sm:$0xff]  ;;  %v15741_v0 = vcombine.high %v423_v59, %v427_v60  ;;  %v431_v3 = vld [vmem:[%s18438_s12 + $0x2c8] sm:$0xff]  ;;  %v15740_v6 = vcombine.low %v423_v59, %v427_v60 }
  0x9b   : > { %12894 = vmatprep.mubr.bf16.mxu0 %v18498_v42  ;;  %13550 = vmatprep.mubr.bf16.mxu1 %v18498_v42  ;;  %v15739_v63 = vcombine.high %v422_v57, %v426_v58  ;;  %v430_v1 = vld [vmem:[%s18438_s12 + $0x2c0] sm:$0xff]  ;;  %v435_v4 = vld [vmem:[%s18438_s12 + $0x2e8] sm:$0xff]  ;;  %v15738_v5 = vcombine.low %v422_v57, %v426_v58 }
  0x9c   : > { %v434_v2 = vld [vmem:[%s18438_s12 + $0x2e0] sm:$0xff]  ;;  %v15749_v8 = vcombine.high %v431_v3, %v435_v4  ;;  %v439_v11 = vld [vmem:[%s18438_s12 + $0x308] sm:$0xff]  ;;  %v15748_v15 = vcombine.low %v431_v3, %v435_v4 }
  0x9d   : > { %12873 = vmatpush1.bf16.msra.mxu0 %v15698_v25  ;;  %13529 = vmatpush1.bf16.msra.mxu1 %v15700_v26  ;;  %v15747_v7 = vcombine.high %v430_v1, %v434_v2  ;;  %v438_v9 = vld [vmem:[%s18438_s12 + $0x300] sm:$0xff]  ;;  %v443_v12 = vld [vmem:[%s18438_s12 + $0x328] sm:$0xff]  ;;  %v15746_v14 = vcombine.low %v430_v1, %v434_v2  ;;  %v18548_v1 = vcombine.high %v18498_v42, %v18498_v42 }
  0x9e   : > { %12874 = vmatprep.subr.bf16.mxu0 %v15707_v27  ;;  %13530 = vmatprep.subr.bf16.mxu1 %v15709_v29  ;;  %v442_v10 = vld [vmem:[%s18438_s12 + $0x320] sm:$0xff]  ;;  %v15757_v17 = vcombine.high %v439_v11, %v443_v12  ;;  %v447_v20 = vld [vmem:[%s18438_s12 + $0x348] sm:$0xff]  ;;  %v15756_v24 = vcombine.low %v439_v11, %v443_v12 }
  0x9f   : > { %v15755_v16 = vcombine.high %v438_v9, %v442_v10  ;;  %v446_v18 = vld [vmem:[%s18438_s12 + $0x340] sm:$0xff]  ;;  %v451_v21 = vld [vmem:[%s18438_s12 + $0x368] sm:$0xff]  ;;  %v15754_v23 = vcombine.low %v438_v9, %v442_v10 }
  0xa0   : > { %v450_v19 = vld [vmem:[%s18438_s12 + $0x360] sm:$0xff]  ;;  %v15765_v26 = vcombine.high %v447_v20, %v451_v21  ;;  %v455_v30 = vld [vmem:[%s18438_s12 + $0x388] sm:$0xff]  ;;  %v15764_v34 = vcombine.low %v447_v20, %v451_v21 }
  0xa1   : > { %12875 = vmatpush1.bf16.msra.mxu0 %v15706_v35  ;;  %13531 = vmatpush1.bf16.msra.mxu1 %v15708_v37  ;;  %v15763_v25 = vcombine.high %v446_v18, %v450_v19  ;;  %v454_v27 = vld [vmem:[%s18438_s12 + $0x380] sm:$0xff]  ;;  %v459_v31 = vld [vmem:[%s18438_s12 + $0x3a8] sm:$0xff]  ;;  %v15762_v33 = vcombine.low %v446_v18, %v450_v19 }
  0xa2   : > { %12876 = vmatprep.subr.bf16.mxu0 %v15715_v38  ;;  %13532 = vmatprep.subr.bf16.mxu1 %v15717_v39  ;;  %v458_v29 = vld [vmem:[%s18438_s12 + $0x3a0] sm:$0xff]  ;;  %v15773_v36 = vcombine.high %v455_v30, %v459_v31  ;;  %v463_v39 = vld [vmem:[%s18438_s12 + $0x3c8] sm:$0xff]  ;;  %v15772_v43 = vcombine.low %v455_v30, %v459_v31 }
  0xa3   : > { %v15771_v35 = vcombine.high %v454_v27, %v458_v29  ;;  %v462_v37 = vld [vmem:[%s18438_s12 + $0x3c0] sm:$0xff]  ;;  %v467_v40 = vld [vmem:[%s18438_s12 + $0x3e8] sm:$0xff]  ;;  %v15770_v41 = vcombine.low %v454_v27, %v458_v29 }
  0xa4   : > { %v466_v38 = vld [vmem:[%s18438_s12 + $0x3e0] sm:$0xff]  ;;  %v475_v49 = vld [vmem:[%s18438_s12 + $0x428] sm:$0xff]  ;;  %v15780_v51 = vcombine.low %v463_v39, %v467_v40 }
  0xa5   : > { %12877 = vmatpush1.bf16.msra.mxu0 %v15714_v45  ;;  %13533 = vmatpush1.bf16.msra.mxu1 %v15716_v46  ;;  %v15779_v44 = vcombine.high %v462_v37, %v466_v38  ;;  %v15781_v45 = vcombine.high %v463_v39, %v467_v40  ;;  %v470_v46 = vld [vmem:[%s18438_s12 + $0x400] sm:$0xff]  ;;  %v15778_v50 = vcombine.low %v462_v37, %v466_v38  ;;  %v479_v57 = vld [vmem:[%s18438_s12 + $0x448] sm:$0xff] }
  0xa6   : > { %12878 = vmatprep.subr.bf16.mxu0 %v15723_v47  ;;  %13534 = vmatprep.subr.bf16.mxu1 %v15725_v48  ;;  %v474_v47 = vld [vmem:[%s18438_s12 + $0x420] sm:$0xff]  ;;  %v471_v48 = vld [vmem:[%s18438_s12 + $0x408] sm:$0xff] }
  0xa7   : > { %v15787_v52 = vcombine.high %v470_v46, %v474_v47  ;;  %v483_v58 = vld [vmem:[%s18438_s12 + $0x468] sm:$0xff]  ;;  %v15786_v59 = vcombine.low %v470_v46, %v474_v47  ;;  %v15788_v60 = vcombine.low %v471_v48, %v475_v49 }
  0xa8   : > { %v491_v2 = vld [vmem:[%s18438_s12 + $0x4a8] sm:$0xff]  ;;  %v15796_v4 = vcombine.low %v479_v57, %v483_v58 }
  0xa9   : > { %12879 = vmatpush1.bf16.msra.mxu0 %v15722_v53  ;;  %13535 = vmatpush1.bf16.msra.mxu1 %v15724_v54  ;;  %v15789_v53 = vcombine.high %v471_v48, %v475_v49  ;;  %v478_v54 = vld [vmem:[%s18438_s12 + $0x440] sm:$0xff]  ;;  %v495_v9 = vld [vmem:[%s18438_s12 + $0x4c8] sm:$0xff] }
  0xaa   : > { %12880 = vmatprep.subr.bf16.mxu0 %v15731_v55  ;;  %13536 = vmatprep.subr.bf16.mxu1 %v15733_v56  ;;  %v482_v55 = vld [vmem:[%s18438_s12 + $0x460] sm:$0xff]  ;;  %v18540_v56 = vrot.slane %v18489_v32, %v18478_v22  ;;  %v487_v32 = vld [vmem:[%s18438_s12 + $0x488] sm:$0xff] }
  0xab   : > { %v15794_v3 = vcombine.low %v478_v54, %v482_v55  ;;  %v499_v10 = vld [vmem:[%s18438_s12 + $0x4e8] sm:$0xff]  ;;  %v15804_v12 = vcombine.low %v487_v32, %v491_v2 }
  0xac   : > { %v503_v18 = vld [vmem:[%s18438_s12 + $0x508] sm:$0xff]  ;;  %v15812_v21 = vcombine.low %v495_v9, %v499_v10 }
  0xad   : > { %12881 = vmatpush1.bf16.msra.mxu0 %v15730_v61  ;;  %13537 = vmatpush1.bf16.msra.mxu1 %v15732_v62  ;;  %v15795_v61 = vcombine.high %v478_v54, %v482_v55  ;;  %v15797_v62 = vcombine.high %v479_v57, %v483_v58  ;;  %v507_v19 = vld [vmem:[%s18438_s12 + $0x528] sm:$0xff] }
  0xae   : > { %12882 = vmatprep.subr.bf16.mxu0 %v15739_v63  ;;  %13538 = vmatprep.subr.bf16.mxu1 %v15741_v0  ;;  %v486_v63 = vld [vmem:[%s18438_s12 + $0x480] sm:$0xff]  ;;  %v511_v27 = vld [vmem:[%s18438_s12 + $0x548] sm:$0xff]  ;;  %v15820_v31 = vcombine.low %v503_v18, %v507_v19 }
  0xaf   : > { %v490_v0 = vld [vmem:[%s18438_s12 + $0x4a0] sm:$0xff]  ;;  %v515_v29 = vld [vmem:[%s18438_s12 + $0x568] sm:$0xff] }
  0xb0   : > { %v15802_v11 = vcombine.low %v486_v63, %v490_v0  ;;  %v519_v37 = vld [vmem:[%s18438_s12 + $0x588] sm:$0xff]  ;;  %v15828_v40 = vcombine.low %v511_v27, %v515_v29 }
  0xb1   : > { %12883 = vmatpush1.bf16.msra.mxu0 %v15738_v5  ;;  %13539 = vmatpush1.bf16.msra.mxu1 %v15740_v6  ;;  %v15803_v5 = vcombine.high %v486_v63, %v490_v0  ;;  %v15805_v6 = vcombine.high %v487_v32, %v491_v2  ;;  %v523_v38 = vld [vmem:[%s18438_s12 + $0x5a8] sm:$0xff] }
  0xb2   : > { %12884 = vmatprep.subr.bf16.mxu0 %v15747_v7  ;;  %13540 = vmatprep.subr.bf16.mxu1 %v15749_v8  ;;  %v494_v7 = vld [vmem:[%s18438_s12 + $0x4c0] sm:$0xff]  ;;  %v527_v46 = vld [vmem:[%s18438_s12 + $0x5c8] sm:$0xff]  ;;  %v15836_v49 = vcombine.low %v519_v37, %v523_v38 }
  0xb3   : > { %v498_v8 = vld [vmem:[%s18438_s12 + $0x4e0] sm:$0xff]  ;;  %v531_v47 = vld [vmem:[%s18438_s12 + $0x5e8] sm:$0xff] }
  0xb4   : > { %v15810_v20 = vcombine.low %v494_v7, %v498_v8  ;;  %v535_v54 = vld [vmem:[%s18438_s12 + $0x608] sm:$0xff]  ;;  %v15844_v58 = vcombine.low %v527_v46, %v531_v47 }
  0xb5   : > { %12885 = vmatpush1.bf16.msra.mxu0 %v15746_v14  ;;  %13541 = vmatpush1.bf16.msra.mxu1 %v15748_v15  ;;  %v15811_v14 = vcombine.high %v494_v7, %v498_v8  ;;  %v15813_v15 = vcombine.high %v495_v9, %v499_v10  ;;  %v539_v55 = vld [vmem:[%s18438_s12 + $0x628] sm:$0xff] }
  0xb6   : > { %12886 = vmatprep.subr.bf16.mxu0 %v15755_v16  ;;  %13542 = vmatprep.subr.bf16.mxu1 %v15757_v17  ;;  %v502_v16 = vld [vmem:[%s18438_s12 + $0x500] sm:$0xff]  ;;  %v543_v63 = vld [vmem:[%s18438_s12 + $0x648] sm:$0xff]  ;;  %v15852_v2 = vcombine.low %v535_v54, %v539_v55 }
  0xb7   : > { %v506_v17 = vld [vmem:[%s18438_s12 + $0x520] sm:$0xff]  ;;  %v547_v0 = vld [vmem:[%s18438_s12 + $0x668] sm:$0xff] }
  0xb8   : > { %v15818_v30 = vcombine.low %v502_v16, %v506_v17  ;;  %v551_v7 = vld [vmem:[%s18438_s12 + $0x688] sm:$0xff]  ;;  %v15860_v10 = vcombine.low %v543_v63, %v547_v0 }
  0xb9   : > { %12887 = vmatpush1.bf16.msra.mxu0 %v15754_v23  ;;  %13543 = vmatpush1.bf16.msra.mxu1 %v15756_v24  ;;  %v15819_v23 = vcombine.high %v502_v16, %v506_v17  ;;  %v15821_v24 = vcombine.high %v503_v18, %v507_v19  ;;  %v555_v8 = vld [vmem:[%s18438_s12 + $0x6a8] sm:$0xff] }
  0xba   : > { %12888 = vmatprep.subr.bf16.mxu0 %v15763_v25  ;;  %13544 = vmatprep.subr.bf16.mxu1 %v15765_v26  ;;  %v510_v25 = vld [vmem:[%s18438_s12 + $0x540] sm:$0xff]  ;;  %v559_v16 = vld [vmem:[%s18438_s12 + $0x6c8] sm:$0xff]  ;;  %v15868_v19 = vcombine.low %v551_v7, %v555_v8 }
  0xbb   : > { %v514_v26 = vld [vmem:[%s18438_s12 + $0x560] sm:$0xff]  ;;  %v563_v17 = vld [vmem:[%s18438_s12 + $0x6e8] sm:$0xff] }
  0xbc   : > { %v15826_v39 = vcombine.low %v510_v25, %v514_v26 }
  0xbd   : > { %12889 = vmatpush1.bf16.msra.mxu0 %v15762_v33  ;;  %13545 = vmatpush1.bf16.msra.mxu1 %v15764_v34  ;;  %v15827_v33 = vcombine.high %v510_v25, %v514_v26  ;;  %v15829_v34 = vcombine.high %v511_v27, %v515_v29  ;;  %v567_v25 = vld [vmem:[%s18438_s12 + $0x708] sm:$0xff]  ;;  %v15876_v29 = vcombine.low %v559_v16, %v563_v17 }
  0xbe   : > { %12890 = vmatprep.subr.bf16.mxu0 %v15771_v35  ;;  %13546 = vmatprep.subr.bf16.mxu1 %v15773_v36  ;;  %v518_v35 = vld [vmem:[%s18438_s12 + $0x580] sm:$0xff]  ;;  %v571_v26 = vld [vmem:[%s18438_s12 + $0x728] sm:$0xff] }
  0xbf   : > { %v522_v36 = vld [vmem:[%s18438_s12 + $0x5a0] sm:$0xff] }
  0xc0   : > { %v15834_v48 = vcombine.low %v518_v35, %v522_v36 }
  0xc1   : > { %12891 = vmatpush1.bf16.msra.mxu0 %v15770_v41  ;;  %13547 = vmatpush1.bf16.msra.mxu1 %v15772_v43  ;;  %v15835_v41 = vcombine.high %v518_v35, %v522_v36  ;;  %v15837_v43 = vcombine.high %v519_v37, %v523_v38  ;;  %v575_v35 = vld [vmem:[%s18438_s12 + $0x748] sm:$0xff]  ;;  %v15884_v38 = vcombine.low %v567_v25, %v571_v26 }
  0xc2   : > { %12892 = vmatprep.subr.bf16.mxu0 %v15779_v44  ;;  %13548 = vmatprep.subr.bf16.mxu1 %v15781_v45  ;;  %v526_v44 = vld [vmem:[%s18438_s12 + $0x5c0] sm:$0xff]  ;;  %v579_v36 = vld [vmem:[%s18438_s12 + $0x768] sm:$0xff] }
  0xc3   : > { %v530_v45 = vld [vmem:[%s18438_s12 + $0x5e0] sm:$0xff] }
  0xc4   : > { %v15842_v57 = vcombine.low %v526_v44, %v530_v45 }
  0xc5   : > { %12893 = vmatpush1.bf16.msra.mxu0 %v15778_v50  ;;  %13549 = vmatpush1.bf16.msra.mxu1 %v15780_v51  ;;  %v15843_v50 = vcombine.high %v526_v44, %v530_v45  ;;  %v15845_v51 = vcombine.high %v527_v46, %v531_v47  ;;  %v583_v44 = vld [vmem:[%s18438_s12 + $0x788] sm:$0xff]  ;;  %v15892_v47 = vcombine.low %v575_v35, %v579_v36 }
  0xc6   : > { %12903 = vmatprep.subr.bf16.mxu0 %v15787_v52  ;;  %13559 = vmatprep.subr.bf16.mxu1 %v15789_v53  ;;  %v534_v52 = vld [vmem:[%s18438_s12 + $0x600] sm:$0xff]  ;;  %v587_v45 = vld [vmem:[%s18438_s12 + $0x7a8] sm:$0xff] }
  0xc7   : > { %v538_v53 = vld [vmem:[%s18438_s12 + $0x620] sm:$0xff] }
  0xc8   : > { %12895 = vmatmul.mubr.bf16.vlgmr.msra.gmra.mrb[0].mxu0 %v18540_v56  ;;  %13551 = vmatmul.mubr.bf16.vlgmr.msra.gmra.mrb[0].mxu1 %v18540_v56  ;;  %v15850_v32 = vcombine.low %v534_v52, %v538_v53 }
  0xc9   : > { %12904 = vmatpush1.bf16.msra.mxu0 %v15786_v59  ;;  %13560 = vmatpush1.bf16.msra.mxu1 %v15788_v60  ;;  %v15851_v59 = vcombine.high %v534_v52, %v538_v53  ;;  %v15853_v60 = vcombine.high %v535_v54, %v539_v55  ;;  %v2394_v52 = vcombine.high %v18483_v28, %v18483_v28  ;;  %v591_v53 = vld [vmem:[%s18438_s12 + $0x7c8] sm:$0xff] }
  0xca   : > { %12905 = vmatprep.subr.bf16.mxu0 %v15795_v61  ;;  %13561 = vmatprep.subr.bf16.mxu1 %v15797_v62  ;;  %v542_v61 = vld [vmem:[%s18438_s12 + $0x640] sm:$0xff]  ;;  %v595_v54 = vld [vmem:[%s18438_s12 + $0x7e8] sm:$0xff] }
  0xcb   : > { %12935 = vmatprep.mubr.bf16.mxu0 %v18548_v1  ;;  %13591 = vmatprep.mubr.bf16.mxu1 %v18548_v1  ;;  %v546_v62 = vld [vmem:[%s18438_s12 + $0x660] sm:$0xff]  ;;  %v599_v28 = vld [vmem:[%s18438_s12 + $0x808] sm:$0xff] }
  0xcc   : > { %v15858_v9 = vcombine.low %v542_v61, %v546_v62 }
  0xcd   : > { %12906 = vmatpush1.bf16.msra.mxu0 %v15794_v3  ;;  %13562 = vmatpush1.bf16.msra.mxu1 %v15796_v4  ;;  %v15859_v3 = vcombine.high %v542_v61, %v546_v62  ;;  %v15861_v4 = vcombine.high %v543_v63, %v547_v0  ;;  %v602_v61 = vld [vmem:[%s18438_s12 + $0x820] sm:$0xff]  ;;  %v18613_v62 = vrot.slane %v2394_v52, %v18478_v22  ;;  %v603_v63 = vld [vmem:[%s18438_s12 + $0x828] sm:$0xff] }
  0xce   : > { %12907 = vmatprep.subr.bf16.mxu0 %v15803_v5  ;;  %13563 = vmatprep.subr.bf16.mxu1 %v15805_v6  ;;  %v550_v5 = vld [vmem:[%s18438_s12 + $0x680] sm:$0xff] }
  0xcf   : > { %v554_v6 = vld [vmem:[%s18438_s12 + $0x6a0] sm:$0xff] }
  0xd0   : > { %v15866_v18 = vcombine.low %v550_v5, %v554_v6  ;;  %v646_v52 = vld [vmem:[%s18438_s12 + $0x980] sm:$0xff] }
  0xd1   : > { %12908 = vmatpush1.bf16.msra.mxu0 %v15802_v11  ;;  %13564 = vmatpush1.bf16.msra.mxu1 %v15804_v12  ;;  %v15867_v11 = vcombine.high %v550_v5, %v554_v6  ;;  %v15869_v12 = vcombine.high %v551_v7, %v555_v8  ;;  %v610_v5 = vld [vmem:[%s18438_s12 + $0x860] sm:$0xff]  ;;  %v2410_v6 = vcombine.high %v18613_v62, %v18613_v62  ;;  %v607_v8 = vld [vmem:[%s18438_s12 + $0x848] sm:$0xff] }
  0xd2   : > { %12909 = vmatprep.subr.bf16.mxu0 %v15811_v14  ;;  %13565 = vmatprep.subr.bf16.mxu1 %v15813_v15  ;;  %v558_v14 = vld [vmem:[%s18438_s12 + $0x6c0] sm:$0xff]  ;;  %v18623_v7 = vcombine.high %v18540_v56, %v18540_v56 }
  0xd3   : > { %v562_v15 = vld [vmem:[%s18438_s12 + $0x6e0] sm:$0xff] }
  0xd4   : > { %v15874_v27 = vcombine.low %v558_v14, %v562_v15 }
  0xd5   : > { %12910 = vmatpush1.bf16.msra.mxu0 %v15810_v20  ;;  %13566 = vmatpush1.bf16.msra.mxu1 %v15812_v21  ;;  %v15875_v20 = vcombine.high %v558_v14, %v562_v15  ;;  %v15877_v21 = vcombine.high %v559_v16, %v563_v17  ;;  %v614_v15 = vld [vmem:[%s18438_s12 + $0x880] sm:$0xff]  ;;  %v18630_v17 = vrot.slane %v2410_v6, %v18478_v22 }
  0xd6   : > { %12911 = vmatprep.subr.bf16.mxu0 %v15819_v23  ;;  %13567 = vmatprep.subr.bf16.mxu1 %v15821_v24  ;;  %v566_v23 = vld [vmem:[%s18438_s12 + $0x700] sm:$0xff] }
  0xd7   : > { %v570_v24 = vld [vmem:[%s18438_s12 + $0x720] sm:$0xff] }
  0xd8   : > { %v15882_v37 = vcombine.low %v566_v23, %v570_v24  ;;  %v618_v16 = vld [vmem:[%s18438_s12 + $0x8a0] sm:$0xff] }
  0xd9   : > { %12912 = vmatpush1.bf16.msra.mxu0 %v15818_v30  ;;  %13568 = vmatpush1.bf16.msra.mxu1 %v15820_v31  ;;  %v15883_v30 = vcombine.high %v566_v23, %v570_v24  ;;  %v15885_v31 = vcombine.high %v567_v25, %v571_v26  ;;  %v15931_v23 = vcombine.high %v614_v15, %v618_v16  ;;  %v622_v25 = vld [vmem:[%s18438_s12 + $0x8c0] sm:$0xff] }
  0xda   : > { %12913 = vmatprep.subr.bf16.mxu0 %v15827_v33  ;;  %13569 = vmatprep.subr.bf16.mxu1 %v15829_v34  ;;  %v574_v33 = vld [vmem:[%s18438_s12 + $0x740] sm:$0xff] }
  0xdb   : > { %v578_v34 = vld [vmem:[%s18438_s12 + $0x760] sm:$0xff] }
  0xdc   : > { %v15890_v46 = vcombine.low %v574_v33, %v578_v34  ;;  %v626_v26 = vld [vmem:[%s18438_s12 + $0x8e0] sm:$0xff] }
  0xdd   : > { %12914 = vmatpush1.bf16.msra.mxu0 %v15826_v39  ;;  %13570 = vmatpush1.bf16.msra.mxu1 %v15828_v40  ;;  %v15891_v39 = vcombine.high %v574_v33, %v578_v34  ;;  %v15893_v40 = vcombine.high %v575_v35, %v579_v36  ;;  %v15939_v33 = vcombine.high %v622_v25, %v626_v26  ;;  %v630_v35 = vld [vmem:[%s18438_s12 + $0x900] sm:$0xff] }
  0xde   : > { %12915 = vmatprep.subr.bf16.mxu0 %v15835_v41  ;;  %13571 = vmatprep.subr.bf16.mxu1 %v15837_v43  ;;  %v582_v41 = vld [vmem:[%s18438_s12 + $0x780] sm:$0xff] }
  0xdf   : > { %v586_v43 = vld [vmem:[%s18438_s12 + $0x7a0] sm:$0xff] }
  0xe0   : > { %v15898_v55 = vcombine.low %v582_v41, %v586_v43  ;;  %v634_v36 = vld [vmem:[%s18438_s12 + $0x920] sm:$0xff] }
  0xe1   : > { %12916 = vmatpush1.bf16.msra.mxu0 %v15834_v48  ;;  %13572 = vmatpush1.bf16.msra.mxu1 %v15836_v49  ;;  %v15899_v48 = vcombine.high %v582_v41, %v586_v43  ;;  %v15901_v49 = vcombine.high %v583_v44, %v587_v45  ;;  %v15947_v41 = vcombine.high %v630_v35, %v634_v36  ;;  %v666_v6 = vld [vmem:[%s18438_s12 + $0xa20] sm:$0xff] }
  0xe2   : > { %12917 = vmatprep.subr.bf16.mxu0 %v15843_v50  ;;  %13573 = vmatprep.subr.bf16.mxu1 %v15845_v51  ;;  %v590_v50 = vld [vmem:[%s18438_s12 + $0x7c0] sm:$0xff] }
  0xe3   : > { %v594_v51 = vld [vmem:[%s18438_s12 + $0x7e0] sm:$0xff] }
  0xe4   : > { %v15906_v0 = vcombine.low %v590_v50, %v594_v51 }
  0xe5   : > { %12918 = vmatpush1.bf16.msra.mxu0 %v15842_v57  ;;  %13574 = vmatpush1.bf16.msra.mxu1 %v15844_v58  ;;  %v15900_v57 = vcombine.low %v583_v44, %v587_v45  ;;  %v15907_v58 = vcombine.high %v590_v50, %v594_v51  ;;  %v638_v44 = vld [vmem:[%s18438_s12 + $0x940] sm:$0xff] }
  0xe6   : > { %12919 = vmatprep.subr.bf16.mxu0 %v15851_v59  ;;  %13575 = vmatprep.subr.bf16.mxu1 %v15853_v60  ;;  %v15909_v59 = vcombine.high %v591_v53, %v595_v54  ;;  %v598_v60 = vld [vmem:[%s18438_s12 + $0x800] sm:$0xff] }
  0xe7   : > { %v642_v45 = vld [vmem:[%s18438_s12 + $0x960] sm:$0xff] }
  0xe8   : > { %v15955_v50 = vcombine.high %v638_v44, %v642_v45 }
  0xe9   : > { %12920 = vmatpush1.bf16.msra.mxu0 %v15850_v32  ;;  %13576 = vmatpush1.bf16.msra.mxu1 %v15852_v2  ;;  %v15908_v32 = vcombine.low %v591_v53, %v595_v54  ;;  %v15915_v2 = vcombine.high %v598_v60, %v602_v61  ;;  %v650_v53 = vld [vmem:[%s18438_s12 + $0x9a0] sm:$0xff]  ;;  %v647_v54 = vld [vmem:[%s18438_s12 + $0x988] sm:$0xff] }
  0xea   : > { %12921 = vmatprep.subr.bf16.mxu0 %v15859_v3  ;;  %13577 = vmatprep.subr.bf16.mxu1 %v15861_v4  ;;  %v15917_v3 = vcombine.high %v599_v28, %v603_v63  ;;  %v606_v4 = vld [vmem:[%s18438_s12 + $0x840] sm:$0xff] }
  0xed   : > { %12922 = vmatpush1.bf16.msra.mxu0 %v15858_v9  ;;  %13578 = vmatpush1.bf16.msra.mxu1 %v15860_v10  ;;  %v611_v9 = vld [vmem:[%s18438_s12 + $0x868] sm:$0xff]  ;;  %v15914_v10 = vcombine.low %v598_v60, %v602_v61  ;;  %v654_v61 = vld [vmem:[%s18438_s12 + $0x9c0] sm:$0xff] }
  0xee   : > { %12923 = vmatprep.subr.bf16.mxu0 %v15867_v11  ;;  %13579 = vmatprep.subr.bf16.mxu1 %v15869_v12  ;;  %v15916_v11 = vcombine.low %v599_v28, %v603_v63  ;;  %v15923_v12 = vcombine.high %v606_v4, %v610_v5  ;;  %v15925_v14 = vcombine.high %v607_v8, %v611_v9  ;;  %v658_v28 = vld [vmem:[%s18438_s12 + $0x9e0] sm:$0xff]  ;;  %v655_v63 = vld [vmem:[%s18438_s12 + $0x9c8] sm:$0xff] }
  0xf1   : > { %12924 = vmatpush1.bf16.msra.mxu0 %v15866_v18  ;;  %13580 = vmatpush1.bf16.msra.mxu1 %v15868_v19  ;;  %v615_v18 = vld [vmem:[%s18438_s12 + $0x888] sm:$0xff] }
  0xf2   : > { %12925 = vmatprep.subr.bf16.mxu0 %v15875_v20  ;;  %13581 = vmatprep.subr.bf16.mxu1 %v15877_v21  ;;  %v619_v19 = vld [vmem:[%s18438_s12 + $0x8a8] sm:$0xff]  ;;  %v15922_v20 = vcombine.low %v606_v4, %v610_v5  ;;  %v15924_v21 = vcombine.low %v607_v8, %v611_v9  ;;  %v662_v5 = vld [vmem:[%s18438_s12 + $0xa00] sm:$0xff] }
  0xf3   : > { %v15933_v24 = vcombine.high %v615_v18, %v619_v19  ;;  %v663_v8 = vld [vmem:[%s18438_s12 + $0xa08] sm:$0xff] }
  0xf4   : > { %v667_v9 = vld [vmem:[%s18438_s12 + $0xa28] sm:$0xff] }
  0xf5   : > { %12926 = vmatpush1.bf16.msra.mxu0 %v15874_v27  ;;  %13582 = vmatpush1.bf16.msra.mxu1 %v15876_v29  ;;  %v623_v27 = vld [vmem:[%s18438_s12 + $0x8c8] sm:$0xff] }
  0xf6   : > { %12927 = vmatprep.subr.bf16.mxu0 %v15883_v30  ;;  %13583 = vmatprep.subr.bf16.mxu1 %v15885_v31  ;;  %v627_v29 = vld [vmem:[%s18438_s12 + $0x8e8] sm:$0xff]  ;;  %v15930_v30 = vcombine.low %v614_v15, %v618_v16  ;;  %v15932_v31 = vcombine.low %v615_v18, %v619_v19  ;;  %v670_v15 = vld [vmem:[%s18438_s12 + $0xa40] sm:$0xff] }
  0xf7   : > { %v15941_v34 = vcombine.high %v623_v27, %v627_v29  ;;  %v674_v16 = vld [vmem:[%s18438_s12 + $0xa60] sm:$0xff]  ;;  %v671_v18 = vld [vmem:[%s18438_s12 + $0xa48] sm:$0xff] }
  0xf8   : > { %v675_v19 = vld [vmem:[%s18438_s12 + $0xa68] sm:$0xff] }
  0xf9   : > { %12928 = vmatpush1.bf16.msra.mxu0 %v15882_v37  ;;  %13584 = vmatpush1.bf16.msra.mxu1 %v15884_v38  ;;  %v631_v37 = vld [vmem:[%s18438_s12 + $0x908] sm:$0xff] }
  0xfa   : > { %12929 = vmatprep.subr.bf16.mxu0 %v15891_v39  ;;  %13585 = vmatprep.subr.bf16.mxu1 %v15893_v40  ;;  %v635_v38 = vld [vmem:[%s18438_s12 + $0x928] sm:$0xff]  ;;  %v15938_v39 = vcombine.low %v622_v25, %v626_v26  ;;  %v15940_v40 = vcombine.low %v623_v27, %v627_v29  ;;  %v678_v25 = vld [vmem:[%s18438_s12 + $0xa80] sm:$0xff] }
  0xfb   : > { %v15949_v43 = vcombine.high %v631_v37, %v635_v38  ;;  %v682_v26 = vld [vmem:[%s18438_s12 + $0xaa0] sm:$0xff]  ;;  %v679_v27 = vld [vmem:[%s18438_s12 + $0xa88] sm:$0xff] }
  0xfc   : > { %v683_v29 = vld [vmem:[%s18438_s12 + $0xaa8] sm:$0xff] }
  0xfd   : > { %12930 = vmatpush1.bf16.msra.mxu0 %v15890_v46  ;;  %13586 = vmatpush1.bf16.msra.mxu1 %v15892_v47  ;;  %v639_v46 = vld [vmem:[%s18438_s12 + $0x948] sm:$0xff] }
  0xfe   : > { %12931 = vmatprep.subr.bf16.mxu0 %v15899_v48  ;;  %13587 = vmatprep.subr.bf16.mxu1 %v15901_v49  ;;  %v643_v47 = vld [vmem:[%s18438_s12 + $0x968] sm:$0xff]  ;;  %v15946_v48 = vcombine.low %v630_v35, %v634_v36  ;;  %v15948_v49 = vcombine.low %v631_v37, %v635_v38  ;;  %v686_v35 = vld [vmem:[%s18438_s12 + $0xac0] sm:$0xff] }
  0xff   : > { %v15957_v51 = vcombine.high %v639_v46, %v643_v47  ;;  %v690_v36 = vld [vmem:[%s18438_s12 + $0xae0] sm:$0xff]  ;;  %v687_v37 = vld [vmem:[%s18438_s12 + $0xac8] sm:$0xff] }
 0x100   : > { %v691_v38 = vld [vmem:[%s18438_s12 + $0xae8] sm:$0xff] }
 0x101   : > { %12932 = vmatpush1.bf16.msra.mxu0 %v15898_v55  ;;  %13588 = vmatpush1.bf16.msra.mxu1 %v15900_v57  ;;  %v651_v55 = vld [vmem:[%s18438_s12 + $0x9a8] sm:$0xff]  ;;  %v15954_v57 = vcombine.low %v638_v44, %v642_v45  ;;  %v694_v44 = vld [vmem:[%s18438_s12 + $0xb00] sm:$0xff] }
 0x102   : > { %12933 = vmatprep.subr.bf16.mxu0 %v15907_v58  ;;  %13589 = vmatprep.subr.bf16.mxu1 %v15909_v59  ;;  %v15956_v58 = vcombine.low %v639_v46, %v643_v47  ;;  %v15963_v59 = vcombine.high %v646_v52, %v650_v53  ;;  %v15965_v60 = vcombine.high %v647_v54, %v651_v55  ;;  %v698_v45 = vld [vmem:[%s18438_s12 + $0xb20] sm:$0xff]  ;;  %v695_v46 = vld [vmem:[%s18438_s12 + $0xb08] sm:$0xff] }
 0x103   : > { %v699_v47 = vld [vmem:[%s18438_s12 + $0xb28] sm:$0xff] }
 0x105   : > { %12934 = vmatpush1.bf16.msra.mxu0 %v15906_v0  ;;  %13590 = vmatpush1.bf16.msra.mxu1 %v15908_v32  ;;  %v659_v0 = vld [vmem:[%s18438_s12 + $0x9e8] sm:$0xff]  ;;  %v15962_v32 = vcombine.low %v646_v52, %v650_v53  ;;  %v702_v52 = vld [vmem:[%s18438_s12 + $0xb40] sm:$0xff] }
 0x106   : > { %12944 = vmatprep.subr.bf16.mxu0 %v15915_v2  ;;  %13600 = vmatprep.subr.bf16.mxu1 %v15917_v3  ;;  %v15964_v2 = vcombine.low %v647_v54, %v651_v55  ;;  %v15971_v3 = vcombine.high %v654_v61, %v658_v28  ;;  %v15973_v4 = vcombine.high %v655_v63, %v659_v0  ;;  %v706_v53 = vld [vmem:[%s18438_s12 + $0xb60] sm:$0xff]  ;;  %v703_v54 = vld [vmem:[%s18438_s12 + $0xb48] sm:$0xff] }
 0x107   : > { %v707_v55 = vld [vmem:[%s18438_s12 + $0xb68] sm:$0xff] }
 0x108   : > { %12936 = vmatmul.mubr.bf16.vlgmr.msra.gmra.mrb[0].mxu0 %v18623_v7  ;;  %13592 = vmatmul.mubr.bf16.vlgmr.msra.gmra.mrb[0].mxu1 %v18623_v7 }
 0x109   : > { %12945 = vmatpush1.bf16.msra.mxu0 %v15914_v10  ;;  %13601 = vmatpush1.bf16.msra.mxu1 %v15916_v11  ;;  %v15970_v10 = vcombine.low %v654_v61, %v658_v28  ;;  %v15972_v11 = vcombine.low %v655_v63, %v659_v0  ;;  %v710_v61 = vld [vmem:[%s18438_s12 + $0xb80] sm:$0xff]  ;;  %v711_v63 = vld [vmem:[%s18438_s12 + $0xb88] sm:$0xff] }
 0x10a   : > { %12946 = vmatprep.subr.bf16.mxu0 %v15923_v12  ;;  %13602 = vmatprep.subr.bf16.mxu1 %v15925_v14  ;;  %v15979_v12 = vcombine.high %v662_v5, %v666_v6  ;;  %v15981_v14 = vcombine.high %v663_v8, %v667_v9  ;;  %v714_v28 = vld [vmem:[%s18438_s12 + $0xba0] sm:$0xff]  ;;  %v715_v0 = vld [vmem:[%s18438_s12 + $0xba8] sm:$0xff] }
 0x10b   : > { %12976 = vmatprep.mubr.bf16.mxu0 %v18630_v17  ;;  %13632 = vmatprep.mubr.bf16.mxu1 %v18630_v17 }
 0x10d   : > { %12947 = vmatpush1.bf16.msra.mxu0 %v15922_v20  ;;  %13603 = vmatpush1.bf16.msra.mxu1 %v15924_v21  ;;  %v15978_v20 = vcombine.low %v662_v5, %v666_v6  ;;  %v15980_v21 = vcombine.low %v663_v8, %v667_v9  ;;  %v718_v5 = vld [vmem:[%s18438_s12 + $0xbc0] sm:$0xff]  ;;  %v719_v8 = vld [vmem:[%s18438_s12 + $0xbc8] sm:$0xff] }
 0x10e   : > { %12948 = vmatprep.subr.bf16.mxu0 %v15931_v23  ;;  %13604 = vmatprep.subr.bf16.mxu1 %v15933_v24  ;;  %v15987_v23 = vcombine.high %v670_v15, %v674_v16  ;;  %v15989_v24 = vcombine.high %v671_v18, %v675_v19  ;;  %v722_v6 = vld [vmem:[%s18438_s12 + $0xbe0] sm:$0xff]  ;;  %v723_v9 = vld [vmem:[%s18438_s12 + $0xbe8] sm:$0xff] }
 0x111   : > { %12949 = vmatpush1.bf16.msra.mxu0 %v15930_v30  ;;  %13605 = vmatpush1.bf16.msra.mxu1 %v15932_v31  ;;  %v15986_v30 = vcombine.low %v670_v15, %v674_v16  ;;  %v15988_v31 = vcombine.low %v671_v18, %v675_v19  ;;  %v726_v15 = vld [vmem:[%s18438_s12 + $0xc00] sm:$0xff]  ;;  %v727_v18 = vld [vmem:[%s18438_s12 + $0xc08] sm:$0xff] }
 0x112   : > { %12950 = vmatprep.subr.bf16.mxu0 %v15939_v33  ;;  %13606 = vmatprep.subr.bf16.mxu1 %v15941_v34  ;;  %v15995_v33 = vcombine.high %v678_v25, %v682_v26  ;;  %v15997_v34 = vcombine.high %v679_v27, %v683_v29  ;;  %v730_v16 = vld [vmem:[%s18438_s12 + $0xc20] sm:$0xff]  ;;  %v731_v19 = vld [vmem:[%s18438_s12 + $0xc28] sm:$0xff] }
 0x115   : > { %12951 = vmatpush1.bf16.msra.mxu0 %v15938_v39  ;;  %13607 = vmatpush1.bf16.msra.mxu1 %v15940_v40  ;;  %v15994_v39 = vcombine.low %v678_v25, %v682_v26  ;;  %v15996_v40 = vcombine.low %v679_v27, %v683_v29  ;;  %v734_v25 = vld [vmem:[%s18438_s12 + $0xc40] sm:$0xff]  ;;  %v18698_v27 = vrot.slane %v18613_v62, %v18478_v22  ;;  %v735_v29 = vld [vmem:[%s18438_s12 + $0xc48] sm:$0xff] }
 0x116   : > { %12952 = vmatprep.subr.bf16.mxu0 %v15947_v41  ;;  %13608 = vmatprep.subr.bf16.mxu1 %v15949_v43  ;;  %v16003_v41 = vcombine.high %v686_v35, %v690_v36  ;;  %v16005_v43 = vcombine.high %v687_v37, %v691_v38  ;;  %v738_v26 = vld [vmem:[%s18438_s12 + $0xc60] sm:$0xff]  ;;  %v743_v62 = vld [vmem:[%s18438_s12 + $0xc88] sm:$0xff] }
 0x119   : > { %12953 = vmatpush1.bf16.msra.mxu0 %v15946_v48  ;;  %13609 = vmatpush1.bf16.msra.mxu1 %v15948_v49  ;;  %v16002_v48 = vcombine.low %v686_v35, %v690_v36  ;;  %v16004_v49 = vcombine.low %v687_v37, %v691_v38  ;;  %v742_v36 = vld [vmem:[%s18438_s12 + $0xc80] sm:$0xff]  ;;  %v18706_v38 = vcombine.high %v18630_v17, %v18630_v17 }
 0x11a   : > { %12954 = vmatprep.subr.bf16.mxu0 %v15955_v50  ;;  %13610 = vmatprep.subr.bf16.mxu1 %v15957_v51  ;;  %v16011_v50 = vcombine.high %v694_v44, %v698_v45  ;;  %v16013_v51 = vcombine.high %v695_v46, %v699_v47  ;;  %v746_v37 = vld [vmem:[%s18438_s12 + $0xca0] sm:$0xff] }
 0x11d   : > { %12955 = vmatpush1.bf16.msra.mxu0 %v15954_v57  ;;  %13611 = vmatpush1.bf16.msra.mxu1 %v15956_v58  ;;  %v16010_v57 = vcombine.low %v694_v44, %v698_v45  ;;  %v16012_v58 = vcombine.low %v695_v46, %v699_v47  ;;  %v750_v45 = vld [vmem:[%s18438_s12 + $0xcc0] sm:$0xff]  ;;  %v751_v47 = vld [vmem:[%s18438_s12 + $0xcc8] sm:$0xff] }
 0x11e   : > { %12956 = vmatprep.subr.bf16.mxu0 %v15963_v59  ;;  %13612 = vmatprep.subr.bf16.mxu1 %v15965_v60  ;;  %v16019_v59 = vcombine.high %v702_v52, %v706_v53  ;;  %v16021_v60 = vcombine.high %v703_v54, %v707_v55  ;;  %v754_v46 = vld [vmem:[%s18438_s12 + $0xce0] sm:$0xff] }
 0x121   : > { %12957 = vmatpush1.bf16.msra.mxu0 %v15962_v32  ;;  %13613 = vmatpush1.bf16.msra.mxu1 %v15964_v2  ;;  %v16018_v32 = vcombine.low %v702_v52, %v706_v53  ;;  %v16020_v2 = vcombine.low %v703_v54, %v707_v55  ;;  %v758_v53 = vld [vmem:[%s18438_s12 + $0xd00] sm:$0xff]  ;;  %v759_v55 = vld [vmem:[%s18438_s12 + $0xd08] sm:$0xff] }
 0x122   : > { %12958 = vmatprep.subr.bf16.mxu0 %v15971_v3  ;;  %13614 = vmatprep.subr.bf16.mxu1 %v15973_v4  ;;  %v16027_v3 = vcombine.high %v710_v61, %v714_v28  ;;  %v16029_v4 = vcombine.high %v711_v63, %v715_v0  ;;  %v762_v54 = vld [vmem:[%s18438_s12 + $0xd20] sm:$0xff] }
 0x125   : > { %12959 = vmatpush1.bf16.msra.mxu0 %v15970_v10  ;;  %13615 = vmatpush1.bf16.msra.mxu1 %v15972_v11  ;;  %v16026_v10 = vcombine.low %v710_v61, %v714_v28  ;;  %v16028_v11 = vcombine.low %v711_v63, %v715_v0  ;;  %v766_v28 = vld [vmem:[%s18438_s12 + $0xd40] sm:$0xff]  ;;  %v767_v0 = vld [vmem:[%s18438_s12 + $0xd48] sm:$0xff] }
 0x126   : > { %12960 = vmatprep.subr.bf16.mxu0 %v15979_v12  ;;  %13616 = vmatprep.subr.bf16.mxu1 %v15981_v14  ;;  %v16035_v12 = vcombine.high %v718_v5, %v722_v6  ;;  %v16037_v14 = vcombine.high %v719_v8, %v723_v9  ;;  %v770_v63 = vld [vmem:[%s18438_s12 + $0xd60] sm:$0xff] }
 0x129   : > { %12961 = vmatpush1.bf16.msra.mxu0 %v15978_v20  ;;  %13617 = vmatpush1.bf16.msra.mxu1 %v15980_v21  ;;  %v16034_v20 = vcombine.low %v718_v5, %v722_v6  ;;  %v16036_v21 = vcombine.low %v719_v8, %v723_v9  ;;  %v774_v6 = vld [vmem:[%s18438_s12 + $0xd80] sm:$0xff]  ;;  %v775_v9 = vld [vmem:[%s18438_s12 + $0xd88] sm:$0xff] }
 0x12a   : > { %12962 = vmatprep.subr.bf16.mxu0 %v15987_v23  ;;  %13618 = vmatprep.subr.bf16.mxu1 %v15989_v24  ;;  %v16043_v23 = vcombine.high %v726_v15, %v730_v16  ;;  %v16045_v24 = vcombine.high %v727_v18, %v731_v19  ;;  %v778_v8 = vld [vmem:[%s18438_s12 + $0xda0] sm:$0xff] }
 0x12d   : > { %12963 = vmatpush1.bf16.msra.mxu0 %v15986_v30  ;;  %13619 = vmatpush1.bf16.msra.mxu1 %v15988_v31  ;;  %v739_v30 = vld [vmem:[%s18438_s12 + $0xc68] sm:$0xff]  ;;  %v16042_v31 = vcombine.low %v726_v15, %v730_v16  ;;  %v782_v16 = vld [vmem:[%s18438_s12 + $0xdc0] sm:$0xff] }
 0x12e   : > { %12964 = vmatprep.subr.bf16.mxu0 %v15995_v33  ;;  %13620 = vmatprep.subr.bf16.mxu1 %v15997_v34  ;;  %v16044_v33 = vcombine.low %v727_v18, %v731_v19  ;;  %v16051_v34 = vcombine.high %v734_v25, %v738_v26  ;;  %v16053_v35 = vcombine.high %v735_v29, %v739_v30  ;;  %v786_v18 = vld [vmem:[%s18438_s12 + $0xde0] sm:$0xff]  ;;  %v783_v19 = vld [vmem:[%s18438_s12 + $0xdc8] sm:$0xff] }
 0x131   : > { %12965 = vmatpush1.bf16.msra.mxu0 %v15994_v39  ;;  %13621 = vmatpush1.bf16.msra.mxu1 %v15996_v40  ;;  %v747_v39 = vld [vmem:[%s18438_s12 + $0xca8] sm:$0xff]  ;;  %v16050_v40 = vcombine.low %v734_v25, %v738_v26  ;;  %v790_v26 = vld [vmem:[%s18438_s12 + $0xe00] sm:$0xff] }
 0x132   : > { %12966 = vmatprep.subr.bf16.mxu0 %v16003_v41  ;;  %13622 = vmatprep.subr.bf16.mxu1 %v16005_v43  ;;  %v16052_v41 = vcombine.low %v735_v29, %v739_v30  ;;  %v16059_v43 = vcombine.high %v742_v36, %v746_v37  ;;  %v16061_v44 = vcombine.high %v743_v62, %v747_v39  ;;  %v794_v29 = vld [vmem:[%s18438_s12 + $0xe20] sm:$0xff]  ;;  %v791_v30 = vld [vmem:[%s18438_s12 + $0xe08] sm:$0xff] }
 0x135   : > { %12967 = vmatpush1.bf16.msra.mxu0 %v16002_v48  ;;  %13623 = vmatpush1.bf16.msra.mxu1 %v16004_v49  ;;  %v755_v48 = vld [vmem:[%s18438_s12 + $0xce8] sm:$0xff]  ;;  %v16058_v49 = vcombine.low %v742_v36, %v746_v37  ;;  %v798_v37 = vld [vmem:[%s18438_s12 + $0xe40] sm:$0xff] }
 0x136   : > { %12968 = vmatprep.subr.bf16.mxu0 %v16011_v50  ;;  %13624 = vmatprep.subr.bf16.mxu1 %v16013_v51  ;;  %v16060_v50 = vcombine.low %v743_v62, %v747_v39  ;;  %v16067_v51 = vcombine.high %v750_v45, %v754_v46  ;;  %v16069_v52 = vcombine.high %v751_v47, %v755_v48  ;;  %v802_v62 = vld [vmem:[%s18438_s12 + $0xe60] sm:$0xff]  ;;  %v799_v39 = vld [vmem:[%s18438_s12 + $0xe48] sm:$0xff] }
 0x139   : > { %12969 = vmatpush1.bf16.msra.mxu0 %v16010_v57  ;;  %13625 = vmatpush1.bf16.msra.mxu1 %v16012_v58  ;;  %v763_v57 = vld [vmem:[%s18438_s12 + $0xd28] sm:$0xff]  ;;  %v16066_v58 = vcombine.low %v750_v45, %v754_v46  ;;  %v806_v46 = vld [vmem:[%s18438_s12 + $0xe80] sm:$0xff] }
 0x13a   : > { %12970 = vmatprep.subr.bf16.mxu0 %v16019_v59  ;;  %13626 = vmatprep.subr.bf16.mxu1 %v16021_v60  ;;  %v16068_v59 = vcombine.low %v751_v47, %v755_v48  ;;  %v16075_v60 = vcombine.high %v758_v53, %v762_v54  ;;  %v16077_v61 = vcombine.high %v759_v55, %v763_v57  ;;  %v810_v47 = vld [vmem:[%s18438_s12 + $0xea0] sm:$0xff]  ;;  %v807_v48 = vld [vmem:[%s18438_s12 + $0xe88] sm:$0xff] }
 0x13d   : > { %12971 = vmatpush1.bf16.msra.mxu0 %v16018_v32  ;;  %13627 = vmatpush1.bf16.msra.mxu1 %v16020_v2  ;;  %v771_v32 = vld [vmem:[%s18438_s12 + $0xd68] sm:$0xff]  ;;  %v16074_v2 = vcombine.low %v758_v53, %v762_v54  ;;  %v814_v54 = vld [vmem:[%s18438_s12 + $0xec0] sm:$0xff] }
 0x13e   : > { %12972 = vmatprep.subr.bf16.mxu0 %v16027_v3  ;;  %13628 = vmatprep.subr.bf16.mxu1 %v16029_v4  ;;  %v16076_v3 = vcombine.low %v759_v55, %v763_v57  ;;  %v16083_v4 = vcombine.high %v766_v28, %v770_v63  ;;  %v16085_v5 = vcombine.high %v767_v0, %v771_v32  ;;  %v818_v55 = vld [vmem:[%s18438_s12 + $0xee0] sm:$0xff]  ;;  %v815_v57 = vld [vmem:[%s18438_s12 + $0xec8] sm:$0xff] }
 0x141   : > { %12973 = vmatpush1.bf16.msra.mxu0 %v16026_v10  ;;  %13629 = vmatpush1.bf16.msra.mxu1 %v16028_v11  ;;  %v779_v10 = vld [vmem:[%s18438_s12 + $0xda8] sm:$0xff]  ;;  %v16082_v11 = vcombine.low %v766_v28, %v770_v63  ;;  %v822_v63 = vld [vmem:[%s18438_s12 + $0xf00] sm:$0xff] }
 0x142   : > { %12974 = vmatprep.subr.bf16.mxu0 %v16035_v12  ;;  %13630 = vmatprep.subr.bf16.mxu1 %v16037_v14  ;;  %v16084_v12 = vcombine.low %v767_v0, %v771_v32  ;;  %v16091_v14 = vcombine.high %v774_v6, %v778_v8  ;;  %v16093_v15 = vcombine.high %v775_v9, %v779_v10  ;;  %v826_v0 = vld [vmem:[%s18438_s12 + $0xf20] sm:$0xff]  ;;  %v823_v32 = vld [vmem:[%s18438_s12 + $0xf08] sm:$0xff] }
 0x145   : > { %12975 = vmatpush1.bf16.msra.mxu0 %v16034_v20  ;;  %13631 = vmatpush1.bf16.msra.mxu1 %v16036_v21  ;;  %v787_v20 = vld [vmem:[%s18438_s12 + $0xde8] sm:$0xff]  ;;  %v16090_v21 = vcombine.low %v774_v6, %v778_v8  ;;  %v830_v8 = vld [vmem:[%s18438_s12 + $0xf40] sm:$0xff] }
 0x146   : > { %12985 = vmatprep.subr.bf16.mxu0 %v16043_v23  ;;  %13641 = vmatprep.subr.bf16.mxu1 %v16045_v24  ;;  %v16092_v23 = vcombine.low %v775_v9, %v779_v10  ;;  %v16099_v24 = vcombine.high %v782_v16, %v786_v18  ;;  %v16101_v25 = vcombine.high %v783_v19, %v787_v20  ;;  %v834_v9 = vld [vmem:[%s18438_s12 + $0xf60] sm:$0xff]  ;;  %v831_v10 = vld [vmem:[%s18438_s12 + $0xf48] sm:$0xff] }
 0x148   : > { %12977 = vmatmul.mubr.bf16.vlgmr.msra.gmra.mrb[0].mxu0 %v18698_v27  ;;  %13633 = vmatmul.mubr.bf16.vlgmr.msra.gmra.mrb[0].mxu1 %v18698_v27 }
 0x149   : > { %12986 = vmatpush1.bf16.msra.mxu0 %v16042_v31  ;;  %13642 = vmatpush1.bf16.msra.mxu1 %v16044_v33  ;;  %v795_v31 = vld [vmem:[%s18438_s12 + $0xe28] sm:$0xff]  ;;  %v16098_v33 = vcombine.low %v782_v16, %v786_v18  ;;  %v838_v18 = vld [vmem:[%s18438_s12 + $0xf80] sm:$0xff] }
 0x14a   : > { %12987 = vmatprep.subr.bf16.mxu0 %v16051_v34  ;;  %13643 = vmatprep.subr.bf16.mxu1 %v16053_v35  ;;  %v16100_v34 = vcombine.low %v783_v19, %v787_v20  ;;  %v16107_v35 = vcombine.high %v790_v26, %v794_v29  ;;  %v16109_v36 = vcombine.high %v791_v30, %v795_v31  ;;  %v842_v19 = vld [vmem:[%s18438_s12 + $0xfa0] sm:$0xff]  ;;  %v839_v20 = vld [vmem:[%s18438_s12 + $0xf88] sm:$0xff] }
 0x14b   : > { %13017 = vmatprep.mubr.bf16.mxu0 %v18706_v38  ;;  %13673 = vmatprep.mubr.bf16.mxu1 %v18706_v38 }
 0x14d   : > { %12988 = vmatpush1.bf16.msra.mxu0 %v16050_v40  ;;  %13644 = vmatpush1.bf16.msra.mxu1 %v16052_v41  ;;  %v803_v40 = vld [vmem:[%s18438_s12 + $0xe68] sm:$0xff]  ;;  %v16106_v41 = vcombine.low %v790_v26, %v794_v29  ;;  %v846_v29 = vld [vmem:[%s18438_s12 + $0xfc0] sm:$0xff] }
 0x14e   : > { %12989 = vmatprep.subr.bf16.mxu0 %v16059_v43  ;;  %13645 = vmatprep.subr.bf16.mxu1 %v16061_v44  ;;  %v16108_v43 = vcombine.low %v791_v30, %v795_v31  ;;  %v16115_v44 = vcombine.high %v798_v37, %v802_v62  ;;  %v16117_v45 = vcombine.high %v799_v39, %v803_v40  ;;  %v850_v30 = vld [vmem:[%s18438_s12 + $0xfe0] sm:$0xff]  ;;  %v847_v31 = vld [vmem:[%s18438_s12 + $0xfc8] sm:$0xff] }
 0x151   : > { %12990 = vmatpush1.bf16.msra.mxu0 %v16058_v49  ;;  %13646 = vmatpush1.bf16.msra.mxu1 %v16060_v50  ;;  %v811_v49 = vld [vmem:[%s18438_s12 + $0xea8] sm:$0xff]  ;;  %v16114_v50 = vcombine.low %v798_v37, %v802_v62  ;;  %v16163_v37 = vcombine.high %v846_v29, %v850_v30 }
 0x152   : > { %12991 = vmatprep.subr.bf16.mxu0 %v16067_v51  ;;  %13647 = vmatprep.subr.bf16.mxu1 %v16069_v52  ;;  %v16116_v51 = vcombine.low %v799_v39, %v803_v40  ;;  %v16123_v52 = vcombine.high %v806_v46, %v810_v47  ;;  %v16125_v53 = vcombine.high %v807_v48, %v811_v49  ;;  %v854_v39 = vld [vmem:[%s18438_s12 + $0x1000] sm:$0xff] }
 0x153   : > { %v858_v40 = vld [vmem:[%s18438_s12 + $0x1020] sm:$0xff] }
 0x155   : > { %12992 = vmatpush1.bf16.msra.mxu0 %v16066_v58  ;;  %13648 = vmatpush1.bf16.msra.mxu1 %v16068_v59  ;;  %v819_v58 = vld [vmem:[%s18438_s12 + $0xee8] sm:$0xff]  ;;  %v16122_v59 = vcombine.low %v806_v46, %v810_v47  ;;  %v16171_v47 = vcombine.high %v854_v39, %v858_v40 }
 0x156   : > { %12993 = vmatprep.subr.bf16.mxu0 %v16075_v60  ;;  %13649 = vmatprep.subr.bf16.mxu1 %v16077_v61  ;;  %v16124_v60 = vcombine.low %v807_v48, %v811_v49  ;;  %v16131_v61 = vcombine.high %v814_v54, %v818_v55  ;;  %v16133_v28 = vcombine.high %v815_v57, %v819_v58  ;;  %v862_v49 = vld [vmem:[%s18438_s12 + $0x1040] sm:$0xff] }
 0x159   : > { %12994 = vmatpush1.bf16.msra.mxu0 %v16074_v2  ;;  %13650 = vmatpush1.bf16.msra.mxu1 %v16076_v3  ;;  %v827_v2 = vld [vmem:[%s18438_s12 + $0xf28] sm:$0xff]  ;;  %v16130_v3 = vcombine.low %v814_v54, %v818_v55  ;;  %v16170_v55 = vcombine.low %v854_v39, %v858_v40 }
 0x15a   : > { %12995 = vmatprep.subr.bf16.mxu0 %v16083_v4  ;;  %13651 = vmatprep.subr.bf16.mxu1 %v16085_v5  ;;  %v16132_v4 = vcombine.low %v815_v57, %v819_v58  ;;  %v16139_v5 = vcombine.high %v822_v63, %v826_v0  ;;  %v16141_v6 = vcombine.high %v823_v32, %v827_v2  ;;  %v867_v54 = vld [vmem:[%s18438_s12 + $0x1068] sm:$0xff] }
 0x15b   : > { %v903_v39 = vld [vmem:[%s18438_s12 + $0x1188] sm:$0xff] }
 0x15c   : > { %v907_v40 = vld [vmem:[%s18438_s12 + $0x11a8] sm:$0xff] }
 0x15d   : > { %12996 = vmatpush1.bf16.msra.mxu0 %v16082_v11  ;;  %13652 = vmatpush1.bf16.msra.mxu1 %v16084_v12  ;;  %v835_v11 = vld [vmem:[%s18438_s12 + $0xf68] sm:$0xff]  ;;  %v16138_v12 = vcombine.low %v822_v63, %v826_v0 }
 0x15e   : > { %12997 = vmatprep.subr.bf16.mxu0 %v16091_v14  ;;  %13653 = vmatprep.subr.bf16.mxu1 %v16093_v15  ;;  %v16140_v14 = vcombine.low %v823_v32, %v827_v2  ;;  %v16147_v15 = vcombine.high %v830_v8, %v834_v9  ;;  %v16149_v16 = vcombine.high %v831_v10, %v835_v11  ;;  %v871_v63 = vld [vmem:[%s18438_s12 + $0x1088] sm:$0xff] }
 0x15f   : > { %v875_v0 = vld [vmem:[%s18438_s12 + $0x10a8] sm:$0xff] }
 0x161   : > { %12998 = vmatpush1.bf16.msra.mxu0 %v16090_v21  ;;  %13654 = vmatpush1.bf16.msra.mxu1 %v16092_v23  ;;  %v843_v21 = vld [vmem:[%s18438_s12 + $0xfa8] sm:$0xff]  ;;  %v16146_v23 = vcombine.low %v830_v8, %v834_v9 }
 0x162   : > { %12999 = vmatprep.subr.bf16.mxu0 %v16099_v24  ;;  %13655 = vmatprep.subr.bf16.mxu1 %v16101_v25  ;;  %v16148_v24 = vcombine.low %v831_v10, %v835_v11  ;;  %v16155_v25 = vcombine.high %v838_v18, %v842_v19  ;;  %v16157_v26 = vcombine.high %v839_v20, %v843_v21  ;;  %v879_v8 = vld [vmem:[%s18438_s12 + $0x10c8] sm:$0xff] }
 0x163   : > { %v883_v9 = vld [vmem:[%s18438_s12 + $0x10e8] sm:$0xff]  ;;  %v16188_v11 = vcombine.low %v871_v63, %v875_v0 }
 0x165   : > { %13000 = vmatpush1.bf16.msra.mxu0 %v16098_v33  ;;  %13656 = vmatpush1.bf16.msra.mxu1 %v16100_v34  ;;  %v851_v33 = vld [vmem:[%s18438_s12 + $0xfe8] sm:$0xff] }
 0x166   : > { %13001 = vmatprep.subr.bf16.mxu0 %v16107_v35  ;;  %13657 = vmatprep.subr.bf16.mxu1 %v16109_v36  ;;  %v18767_v34 = vld [vmem:[%s18431_s30 + $0x8] sm:$0xff]  ;;  %v16154_v35 = vcombine.low %v838_v18, %v842_v19  ;;  %v16156_v36 = vcombine.low %v839_v20, %v843_v21  ;;  %v16165_v62 = vcombine.high %v847_v31, %v851_v33 }
 0x167   : > { %v16164_v46 = vcombine.low %v847_v31, %v851_v33  ;;  %v887_v18 = vld [vmem:[%s18438_s12 + $0x1108] sm:$0xff]  ;;  %v16196_v21 = vcombine.low %v879_v8, %v883_v9 }
 0x168   : > { %v891_v19 = vld [vmem:[%s18438_s12 + $0x1128] sm:$0xff] }
 0x169   : > { %13002 = vmatpush1.bf16.msra.mxu0 %v16106_v41  ;;  %13658 = vmatpush1.bf16.msra.mxu1 %v16108_v43  ;;  %v18773_v41 = vrot.slane %v18767_v34, %v18478_v22  ;;  %v855_v43 = vld [vmem:[%s18438_s12 + $0x1008] sm:$0xff]  ;;  %v16204_v33 = vcombine.low %v887_v18, %v891_v19 }
 0x16a   : > { %13003 = vmatprep.subr.bf16.mxu0 %v16115_v44  ;;  %13659 = vmatprep.subr.bf16.mxu1 %v16117_v45  ;;  %v859_v44 = vld [vmem:[%s18438_s12 + $0x1028] sm:$0xff]  ;;  %v16162_v45 = vcombine.low %v846_v29, %v850_v30 }
 0x16b   : > { %v16173_v48 = vcombine.high %v855_v43, %v859_v44  ;;  %v16172_v57 = vcombine.low %v855_v43, %v859_v44  ;;  %v895_v29 = vld [vmem:[%s18438_s12 + $0x1148] sm:$0xff] }
 0x16c   : > { %v899_v30 = vld [vmem:[%s18438_s12 + $0x1168] sm:$0xff] }
 0x16d   : > { %13004 = vmatpush1.bf16.msra.mxu0 %v16114_v50  ;;  %13660 = vmatpush1.bf16.msra.mxu1 %v16116_v51  ;;  %v866_v50 = vld [vmem:[%s18438_s12 + $0x1060] sm:$0xff]  ;;  %v2458_v51 = vcombine.high %v18773_v41, %v18773_v41  ;;  %v16212_v44 = vcombine.low %v895_v29, %v899_v30 }
 0x16e   : > { %13005 = vmatprep.subr.bf16.mxu0 %v16123_v52  ;;  %13661 = vmatprep.subr.bf16.mxu1 %v16125_v53  ;;  %v18783_v52 = vcombine.high %v18698_v27, %v18698_v27  ;;  %v863_v53 = vld [vmem:[%s18438_s12 + $0x1048] sm:$0xff]  ;;  %v16179_v58 = vcombine.high %v862_v49, %v866_v50  ;;  %v16178_v32 = vcombine.low %v862_v49, %v866_v50 }
 0x16f   : > { %v16180_v2 = vcombine.low %v863_v53, %v867_v54  ;;  %v911_v49 = vld [vmem:[%s18438_s12 + $0x11c8] sm:$0xff] }
 0x170   : > { %v915_v50 = vld [vmem:[%s18438_s12 + $0x11e8] sm:$0xff] }
 0x171   : > { %13006 = vmatpush1.bf16.msra.mxu0 %v16122_v59  ;;  %13662 = vmatpush1.bf16.msra.mxu1 %v16124_v60  ;;  %v16181_v59 = vcombine.high %v863_v53, %v867_v54  ;;  %v870_v60 = vld [vmem:[%s18438_s12 + $0x1080] sm:$0xff]  ;;  %v16220_v53 = vcombine.low %v903_v39, %v907_v40 }
 0x172   : > { %13007 = vmatprep.subr.bf16.mxu0 %v16131_v61  ;;  %13663 = vmatprep.subr.bf16.mxu1 %v16133_v28  ;;  %v874_v61 = vld [vmem:[%s18438_s12 + $0x10a0] sm:$0xff]  ;;  %v18790_v28 = vrot.slane %v2458_v51, %v18478_v22 }
 0x173   : > { %v16186_v10 = vcombine.low %v870_v60, %v874_v61 }
 0x175   : > { %13008 = vmatpush1.bf16.msra.mxu0 %v16130_v3  ;;  %13664 = vmatpush1.bf16.msra.mxu1 %v16132_v4  ;;  %v16187_v3 = vcombine.high %v870_v60, %v874_v61  ;;  %v16189_v4 = vcombine.high %v871_v63, %v875_v0  ;;  %v923_v60 = vld [vmem:[%s18438_s12 + $0x1228] sm:$0xff]  ;;  %v16228_v63 = vcombine.low %v911_v49, %v915_v50 }
 0x176   : > { %13009 = vmatprep.subr.bf16.mxu0 %v16139_v5  ;;  %13665 = vmatprep.subr.bf16.mxu1 %v16141_v6  ;;  %v878_v5 = vld [vmem:[%s18438_s12 + $0x10c0] sm:$0xff] }
 0x177   : > { %v882_v6 = vld [vmem:[%s18438_s12 + $0x10e0] sm:$0xff] }
 0x178   : > { %v16194_v20 = vcombine.low %v878_v5, %v882_v6 }
 0x179   : > { %13010 = vmatpush1.bf16.msra.mxu0 %v16138_v12  ;;  %13666 = vmatpush1.bf16.msra.mxu1 %v16140_v14  ;;  %v16195_v12 = vcombine.high %v878_v5, %v882_v6  ;;  %v16197_v14 = vcombine.high %v879_v8, %v883_v9  ;;  %v931_v5 = vld [vmem:[%s18438_s12 + $0x1268] sm:$0xff] }
 0x17a   : > { %13011 = vmatprep.subr.bf16.mxu0 %v16147_v15  ;;  %13667 = vmatprep.subr.bf16.mxu1 %v16149_v16  ;;  %v886_v15 = vld [vmem:[%s18438_s12 + $0x1100] sm:$0xff] }
 0x17b   : > { %v890_v16 = vld [vmem:[%s18438_s12 + $0x1120] sm:$0xff] }
 0x17c   : > { %v16202_v31 = vcombine.low %v886_v15, %v890_v16 }
 0x17d   : > { %13012 = vmatpush1.bf16.msra.mxu0 %v16146_v23  ;;  %13668 = vmatpush1.bf16.msra.mxu1 %v16148_v24  ;;  %v16203_v23 = vcombine.high %v886_v15, %v890_v16  ;;  %v16205_v24 = vcombine.high %v887_v18, %v891_v19  ;;  %v939_v15 = vld [vmem:[%s18438_s12 + $0x12a8] sm:$0xff] }
 0x17e   : > { %13013 = vmatprep.subr.bf16.mxu0 %v16155_v25  ;;  %13669 = vmatprep.subr.bf16.mxu1 %v16157_v26  ;;  %v894_v25 = vld [vmem:[%s18438_s12 + $0x1140] sm:$0xff] }
 0x17f   : > { %v898_v26 = vld [vmem:[%s18438_s12 + $0x1160] sm:$0xff] }
 0x180   : > { %v16210_v43 = vcombine.low %v894_v25, %v898_v26 }
 0x181   : > { %13014 = vmatpush1.bf16.msra.mxu0 %v16154_v35  ;;  %13670 = vmatpush1.bf16.msra.mxu1 %v16156_v36  ;;  %v16211_v35 = vcombine.high %v894_v25, %v898_v26  ;;  %v16213_v36 = vcombine.high %v895_v29, %v899_v30  ;;  %v947_v25 = vld [vmem:[%s18438_s12 + $0x12e8] sm:$0xff] }
 0x182   : > { %13015 = vmatprep.subr.bf16.mxu0 %v16163_v37  ;;  %13671 = vmatprep.subr.bf16.mxu1 %v16165_v62  ;;  %v902_v37 = vld [vmem:[%s18438_s12 + $0x1180] sm:$0xff] }
 0x183   : > { %v906_v62 = vld [vmem:[%s18438_s12 + $0x11a0] sm:$0xff] }
 0x184   : > { %v16218_v51 = vcombine.low %v902_v37, %v906_v62 }
 0x185   : > { %13016 = vmatpush1.bf16.msra.mxu0 %v16162_v45  ;;  %13672 = vmatpush1.bf16.msra.mxu1 %v16164_v46  ;;  %v16219_v45 = vcombine.high %v902_v37, %v906_v62  ;;  %v16221_v46 = vcombine.high %v903_v39, %v907_v40  ;;  %v955_v37 = vld [vmem:[%s18438_s12 + $0x1328] sm:$0xff] }
 0x186   : > { %13026 = vmatprep.subr.bf16.mxu0 %v16171_v47  ;;  %13682 = vmatprep.subr.bf16.mxu1 %v16173_v48  ;;  %v910_v47 = vld [vmem:[%s18438_s12 + $0x11c0] sm:$0xff] }
 0x187   : > { %v914_v48 = vld [vmem:[%s18438_s12 + $0x11e0] sm:$0xff] }
 0x188   : > { %13018 = vmatmul.mubr.bf16.vlgmr.msra.gmra.mrb[0].mxu0 %v18783_v52  ;;  %13674 = vmatmul.mubr.bf16.vlgmr.msra.gmra.mrb[0].mxu1 %v18783_v52  ;;  %v16227_v54 = vcombine.high %v910_v47, %v914_v48  ;;  %v16226_v61 = vcombine.low %v910_v47, %v914_v48  ;;  %v963_v47 = vld [vmem:[%s18438_s12 + $0x1368] sm:$0xff] }
 0x189   : > { %13027 = vmatpush1.bf16.msra.mxu0 %v16170_v55  ;;  %13683 = vmatpush1.bf16.msra.mxu1 %v16172_v57  ;;  %v16229_v55 = vcombine.high %v911_v49, %v915_v50  ;;  %v918_v57 = vld [vmem:[%s18438_s12 + $0x1200] sm:$0xff] }
 0x18a   : > { %13028 = vmatprep.subr.bf16.mxu0 %v16179_v58  ;;  %13684 = vmatprep.subr.bf16.mxu1 %v16181_v59  ;;  %v922_v58 = vld [vmem:[%s18438_s12 + $0x1220] sm:$0xff]  ;;  %v919_v59 = vld [vmem:[%s18438_s12 + $0x1208] sm:$0xff] }
 0x18b   : > { %13058 = vmatprep.mubr.bf16.mxu0 %v18790_v28  ;;  %13714 = vmatprep.mubr.bf16.mxu1 %v18790_v28  ;;  %v16235_v0 = vcombine.high %v918_v57, %v922_v58  ;;  %v16234_v6 = vcombine.low %v918_v57, %v922_v58  ;;  %v16236_v8 = vcombine.low %v919_v59, %v923_v60  ;;  %v971_v57 = vld [vmem:[%s18438_s12 + $0x13a8] sm:$0xff] }
 0x18d   : > { %13029 = vmatpush1.bf16.msra.mxu0 %v16178_v32  ;;  %13685 = vmatpush1.bf16.msra.mxu1 %v16180_v2  ;;  %v16237_v32 = vcombine.high %v919_v59, %v923_v60  ;;  %v926_v2 = vld [vmem:[%s18438_s12 + $0x1240] sm:$0xff] }
 0x18e   : > { %13030 = vmatprep.subr.bf16.mxu0 %v16187_v3  ;;  %13686 = vmatprep.subr.bf16.mxu1 %v16189_v4  ;;  %v930_v3 = vld [vmem:[%s18438_s12 + $0x1260] sm:$0xff]  ;;  %v927_v4 = vld [vmem:[%s18438_s12 + $0x1248] sm:$0xff] }
 0x18f   : > { %v16243_v9 = vcombine.high %v926_v2, %v930_v3  ;;  %v16242_v16 = vcombine.low %v926_v2, %v930_v3  ;;  %v16244_v18 = vcombine.low %v927_v4, %v931_v5  ;;  %v979_v2 = vld [vmem:[%s18438_s12 + $0x13e8] sm:$0xff] }
 0x191   : > { %13031 = vmatpush1.bf16.msra.mxu0 %v16186_v10  ;;  %13687 = vmatpush1.bf16.msra.mxu1 %v16188_v11  ;;  %v16245_v10 = vcombine.high %v927_v4, %v931_v5  ;;  %v934_v11 = vld [vmem:[%s18438_s12 + $0x1280] sm:$0xff] }
 0x192   : > { %13032 = vmatprep.subr.bf16.mxu0 %v16195_v12  ;;  %13688 = vmatprep.subr.bf16.mxu1 %v16197_v14  ;;  %v938_v12 = vld [vmem:[%s18438_s12 + $0x12a0] sm:$0xff]  ;;  %v935_v14 = vld [vmem:[%s18438_s12 + $0x1288] sm:$0xff] }
 0x193   : > { %v16251_v19 = vcombine.high %v934_v11, %v938_v12  ;;  %v16250_v26 = vcombine.low %v934_v11, %v938_v12  ;;  %v16252_v29 = vcombine.low %v935_v14, %v939_v15  ;;  %v987_v11 = vld [vmem:[%s18438_s12 + $0x1428] sm:$0xff] }
 0x195   : > { %13033 = vmatpush1.bf16.msra.mxu0 %v16194_v20  ;;  %13689 = vmatpush1.bf16.msra.mxu1 %v16196_v21  ;;  %v16253_v20 = vcombine.high %v935_v14, %v939_v15  ;;  %v942_v21 = vld [vmem:[%s18438_s12 + $0x12c0] sm:$0xff] }
 0x196   : > { %13034 = vmatprep.subr.bf16.mxu0 %v16203_v23  ;;  %13690 = vmatprep.subr.bf16.mxu1 %v16205_v24  ;;  %v946_v23 = vld [vmem:[%s18438_s12 + $0x12e0] sm:$0xff]  ;;  %v943_v24 = vld [vmem:[%s18438_s12 + $0x12c8] sm:$0xff] }
 0x197   : > { %v16259_v30 = vcombine.high %v942_v21, %v946_v23  ;;  %v16258_v62 = vcombine.low %v942_v21, %v946_v23  ;;  %v16260_v39 = vcombine.low %v943_v24, %v947_v25  ;;  %v991_v21 = vld [vmem:[%s18438_s12 + $0x1448] sm:$0xff] }
 0x198   : > { %v995_v23 = vld [vmem:[%s18438_s12 + $0x1468] sm:$0xff] }
 0x199   : > { %13035 = vmatpush1.bf16.msra.mxu0 %v16202_v31  ;;  %13691 = vmatpush1.bf16.msra.mxu1 %v16204_v33  ;;  %v16261_v31 = vcombine.high %v943_v24, %v947_v25  ;;  %v950_v33 = vld [vmem:[%s18438_s12 + $0x1300] sm:$0xff] }
 0x19a   : > { %13036 = vmatprep.subr.bf16.mxu0 %v16211_v35  ;;  %13692 = vmatprep.subr.bf16.mxu1 %v16213_v36  ;;  %v954_v35 = vld [vmem:[%s18438_s12 + $0x1320] sm:$0xff]  ;;  %v951_v36 = vld [vmem:[%s18438_s12 + $0x1308] sm:$0xff] }
 0x19b   : > { %v16267_v40 = vcombine.high %v950_v33, %v954_v35  ;;  %v16266_v48 = vcombine.low %v950_v33, %v954_v35  ;;  %v16268_v49 = vcombine.low %v951_v36, %v955_v37  ;;  %v18866_v33 = vcombine.high %v18790_v28, %v18790_v28  ;;  %v1003_v35 = vld [vmem:[%s18438_s12 + $0x14a8] sm:$0xff] }
 0x19d   : > { %13037 = vmatpush1.bf16.msra.mxu0 %v16210_v43  ;;  %13693 = vmatpush1.bf16.msra.mxu1 %v16212_v44  ;;  %v16269_v43 = vcombine.high %v951_v36, %v955_v37  ;;  %v958_v44 = vld [vmem:[%s18438_s12 + $0x1340] sm:$0xff]  ;;  %v16308_v37 = vcombine.low %v991_v21, %v995_v23 }
 0x19e   : > { %13038 = vmatprep.subr.bf16.mxu0 %v16219_v45  ;;  %13694 = vmatprep.subr.bf16.mxu1 %v16221_v46  ;;  %v962_v45 = vld [vmem:[%s18438_s12 + $0x1360] sm:$0xff]  ;;  %v959_v46 = vld [vmem:[%s18438_s12 + $0x1348] sm:$0xff] }
 0x19f   : > { %v16275_v50 = vcombine.high %v958_v44, %v962_v45  ;;  %v16274_v58 = vcombine.low %v958_v44, %v962_v45  ;;  %v16276_v59 = vcombine.low %v959_v46, %v963_v47  ;;  %v1007_v44 = vld [vmem:[%s18438_s12 + $0x14c8] sm:$0xff] }
 0x1a0   : > { %v1011_v45 = vld [vmem:[%s18438_s12 + $0x14e8] sm:$0xff] }
 0x1a1   : > { %13039 = vmatpush1.bf16.msra.mxu0 %v16218_v51  ;;  %13695 = vmatpush1.bf16.msra.mxu1 %v16220_v53  ;;  %v16277_v51 = vcombine.high %v959_v46, %v963_v47  ;;  %v966_v53 = vld [vmem:[%s18438_s12 + $0x1380] sm:$0xff] }
 0x1a2   : > { %13040 = vmatprep.subr.bf16.mxu0 %v16227_v54  ;;  %13696 = vmatprep.subr.bf16.mxu1 %v16229_v55  ;;  %v970_v54 = vld [vmem:[%s18438_s12 + $0x13a0] sm:$0xff]  ;;  %v967_v55 = vld [vmem:[%s18438_s12 + $0x1388] sm:$0xff] }
 0x1a3   : > { %v16283_v60 = vcombine.high %v966_v53, %v970_v54  ;;  %v16282_v3 = vcombine.low %v966_v53, %v970_v54  ;;  %v16284_v4 = vcombine.low %v967_v55, %v971_v57  ;;  %v1015_v53 = vld [vmem:[%s18438_s12 + $0x1508] sm:$0xff] }
 0x1a4   : > { %v1019_v54 = vld [vmem:[%s18438_s12 + $0x1528] sm:$0xff] }
 0x1a5   : > { %13041 = vmatpush1.bf16.msra.mxu0 %v16226_v61  ;;  %13697 = vmatpush1.bf16.msra.mxu1 %v16228_v63  ;;  %v16285_v61 = vcombine.high %v967_v55, %v971_v57  ;;  %v974_v63 = vld [vmem:[%s18438_s12 + $0x13c0] sm:$0xff]  ;;  %v16324_v57 = vcombine.low %v1007_v44, %v1011_v45 }
 0x1a6   : > { %13042 = vmatprep.subr.bf16.mxu0 %v16235_v0  ;;  %13698 = vmatprep.subr.bf16.mxu1 %v16237_v32  ;;  %v978_v0 = vld [vmem:[%s18438_s12 + $0x13e0] sm:$0xff]  ;;  %v975_v32 = vld [vmem:[%s18438_s12 + $0x13c8] sm:$0xff] }
 0x1a7   : > { %v16291_v5 = vcombine.high %v974_v63, %v978_v0  ;;  %v16290_v12 = vcombine.low %v974_v63, %v978_v0  ;;  %v16292_v14 = vcombine.low %v975_v32, %v979_v2  ;;  %v1023_v63 = vld [vmem:[%s18438_s12 + $0x1548] sm:$0xff] }
 0x1a8   : > { %v1027_v0 = vld [vmem:[%s18438_s12 + $0x1568] sm:$0xff] }
 0x1a9   : > { %13043 = vmatpush1.bf16.msra.mxu0 %v16234_v6  ;;  %13699 = vmatpush1.bf16.msra.mxu1 %v16236_v8  ;;  %v16293_v6 = vcombine.high %v975_v32, %v979_v2  ;;  %v982_v8 = vld [vmem:[%s18438_s12 + $0x1400] sm:$0xff]  ;;  %v16332_v2 = vcombine.low %v1015_v53, %v1019_v54 }
 0x1aa   : > { %13044 = vmatprep.subr.bf16.mxu0 %v16243_v9  ;;  %13700 = vmatprep.subr.bf16.mxu1 %v16245_v10  ;;  %v986_v9 = vld [vmem:[%s18438_s12 + $0x1420] sm:$0xff]  ;;  %v983_v10 = vld [vmem:[%s18438_s12 + $0x1408] sm:$0xff] }
 0x1ab   : > { %v16299_v15 = vcombine.high %v982_v8, %v986_v9  ;;  %v16298_v24 = vcombine.low %v982_v8, %v986_v9  ;;  %v16300_v25 = vcombine.low %v983_v10, %v987_v11  ;;  %v1031_v8 = vld [vmem:[%s18438_s12 + $0x1588] sm:$0xff] }
 0x1ac   : > { %v1035_v9 = vld [vmem:[%s18438_s12 + $0x15a8] sm:$0xff] }
 0x1ad   : > { %13045 = vmatpush1.bf16.msra.mxu0 %v16242_v16  ;;  %13701 = vmatpush1.bf16.msra.mxu1 %v16244_v18  ;;  %v16301_v16 = vcombine.high %v983_v10, %v987_v11  ;;  %v990_v18 = vld [vmem:[%s18438_s12 + $0x1440] sm:$0xff]  ;;  %v16340_v11 = vcombine.low %v1023_v63, %v1027_v0 }
 0x1ae   : > { %13046 = vmatprep.subr.bf16.mxu0 %v16251_v19  ;;  %13702 = vmatprep.subr.bf16.mxu1 %v16253_v20  ;;  %v994_v19 = vld [vmem:[%s18438_s12 + $0x1460] sm:$0xff]  ;;  %v18858_v20 = vrot.slane %v18773_v41, %v18478_v22  ;;  %v999_v41 = vld [vmem:[%s18438_s12 + $0x1488] sm:$0xff] }
 0x1af   : > { %v16306_v36 = vcombine.low %v990_v18, %v994_v19  ;;  %v16316_v47 = vcombine.low %v999_v41, %v1003_v35 }
 0x1b1   : > { %13047 = vmatpush1.bf16.msra.mxu0 %v16250_v26  ;;  %13703 = vmatpush1.bf16.msra.mxu1 %v16252_v29  ;;  %v16307_v26 = vcombine.high %v990_v18, %v994_v19  ;;  %v16309_v29 = vcombine.high %v991_v21, %v995_v23  ;;  %v1039_v18 = vld [vmem:[%s18438_s12 + $0x15c8] sm:$0xff]  ;;  %v16348_v23 = vcombine.low %v1031_v8, %v1035_v9 }
 0x1b2   : > { %13048 = vmatprep.subr.bf16.mxu0 %v16259_v30  ;;  %13704 = vmatprep.subr.bf16.mxu1 %v16261_v31  ;;  %v998_v30 = vld [vmem:[%s18438_s12 + $0x1480] sm:$0xff]  ;;  %v1043_v19 = vld [vmem:[%s18438_s12 + $0x15e8] sm:$0xff] }
 0x1b3   : > { %v1002_v31 = vld [vmem:[%s18438_s12 + $0x14a0] sm:$0xff] }
 0x1b4   : > { %v16314_v46 = vcombine.low %v998_v30, %v1002_v31 }
 0x1b5   : > { %13049 = vmatpush1.bf16.msra.mxu0 %v16258_v62  ;;  %13705 = vmatpush1.bf16.msra.mxu1 %v16260_v39  ;;  %v16315_v62 = vcombine.high %v998_v30, %v1002_v31  ;;  %v16317_v39 = vcombine.high %v999_v41, %v1003_v35  ;;  %v1047_v30 = vld [vmem:[%s18438_s12 + $0x1608] sm:$0xff]  ;;  %v16356_v35 = vcombine.low %v1039_v18, %v1043_v19 }
 0x1b6   : > { %13050 = vmatprep.subr.bf16.mxu0 %v16267_v40  ;;  %13706 = vmatprep.subr.bf16.mxu1 %v16269_v43  ;;  %v1006_v40 = vld [vmem:[%s18438_s12 + $0x14c0] sm:$0xff]  ;;  %v1051_v31 = vld [vmem:[%s18438_s12 + $0x1628] sm:$0xff] }
 0x1b7   : > { %v1010_v43 = vld [vmem:[%s18438_s12 + $0x14e0] sm:$0xff] }
 0x1b8   : > { %v16322_v55 = vcombine.low %v1006_v40, %v1010_v43 }
 0x1b9   : > { %13051 = vmatpush1.bf16.msra.mxu0 %v16266_v48  ;;  %13707 = vmatpush1.bf16.msra.mxu1 %v16268_v49  ;;  %v16323_v48 = vcombine.high %v1006_v40, %v1010_v43  ;;  %v16325_v49 = vcombine.high %v1007_v44, %v1011_v45  ;;  %v1055_v40 = vld [vmem:[%s18438_s12 + $0x1648] sm:$0xff]  ;;  %v16364_v45 = vcombine.low %v1047_v30, %v1051_v31 }
 0x1ba   : > { %13052 = vmatprep.subr.bf16.mxu0 %v16275_v50  ;;  %13708 = vmatprep.subr.bf16.mxu1 %v16277_v51  ;;  %v1014_v50 = vld [vmem:[%s18438_s12 + $0x1500] sm:$0xff]  ;;  %v1059_v43 = vld [vmem:[%s18438_s12 + $0x1668] sm:$0xff] }
 0x1bb   : > { %v1018_v51 = vld [vmem:[%s18438_s12 + $0x1520] sm:$0xff] }
 0x1bc   : > { %v16330_v32 = vcombine.low %v1014_v50, %v1018_v51 }
 0x1bd   : > { %13053 = vmatpush1.bf16.msra.mxu0 %v16274_v58  ;;  %13709 = vmatpush1.bf16.msra.mxu1 %v16276_v59  ;;  %v16331_v58 = vcombine.high %v1014_v50, %v1018_v51  ;;  %v16333_v59 = vcombine.high %v1015_v53, %v1019_v54  ;;  %v1063_v50 = vld [vmem:[%s18438_s12 + $0x1688] sm:$0xff]  ;;  %v16372_v54 = vcombine.low %v1055_v40, %v1059_v43 }
 0x1be   : > { %13054 = vmatprep.subr.bf16.mxu0 %v16283_v60  ;;  %13710 = vmatprep.subr.bf16.mxu1 %v16285_v61  ;;  %v1022_v60 = vld [vmem:[%s18438_s12 + $0x1540] sm:$0xff]  ;;  %v1067_v51 = vld [vmem:[%s18438_s12 + $0x16a8] sm:$0xff] }
 0x1bf   : > { %v1026_v61 = vld [vmem:[%s18438_s12 + $0x1560] sm:$0xff] }
 0x1c0   : > { %v16338_v10 = vcombine.low %v1022_v60, %v1026_v61 }
 0x1c1   : > { %13055 = vmatpush1.bf16.msra.mxu0 %v16282_v3  ;;  %13711 = vmatpush1.bf16.msra.mxu1 %v16284_v4  ;;  %v16339_v3 = vcombine.high %v1022_v60, %v1026_v61  ;;  %v16341_v4 = vcombine.high %v1023_v63, %v1027_v0  ;;  %v1071_v60 = vld [vmem:[%s18438_s12 + $0x16c8] sm:$0xff]  ;;  %v16380_v0 = vcombine.low %v1063_v50, %v1067_v51 }
 0x1c2   : > { %13056 = vmatprep.subr.bf16.mxu0 %v16291_v5  ;;  %13712 = vmatprep.subr.bf16.mxu1 %v16293_v6  ;;  %v1030_v5 = vld [vmem:[%s18438_s12 + $0x1580] sm:$0xff]  ;;  %v1075_v61 = vld [vmem:[%s18438_s12 + $0x16e8] sm:$0xff] }
 0x1c3   : > { %v1034_v6 = vld [vmem:[%s18438_s12 + $0x15a0] sm:$0xff] }
 0x1c4   : > { %v16346_v21 = vcombine.low %v1030_v5, %v1034_v6 }
 0x1c5   : > { %13057 = vmatpush1.bf16.msra.mxu0 %v16290_v12  ;;  %13713 = vmatpush1.bf16.msra.mxu1 %v16292_v14  ;;  %v16347_v12 = vcombine.high %v1030_v5, %v1034_v6  ;;  %v16349_v14 = vcombine.high %v1031_v8, %v1035_v9  ;;  %v1079_v5 = vld [vmem:[%s18438_s12 + $0x1708] sm:$0xff]  ;;  %v16388_v9 = vcombine.low %v1071_v60, %v1075_v61 }
 0x1c6   : > { %13067 = vmatprep.subr.bf16.mxu0 %v16299_v15  ;;  %13723 = vmatprep.subr.bf16.mxu1 %v16301_v16  ;;  %v1038_v15 = vld [vmem:[%s18438_s12 + $0x15c0] sm:$0xff]  ;;  %v1083_v6 = vld [vmem:[%s18438_s12 + $0x1728] sm:$0xff] }
 0x1c7   : > { %v1042_v16 = vld [vmem:[%s18438_s12 + $0x15e0] sm:$0xff] }
 0x1c8   : > { %13059 = vmatmul.mubr.bf16.vlgmr.msra.gmra.mrb[0].mxu0 %v18858_v20  ;;  %13715 = vmatmul.mubr.bf16.vlgmr.msra.gmra.mrb[0].mxu1 %v18858_v20  ;;  %v16354_v41 = vcombine.low %v1038_v15, %v1042_v16 }
 0x1c9   : > { %13068 = vmatpush1.bf16.msra.mxu0 %v16298_v24  ;;  %13724 = vmatpush1.bf16.msra.mxu1 %v16300_v25  ;;  %v16355_v24 = vcombine.high %v1038_v15, %v1042_v16  ;;  %v16357_v25 = vcombine.high %v1039_v18, %v1043_v19  ;;  %v1087_v15 = vld [vmem:[%s18438_s12 + $0x1748] sm:$0xff]  ;;  %v16396_v19 = vcombine.low %v1079_v5, %v1083_v6 }
 0x1ca   : > { %13069 = vmatprep.subr.bf16.mxu0 %v16307_v26  ;;  %13725 = vmatprep.subr.bf16.mxu1 %v16309_v29  ;;  %v1046_v26 = vld [vmem:[%s18438_s12 + $0x1600] sm:$0xff]  ;;  %v1091_v16 = vld [vmem:[%s18438_s12 + $0x1768] sm:$0xff] }
 0x1cb   : > { %13099 = vmatprep.mubr.bf16.mxu0 %v18866_v33  ;;  %13755 = vmatprep.mubr.bf16.mxu1 %v18866_v33  ;;  %v1050_v29 = vld [vmem:[%s18438_s12 + $0x1620] sm:$0xff] }
 0x1cc   : > { %v16362_v44 = vcombine.low %v1046_v26, %v1050_v29 }
 0x1cd   : > { %13070 = vmatpush1.bf16.msra.mxu0 %v16306_v36  ;;  %13726 = vmatpush1.bf16.msra.mxu1 %v16308_v37  ;;  %v16363_v36 = vcombine.high %v1046_v26, %v1050_v29  ;;  %v16365_v37 = vcombine.high %v1047_v30, %v1051_v31  ;;  %v1095_v26 = vld [vmem:[%s18438_s12 + $0x1788] sm:$0xff]  ;;  %v16404_v31 = vcombine.low %v1087_v15, %v1091_v16 }
 0x1ce   : > { %13071 = vmatprep.subr.bf16.mxu0 %v16315_v62  ;;  %13727 = vmatprep.subr.bf16.mxu1 %v16317_v39  ;;  %v1054_v62 = vld [vmem:[%s18438_s12 + $0x1640] sm:$0xff]  ;;  %v1099_v29 = vld [vmem:[%s18438_s12 + $0x17a8] sm:$0xff] }
 0x1cf   : > { %v1058_v39 = vld [vmem:[%s18438_s12 + $0x1660] sm:$0xff] }
 0x1d0   : > { %v16370_v53 = vcombine.low %v1054_v62, %v1058_v39 }
 0x1d1   : > { %13072 = vmatpush1.bf16.msra.mxu0 %v16314_v46  ;;  %13728 = vmatpush1.bf16.msra.mxu1 %v16316_v47  ;;  %v16371_v46 = vcombine.high %v1054_v62, %v1058_v39  ;;  %v16373_v47 = vcombine.high %v1055_v40, %v1059_v43  ;;  %v2443_v62 = vcombine.high %v18767_v34, %v18767_v34  ;;  %v1103_v39 = vld [vmem:[%s18438_s12 + $0x17c8] sm:$0xff] }
 0x1d2   : > { %13073 = vmatprep.subr.bf16.mxu0 %v16323_v48  ;;  %13729 = vmatprep.subr.bf16.mxu1 %v16325_v49  ;;  %v1062_v48 = vld [vmem:[%s18438_s12 + $0x1680] sm:$0xff]  ;;  %v1107_v40 = vld [vmem:[%s18438_s12 + $0x17e8] sm:$0xff] }
 0x1d3   : > { %v1066_v49 = vld [vmem:[%s18438_s12 + $0x16a0] sm:$0xff]  ;;  %v1111_v34 = vld [vmem:[%s18438_s12 + $0x1808] sm:$0xff] }
 0x1d4   : > { %v16378_v63 = vcombine.low %v1062_v48, %v1066_v49 }
 0x1d5   : > { %13074 = vmatpush1.bf16.msra.mxu0 %v16322_v55  ;;  %13730 = vmatpush1.bf16.msra.mxu1 %v16324_v57  ;;  %v16379_v55 = vcombine.high %v1062_v48, %v1066_v49  ;;  %v16381_v57 = vcombine.high %v1063_v50, %v1067_v51  ;;  %v1114_v48 = vld [vmem:[%s18438_s12 + $0x1820] sm:$0xff]  ;;  %v18931_v49 = vrot.slane %v2443_v62, %v18478_v22  ;;  %v1115_v50 = vld [vmem:[%s18438_s12 + $0x1828] sm:$0xff] }
 0x1d6   : > { %13075 = vmatprep.subr.bf16.mxu0 %v16331_v58  ;;  %13731 = vmatprep.subr.bf16.mxu1 %v16333_v59  ;;  %v1070_v58 = vld [vmem:[%s18438_s12 + $0x16c0] sm:$0xff] }
 0x1d7   : > { %v1074_v59 = vld [vmem:[%s18438_s12 + $0x16e0] sm:$0xff] }
 0x1d8   : > { %v16386_v8 = vcombine.low %v1070_v58, %v1074_v59  ;;  %v1150_v62 = vld [vmem:[%s18438_s12 + $0x1940] sm:$0xff] }
 0x1d9   : > { %13076 = vmatpush1.bf16.msra.mxu0 %v16330_v32  ;;  %13732 = vmatpush1.bf16.msra.mxu1 %v16332_v2  ;;  %v16387_v32 = vcombine.high %v1070_v58, %v1074_v59  ;;  %v16389_v2 = vcombine.high %v1071_v60, %v1075_v61  ;;  %v1122_v58 = vld [vmem:[%s18438_s12 + $0x1860] sm:$0xff]  ;;  %v2459_v59 = vcombine.high %v18931_v49, %v18931_v49  ;;  %v1119_v61 = vld [vmem:[%s18438_s12 + $0x1848] sm:$0xff] }
 0x1da   : > { %13077 = vmatprep.subr.bf16.mxu0 %v16339_v3  ;;  %13733 = vmatprep.subr.bf16.mxu1 %v16341_v4  ;;  %v1078_v3 = vld [vmem:[%s18438_s12 + $0x1700] sm:$0xff]  ;;  %v18941_v60 = vcombine.high %v18858_v20, %v18858_v20 }
 0x1db   : > { %v1082_v4 = vld [vmem:[%s18438_s12 + $0x1720] sm:$0xff] }
 0x1dc   : > { %v16394_v18 = vcombine.low %v1078_v3, %v1082_v4 }
 0x1dd   : > { %13078 = vmatpush1.bf16.msra.mxu0 %v16338_v10  ;;  %13734 = vmatpush1.bf16.msra.mxu1 %v16340_v11  ;;  %v16395_v10 = vcombine.high %v1078_v3, %v1082_v4  ;;  %v16397_v11 = vcombine.high %v1079_v5, %v1083_v6  ;;  %v1126_v4 = vld [vmem:[%s18438_s12 + $0x1880] sm:$0xff]  ;;  %v18948_v6 = vrot.slane %v2459_v59, %v18478_v22 }
 0x1de   : > { %13079 = vmatprep.subr.bf16.mxu0 %v16347_v12  ;;  %13735 = vmatprep.subr.bf16.mxu1 %v16349_v14  ;;  %v1086_v12 = vld [vmem:[%s18438_s12 + $0x1740] sm:$0xff] }
 0x1df   : > { %v1090_v14 = vld [vmem:[%s18438_s12 + $0x1760] sm:$0xff] }
 0x1e0   : > { %v16402_v30 = vcombine.low %v1086_v12, %v1090_v14  ;;  %v1130_v5 = vld [vmem:[%s18438_s12 + $0x18a0] sm:$0xff] }
 0x1e1   : > { %13080 = vmatpush1.bf16.msra.mxu0 %v16346_v21  ;;  %13736 = vmatpush1.bf16.msra.mxu1 %v16348_v23  ;;  %v16403_v21 = vcombine.high %v1086_v12, %v1090_v14  ;;  %v16405_v23 = vcombine.high %v1087_v15, %v1091_v16  ;;  %v16443_v12 = vcombine.high %v1126_v4, %v1130_v5  ;;  %v1134_v15 = vld [vmem:[%s18438_s12 + $0x18c0] sm:$0xff] }
 0x1e2   : > { %13081 = vmatprep.subr.bf16.mxu0 %v16355_v24  ;;  %13737 = vmatprep.subr.bf16.mxu1 %v16357_v25  ;;  %v1094_v24 = vld [vmem:[%s18438_s12 + $0x1780] sm:$0xff] }
 0x1e3   : > { %v1098_v25 = vld [vmem:[%s18438_s12 + $0x17a0] sm:$0xff] }
 0x1e4   : > { %v16410_v43 = vcombine.low %v1094_v24, %v1098_v25  ;;  %v1138_v16 = vld [vmem:[%s18438_s12 + $0x18e0] sm:$0xff] }
 0x1e5   : > { %13082 = vmatpush1.bf16.msra.mxu0 %v16354_v41  ;;  %13738 = vmatpush1.bf16.msra.mxu1 %v16356_v35  ;;  %v16411_v41 = vcombine.high %v1094_v24, %v1098_v25  ;;  %v16413_v35 = vcombine.high %v1095_v26, %v1099_v29  ;;  %v16451_v24 = vcombine.high %v1134_v15, %v1138_v16  ;;  %v1170_v59 = vld [vmem:[%s18438_s12 + $0x19e0] sm:$0xff] }
 0x1e6   : > { %13083 = vmatprep.subr.bf16.mxu0 %v16363_v36  ;;  %13739 = vmatprep.subr.bf16.mxu1 %v16365_v37  ;;  %v1102_v36 = vld [vmem:[%s18438_s12 + $0x17c0] sm:$0xff] }
 0x1e7   : > { %v1106_v37 = vld [vmem:[%s18438_s12 + $0x17e0] sm:$0xff] }
 0x1e8   : > { %v16418_v51 = vcombine.low %v1102_v36, %v1106_v37 }
 0x1e9   : > { %13084 = vmatpush1.bf16.msra.mxu0 %v16362_v44  ;;  %13740 = vmatpush1.bf16.msra.mxu1 %v16364_v45  ;;  %v16412_v44 = vcombine.low %v1095_v26, %v1099_v29  ;;  %v16419_v45 = vcombine.high %v1102_v36, %v1106_v37  ;;  %v1142_v26 = vld [vmem:[%s18438_s12 + $0x1900] sm:$0xff] }
 0x1ea   : > { %13085 = vmatprep.subr.bf16.mxu0 %v16371_v46  ;;  %13741 = vmatprep.subr.bf16.mxu1 %v16373_v47  ;;  %v16421_v46 = vcombine.high %v1103_v39, %v1107_v40  ;;  %v1110_v47 = vld [vmem:[%s18438_s12 + $0x1800] sm:$0xff] }
 0x1eb   : > { %v1146_v29 = vld [vmem:[%s18438_s12 + $0x1920] sm:$0xff] }
 0x1ec   : > { %v16459_v36 = vcombine.high %v1142_v26, %v1146_v29 }
 0x1ed   : > { %13086 = vmatpush1.bf16.msra.mxu0 %v16370_v53  ;;  %13742 = vmatpush1.bf16.msra.mxu1 %v16372_v54  ;;  %v16420_v53 = vcombine.low %v1103_v39, %v1107_v40  ;;  %v16427_v54 = vcombine.high %v1110_v47, %v1114_v48  ;;  %v1154_v39 = vld [vmem:[%s18438_s12 + $0x1960] sm:$0xff]  ;;  %v1151_v40 = vld [vmem:[%s18438_s12 + $0x1948] sm:$0xff] }
 0x1ee   : > { %13087 = vmatprep.subr.bf16.mxu0 %v16379_v55  ;;  %13743 = vmatprep.subr.bf16.mxu1 %v16381_v57  ;;  %v16429_v55 = vcombine.high %v1111_v34, %v1115_v50  ;;  %v1118_v57 = vld [vmem:[%s18438_s12 + $0x1840] sm:$0xff] }
 0x1f1   : > { %13088 = vmatpush1.bf16.msra.mxu0 %v16378_v63  ;;  %13744 = vmatpush1.bf16.msra.mxu1 %v16380_v0  ;;  %v1123_v63 = vld [vmem:[%s18438_s12 + $0x1868] sm:$0xff]  ;;  %v16426_v0 = vcombine.low %v1110_v47, %v1114_v48  ;;  %v1158_v48 = vld [vmem:[%s18438_s12 + $0x1980] sm:$0xff] }
 0x1f2   : > { %13089 = vmatprep.subr.bf16.mxu0 %v16387_v32  ;;  %13745 = vmatprep.subr.bf16.mxu1 %v16389_v2  ;;  %v16428_v32 = vcombine.low %v1111_v34, %v1115_v50  ;;  %v16435_v2 = vcombine.high %v1118_v57, %v1122_v58  ;;  %v16437_v3 = vcombine.high %v1119_v61, %v1123_v63  ;;  %v1162_v34 = vld [vmem:[%s18438_s12 + $0x19a0] sm:$0xff]  ;;  %v1159_v50 = vld [vmem:[%s18438_s12 + $0x1988] sm:$0xff] }
 0x1f5   : > { %13090 = vmatpush1.bf16.msra.mxu0 %v16386_v8  ;;  %13746 = vmatpush1.bf16.msra.mxu1 %v16388_v9  ;;  %v1127_v8 = vld [vmem:[%s18438_s12 + $0x1888] sm:$0xff] }
 0x1f6   : > { %13091 = vmatprep.subr.bf16.mxu0 %v16395_v10  ;;  %13747 = vmatprep.subr.bf16.mxu1 %v16397_v11  ;;  %v1131_v9 = vld [vmem:[%s18438_s12 + $0x18a8] sm:$0xff]  ;;  %v16434_v10 = vcombine.low %v1118_v57, %v1122_v58  ;;  %v16436_v11 = vcombine.low %v1119_v61, %v1123_v63  ;;  %v1166_v58 = vld [vmem:[%s18438_s12 + $0x19c0] sm:$0xff] }
 0x1f7   : > { %v16445_v14 = vcombine.high %v1127_v8, %v1131_v9  ;;  %v1167_v61 = vld [vmem:[%s18438_s12 + $0x19c8] sm:$0xff] }
 0x1f8   : > { %v1171_v63 = vld [vmem:[%s18438_s12 + $0x19e8] sm:$0xff] }
 0x1f9   : > { %13092 = vmatpush1.bf16.msra.mxu0 %v16394_v18  ;;  %13748 = vmatpush1.bf16.msra.mxu1 %v16396_v19  ;;  %v1135_v18 = vld [vmem:[%s18438_s12 + $0x18c8] sm:$0xff] }
 0x1fa   : > { %13093 = vmatprep.subr.bf16.mxu0 %v16403_v21  ;;  %13749 = vmatprep.subr.bf16.mxu1 %v16405_v23  ;;  %v1139_v19 = vld [vmem:[%s18438_s12 + $0x18e8] sm:$0xff]  ;;  %v16442_v21 = vcombine.low %v1126_v4, %v1130_v5  ;;  %v16444_v23 = vcombine.low %v1127_v8, %v1131_v9  ;;  %v1174_v4 = vld [vmem:[%s18438_s12 + $0x1a00] sm:$0xff] }
 0x1fb   : > { %v16453_v25 = vcombine.high %v1135_v18, %v1139_v19  ;;  %v1178_v5 = vld [vmem:[%s18438_s12 + $0x1a20] sm:$0xff]  ;;  %v1175_v8 = vld [vmem:[%s18438_s12 + $0x1a08] sm:$0xff] }
 0x1fc   : > { %v1179_v9 = vld [vmem:[%s18438_s12 + $0x1a28] sm:$0xff] }
 0x1fd   : > { %13094 = vmatpush1.bf16.msra.mxu0 %v16402_v30  ;;  %13750 = vmatpush1.bf16.msra.mxu1 %v16404_v31  ;;  %v1143_v30 = vld [vmem:[%s18438_s12 + $0x1908] sm:$0xff] }
 0x1fe   : > { %13095 = vmatprep.subr.bf16.mxu0 %v16411_v41  ;;  %13751 = vmatprep.subr.bf16.mxu1 %v16413_v35  ;;  %v1147_v31 = vld [vmem:[%s18438_s12 + $0x1928] sm:$0xff]  ;;  %v16450_v41 = vcombine.low %v1134_v15, %v1138_v16  ;;  %v16452_v35 = vcombine.low %v1135_v18, %v1139_v19  ;;  %v1182_v15 = vld [vmem:[%s18438_s12 + $0x1a40] sm:$0xff] }
 0x1ff   : > { %v16461_v37 = vcombine.high %v1143_v30, %v1147_v31  ;;  %v1186_v16 = vld [vmem:[%s18438_s12 + $0x1a60] sm:$0xff]  ;;  %v1183_v18 = vld [vmem:[%s18438_s12 + $0x1a48] sm:$0xff] }
 0x200   : > { %v1187_v19 = vld [vmem:[%s18438_s12 + $0x1a68] sm:$0xff] }
 0x201   : > { %13096 = vmatpush1.bf16.msra.mxu0 %v16410_v43  ;;  %13752 = vmatpush1.bf16.msra.mxu1 %v16412_v44  ;;  %v1155_v43 = vld [vmem:[%s18438_s12 + $0x1968] sm:$0xff]  ;;  %v16458_v44 = vcombine.low %v1142_v26, %v1146_v29  ;;  %v1190_v26 = vld [vmem:[%s18438_s12 + $0x1a80] sm:$0xff] }
 0x202   : > { %13097 = vmatprep.subr.bf16.mxu0 %v16419_v45  ;;  %13753 = vmatprep.subr.bf16.mxu1 %v16421_v46  ;;  %v16460_v45 = vcombine.low %v1143_v30, %v1147_v31  ;;  %v16467_v46 = vcombine.high %v1150_v62, %v1154_v39  ;;  %v16469_v47 = vcombine.high %v1151_v40, %v1155_v43  ;;  %v1194_v29 = vld [vmem:[%s18438_s12 + $0x1aa0] sm:$0xff]  ;;  %v1191_v30 = vld [vmem:[%s18438_s12 + $0x1a88] sm:$0xff] }
 0x203   : > { %v1195_v31 = vld [vmem:[%s18438_s12 + $0x1aa8] sm:$0xff] }
 0x205   : > { %13098 = vmatpush1.bf16.msra.mxu0 %v16418_v51  ;;  %13754 = vmatpush1.bf16.msra.mxu1 %v16420_v53  ;;  %v1163_v51 = vld [vmem:[%s18438_s12 + $0x19a8] sm:$0xff]  ;;  %v16466_v53 = vcombine.low %v1150_v62, %v1154_v39  ;;  %v1198_v62 = vld [vmem:[%s18438_s12 + $0x1ac0] sm:$0xff] }
 0x206   : > { %13108 = vmatprep.subr.bf16.mxu0 %v16427_v54  ;;  %13764 = vmatprep.subr.bf16.mxu1 %v16429_v55  ;;  %v16468_v54 = vcombine.low %v1151_v40, %v1155_v43  ;;  %v16475_v55 = vcombine.high %v1158_v48, %v1162_v34  ;;  %v16477_v57 = vcombine.high %v1159_v50, %v1163_v51  ;;  %v1202_v39 = vld [vmem:[%s18438_s12 + $0x1ae0] sm:$0xff]  ;;  %v1199_v40 = vld [vmem:[%s18438_s12 + $0x1ac8] sm:$0xff] }
 0x207   : > { %v1203_v43 = vld [vmem:[%s18438_s12 + $0x1ae8] sm:$0xff] }
 0x208   : > { %13100 = vmatmul.mubr.bf16.vlgmr.msra.gmra.mrb[0].mxu0 %v18941_v60  ;;  %13756 = vmatmul.mubr.bf16.vlgmr.msra.gmra.mrb[0].mxu1 %v18941_v60 }
 0x209   : > { %13109 = vmatpush1.bf16.msra.mxu0 %v16426_v0  ;;  %13765 = vmatpush1.bf16.msra.mxu1 %v16428_v32  ;;  %v16474_v0 = vcombine.low %v1158_v48, %v1162_v34  ;;  %v16476_v32 = vcombine.low %v1159_v50, %v1163_v51  ;;  %v1206_v48 = vld [vmem:[%s18438_s12 + $0x1b00] sm:$0xff]  ;;  %v1207_v50 = vld [vmem:[%s18438_s12 + $0x1b08] sm:$0xff] }
 0x20a   : > { %13110 = vmatprep.subr.bf16.mxu0 %v16435_v2  ;;  %13766 = vmatprep.subr.bf16.mxu1 %v16437_v3  ;;  %v16483_v2 = vcombine.high %v1166_v58, %v1170_v59  ;;  %v16485_v3 = vcombine.high %v1167_v61, %v1171_v63  ;;  %v1210_v34 = vld [vmem:[%s18438_s12 + $0x1b20] sm:$0xff]  ;;  %v1211_v51 = vld [vmem:[%s18438_s12 + $0x1b28] sm:$0xff] }
 0x20b   : > { %13140 = vmatprep.mubr.bf16.mxu0 %v18948_v6  ;;  %13796 = vmatprep.mubr.bf16.mxu1 %v18948_v6 }
 0x20d   : > { %13111 = vmatpush1.bf16.msra.mxu0 %v16434_v10  ;;  %13767 = vmatpush1.bf16.msra.mxu1 %v16436_v11  ;;  %v16482_v10 = vcombine.low %v1166_v58, %v1170_v59  ;;  %v16484_v11 = vcombine.low %v1167_v61, %v1171_v63  ;;  %v1214_v58 = vld [vmem:[%s18438_s12 + $0x1b40] sm:$0xff]  ;;  %v1215_v61 = vld [vmem:[%s18438_s12 + $0x1b48] sm:$0xff] }
 0x20e   : > { %13112 = vmatprep.subr.bf16.mxu0 %v16443_v12  ;;  %13768 = vmatprep.subr.bf16.mxu1 %v16445_v14  ;;  %v16491_v12 = vcombine.high %v1174_v4, %v1178_v5  ;;  %v16493_v14 = vcombine.high %v1175_v8, %v1179_v9  ;;  %v1218_v59 = vld [vmem:[%s18438_s12 + $0x1b60] sm:$0xff]  ;;  %v1219_v63 = vld [vmem:[%s18438_s12 + $0x1b68] sm:$0xff] }
 0x211   : > { %13113 = vmatpush1.bf16.msra.mxu0 %v16442_v21  ;;  %13769 = vmatpush1.bf16.msra.mxu1 %v16444_v23  ;;  %v16490_v21 = vcombine.low %v1174_v4, %v1178_v5  ;;  %v16492_v23 = vcombine.low %v1175_v8, %v1179_v9  ;;  %v1222_v4 = vld [vmem:[%s18438_s12 + $0x1b80] sm:$0xff]  ;;  %v1223_v8 = vld [vmem:[%s18438_s12 + $0x1b88] sm:$0xff] }
 0x212   : > { %13114 = vmatprep.subr.bf16.mxu0 %v16451_v24  ;;  %13770 = vmatprep.subr.bf16.mxu1 %v16453_v25  ;;  %v16499_v24 = vcombine.high %v1182_v15, %v1186_v16  ;;  %v16501_v25 = vcombine.high %v1183_v18, %v1187_v19  ;;  %v1226_v5 = vld [vmem:[%s18438_s12 + $0x1ba0] sm:$0xff]  ;;  %v1227_v9 = vld [vmem:[%s18438_s12 + $0x1ba8] sm:$0xff] }
 0x215   : > { %13115 = vmatpush1.bf16.msra.mxu0 %v16450_v41  ;;  %13771 = vmatpush1.bf16.msra.mxu1 %v16452_v35  ;;  %v16498_v41 = vcombine.low %v1182_v15, %v1186_v16  ;;  %v16500_v35 = vcombine.low %v1183_v18, %v1187_v19  ;;  %v1230_v15 = vld [vmem:[%s18438_s12 + $0x1bc0] sm:$0xff]  ;;  %v1231_v18 = vld [vmem:[%s18438_s12 + $0x1bc8] sm:$0xff] }
 0x216   : > { %13116 = vmatprep.subr.bf16.mxu0 %v16459_v36  ;;  %13772 = vmatprep.subr.bf16.mxu1 %v16461_v37  ;;  %v16507_v36 = vcombine.high %v1190_v26, %v1194_v29  ;;  %v16509_v37 = vcombine.high %v1191_v30, %v1195_v31  ;;  %v1234_v16 = vld [vmem:[%s18438_s12 + $0x1be0] sm:$0xff]  ;;  %v1235_v19 = vld [vmem:[%s18438_s12 + $0x1be8] sm:$0xff] }
 0x219   : > { %13117 = vmatpush1.bf16.msra.mxu0 %v16458_v44  ;;  %13773 = vmatpush1.bf16.msra.mxu1 %v16460_v45  ;;  %v16506_v44 = vcombine.low %v1190_v26, %v1194_v29  ;;  %v16508_v45 = vcombine.low %v1191_v30, %v1195_v31  ;;  %v1238_v26 = vld [vmem:[%s18438_s12 + $0x1c00] sm:$0xff]  ;;  %v1239_v30 = vld [vmem:[%s18438_s12 + $0x1c08] sm:$0xff] }
 0x21a   : > { %13118 = vmatprep.subr.bf16.mxu0 %v16467_v46  ;;  %13774 = vmatprep.subr.bf16.mxu1 %v16469_v47  ;;  %v16515_v46 = vcombine.high %v1198_v62, %v1202_v39  ;;  %v16517_v47 = vcombine.high %v1199_v40, %v1203_v43  ;;  %v1242_v29 = vld [vmem:[%s18438_s12 + $0x1c20] sm:$0xff]  ;;  %v1243_v31 = vld [vmem:[%s18438_s12 + $0x1c28] sm:$0xff] }
 0x21d   : > { %13119 = vmatpush1.bf16.msra.mxu0 %v16466_v53  ;;  %13775 = vmatpush1.bf16.msra.mxu1 %v16468_v54  ;;  %v16514_v53 = vcombine.low %v1198_v62, %v1202_v39  ;;  %v16516_v54 = vcombine.low %v1199_v40, %v1203_v43  ;;  %v1246_v62 = vld [vmem:[%s18438_s12 + $0x1c40] sm:$0xff]  ;;  %v19016_v40 = vrot.slane %v18931_v49, %v18478_v22  ;;  %v1247_v43 = vld [vmem:[%s18438_s12 + $0x1c48] sm:$0xff] }
 0x21e   : > { %13120 = vmatprep.subr.bf16.mxu0 %v16475_v55  ;;  %13776 = vmatprep.subr.bf16.mxu1 %v16477_v57  ;;  %v16523_v55 = vcombine.high %v1206_v48, %v1210_v34  ;;  %v16525_v57 = vcombine.high %v1207_v50, %v1211_v51  ;;  %v1250_v39 = vld [vmem:[%s18438_s12 + $0x1c60] sm:$0xff]  ;;  %v1255_v49 = vld [vmem:[%s18438_s12 + $0x1c88] sm:$0xff] }
 0x221   : > { %13121 = vmatpush1.bf16.msra.mxu0 %v16474_v0  ;;  %13777 = vmatpush1.bf16.msra.mxu1 %v16476_v32  ;;  %v16522_v0 = vcombine.low %v1206_v48, %v1210_v34  ;;  %v16524_v32 = vcombine.low %v1207_v50, %v1211_v51  ;;  %v1254_v34 = vld [vmem:[%s18438_s12 + $0x1c80] sm:$0xff]  ;;  %v19024_v51 = vcombine.high %v18948_v6, %v18948_v6 }
 0x222   : > { %13122 = vmatprep.subr.bf16.mxu0 %v16483_v2  ;;  %13778 = vmatprep.subr.bf16.mxu1 %v16485_v3  ;;  %v16531_v2 = vcombine.high %v1214_v58, %v1218_v59  ;;  %v16533_v3 = vcombine.high %v1215_v61, %v1219_v63  ;;  %v1258_v50 = vld [vmem:[%s18438_s12 + $0x1ca0] sm:$0xff] }
 0x225   : > { %13123 = vmatpush1.bf16.msra.mxu0 %v16482_v10  ;;  %13779 = vmatpush1.bf16.msra.mxu1 %v16484_v11  ;;  %v16530_v10 = vcombine.low %v1214_v58, %v1218_v59  ;;  %v16532_v11 = vcombine.low %v1215_v61, %v1219_v63  ;;  %v1262_v59 = vld [vmem:[%s18438_s12 + $0x1cc0] sm:$0xff]  ;;  %v1263_v63 = vld [vmem:[%s18438_s12 + $0x1cc8] sm:$0xff] }
 0x226   : > { %13124 = vmatprep.subr.bf16.mxu0 %v16491_v12  ;;  %13780 = vmatprep.subr.bf16.mxu1 %v16493_v14  ;;  %v16539_v12 = vcombine.high %v1222_v4, %v1226_v5  ;;  %v16541_v14 = vcombine.high %v1223_v8, %v1227_v9  ;;  %v1266_v61 = vld [vmem:[%s18438_s12 + $0x1ce0] sm:$0xff] }
 0x229   : > { %13125 = vmatpush1.bf16.msra.mxu0 %v16490_v21  ;;  %13781 = vmatpush1.bf16.msra.mxu1 %v16492_v23  ;;  %v16538_v21 = vcombine.low %v1222_v4, %v1226_v5  ;;  %v16540_v23 = vcombine.low %v1223_v8, %v1227_v9  ;;  %v1270_v5 = vld [vmem:[%s18438_s12 + $0x1d00] sm:$0xff]  ;;  %v1271_v9 = vld [vmem:[%s18438_s12 + $0x1d08] sm:$0xff] }
 0x22a   : > { %13126 = vmatprep.subr.bf16.mxu0 %v16499_v24  ;;  %13782 = vmatprep.subr.bf16.mxu1 %v16501_v25  ;;  %v16547_v24 = vcombine.high %v1230_v15, %v1234_v16  ;;  %v16549_v25 = vcombine.high %v1231_v18, %v1235_v19  ;;  %v1274_v8 = vld [vmem:[%s18438_s12 + $0x1d20] sm:$0xff] }
 0x22d   : > { %13127 = vmatpush1.bf16.msra.mxu0 %v16498_v41  ;;  %13783 = vmatpush1.bf16.msra.mxu1 %v16500_v35  ;;  %v16546_v41 = vcombine.low %v1230_v15, %v1234_v16  ;;  %v16548_v35 = vcombine.low %v1231_v18, %v1235_v19  ;;  %v1278_v16 = vld [vmem:[%s18438_s12 + $0x1d40] sm:$0xff]  ;;  %v1279_v19 = vld [vmem:[%s18438_s12 + $0x1d48] sm:$0xff] }
 0x22e   : > { %13128 = vmatprep.subr.bf16.mxu0 %v16507_v36  ;;  %13784 = vmatprep.subr.bf16.mxu1 %v16509_v37  ;;  %v16555_v36 = vcombine.high %v1238_v26, %v1242_v29  ;;  %v16557_v37 = vcombine.high %v1239_v30, %v1243_v31  ;;  %v1282_v18 = vld [vmem:[%s18438_s12 + $0x1d60] sm:$0xff] }
 0x231   : > { %13129 = vmatpush1.bf16.msra.mxu0 %v16506_v44  ;;  %13785 = vmatpush1.bf16.msra.mxu1 %v16508_v45  ;;  %v1251_v44 = vld [vmem:[%s18438_s12 + $0x1c68] sm:$0xff]  ;;  %v16554_v45 = vcombine.low %v1238_v26, %v1242_v29  ;;  %v1286_v29 = vld [vmem:[%s18438_s12 + $0x1d80] sm:$0xff] }
 0x232   : > { %13130 = vmatprep.subr.bf16.mxu0 %v16515_v46  ;;  %13786 = vmatprep.subr.bf16.mxu1 %v16517_v47  ;;  %v16556_v46 = vcombine.low %v1239_v30, %v1243_v31  ;;  %v16563_v47 = vcombine.high %v1246_v62, %v1250_v39  ;;  %v16565_v48 = vcombine.high %v1247_v43, %v1251_v44  ;;  %v1290_v30 = vld [vmem:[%s18438_s12 + $0x1da0] sm:$0xff]  ;;  %v1287_v31 = vld [vmem:[%s18438_s12 + $0x1d88] sm:$0xff] }
 0x235   : > { %13131 = vmatpush1.bf16.msra.mxu0 %v16514_v53  ;;  %13787 = vmatpush1.bf16.msra.mxu1 %v16516_v54  ;;  %v1259_v53 = vld [vmem:[%s18438_s12 + $0x1ca8] sm:$0xff]  ;;  %v16562_v54 = vcombine.low %v1246_v62, %v1250_v39  ;;  %v1294_v39 = vld [vmem:[%s18438_s12 + $0x1dc0] sm:$0xff] }
 0x236   : > { %13132 = vmatprep.subr.bf16.mxu0 %v16523_v55  ;;  %13788 = vmatprep.subr.bf16.mxu1 %v16525_v57  ;;  %v16564_v55 = vcombine.low %v1247_v43, %v1251_v44  ;;  %v16571_v57 = vcombine.high %v1254_v34, %v1258_v50  ;;  %v16573_v58 = vcombine.high %v1255_v49, %v1259_v53  ;;  %v1298_v43 = vld [vmem:[%s18438_s12 + $0x1de0] sm:$0xff]  ;;  %v1295_v44 = vld [vmem:[%s18438_s12 + $0x1dc8] sm:$0xff] }
 0x239   : > { %13133 = vmatpush1.bf16.msra.mxu0 %v16522_v0  ;;  %13789 = vmatpush1.bf16.msra.mxu1 %v16524_v32  ;;  %v1267_v0 = vld [vmem:[%s18438_s12 + $0x1ce8] sm:$0xff]  ;;  %v16570_v32 = vcombine.low %v1254_v34, %v1258_v50  ;;  %v1302_v50 = vld [vmem:[%s18438_s12 + $0x1e00] sm:$0xff] }
 0x23a   : > { %13134 = vmatprep.subr.bf16.mxu0 %v16531_v2  ;;  %13790 = vmatprep.subr.bf16.mxu1 %v16533_v3  ;;  %v16572_v2 = vcombine.low %v1255_v49, %v1259_v53  ;;  %v16579_v3 = vcombine.high %v1262_v59, %v1266_v61  ;;  %v16581_v4 = vcombine.high %v1263_v63, %v1267_v0  ;;  %v1306_v49 = vld [vmem:[%s18438_s12 + $0x1e20] sm:$0xff]  ;;  %v1303_v53 = vld [vmem:[%s18438_s12 + $0x1e08] sm:$0xff] }
 0x23d   : > { %13135 = vmatpush1.bf16.msra.mxu0 %v16530_v10  ;;  %13791 = vmatpush1.bf16.msra.mxu1 %v16532_v11  ;;  %v1275_v10 = vld [vmem:[%s18438_s12 + $0x1d28] sm:$0xff]  ;;  %v16578_v11 = vcombine.low %v1262_v59, %v1266_v61  ;;  %v1310_v61 = vld [vmem:[%s18438_s12 + $0x1e40] sm:$0xff] }
 0x23e   : > { %13136 = vmatprep.subr.bf16.mxu0 %v16539_v12  ;;  %13792 = vmatprep.subr.bf16.mxu1 %v16541_v14  ;;  %v16580_v12 = vcombine.low %v1263_v63, %v1267_v0  ;;  %v16587_v14 = vcombine.high %v1270_v5, %v1274_v8  ;;  %v16589_v15 = vcombine.high %v1271_v9, %v1275_v10  ;;  %v1314_v63 = vld [vmem:[%s18438_s12 + $0x1e60] sm:$0xff]  ;;  %v1311_v0 = vld [vmem:[%s18438_s12 + $0x1e48] sm:$0xff] }
 0x241   : > { %13137 = vmatpush1.bf16.msra.mxu0 %v16538_v21  ;;  %13793 = vmatpush1.bf16.msra.mxu1 %v16540_v23  ;;  %v1283_v21 = vld [vmem:[%s18438_s12 + $0x1d68] sm:$0xff]  ;;  %v16586_v23 = vcombine.low %v1270_v5, %v1274_v8  ;;  %v1318_v8 = vld [vmem:[%s18438_s12 + $0x1e80] sm:$0xff] }
 0x242   : > { %13138 = vmatprep.subr.bf16.mxu0 %v16547_v24  ;;  %13794 = vmatprep.subr.bf16.mxu1 %v16549_v25  ;;  %v16588_v24 = vcombine.low %v1271_v9, %v1275_v10  ;;  %v16595_v25 = vcombine.high %v1278_v16, %v1282_v18  ;;  %v16597_v26 = vcombine.high %v1279_v19, %v1283_v21  ;;  %v1322_v9 = vld [vmem:[%s18438_s12 + $0x1ea0] sm:$0xff]  ;;  %v1319_v10 = vld [vmem:[%s18438_s12 + $0x1e88] sm:$0xff] }
 0x245   : > { %13139 = vmatpush1.bf16.msra.mxu0 %v16546_v41  ;;  %13795 = vmatpush1.bf16.msra.mxu1 %v16548_v35  ;;  %v1291_v41 = vld [vmem:[%s18438_s12 + $0x1da8] sm:$0xff]  ;;  %v16594_v35 = vcombine.low %v1278_v16, %v1282_v18  ;;  %v1326_v18 = vld [vmem:[%s18438_s12 + $0x1ec0] sm:$0xff] }
 0x246   : > { %13149 = vmatprep.subr.bf16.mxu0 %v16555_v36  ;;  %13805 = vmatprep.subr.bf16.mxu1 %v16557_v37  ;;  %v16596_v36 = vcombine.low %v1279_v19, %v1283_v21  ;;  %v16603_v37 = vcombine.high %v1286_v29, %v1290_v30  ;;  %v16605_v62 = vcombine.high %v1287_v31, %v1291_v41  ;;  %v1330_v19 = vld [vmem:[%s18438_s12 + $0x1ee0] sm:$0xff]  ;;  %v1327_v21 = vld [vmem:[%s18438_s12 + $0x1ec8] sm:$0xff] }
 0x248   : > { %13141 = vmatmul.mubr.bf16.vlgmr.msra.gmra.mrb[0].mxu0 %v19016_v40  ;;  %13797 = vmatmul.mubr.bf16.vlgmr.msra.gmra.mrb[0].mxu1 %v19016_v40 }
 0x249   : > { %13150 = vmatpush1.bf16.msra.mxu0 %v16554_v45  ;;  %13806 = vmatpush1.bf16.msra.mxu1 %v16556_v46  ;;  %v1299_v45 = vld [vmem:[%s18438_s12 + $0x1de8] sm:$0xff]  ;;  %v16602_v46 = vcombine.low %v1286_v29, %v1290_v30  ;;  %v1334_v30 = vld [vmem:[%s18438_s12 + $0x1f00] sm:$0xff] }
 0x24a   : > { %13151 = vmatprep.subr.bf16.mxu0 %v16563_v47  ;;  %13807 = vmatprep.subr.bf16.mxu1 %v16565_v48  ;;  %v16604_v47 = vcombine.low %v1287_v31, %v1291_v41  ;;  %v16611_v48 = vcombine.high %v1294_v39, %v1298_v43  ;;  %v16613_v34 = vcombine.high %v1295_v44, %v1299_v45  ;;  %v1338_v31 = vld [vmem:[%s18438_s12 + $0x1f20] sm:$0xff]  ;;  %v1335_v41 = vld [vmem:[%s18438_s12 + $0x1f08] sm:$0xff] }
 0x24b   : > { %13181 = vmatprep.mubr.bf16.mxu0 %v19024_v51  ;;  %13837 = vmatprep.mubr.bf16.mxu1 %v19024_v51 }
 0x24d   : > { %13152 = vmatpush1.bf16.msra.mxu0 %v16562_v54  ;;  %13808 = vmatpush1.bf16.msra.mxu1 %v16564_v55  ;;  %v1307_v54 = vld [vmem:[%s18438_s12 + $0x1e28] sm:$0xff]  ;;  %v16610_v55 = vcombine.low %v1294_v39, %v1298_v43  ;;  %v1342_v43 = vld [vmem:[%s18438_s12 + $0x1f40] sm:$0xff] }
 0x24e   : > { %13153 = vmatprep.subr.bf16.mxu0 %v16571_v57  ;;  %13809 = vmatprep.subr.bf16.mxu1 %v16573_v58  ;;  %v16612_v57 = vcombine.low %v1295_v44, %v1299_v45  ;;  %v16619_v58 = vcombine.high %v1302_v50, %v1306_v49  ;;  %v16621_v59 = vcombine.high %v1303_v53, %v1307_v54  ;;  %v1346_v44 = vld [vmem:[%s18438_s12 + $0x1f60] sm:$0xff]  ;;  %v1343_v45 = vld [vmem:[%s18438_s12 + $0x1f48] sm:$0xff] }
 0x251   : > { %13154 = vmatpush1.bf16.msra.mxu0 %v16570_v32  ;;  %13810 = vmatpush1.bf16.msra.mxu1 %v16572_v2  ;;  %v1315_v32 = vld [vmem:[%s18438_s12 + $0x1e68] sm:$0xff]  ;;  %v16618_v2 = vcombine.low %v1302_v50, %v1306_v49  ;;  %v1350_v49 = vld [vmem:[%s18438_s12 + $0x1f80] sm:$0xff] }
 0x252   : > { %13155 = vmatprep.subr.bf16.mxu0 %v16579_v3  ;;  %13811 = vmatprep.subr.bf16.mxu1 %v16581_v4  ;;  %v16620_v3 = vcombine.low %v1303_v53, %v1307_v54  ;;  %v16627_v4 = vcombine.high %v1310_v61, %v1314_v63  ;;  %v16629_v5 = vcombine.high %v1311_v0, %v1315_v32  ;;  %v1354_v53 = vld [vmem:[%s18438_s12 + $0x1fa0] sm:$0xff]  ;;  %v1351_v54 = vld [vmem:[%s18438_s12 + $0x1f88] sm:$0xff] }
 0x255   : > { %13156 = vmatpush1.bf16.msra.mxu0 %v16578_v11  ;;  %13812 = vmatpush1.bf16.msra.mxu1 %v16580_v12  ;;  %v1323_v11 = vld [vmem:[%s18438_s12 + $0x1ea8] sm:$0xff]  ;;  %v16626_v12 = vcombine.low %v1310_v61, %v1314_v63  ;;  %v1358_v63 = vld [vmem:[%s18438_s12 + $0x1fc0] sm:$0xff] }
 0x256   : > { %13157 = vmatprep.subr.bf16.mxu0 %v16587_v14  ;;  %13813 = vmatprep.subr.bf16.mxu1 %v16589_v15  ;;  %v16628_v14 = vcombine.low %v1311_v0, %v1315_v32  ;;  %v16635_v15 = vcombine.high %v1318_v8, %v1322_v9  ;;  %v16637_v16 = vcombine.high %v1319_v10, %v1323_v11  ;;  %v1362_v0 = vld [vmem:[%s18438_s12 + $0x1fe0] sm:$0xff]  ;;  %v1359_v32 = vld [vmem:[%s18438_s12 + $0x1fc8] sm:$0xff] }
 0x259   : > { %13158 = vmatpush1.bf16.msra.mxu0 %v16586_v23  ;;  %13814 = vmatpush1.bf16.msra.mxu1 %v16588_v24  ;;  %v1331_v23 = vld [vmem:[%s18438_s12 + $0x1ee8] sm:$0xff]  ;;  %v16634_v24 = vcombine.low %v1318_v8, %v1322_v9  ;;  %v16675_v8 = vcombine.high %v1358_v63, %v1362_v0 }
 0x25a   : > { %13159 = vmatprep.subr.bf16.mxu0 %v16595_v25  ;;  %13815 = vmatprep.subr.bf16.mxu1 %v16597_v26  ;;  %v16636_v25 = vcombine.low %v1319_v10, %v1323_v11  ;;  %v16643_v26 = vcombine.high %v1326_v18, %v1330_v19  ;;  %v16645_v29 = vcombine.high %v1327_v21, %v1331_v23  ;;  %v1366_v10 = vld [vmem:[%s18438_s12 + $0x2000] sm:$0xff] }
 0x25b   : > { %v1370_v11 = vld [vmem:[%s18438_s12 + $0x2020] sm:$0xff] }
 0x25d   : > { %13160 = vmatpush1.bf16.msra.mxu0 %v16594_v35  ;;  %13816 = vmatpush1.bf16.msra.mxu1 %v16596_v36  ;;  %v1339_v35 = vld [vmem:[%s18438_s12 + $0x1f28] sm:$0xff]  ;;  %v16642_v36 = vcombine.low %v1326_v18, %v1330_v19  ;;  %v16683_v19 = vcombine.high %v1366_v10, %v1370_v11 }
 0x25e   : > { %13161 = vmatprep.subr.bf16.mxu0 %v16603_v37  ;;  %13817 = vmatprep.subr.bf16.mxu1 %v16605_v62  ;;  %v16644_v37 = vcombine.low %v1327_v21, %v1331_v23  ;;  %v16651_v62 = vcombine.high %v1334_v30, %v1338_v31  ;;  %v16653_v39 = vcombine.high %v1335_v41, %v1339_v35  ;;  %v1374_v23 = vld [vmem:[%s18438_s12 + $0x2040] sm:$0xff] }
 0x261   : > { %13162 = vmatpush1.bf16.msra.mxu0 %v16602_v46  ;;  %13818 = vmatpush1.bf16.msra.mxu1 %v16604_v47  ;;  %v1347_v46 = vld [vmem:[%s18438_s12 + $0x1f68] sm:$0xff]  ;;  %v16650_v47 = vcombine.low %v1334_v30, %v1338_v31  ;;  %v16682_v31 = vcombine.low %v1366_v10, %v1370_v11 }
 0x262   : > { %13163 = vmatprep.subr.bf16.mxu0 %v16611_v48  ;;  %13819 = vmatprep.subr.bf16.mxu1 %v16613_v34  ;;  %v16652_v48 = vcombine.low %v1335_v41, %v1339_v35  ;;  %v16659_v34 = vcombine.high %v1342_v43, %v1346_v44  ;;  %v16661_v50 = vcombine.high %v1343_v45, %v1347_v46  ;;  %v1379_v30 = vld [vmem:[%s18438_s12 + $0x2068] sm:$0xff] }
 0x263   : > { %v1407_v10 = vld [vmem:[%s18438_s12 + $0x2148] sm:$0xff] }
 0x264   : > { %v1411_v11 = vld [vmem:[%s18438_s12 + $0x2168] sm:$0xff] }
 0x265   : > { %13164 = vmatpush1.bf16.msra.mxu0 %v16610_v55  ;;  %13820 = vmatpush1.bf16.msra.mxu1 %v16612_v57  ;;  %v1355_v55 = vld [vmem:[%s18438_s12 + $0x1fa8] sm:$0xff]  ;;  %v16658_v57 = vcombine.low %v1342_v43, %v1346_v44 }
 0x266   : > { %13165 = vmatprep.subr.bf16.mxu0 %v16619_v58  ;;  %13821 = vmatprep.subr.bf16.mxu1 %v16621_v59  ;;  %v16660_v58 = vcombine.low %v1343_v45, %v1347_v46  ;;  %v16667_v59 = vcombine.high %v1350_v49, %v1354_v53  ;;  %v16669_v61 = vcombine.high %v1351_v54, %v1355_v55  ;;  %v1383_v43 = vld [vmem:[%s18438_s12 + $0x2088] sm:$0xff] }
 0x267   : > { %v1387_v44 = vld [vmem:[%s18438_s12 + $0x20a8] sm:$0xff] }
 0x269   : > { %13166 = vmatpush1.bf16.msra.mxu0 %v16618_v2  ;;  %13822 = vmatpush1.bf16.msra.mxu1 %v16620_v3  ;;  %v1363_v2 = vld [vmem:[%s18438_s12 + $0x1fe8] sm:$0xff]  ;;  %v19085_v3 = vld [vmem:[%s18431_s30 + $0x10] sm:$0xff] }
 0x26a   : > { %13167 = vmatprep.subr.bf16.mxu0 %v16627_v4  ;;  %13823 = vmatprep.subr.bf16.mxu1 %v16629_v5  ;;  %v16666_v4 = vcombine.low %v1350_v49, %v1354_v53  ;;  %v16668_v5 = vcombine.low %v1351_v54, %v1355_v55  ;;  %v16677_v9 = vcombine.high %v1359_v32, %v1363_v2  ;;  %v1391_v49 = vld [vmem:[%s18438_s12 + $0x20c8] sm:$0xff] }
 0x26b   : > { %v16676_v18 = vcombine.low %v1359_v32, %v1363_v2  ;;  %v1395_v53 = vld [vmem:[%s18438_s12 + $0x20e8] sm:$0xff]  ;;  %v16700_v55 = vcombine.low %v1383_v43, %v1387_v44 }
 0x26c   : > { %v16708_v2 = vcombine.low %v1391_v49, %v1395_v53 }
 0x26d   : > { %13168 = vmatpush1.bf16.msra.mxu0 %v16626_v12  ;;  %13824 = vmatpush1.bf16.msra.mxu1 %v16628_v14  ;;  %v19091_v12 = vrot.slane %v19085_v3, %v18478_v22  ;;  %v1367_v14 = vld [vmem:[%s18438_s12 + $0x2008] sm:$0xff] }
 0x26e   : > { %13169 = vmatprep.subr.bf16.mxu0 %v16635_v15  ;;  %13825 = vmatprep.subr.bf16.mxu1 %v16637_v16  ;;  %v1371_v15 = vld [vmem:[%s18438_s12 + $0x2028] sm:$0xff]  ;;  %v16674_v16 = vcombine.low %v1358_v63, %v1362_v0 }
 0x26f   : > { %v16685_v21 = vcombine.high %v1367_v14, %v1371_v15  ;;  %v16684_v41 = vcombine.low %v1367_v14, %v1371_v15  ;;  %v1399_v63 = vld [vmem:[%s18438_s12 + $0x2108] sm:$0xff] }
 0x270   : > { %v1403_v0 = vld [vmem:[%s18438_s12 + $0x2128] sm:$0xff] }
 0x271   : > { %13170 = vmatpush1.bf16.msra.mxu0 %v16634_v24  ;;  %13826 = vmatpush1.bf16.msra.mxu1 %v16636_v25  ;;  %v1378_v24 = vld [vmem:[%s18438_s12 + $0x2060] sm:$0xff]  ;;  %v2507_v25 = vcombine.high %v19091_v12, %v19091_v12  ;;  %v16716_v15 = vcombine.low %v1399_v63, %v1403_v0 }
 0x272   : > { %13171 = vmatprep.subr.bf16.mxu0 %v16643_v26  ;;  %13827 = vmatprep.subr.bf16.mxu1 %v16645_v29  ;;  %v19101_v26 = vcombine.high %v19016_v40, %v19016_v40  ;;  %v1375_v29 = vld [vmem:[%s18438_s12 + $0x2048] sm:$0xff]  ;;  %v16691_v35 = vcombine.high %v1374_v23, %v1378_v24  ;;  %v16690_v45 = vcombine.low %v1374_v23, %v1378_v24 }
 0x273   : > { %v16692_v46 = vcombine.low %v1375_v29, %v1379_v30  ;;  %v1415_v23 = vld [vmem:[%s18438_s12 + $0x2188] sm:$0xff] }
 0x274   : > { %v1419_v24 = vld [vmem:[%s18438_s12 + $0x21a8] sm:$0xff] }
 0x275   : > { %13172 = vmatpush1.bf16.msra.mxu0 %v16642_v36  ;;  %13828 = vmatpush1.bf16.msra.mxu1 %v16644_v37  ;;  %v16693_v36 = vcombine.high %v1375_v29, %v1379_v30  ;;  %v1382_v37 = vld [vmem:[%s18438_s12 + $0x2080] sm:$0xff]  ;;  %v16724_v29 = vcombine.low %v1407_v10, %v1411_v11 }
 0x276   : > { %13173 = vmatprep.subr.bf16.mxu0 %v16651_v62  ;;  %13829 = vmatprep.subr.bf16.mxu1 %v16653_v39  ;;  %v1386_v62 = vld [vmem:[%s18438_s12 + $0x20a0] sm:$0xff]  ;;  %v19108_v39 = vrot.slane %v2507_v25, %v18478_v22 }
 0x277   : > { %v16698_v54 = vcombine.low %v1382_v37, %v1386_v62 }
 0x279   : > { %13174 = vmatpush1.bf16.msra.mxu0 %v16650_v47  ;;  %13830 = vmatpush1.bf16.msra.mxu1 %v16652_v48  ;;  %v16699_v47 = vcombine.high %v1382_v37, %v1386_v62  ;;  %v16701_v48 = vcombine.high %v1383_v43, %v1387_v44  ;;  %v1427_v37 = vld [vmem:[%s18438_s12 + $0x21e8] sm:$0xff]  ;;  %v16732_v43 = vcombine.low %v1415_v23, %v1419_v24 }
 0x27a   : > { %13175 = vmatprep.subr.bf16.mxu0 %v16659_v34  ;;  %13831 = vmatprep.subr.bf16.mxu1 %v16661_v50  ;;  %v1390_v34 = vld [vmem:[%s18438_s12 + $0x20c0] sm:$0xff] }
 0x27b   : > { %v1394_v50 = vld [vmem:[%s18438_s12 + $0x20e0] sm:$0xff] }
 0x27c   : > { %v16706_v32 = vcombine.low %v1390_v34, %v1394_v50 }
 0x27d   : > { %13176 = vmatpush1.bf16.msra.mxu0 %v16658_v57  ;;  %13832 = vmatpush1.bf16.msra.mxu1 %v16660_v58  ;;  %v16707_v57 = vcombine.high %v1390_v34, %v1394_v50  ;;  %v16709_v58 = vcombine.high %v1391_v49, %v1395_v53  ;;  %v1435_v34 = vld [vmem:[%s18438_s12 + $0x2228] sm:$0xff] }
 0x27e   : > { %13177 = vmatprep.subr.bf16.mxu0 %v16667_v59  ;;  %13833 = vmatprep.subr.bf16.mxu1 %v16669_v61  ;;  %v1398_v59 = vld [vmem:[%s18438_s12 + $0x2100] sm:$0xff] }
 0x27f   : > { %v1402_v61 = vld [vmem:[%s18438_s12 + $0x2120] sm:$0xff] }
 0x280   : > { %v16714_v14 = vcombine.low %v1398_v59, %v1402_v61 }
 0x281   : > { %13178 = vmatpush1.bf16.msra.mxu0 %v16666_v4  ;;  %13834 = vmatpush1.bf16.msra.mxu1 %v16668_v5  ;;  %v16715_v4 = vcombine.high %v1398_v59, %v1402_v61  ;;  %v16717_v5 = vcombine.high %v1399_v63, %v1403_v0  ;;  %v1443_v59 = vld [vmem:[%s18438_s12 + $0x2268] sm:$0xff] }
 0x282   : > { %13179 = vmatprep.subr.bf16.mxu0 %v16675_v8  ;;  %13835 = vmatprep.subr.bf16.mxu1 %v16677_v9  ;;  %v1406_v8 = vld [vmem:[%s18438_s12 + $0x2140] sm:$0xff] }
 0x283   : > { %v1410_v9 = vld [vmem:[%s18438_s12 + $0x2160] sm:$0xff] }
 0x284   : > { %v16722_v25 = vcombine.low %v1406_v8, %v1410_v9 }
 0x285   : > { %13180 = vmatpush1.bf16.msra.mxu0 %v16674_v16  ;;  %13836 = vmatpush1.bf16.msra.mxu1 %v16676_v18  ;;  %v16723_v16 = vcombine.high %v1406_v8, %v1410_v9  ;;  %v16725_v18 = vcombine.high %v1407_v10, %v1411_v11  ;;  %v1451_v8 = vld [vmem:[%s18438_s12 + $0x22a8] sm:$0xff] }
 0x286   : > { %13190 = vmatprep.subr.bf16.mxu0 %v16683_v19  ;;  %13846 = vmatprep.subr.bf16.mxu1 %v16685_v21  ;;  %v1414_v19 = vld [vmem:[%s18438_s12 + $0x2180] sm:$0xff] }
 0x287   : > { %v1418_v21 = vld [vmem:[%s18438_s12 + $0x21a0] sm:$0xff] }
 0x288   : > { %13182 = vmatmul.mubr.bf16.vlgmr.msra.gmra.mrb[0].mxu0 %v19101_v26  ;;  %13838 = vmatmul.mubr.bf16.vlgmr.msra.gmra.mrb[0].mxu1 %v19101_v26  ;;  %v16731_v30 = vcombine.high %v1414_v19, %v1418_v21  ;;  %v16730_v62 = vcombine.low %v1414_v19, %v1418_v21  ;;  %v1459_v19 = vld [vmem:[%s18438_s12 + $0x22e8] sm:$0xff] }
 0x289   : > { %13191 = vmatpush1.bf16.msra.mxu0 %v16682_v31  ;;  %13847 = vmatpush1.bf16.msra.mxu1 %v16684_v41  ;;  %v16733_v31 = vcombine.high %v1415_v23, %v1419_v24  ;;  %v1422_v41 = vld [vmem:[%s18438_s12 + $0x21c0] sm:$0xff] }
 0x28a   : > { %13192 = vmatprep.subr.bf16.mxu0 %v16691_v35  ;;  %13848 = vmatprep.subr.bf16.mxu1 %v16693_v36  ;;  %v1426_v35 = vld [vmem:[%s18438_s12 + $0x21e0] sm:$0xff]  ;;  %v1423_v36 = vld [vmem:[%s18438_s12 + $0x21c8] sm:$0xff] }
 0x28b   : > { %13222 = vmatprep.mubr.bf16.mxu0 %v19108_v39  ;;  %13878 = vmatprep.mubr.bf16.mxu1 %v19108_v39  ;;  %v16739_v44 = vcombine.high %v1422_v41, %v1426_v35  ;;  %v16738_v50 = vcombine.low %v1422_v41, %v1426_v35  ;;  %v16740_v49 = vcombine.low %v1423_v36, %v1427_v37  ;;  %v1467_v41 = vld [vmem:[%s18438_s12 + $0x2328] sm:$0xff] }
 0x28d   : > { %13193 = vmatpush1.bf16.msra.mxu0 %v16690_v45  ;;  %13849 = vmatpush1.bf16.msra.mxu1 %v16692_v46  ;;  %v16741_v45 = vcombine.high %v1423_v36, %v1427_v37  ;;  %v1430_v46 = vld [vmem:[%s18438_s12 + $0x2200] sm:$0xff] }
 0x28e   : > { %13194 = vmatprep.subr.bf16.mxu0 %v16699_v47  ;;  %13850 = vmatprep.subr.bf16.mxu1 %v16701_v48  ;;  %v1434_v47 = vld [vmem:[%s18438_s12 + $0x2220] sm:$0xff]  ;;  %v1431_v48 = vld [vmem:[%s18438_s12 + $0x2208] sm:$0xff] }
 0x28f   : > { %v16747_v53 = vcombine.high %v1430_v46, %v1434_v47  ;;  %v16746_v61 = vcombine.low %v1430_v46, %v1434_v47  ;;  %v16748_v63 = vcombine.low %v1431_v48, %v1435_v34  ;;  %v1475_v46 = vld [vmem:[%s18438_s12 + $0x2368] sm:$0xff] }
 0x291   : > { %13195 = vmatpush1.bf16.msra.mxu0 %v16698_v54  ;;  %13851 = vmatpush1.bf16.msra.mxu1 %v16700_v55  ;;  %v16749_v54 = vcombine.high %v1431_v48, %v1435_v34  ;;  %v1438_v55 = vld [vmem:[%s18438_s12 + $0x2240] sm:$0xff] }
 0x292   : > { %13196 = vmatprep.subr.bf16.mxu0 %v16707_v57  ;;  %13852 = vmatprep.subr.bf16.mxu1 %v16709_v58  ;;  %v1442_v57 = vld [vmem:[%s18438_s12 + $0x2260] sm:$0xff]  ;;  %v1439_v58 = vld [vmem:[%s18438_s12 + $0x2248] sm:$0xff] }
 0x293   : > { %v16755_v0 = vcombine.high %v1438_v55, %v1442_v57  ;;  %v16754_v9 = vcombine.low %v1438_v55, %v1442_v57  ;;  %v16756_v10 = vcombine.low %v1439_v58, %v1443_v59  ;;  %v1483_v55 = vld [vmem:[%s18438_s12 + $0x23a8] sm:$0xff] }
 0x295   : > { %13197 = vmatpush1.bf16.msra.mxu0 %v16706_v32  ;;  %13853 = vmatpush1.bf16.msra.mxu1 %v16708_v2  ;;  %v16757_v32 = vcombine.high %v1439_v58, %v1443_v59  ;;  %v1446_v2 = vld [vmem:[%s18438_s12 + $0x2280] sm:$0xff] }
 0x296   : > { %13198 = vmatprep.subr.bf16.mxu0 %v16715_v4  ;;  %13854 = vmatprep.subr.bf16.mxu1 %v16717_v5  ;;  %v1450_v4 = vld [vmem:[%s18438_s12 + $0x22a0] sm:$0xff]  ;;  %v1447_v5 = vld [vmem:[%s18438_s12 + $0x2288] sm:$0xff] }
 0x297   : > { %v16763_v11 = vcombine.high %v1446_v2, %v1450_v4  ;;  %v16762_v21 = vcombine.low %v1446_v2, %v1450_v4  ;;  %v16764_v23 = vcombine.low %v1447_v5, %v1451_v8  ;;  %v1491_v2 = vld [vmem:[%s18438_s12 + $0x23e8] sm:$0xff] }
 0x299   : > { %13199 = vmatpush1.bf16.msra.mxu0 %v16714_v14  ;;  %13855 = vmatpush1.bf16.msra.mxu1 %v16716_v15  ;;  %v16765_v14 = vcombine.high %v1447_v5, %v1451_v8  ;;  %v1454_v15 = vld [vmem:[%s18438_s12 + $0x22c0] sm:$0xff] }
 0x29a   : > { %13200 = vmatprep.subr.bf16.mxu0 %v16723_v16  ;;  %13856 = vmatprep.subr.bf16.mxu1 %v16725_v18  ;;  %v1458_v16 = vld [vmem:[%s18438_s12 + $0x22e0] sm:$0xff]  ;;  %v1455_v18 = vld [vmem:[%s18438_s12 + $0x22c8] sm:$0xff] }
 0x29b   : > { %v16771_v24 = vcombine.high %v1454_v15, %v1458_v16  ;;  %v16770_v35 = vcombine.low %v1454_v15, %v1458_v16  ;;  %v16772_v36 = vcombine.low %v1455_v18, %v1459_v19  ;;  %v1499_v15 = vld [vmem:[%s18438_s12 + $0x2428] sm:$0xff] }
 0x29d   : > { %13201 = vmatpush1.bf16.msra.mxu0 %v16722_v25  ;;  %13857 = vmatpush1.bf16.msra.mxu1 %v16724_v29  ;;  %v16773_v25 = vcombine.high %v1455_v18, %v1459_v19  ;;  %v1462_v29 = vld [vmem:[%s18438_s12 + $0x2300] sm:$0xff] }
 0x29e   : > { %13202 = vmatprep.subr.bf16.mxu0 %v16731_v30  ;;  %13858 = vmatprep.subr.bf16.mxu1 %v16733_v31  ;;  %v1466_v30 = vld [vmem:[%s18438_s12 + $0x2320] sm:$0xff]  ;;  %v1463_v31 = vld [vmem:[%s18438_s12 + $0x2308] sm:$0xff] }
 0x29f   : > { %v16779_v37 = vcombine.high %v1462_v29, %v1466_v30  ;;  %v16778_v47 = vcombine.low %v1462_v29, %v1466_v30  ;;  %v16780_v48 = vcombine.low %v1463_v31, %v1467_v41  ;;  %v1503_v29 = vld [vmem:[%s18438_s12 + $0x2448] sm:$0xff] }
 0x2a0   : > { %v1507_v30 = vld [vmem:[%s18438_s12 + $0x2468] sm:$0xff] }
 0x2a1   : > { %13203 = vmatpush1.bf16.msra.mxu0 %v16730_v62  ;;  %13859 = vmatpush1.bf16.msra.mxu1 %v16732_v43  ;;  %v16781_v62 = vcombine.high %v1463_v31, %v1467_v41  ;;  %v1470_v43 = vld [vmem:[%s18438_s12 + $0x2340] sm:$0xff] }
 0x2a2   : > { %13204 = vmatprep.subr.bf16.mxu0 %v16739_v44  ;;  %13860 = vmatprep.subr.bf16.mxu1 %v16741_v45  ;;  %v1474_v44 = vld [vmem:[%s18438_s12 + $0x2360] sm:$0xff]  ;;  %v1471_v45 = vld [vmem:[%s18438_s12 + $0x2348] sm:$0xff] }
 0x2a3   : > { %v16787_v34 = vcombine.high %v1470_v43, %v1474_v44  ;;  %v16786_v57 = vcombine.low %v1470_v43, %v1474_v44  ;;  %v16788_v58 = vcombine.low %v1471_v45, %v1475_v46  ;;  %v19184_v43 = vcombine.high %v19108_v39, %v19108_v39  ;;  %v1515_v44 = vld [vmem:[%s18438_s12 + $0x24a8] sm:$0xff] }
 0x2a5   : > { %13205 = vmatpush1.bf16.msra.mxu0 %v16738_v50  ;;  %13861 = vmatpush1.bf16.msra.mxu1 %v16740_v49  ;;  %v16789_v50 = vcombine.high %v1471_v45, %v1475_v46  ;;  %v1478_v49 = vld [vmem:[%s18438_s12 + $0x2380] sm:$0xff]  ;;  %v16820_v46 = vcombine.low %v1503_v29, %v1507_v30 }
 0x2a6   : > { %13206 = vmatprep.subr.bf16.mxu0 %v16747_v53  ;;  %13862 = vmatprep.subr.bf16.mxu1 %v16749_v54  ;;  %v1482_v53 = vld [vmem:[%s18438_s12 + $0x23a0] sm:$0xff]  ;;  %v1479_v54 = vld [vmem:[%s18438_s12 + $0x2388] sm:$0xff] }
 0x2a7   : > { %v16795_v59 = vcombine.high %v1478_v49, %v1482_v53  ;;  %v16794_v4 = vcombine.low %v1478_v49, %v1482_v53  ;;  %v16796_v5 = vcombine.low %v1479_v54, %v1483_v55  ;;  %v1519_v49 = vld [vmem:[%s18438_s12 + $0x24c8] sm:$0xff] }
 0x2a8   : > { %v1523_v53 = vld [vmem:[%s18438_s12 + $0x24e8] sm:$0xff] }
 0x2a9   : > { %13207 = vmatpush1.bf16.msra.mxu0 %v16746_v61  ;;  %13863 = vmatpush1.bf16.msra.mxu1 %v16748_v63  ;;  %v16797_v61 = vcombine.high %v1479_v54, %v1483_v55  ;;  %v1486_v63 = vld [vmem:[%s18438_s12 + $0x23c0] sm:$0xff] }
 0x2aa   : > { %13208 = vmatprep.subr.bf16.mxu0 %v16755_v0  ;;  %13864 = vmatprep.subr.bf16.mxu1 %v16757_v32  ;;  %v1490_v0 = vld [vmem:[%s18438_s12 + $0x23e0] sm:$0xff]  ;;  %v1487_v32 = vld [vmem:[%s18438_s12 + $0x23c8] sm:$0xff] }
 0x2ab   : > { %v16803_v8 = vcombine.high %v1486_v63, %v1490_v0  ;;  %v16802_v16 = vcombine.low %v1486_v63, %v1490_v0  ;;  %v16804_v18 = vcombine.low %v1487_v32, %v1491_v2  ;;  %v1527_v63 = vld [vmem:[%s18438_s12 + $0x2508] sm:$0xff] }
 0x2ac   : > { %v1531_v0 = vld [vmem:[%s18438_s12 + $0x2528] sm:$0xff] }
 0x2ad   : > { %13209 = vmatpush1.bf16.msra.mxu0 %v16754_v9  ;;  %13865 = vmatpush1.bf16.msra.mxu1 %v16756_v10  ;;  %v16805_v9 = vcombine.high %v1487_v32, %v1491_v2  ;;  %v1494_v10 = vld [vmem:[%s18438_s12 + $0x2400] sm:$0xff]  ;;  %v16836_v2 = vcombine.low %v1519_v49, %v1523_v53 }
 0x2ae   : > { %13210 = vmatprep.subr.bf16.mxu0 %v16763_v11  ;;  %13866 = vmatprep.subr.bf16.mxu1 %v16765_v14  ;;  %v1498_v11 = vld [vmem:[%s18438_s12 + $0x2420] sm:$0xff]  ;;  %v1495_v14 = vld [vmem:[%s18438_s12 + $0x2408] sm:$0xff] }
 0x2af   : > { %v16811_v19 = vcombine.high %v1494_v10, %v1498_v11  ;;  %v16810_v31 = vcombine.low %v1494_v10, %v1498_v11  ;;  %v16812_v41 = vcombine.low %v1495_v14, %v1499_v15  ;;  %v1535_v10 = vld [vmem:[%s18438_s12 + $0x2548] sm:$0xff] }
 0x2b0   : > { %v1539_v11 = vld [vmem:[%s18438_s12 + $0x2568] sm:$0xff] }
 0x2b1   : > { %13211 = vmatpush1.bf16.msra.mxu0 %v16762_v21  ;;  %13867 = vmatpush1.bf16.msra.mxu1 %v16764_v23  ;;  %v16813_v21 = vcombine.high %v1495_v14, %v1499_v15  ;;  %v1502_v23 = vld [vmem:[%s18438_s12 + $0x2440] sm:$0xff]  ;;  %v16844_v15 = vcombine.low %v1527_v63, %v1531_v0 }
 0x2b2   : > { %13212 = vmatprep.subr.bf16.mxu0 %v16771_v24  ;;  %13868 = vmatprep.subr.bf16.mxu1 %v16773_v25  ;;  %v1506_v24 = vld [vmem:[%s18438_s12 + $0x2460] sm:$0xff]  ;;  %v19176_v25 = vrot.slane %v19091_v12, %v18478_v22  ;;  %v1511_v12 = vld [vmem:[%s18438_s12 + $0x2488] sm:$0xff] }
 0x2b3   : > { %v16818_v45 = vcombine.low %v1502_v23, %v1506_v24  ;;  %v16828_v55 = vcombine.low %v1511_v12, %v1515_v44 }
 0x2b5   : > { %13213 = vmatpush1.bf16.msra.mxu0 %v16770_v35  ;;  %13869 = vmatpush1.bf16.msra.mxu1 %v16772_v36  ;;  %v16819_v35 = vcombine.high %v1502_v23, %v1506_v24  ;;  %v16821_v36 = vcombine.high %v1503_v29, %v1507_v30  ;;  %v1543_v23 = vld [vmem:[%s18438_s12 + $0x2588] sm:$0xff]  ;;  %v16852_v30 = vcombine.low %v1535_v10, %v1539_v11 }
 0x2b6   : > { %13214 = vmatprep.subr.bf16.mxu0 %v16779_v37  ;;  %13870 = vmatprep.subr.bf16.mxu1 %v16781_v62  ;;  %v1510_v37 = vld [vmem:[%s18438_s12 + $0x2480] sm:$0xff]  ;;  %v1547_v24 = vld [vmem:[%s18438_s12 + $0x25a8] sm:$0xff] }
 0x2b7   : > { %v1514_v62 = vld [vmem:[%s18438_s12 + $0x24a0] sm:$0xff] }
 0x2b8   : > { %v16826_v54 = vcombine.low %v1510_v37, %v1514_v62 }
 0x2b9   : > { %13215 = vmatpush1.bf16.msra.mxu0 %v16778_v47  ;;  %13871 = vmatpush1.bf16.msra.mxu1 %v16780_v48  ;;  %v16827_v47 = vcombine.high %v1510_v37, %v1514_v62  ;;  %v16829_v48 = vcombine.high %v1511_v12, %v1515_v44  ;;  %v1551_v37 = vld [vmem:[%s18438_s12 + $0x25c8] sm:$0xff]  ;;  %v16860_v44 = vcombine.low %v1543_v23, %v1547_v24 }
 0x2ba   : > { %13216 = vmatprep.subr.bf16.mxu0 %v16787_v34  ;;  %13872 = vmatprep.subr.bf16.mxu1 %v16789_v50  ;;  %v1518_v34 = vld [vmem:[%s18438_s12 + $0x24c0] sm:$0xff]  ;;  %v1555_v62 = vld [vmem:[%s18438_s12 + $0x25e8] sm:$0xff] }
 0x2bb   : > { %v1522_v50 = vld [vmem:[%s18438_s12 + $0x24e0] sm:$0xff] }
 0x2bc   : > { %v16834_v32 = vcombine.low %v1518_v34, %v1522_v50 }
 0x2bd   : > { %13217 = vmatpush1.bf16.msra.mxu0 %v16786_v57  ;;  %13873 = vmatpush1.bf16.msra.mxu1 %v16788_v58  ;;  %v16835_v57 = vcombine.high %v1518_v34, %v1522_v50  ;;  %v16837_v58 = vcombine.high %v1519_v49, %v1523_v53  ;;  %v1559_v34 = vld [vmem:[%s18438_s12 + $0x2608] sm:$0xff]  ;;  %v16868_v53 = vcombine.low %v1551_v37, %v1555_v62 }
 0x2be   : > { %13218 = vmatprep.subr.bf16.mxu0 %v16795_v59  ;;  %13874 = vmatprep.subr.bf16.mxu1 %v16797_v61  ;;  %v1526_v59 = vld [vmem:[%s18438_s12 + $0x2500] sm:$0xff]  ;;  %v1563_v50 = vld [vmem:[%s18438_s12 + $0x2628] sm:$0xff] }
 0x2bf   : > { %v1530_v61 = vld [vmem:[%s18438_s12 + $0x2520] sm:$0xff] }
 0x2c0   : > { %v16842_v14 = vcombine.low %v1526_v59, %v1530_v61 }
 0x2c1   : > { %13219 = vmatpush1.bf16.msra.mxu0 %v16794_v4  ;;  %13875 = vmatpush1.bf16.msra.mxu1 %v16796_v5  ;;  %v16843_v4 = vcombine.high %v1526_v59, %v1530_v61  ;;  %v16845_v5 = vcombine.high %v1527_v63, %v1531_v0  ;;  %v1567_v59 = vld [vmem:[%s18438_s12 + $0x2648] sm:$0xff]  ;;  %v16876_v0 = vcombine.low %v1559_v34, %v1563_v50 }
 0x2c2   : > { %13220 = vmatprep.subr.bf16.mxu0 %v16803_v8  ;;  %13876 = vmatprep.subr.bf16.mxu1 %v16805_v9  ;;  %v1534_v8 = vld [vmem:[%s18438_s12 + $0x2540] sm:$0xff]  ;;  %v1571_v61 = vld [vmem:[%s18438_s12 + $0x2668] sm:$0xff] }
 0x2c3   : > { %v1538_v9 = vld [vmem:[%s18438_s12 + $0x2560] sm:$0xff] }
 0x2c4   : > { %v16850_v29 = vcombine.low %v1534_v8, %v1538_v9 }
 0x2c5   : > { %13221 = vmatpush1.bf16.msra.mxu0 %v16802_v16  ;;  %13877 = vmatpush1.bf16.msra.mxu1 %v16804_v18  ;;  %v16851_v16 = vcombine.high %v1534_v8, %v1538_v9  ;;  %v16853_v18 = vcombine.high %v1535_v10, %v1539_v11  ;;  %v1575_v8 = vld [vmem:[%s18438_s12 + $0x2688] sm:$0xff]  ;;  %v16884_v11 = vcombine.low %v1567_v59, %v1571_v61 }
 0x2c6   : > { %13231 = vmatprep.subr.bf16.mxu0 %v16811_v19  ;;  %13887 = vmatprep.subr.bf16.mxu1 %v16813_v21  ;;  %v1542_v19 = vld [vmem:[%s18438_s12 + $0x2580] sm:$0xff]  ;;  %v1579_v9 = vld [vmem:[%s18438_s12 + $0x26a8] sm:$0xff] }
 0x2c7   : > { %v1546_v21 = vld [vmem:[%s18438_s12 + $0x25a0] sm:$0xff] }
 0x2c8   : > { %13223 = vmatmul.mubr.bf16.vlgmr.msra.gmra.mrb[0].mxu0 %v19176_v25  ;;  %13879 = vmatmul.mubr.bf16.vlgmr.msra.gmra.mrb[0].mxu1 %v19176_v25  ;;  %v16858_v12 = vcombine.low %v1542_v19, %v1546_v21 }
 0x2c9   : > { %13232 = vmatpush1.bf16.msra.mxu0 %v16810_v31  ;;  %13888 = vmatpush1.bf16.msra.mxu1 %v16812_v41  ;;  %v16859_v31 = vcombine.high %v1542_v19, %v1546_v21  ;;  %v16861_v41 = vcombine.high %v1543_v23, %v1547_v24  ;;  %v1583_v19 = vld [vmem:[%s18438_s12 + $0x26c8] sm:$0xff]  ;;  %v16892_v24 = vcombine.low %v1575_v8, %v1579_v9 }
 0x2ca   : > { %13233 = vmatprep.subr.bf16.mxu0 %v16819_v35  ;;  %13889 = vmatprep.subr.bf16.mxu1 %v16821_v36  ;;  %v1550_v35 = vld [vmem:[%s18438_s12 + $0x25c0] sm:$0xff]  ;;  %v1587_v21 = vld [vmem:[%s18438_s12 + $0x26e8] sm:$0xff] }
 0x2cb   : > { %13263 = vmatprep.mubr.bf16.mxu0 %v19184_v43  ;;  %13919 = vmatprep.mubr.bf16.mxu1 %v19184_v43  ;;  %v1554_v36 = vld [vmem:[%s18438_s12 + $0x25e0] sm:$0xff] }
 0x2cc   : > { %v16866_v49 = vcombine.low %v1550_v35, %v1554_v36 }
 0x2cd   : > { %13234 = vmatpush1.bf16.msra.mxu0 %v16818_v45  ;;  %13890 = vmatpush1.bf16.msra.mxu1 %v16820_v46  ;;  %v16867_v45 = vcombine.high %v1550_v35, %v1554_v36  ;;  %v16869_v46 = vcombine.high %v1551_v37, %v1555_v62  ;;  %v1591_v35 = vld [vmem:[%s18438_s12 + $0x2708] sm:$0xff]  ;;  %v16900_v62 = vcombine.low %v1583_v19, %v1587_v21 }
 0x2ce   : > { %13235 = vmatprep.subr.bf16.mxu0 %v16827_v47  ;;  %13891 = vmatprep.subr.bf16.mxu1 %v16829_v48  ;;  %v1558_v47 = vld [vmem:[%s18438_s12 + $0x2600] sm:$0xff]  ;;  %v1595_v36 = vld [vmem:[%s18438_s12 + $0x2728] sm:$0xff] }
 0x2cf   : > { %v1562_v48 = vld [vmem:[%s18438_s12 + $0x2620] sm:$0xff] }
 0x2d0   : > { %v16874_v63 = vcombine.low %v1558_v47, %v1562_v48 }
 0x2d1   : > { %13236 = vmatpush1.bf16.msra.mxu0 %v16826_v54  ;;  %13892 = vmatpush1.bf16.msra.mxu1 %v16828_v55  ;;  %v16875_v54 = vcombine.high %v1558_v47, %v1562_v48  ;;  %v16877_v55 = vcombine.high %v1559_v34, %v1563_v50  ;;  %v1599_v47 = vld [vmem:[%s18438_s12 + $0x2748] sm:$0xff]  ;;  %v16908_v50 = vcombine.low %v1591_v35, %v1595_v36 }
 0x2d2   : > { %13237 = vmatprep.subr.bf16.mxu0 %v16835_v57  ;;  %13893 = vmatprep.subr.bf16.mxu1 %v16837_v58  ;;  %v1566_v57 = vld [vmem:[%s18438_s12 + $0x2640] sm:$0xff]  ;;  %v1603_v48 = vld [vmem:[%s18438_s12 + $0x2768] sm:$0xff] }
 0x2d3   : > { %v1570_v58 = vld [vmem:[%s18438_s12 + $0x2660] sm:$0xff] }
 0x2d4   : > { %v16882_v10 = vcombine.low %v1566_v57, %v1570_v58 }
 0x2d5   : > { %13238 = vmatpush1.bf16.msra.mxu0 %v16834_v32  ;;  %13894 = vmatpush1.bf16.msra.mxu1 %v16836_v2  ;;  %v16883_v32 = vcombine.high %v1566_v57, %v1570_v58  ;;  %v16885_v2 = vcombine.high %v1567_v59, %v1571_v61  ;;  %v1607_v57 = vld [vmem:[%s18438_s12 + $0x2788] sm:$0xff]  ;;  %v16916_v61 = vcombine.low %v1599_v47, %v1603_v48 }
 0x2d6   : > { %13239 = vmatprep.subr.bf16.mxu0 %v16843_v4  ;;  %13895 = vmatprep.subr.bf16.mxu1 %v16845_v5  ;;  %v1574_v4 = vld [vmem:[%s18438_s12 + $0x2680] sm:$0xff]  ;;  %v1611_v58 = vld [vmem:[%s18438_s12 + $0x27a8] sm:$0xff] }
 0x2d7   : > { %v1578_v5 = vld [vmem:[%s18438_s12 + $0x26a0] sm:$0xff] }
 0x2d8   : > { %v16890_v23 = vcombine.low %v1574_v4, %v1578_v5 }
 0x2d9   : > { %13240 = vmatpush1.bf16.msra.mxu0 %v16842_v14  ;;  %13896 = vmatpush1.bf16.msra.mxu1 %v16844_v15  ;;  %v16891_v14 = vcombine.high %v1574_v4, %v1578_v5  ;;  %v16893_v15 = vcombine.high %v1575_v8, %v1579_v9  ;;  %v2492_v4 = vcombine.high %v19085_v3, %v19085_v3  ;;  %v1615_v5 = vld [vmem:[%s18438_s12 + $0x27c8] sm:$0xff] }
 0x2da   : > { %13241 = vmatprep.subr.bf16.mxu0 %v16851_v16  ;;  %13897 = vmatprep.subr.bf16.mxu1 %v16853_v18  ;;  %v1582_v16 = vld [vmem:[%s18438_s12 + $0x26c0] sm:$0xff]  ;;  %v1619_v8 = vld [vmem:[%s18438_s12 + $0x27e8] sm:$0xff] }
 0x2db   : > { %v1586_v18 = vld [vmem:[%s18438_s12 + $0x26e0] sm:$0xff]  ;;  %v1623_v3 = vld [vmem:[%s18438_s12 + $0x2808] sm:$0xff] }
 0x2dc   : > { %v16898_v37 = vcombine.low %v1582_v16, %v1586_v18 }
 0x2dd   : > { %13242 = vmatpush1.bf16.msra.mxu0 %v16850_v29  ;;  %13898 = vmatpush1.bf16.msra.mxu1 %v16852_v30  ;;  %v16899_v29 = vcombine.high %v1582_v16, %v1586_v18  ;;  %v16901_v30 = vcombine.high %v1583_v19, %v1587_v21  ;;  %v1626_v16 = vld [vmem:[%s18438_s12 + $0x2820] sm:$0xff]  ;;  %v19249_v18 = vrot.slane %v2492_v4, %v18478_v22  ;;  %v1627_v19 = vld [vmem:[%s18438_s12 + $0x2828] sm:$0xff] }
 0x2de   : > { %13243 = vmatprep.subr.bf16.mxu0 %v16859_v31  ;;  %13899 = vmatprep.subr.bf16.mxu1 %v16861_v41  ;;  %v1590_v31 = vld [vmem:[%s18438_s12 + $0x2700] sm:$0xff] }
 0x2df   : > { %v1594_v41 = vld [vmem:[%s18438_s12 + $0x2720] sm:$0xff] }
 0x2e0   : > { %v16906_v34 = vcombine.low %v1590_v31, %v1594_v41  ;;  %v1654_v4 = vld [vmem:[%s18438_s12 + $0x2900] sm:$0xff] }
 0x2e1   : > { %13244 = vmatpush1.bf16.msra.mxu0 %v16858_v12  ;;  %13900 = vmatpush1.bf16.msra.mxu1 %v16860_v44  ;;  %v16907_v12 = vcombine.high %v1590_v31, %v1594_v41  ;;  %v16909_v44 = vcombine.high %v1591_v35, %v1595_v36  ;;  %v1634_v31 = vld [vmem:[%s18438_s12 + $0x2860] sm:$0xff]  ;;  %v2508_v41 = vcombine.high %v19249_v18, %v19249_v18  ;;  %v1631_v36 = vld [vmem:[%s18438_s12 + $0x2848] sm:$0xff] }
 0x2e2   : > { %13245 = vmatprep.subr.bf16.mxu0 %v16867_v45  ;;  %13901 = vmatprep.subr.bf16.mxu1 %v16869_v46  ;;  %v1598_v45 = vld [vmem:[%s18438_s12 + $0x2740] sm:$0xff]  ;;  %v19259_v35 = vcombine.high %v19176_v25, %v19176_v25 }
 0x2e3   : > { %v1602_v46 = vld [vmem:[%s18438_s12 + $0x2760] sm:$0xff] }
 0x2e4   : > { %v16914_v59 = vcombine.low %v1598_v45, %v1602_v46 }
 0x2e5   : > { %13246 = vmatpush1.bf16.msra.mxu0 %v16866_v49  ;;  %13902 = vmatpush1.bf16.msra.mxu1 %v16868_v53  ;;  %v16915_v49 = vcombine.high %v1598_v45, %v1602_v46  ;;  %v16917_v53 = vcombine.high %v1599_v47, %v1603_v48  ;;  %v1638_v46 = vld [vmem:[%s18438_s12 + $0x2880] sm:$0xff]  ;;  %v19266_v48 = vrot.slane %v2508_v41, %v18478_v22 }
 0x2e6   : > { %13247 = vmatprep.subr.bf16.mxu0 %v16875_v54  ;;  %13903 = vmatprep.subr.bf16.mxu1 %v16877_v55  ;;  %v1606_v54 = vld [vmem:[%s18438_s12 + $0x2780] sm:$0xff] }
 0x2e7   : > { %v1610_v55 = vld [vmem:[%s18438_s12 + $0x27a0] sm:$0xff] }
 0x2e8   : > { %v16922_v9 = vcombine.low %v1606_v54, %v1610_v55  ;;  %v1642_v47 = vld [vmem:[%s18438_s12 + $0x28a0] sm:$0xff] }
 0x2e9   : > { %13248 = vmatpush1.bf16.msra.mxu0 %v16874_v63  ;;  %13904 = vmatpush1.bf16.msra.mxu1 %v16876_v0  ;;  %v16923_v63 = vcombine.high %v1606_v54, %v1610_v55  ;;  %v16925_v0 = vcombine.high %v1607_v57, %v1611_v58  ;;  %v16955_v54 = vcombine.high %v1638_v46, %v1642_v47  ;;  %v1674_v41 = vld [vmem:[%s18438_s12 + $0x29a0] sm:$0xff] }
 0x2ea   : > { %13249 = vmatprep.subr.bf16.mxu0 %v16883_v32  ;;  %13905 = vmatprep.subr.bf16.mxu1 %v16885_v2  ;;  %v1614_v32 = vld [vmem:[%s18438_s12 + $0x27c0] sm:$0xff] }
 0x2eb   : > { %v1618_v2 = vld [vmem:[%s18438_s12 + $0x27e0] sm:$0xff] }
 0x2ec   : > { %v16930_v21 = vcombine.low %v1614_v32, %v1618_v2 }
 0x2ed   : > { %13250 = vmatpush1.bf16.msra.mxu0 %v16882_v10  ;;  %13906 = vmatpush1.bf16.msra.mxu1 %v16884_v11  ;;  %v16924_v10 = vcombine.low %v1607_v57, %v1611_v58  ;;  %v16931_v11 = vcombine.high %v1614_v32, %v1618_v2  ;;  %v1646_v57 = vld [vmem:[%s18438_s12 + $0x28c0] sm:$0xff] }
 0x2ee   : > { %13251 = vmatprep.subr.bf16.mxu0 %v16891_v14  ;;  %13907 = vmatprep.subr.bf16.mxu1 %v16893_v15  ;;  %v16933_v14 = vcombine.high %v1615_v5, %v1619_v8  ;;  %v1622_v15 = vld [vmem:[%s18438_s12 + $0x2800] sm:$0xff] }
 0x2ef   : > { %v1650_v58 = vld [vmem:[%s18438_s12 + $0x28e0] sm:$0xff] }
 0x2f0   : > { %v16963_v32 = vcombine.high %v1646_v57, %v1650_v58 }
 0x2f1   : > { %13252 = vmatpush1.bf16.msra.mxu0 %v16890_v23  ;;  %13908 = vmatpush1.bf16.msra.mxu1 %v16892_v24  ;;  %v16932_v23 = vcombine.low %v1615_v5, %v1619_v8  ;;  %v16939_v24 = vcombine.high %v1622_v15, %v1626_v16  ;;  %v1658_v5 = vld [vmem:[%s18438_s12 + $0x2920] sm:$0xff]  ;;  %v1655_v8 = vld [vmem:[%s18438_s12 + $0x2908] sm:$0xff] }
 0x2f2   : > { %13253 = vmatprep.subr.bf16.mxu0 %v16899_v29  ;;  %13909 = vmatprep.subr.bf16.mxu1 %v16901_v30  ;;  %v16941_v29 = vcombine.high %v1623_v3, %v1627_v19  ;;  %v1630_v30 = vld [vmem:[%s18438_s12 + $0x2840] sm:$0xff] }
 0x2f5   : > { %13254 = vmatpush1.bf16.msra.mxu0 %v16898_v37  ;;  %13910 = vmatpush1.bf16.msra.mxu1 %v16900_v62  ;;  %v1635_v37 = vld [vmem:[%s18438_s12 + $0x2868] sm:$0xff]  ;;  %v16938_v62 = vcombine.low %v1622_v15, %v1626_v16  ;;  %v1662_v16 = vld [vmem:[%s18438_s12 + $0x2940] sm:$0xff] }
 0x2f6   : > { %13255 = vmatprep.subr.bf16.mxu0 %v16907_v12  ;;  %13911 = vmatprep.subr.bf16.mxu1 %v16909_v44  ;;  %v16940_v12 = vcombine.low %v1623_v3, %v1627_v19  ;;  %v16947_v44 = vcombine.high %v1630_v30, %v1634_v31  ;;  %v16949_v45 = vcombine.high %v1631_v36, %v1635_v37  ;;  %v1666_v3 = vld [vmem:[%s18438_s12 + $0x2960] sm:$0xff]  ;;  %v1663_v19 = vld [vmem:[%s18438_s12 + $0x2948] sm:$0xff] }
 0x2f9   : > { %13256 = vmatpush1.bf16.msra.mxu0 %v16906_v34  ;;  %13912 = vmatpush1.bf16.msra.mxu1 %v16908_v50  ;;  %v1639_v34 = vld [vmem:[%s18438_s12 + $0x2888] sm:$0xff] }
 0x2fa   : > { %13257 = vmatprep.subr.bf16.mxu0 %v16915_v49  ;;  %13913 = vmatprep.subr.bf16.mxu1 %v16917_v53  ;;  %v1643_v50 = vld [vmem:[%s18438_s12 + $0x28a8] sm:$0xff]  ;;  %v16946_v49 = vcombine.low %v1630_v30, %v1634_v31  ;;  %v16948_v53 = vcombine.low %v1631_v36, %v1635_v37  ;;  %v1670_v31 = vld [vmem:[%s18438_s12 + $0x2980] sm:$0xff] }
 0x2fb   : > { %v16957_v55 = vcombine.high %v1639_v34, %v1643_v50  ;;  %v1671_v36 = vld [vmem:[%s18438_s12 + $0x2988] sm:$0xff] }
 0x2fc   : > { %v1675_v37 = vld [vmem:[%s18438_s12 + $0x29a8] sm:$0xff] }
 0x2fd   : > { %13258 = vmatpush1.bf16.msra.mxu0 %v16914_v59  ;;  %13914 = vmatpush1.bf16.msra.mxu1 %v16916_v61  ;;  %v1647_v59 = vld [vmem:[%s18438_s12 + $0x28c8] sm:$0xff] }
 0x2fe   : > { %13259 = vmatprep.subr.bf16.mxu0 %v16923_v63  ;;  %13915 = vmatprep.subr.bf16.mxu1 %v16925_v0  ;;  %v1651_v61 = vld [vmem:[%s18438_s12 + $0x28e8] sm:$0xff]  ;;  %v16954_v63 = vcombine.low %v1638_v46, %v1642_v47  ;;  %v16956_v0 = vcombine.low %v1639_v34, %v1643_v50  ;;  %v1678_v46 = vld [vmem:[%s18438_s12 + $0x29c0] sm:$0xff] }
 0x2ff   : > { %v16965_v2 = vcombine.high %v1647_v59, %v1651_v61  ;;  %v1682_v47 = vld [vmem:[%s18438_s12 + $0x29e0] sm:$0xff]  ;;  %v1679_v34 = vld [vmem:[%s18438_s12 + $0x29c8] sm:$0xff] }
 0x300   : > { %v1683_v50 = vld [vmem:[%s18438_s12 + $0x29e8] sm:$0xff] }
 0x301   : > { %13260 = vmatpush1.bf16.msra.mxu0 %v16922_v9  ;;  %13916 = vmatpush1.bf16.msra.mxu1 %v16924_v10  ;;  %v1659_v9 = vld [vmem:[%s18438_s12 + $0x2928] sm:$0xff]  ;;  %v16962_v10 = vcombine.low %v1646_v57, %v1650_v58  ;;  %v1686_v57 = vld [vmem:[%s18438_s12 + $0x2a00] sm:$0xff] }
 0x302   : > { %13261 = vmatprep.subr.bf16.mxu0 %v16931_v11  ;;  %13917 = vmatprep.subr.bf16.mxu1 %v16933_v14  ;;  %v16964_v11 = vcombine.low %v1647_v59, %v1651_v61  ;;  %v16971_v14 = vcombine.high %v1654_v4, %v1658_v5  ;;  %v16973_v15 = vcombine.high %v1655_v8, %v1659_v9  ;;  %v1690_v58 = vld [vmem:[%s18438_s12 + $0x2a20] sm:$0xff]  ;;  %v1687_v59 = vld [vmem:[%s18438_s12 + $0x2a08] sm:$0xff] }
 0x303   : > { %v1691_v61 = vld [vmem:[%s18438_s12 + $0x2a28] sm:$0xff] }
 0x305   : > { %13262 = vmatpush1.bf16.msra.mxu0 %v16930_v21  ;;  %13918 = vmatpush1.bf16.msra.mxu1 %v16932_v23  ;;  %v1667_v21 = vld [vmem:[%s18438_s12 + $0x2968] sm:$0xff]  ;;  %v16970_v23 = vcombine.low %v1654_v4, %v1658_v5  ;;  %v1694_v4 = vld [vmem:[%s18438_s12 + $0x2a40] sm:$0xff] }
 0x306   : > { %13272 = vmatprep.subr.bf16.mxu0 %v16939_v24  ;;  %13928 = vmatprep.subr.bf16.mxu1 %v16941_v29  ;;  %v16972_v24 = vcombine.low %v1655_v8, %v1659_v9  ;;  %v16979_v29 = vcombine.high %v1662_v16, %v1666_v3  ;;  %v16981_v30 = vcombine.high %v1663_v19, %v1667_v21  ;;  %v1698_v5 = vld [vmem:[%s18438_s12 + $0x2a60] sm:$0xff]  ;;  %v1695_v8 = vld [vmem:[%s18438_s12 + $0x2a48] sm:$0xff] }
 0x307   : > { %v1699_v9 = vld [vmem:[%s18438_s12 + $0x2a68] sm:$0xff] }
 0x308   : > { %13264 = vmatmul.mubr.bf16.vlgmr.msra.gmra.mrb[0].mxu0 %v19259_v35  ;;  %13920 = vmatmul.mubr.bf16.vlgmr.msra.gmra.mrb[0].mxu1 %v19259_v35 }
 0x309   : > { %13273 = vmatpush1.bf16.msra.mxu0 %v16938_v62  ;;  %13929 = vmatpush1.bf16.msra.mxu1 %v16940_v12  ;;  %v16978_v62 = vcombine.low %v1662_v16, %v1666_v3  ;;  %v16980_v12 = vcombine.low %v1663_v19, %v1667_v21  ;;  %v1702_v16 = vld [vmem:[%s18438_s12 + $0x2a80] sm:$0xff]  ;;  %v1703_v19 = vld [vmem:[%s18438_s12 + $0x2a88] sm:$0xff] }
 0x30a   : > { %13274 = vmatprep.subr.bf16.mxu0 %v16947_v44  ;;  %13930 = vmatprep.subr.bf16.mxu1 %v16949_v45  ;;  %v16987_v44 = vcombine.high %v1670_v31, %v1674_v41  ;;  %v16989_v45 = vcombine.high %v1671_v36, %v1675_v37  ;;  %v1706_v3 = vld [vmem:[%s18438_s12 + $0x2aa0] sm:$0xff]  ;;  %v1707_v21 = vld [vmem:[%s18438_s12 + $0x2aa8] sm:$0xff] }
 0x30b   : > { %13304 = vmatprep.mubr.bf16.mxu0 %v19266_v48  ;;  %13960 = vmatprep.mubr.bf16.mxu1 %v19266_v48 }
 0x30d   : > { %13275 = vmatpush1.bf16.msra.mxu0 %v16946_v49  ;;  %13931 = vmatpush1.bf16.msra.mxu1 %v16948_v53  ;;  %v16986_v49 = vcombine.low %v1670_v31, %v1674_v41  ;;  %v16988_v53 = vcombine.low %v1671_v36, %v1675_v37  ;;  %v1710_v31 = vld [vmem:[%s18438_s12 + $0x2ac0] sm:$0xff]  ;;  %v1711_v36 = vld [vmem:[%s18438_s12 + $0x2ac8] sm:$0xff] }
 0x30e   : > { %13276 = vmatprep.subr.bf16.mxu0 %v16955_v54  ;;  %13932 = vmatprep.subr.bf16.mxu1 %v16957_v55  ;;  %v16995_v54 = vcombine.high %v1678_v46, %v1682_v47  ;;  %v16997_v55 = vcombine.high %v1679_v34, %v1683_v50  ;;  %v1714_v41 = vld [vmem:[%s18438_s12 + $0x2ae0] sm:$0xff]  ;;  %v1715_v37 = vld [vmem:[%s18438_s12 + $0x2ae8] sm:$0xff] }
 0x311   : > { %13277 = vmatpush1.bf16.msra.mxu0 %v16954_v63  ;;  %13933 = vmatpush1.bf16.msra.mxu1 %v16956_v0  ;;  %v16994_v63 = vcombine.low %v1678_v46, %v1682_v47  ;;  %v16996_v0 = vcombine.low %v1679_v34, %v1683_v50  ;;  %v1718_v46 = vld [vmem:[%s18438_s12 + $0x2b00] sm:$0xff]  ;;  %v1719_v34 = vld [vmem:[%s18438_s12 + $0x2b08] sm:$0xff] }
 0x312   : > { %13278 = vmatprep.subr.bf16.mxu0 %v16963_v32  ;;  %13934 = vmatprep.subr.bf16.mxu1 %v16965_v2  ;;  %v17003_v32 = vcombine.high %v1686_v57, %v1690_v58  ;;  %v17005_v2 = vcombine.high %v1687_v59, %v1691_v61  ;;  %v1722_v47 = vld [vmem:[%s18438_s12 + $0x2b20] sm:$0xff]  ;;  %v1723_v50 = vld [vmem:[%s18438_s12 + $0x2b28] sm:$0xff] }
 0x315   : > { %13279 = vmatpush1.bf16.msra.mxu0 %v16962_v10  ;;  %13935 = vmatpush1.bf16.msra.mxu1 %v16964_v11  ;;  %v17002_v10 = vcombine.low %v1686_v57, %v1690_v58  ;;  %v17004_v11 = vcombine.low %v1687_v59, %v1691_v61  ;;  %v1726_v57 = vld [vmem:[%s18438_s12 + $0x2b40] sm:$0xff]  ;;  %v1727_v59 = vld [vmem:[%s18438_s12 + $0x2b48] sm:$0xff] }
 0x316   : > { %13280 = vmatprep.subr.bf16.mxu0 %v16971_v14  ;;  %13936 = vmatprep.subr.bf16.mxu1 %v16973_v15  ;;  %v17011_v14 = vcombine.high %v1694_v4, %v1698_v5  ;;  %v17013_v15 = vcombine.high %v1695_v8, %v1699_v9  ;;  %v1730_v58 = vld [vmem:[%s18438_s12 + $0x2b60] sm:$0xff]  ;;  %v1731_v61 = vld [vmem:[%s18438_s12 + $0x2b68] sm:$0xff] }
 0x319   : > { %13281 = vmatpush1.bf16.msra.mxu0 %v16970_v23  ;;  %13937 = vmatpush1.bf16.msra.mxu1 %v16972_v24  ;;  %v17010_v23 = vcombine.low %v1694_v4, %v1698_v5  ;;  %v17012_v24 = vcombine.low %v1695_v8, %v1699_v9  ;;  %v1734_v4 = vld [vmem:[%s18438_s12 + $0x2b80] sm:$0xff]  ;;  %v1735_v8 = vld [vmem:[%s18438_s12 + $0x2b88] sm:$0xff] }
 0x31a   : > { %13282 = vmatprep.subr.bf16.mxu0 %v16979_v29  ;;  %13938 = vmatprep.subr.bf16.mxu1 %v16981_v30  ;;  %v17019_v29 = vcombine.high %v1702_v16, %v1706_v3  ;;  %v17021_v30 = vcombine.high %v1703_v19, %v1707_v21  ;;  %v1738_v5 = vld [vmem:[%s18438_s12 + $0x2ba0] sm:$0xff]  ;;  %v1739_v9 = vld [vmem:[%s18438_s12 + $0x2ba8] sm:$0xff] }
 0x31d   : > { %13283 = vmatpush1.bf16.msra.mxu0 %v16978_v62  ;;  %13939 = vmatpush1.bf16.msra.mxu1 %v16980_v12  ;;  %v17018_v62 = vcombine.low %v1702_v16, %v1706_v3  ;;  %v17020_v12 = vcombine.low %v1703_v19, %v1707_v21  ;;  %v1742_v16 = vld [vmem:[%s18438_s12 + $0x2bc0] sm:$0xff]  ;;  %v1743_v19 = vld [vmem:[%s18438_s12 + $0x2bc8] sm:$0xff] }
 0x31e   : > { %13284 = vmatprep.subr.bf16.mxu0 %v16987_v44  ;;  %13940 = vmatprep.subr.bf16.mxu1 %v16989_v45  ;;  %v17027_v44 = vcombine.high %v1710_v31, %v1714_v41  ;;  %v17029_v45 = vcombine.high %v1711_v36, %v1715_v37  ;;  %v1746_v3 = vld [vmem:[%s18438_s12 + $0x2be0] sm:$0xff]  ;;  %v1747_v21 = vld [vmem:[%s18438_s12 + $0x2be8] sm:$0xff] }
 0x321   : > { %13285 = vmatpush1.bf16.msra.mxu0 %v16986_v49  ;;  %13941 = vmatpush1.bf16.msra.mxu1 %v16988_v53  ;;  %v17026_v49 = vcombine.low %v1710_v31, %v1714_v41  ;;  %v17028_v53 = vcombine.low %v1711_v36, %v1715_v37  ;;  %v1750_v31 = vld [vmem:[%s18438_s12 + $0x2c00] sm:$0xff]  ;;  %v1751_v36 = vld [vmem:[%s18438_s12 + $0x2c08] sm:$0xff] }
 0x322   : > { %13286 = vmatprep.subr.bf16.mxu0 %v16995_v54  ;;  %13942 = vmatprep.subr.bf16.mxu1 %v16997_v55  ;;  %v17035_v54 = vcombine.high %v1718_v46, %v1722_v47  ;;  %v17037_v55 = vcombine.high %v1719_v34, %v1723_v50  ;;  %v1754_v41 = vld [vmem:[%s18438_s12 + $0x2c20] sm:$0xff]  ;;  %v1755_v37 = vld [vmem:[%s18438_s12 + $0x2c28] sm:$0xff] }
 0x325   : > { %13287 = vmatpush1.bf16.msra.mxu0 %v16994_v63  ;;  %13943 = vmatpush1.bf16.msra.mxu1 %v16996_v0  ;;  %v17034_v63 = vcombine.low %v1718_v46, %v1722_v47  ;;  %v17036_v0 = vcombine.low %v1719_v34, %v1723_v50  ;;  %v1758_v46 = vld [vmem:[%s18438_s12 + $0x2c40] sm:$0xff]  ;;  %v19334_v34 = vrot.slane %v19249_v18, %v18478_v22  ;;  %v1759_v50 = vld [vmem:[%s18438_s12 + $0x2c48] sm:$0xff] }
 0x326   : > { %13288 = vmatprep.subr.bf16.mxu0 %v17003_v32  ;;  %13944 = vmatprep.subr.bf16.mxu1 %v17005_v2  ;;  %v17043_v32 = vcombine.high %v1726_v57, %v1730_v58  ;;  %v17045_v2 = vcombine.high %v1727_v59, %v1731_v61  ;;  %v1762_v47 = vld [vmem:[%s18438_s12 + $0x2c60] sm:$0xff]  ;;  %v1767_v18 = vld [vmem:[%s18438_s12 + $0x2c88] sm:$0xff] }
 0x329   : > { %13289 = vmatpush1.bf16.msra.mxu0 %v17002_v10  ;;  %13945 = vmatpush1.bf16.msra.mxu1 %v17004_v11  ;;  %v17042_v10 = vcombine.low %v1726_v57, %v1730_v58  ;;  %v17044_v11 = vcombine.low %v1727_v59, %v1731_v61  ;;  %v1766_v58 = vld [vmem:[%s18438_s12 + $0x2c80] sm:$0xff]  ;;  %v19342_v61 = vcombine.high %v19266_v48, %v19266_v48 }
 0x32a   : > { %13290 = vmatprep.subr.bf16.mxu0 %v17011_v14  ;;  %13946 = vmatprep.subr.bf16.mxu1 %v17013_v15  ;;  %v17051_v14 = vcombine.high %v1734_v4, %v1738_v5  ;;  %v17053_v15 = vcombine.high %v1735_v8, %v1739_v9  ;;  %v1770_v59 = vld [vmem:[%s18438_s12 + $0x2ca0] sm:$0xff] }
 0x32d   : > { %13291 = vmatpush1.bf16.msra.mxu0 %v17010_v23  ;;  %13947 = vmatpush1.bf16.msra.mxu1 %v17012_v24  ;;  %v17050_v23 = vcombine.low %v1734_v4, %v1738_v5  ;;  %v17052_v24 = vcombine.low %v1735_v8, %v1739_v9  ;;  %v1774_v5 = vld [vmem:[%s18438_s12 + $0x2cc0] sm:$0xff]  ;;  %v1775_v9 = vld [vmem:[%s18438_s12 + $0x2cc8] sm:$0xff] }
 0x32e   : > { %13292 = vmatprep.subr.bf16.mxu0 %v17019_v29  ;;  %13948 = vmatprep.subr.bf16.mxu1 %v17021_v30  ;;  %v17059_v29 = vcombine.high %v1742_v16, %v1746_v3  ;;  %v17061_v30 = vcombine.high %v1743_v19, %v1747_v21  ;;  %v1778_v8 = vld [vmem:[%s18438_s12 + $0x2ce0] sm:$0xff] }
 0x331   : > { %13293 = vmatpush1.bf16.msra.mxu0 %v17018_v62  ;;  %13949 = vmatpush1.bf16.msra.mxu1 %v17020_v12  ;;  %v17058_v62 = vcombine.low %v1742_v16, %v1746_v3  ;;  %v17060_v12 = vcombine.low %v1743_v19, %v1747_v21  ;;  %v1782_v3 = vld [vmem:[%s18438_s12 + $0x2d00] sm:$0xff]  ;;  %v1783_v21 = vld [vmem:[%s18438_s12 + $0x2d08] sm:$0xff] }
 0x332   : > { %13294 = vmatprep.subr.bf16.mxu0 %v17027_v44  ;;  %13950 = vmatprep.subr.bf16.mxu1 %v17029_v45  ;;  %v17067_v44 = vcombine.high %v1750_v31, %v1754_v41  ;;  %v17069_v45 = vcombine.high %v1751_v36, %v1755_v37  ;;  %v1786_v19 = vld [vmem:[%s18438_s12 + $0x2d20] sm:$0xff] }
 0x335   : > { %13295 = vmatpush1.bf16.msra.mxu0 %v17026_v49  ;;  %13951 = vmatpush1.bf16.msra.mxu1 %v17028_v53  ;;  %v1763_v49 = vld [vmem:[%s18438_s12 + $0x2c68] sm:$0xff]  ;;  %v17066_v53 = vcombine.low %v1750_v31, %v1754_v41  ;;  %v1790_v41 = vld [vmem:[%s18438_s12 + $0x2d40] sm:$0xff] }
 0x336   : > { %13296 = vmatprep.subr.bf16.mxu0 %v17035_v54  ;;  %13952 = vmatprep.subr.bf16.mxu1 %v17037_v55  ;;  %v17068_v54 = vcombine.low %v1751_v36, %v1755_v37  ;;  %v17075_v55 = vcombine.high %v1758_v46, %v1762_v47  ;;  %v17077_v57 = vcombine.high %v1759_v50, %v1763_v49  ;;  %v1794_v36 = vld [vmem:[%s18438_s12 + $0x2d60] sm:$0xff]  ;;  %v1791_v37 = vld [vmem:[%s18438_s12 + $0x2d48] sm:$0xff] }
 0x339   : > { %13297 = vmatpush1.bf16.msra.mxu0 %v17034_v63  ;;  %13953 = vmatpush1.bf16.msra.mxu1 %v17036_v0  ;;  %v1771_v63 = vld [vmem:[%s18438_s12 + $0x2ca8] sm:$0xff]  ;;  %v17074_v0 = vcombine.low %v1758_v46, %v1762_v47  ;;  %v1798_v47 = vld [vmem:[%s18438_s12 + $0x2d80] sm:$0xff] }
 0x33a   : > { %13298 = vmatprep.subr.bf16.mxu0 %v17043_v32  ;;  %13954 = vmatprep.subr.bf16.mxu1 %v17045_v2  ;;  %v17076_v32 = vcombine.low %v1759_v50, %v1763_v49  ;;  %v17083_v2 = vcombine.high %v1766_v58, %v1770_v59  ;;  %v17085_v4 = vcombine.high %v1767_v18, %v1771_v63  ;;  %v1802_v50 = vld [vmem:[%s18438_s12 + $0x2da0] sm:$0xff]  ;;  %v1799_v49 = vld [vmem:[%s18438_s12 + $0x2d88] sm:$0xff] }
 0x33d   : > { %13299 = vmatpush1.bf16.msra.mxu0 %v17042_v10  ;;  %13955 = vmatpush1.bf16.msra.mxu1 %v17044_v11  ;;  %v1779_v10 = vld [vmem:[%s18438_s12 + $0x2ce8] sm:$0xff]  ;;  %v17082_v11 = vcombine.low %v1766_v58, %v1770_v59  ;;  %v1806_v59 = vld [vmem:[%s18438_s12 + $0x2dc0] sm:$0xff] }
 0x33e   : > { %13300 = vmatprep.subr.bf16.mxu0 %v17051_v14  ;;  %13956 = vmatprep.subr.bf16.mxu1 %v17053_v15  ;;  %v17084_v14 = vcombine.low %v1767_v18, %v1771_v63  ;;  %v17091_v15 = vcombine.high %v1774_v5, %v1778_v8  ;;  %v17093_v16 = vcombine.high %v1775_v9, %v1779_v10  ;;  %v1810_v18 = vld [vmem:[%s18438_s12 + $0x2de0] sm:$0xff]  ;;  %v1807_v63 = vld [vmem:[%s18438_s12 + $0x2dc8] sm:$0xff] }
 0x341   : > { %13301 = vmatpush1.bf16.msra.mxu0 %v17050_v23  ;;  %13957 = vmatpush1.bf16.msra.mxu1 %v17052_v24  ;;  %v1787_v23 = vld [vmem:[%s18438_s12 + $0x2d28] sm:$0xff]  ;;  %v17090_v24 = vcombine.low %v1774_v5, %v1778_v8  ;;  %v1814_v8 = vld [vmem:[%s18438_s12 + $0x2e00] sm:$0xff] }
 0x342   : > { %13302 = vmatprep.subr.bf16.mxu0 %v17059_v29  ;;  %13958 = vmatprep.subr.bf16.mxu1 %v17061_v30  ;;  %v17092_v29 = vcombine.low %v1775_v9, %v1779_v10  ;;  %v17099_v30 = vcombine.high %v1782_v3, %v1786_v19  ;;  %v17101_v31 = vcombine.high %v1783_v21, %v1787_v23  ;;  %v1818_v9 = vld [vmem:[%s18438_s12 + $0x2e20] sm:$0xff]  ;;  %v1815_v10 = vld [vmem:[%s18438_s12 + $0x2e08] sm:$0xff] }
 0x345   : > { %13303 = vmatpush1.bf16.msra.mxu0 %v17058_v62  ;;  %13959 = vmatpush1.bf16.msra.mxu1 %v17060_v12  ;;  %v1795_v62 = vld [vmem:[%s18438_s12 + $0x2d68] sm:$0xff]  ;;  %v17098_v12 = vcombine.low %v1782_v3, %v1786_v19  ;;  %v1822_v19 = vld [vmem:[%s18438_s12 + $0x2e40] sm:$0xff] }
 0x346   : > { %13313 = vmatprep.subr.bf16.mxu0 %v17067_v44  ;;  %13969 = vmatprep.subr.bf16.mxu1 %v17069_v45  ;;  %v17100_v44 = vcombine.low %v1783_v21, %v1787_v23  ;;  %v17107_v45 = vcombine.high %v1790_v41, %v1794_v36  ;;  %v17109_v46 = vcombine.high %v1791_v37, %v1795_v62  ;;  %v1826_v21 = vld [vmem:[%s18438_s12 + $0x2e60] sm:$0xff]  ;;  %v1823_v23 = vld [vmem:[%s18438_s12 + $0x2e48] sm:$0xff] }
 0x348   : > { %13305 = vmatmul.mubr.bf16.vlgmr.msra.gmra.mrb[0].mxu0 %v19334_v34  ;;  %13961 = vmatmul.mubr.bf16.vlgmr.msra.gmra.mrb[0].mxu1 %v19334_v34 }
 0x349   : > { %13314 = vmatpush1.bf16.msra.mxu0 %v17066_v53  ;;  %13970 = vmatpush1.bf16.msra.mxu1 %v17068_v54  ;;  %v1803_v53 = vld [vmem:[%s18438_s12 + $0x2da8] sm:$0xff]  ;;  %v17106_v54 = vcombine.low %v1790_v41, %v1794_v36  ;;  %v1830_v36 = vld [vmem:[%s18438_s12 + $0x2e80] sm:$0xff] }
 0x34a   : > { %13315 = vmatprep.subr.bf16.mxu0 %v17075_v55  ;;  %13971 = vmatprep.subr.bf16.mxu1 %v17077_v57  ;;  %v17108_v55 = vcombine.low %v1791_v37, %v1795_v62  ;;  %v17115_v57 = vcombine.high %v1798_v47, %v1802_v50  ;;  %v17117_v58 = vcombine.high %v1799_v49, %v1803_v53  ;;  %v1834_v37 = vld [vmem:[%s18438_s12 + $0x2ea0] sm:$0xff]  ;;  %v1831_v62 = vld [vmem:[%s18438_s12 + $0x2e88] sm:$0xff] }
 0x34b   : > { %13345 = vmatprep.mubr.bf16.mxu0 %v19342_v61  ;;  %14001 = vmatprep.mubr.bf16.mxu1 %v19342_v61 }
 0x34d   : > { %13316 = vmatpush1.bf16.msra.mxu0 %v17074_v0  ;;  %13972 = vmatpush1.bf16.msra.mxu1 %v17076_v32  ;;  %v1811_v0 = vld [vmem:[%s18438_s12 + $0x2de8] sm:$0xff]  ;;  %v17114_v32 = vcombine.low %v1798_v47, %v1802_v50  ;;  %v1838_v50 = vld [vmem:[%s18438_s12 + $0x2ec0] sm:$0xff] }
 0x34e   : > { %13317 = vmatprep.subr.bf16.mxu0 %v17083_v2  ;;  %13973 = vmatprep.subr.bf16.mxu1 %v17085_v4  ;;  %v17116_v2 = vcombine.low %v1799_v49, %v1803_v53  ;;  %v17123_v4 = vcombine.high %v1806_v59, %v1810_v18  ;;  %v17125_v5 = vcombine.high %v1807_v63, %v1811_v0  ;;  %v1842_v49 = vld [vmem:[%s18438_s12 + $0x2ee0] sm:$0xff]  ;;  %v1839_v53 = vld [vmem:[%s18438_s12 + $0x2ec8] sm:$0xff] }
 0x351   : > { %13318 = vmatpush1.bf16.msra.mxu0 %v17082_v11  ;;  %13974 = vmatpush1.bf16.msra.mxu1 %v17084_v14  ;;  %v1819_v11 = vld [vmem:[%s18438_s12 + $0x2e28] sm:$0xff]  ;;  %v17122_v14 = vcombine.low %v1806_v59, %v1810_v18  ;;  %v1846_v18 = vld [vmem:[%s18438_s12 + $0x2f00] sm:$0xff] }
 0x352   : > { %13319 = vmatprep.subr.bf16.mxu0 %v17091_v15  ;;  %13975 = vmatprep.subr.bf16.mxu1 %v17093_v16  ;;  %v17124_v15 = vcombine.low %v1807_v63, %v1811_v0  ;;  %v17131_v16 = vcombine.high %v1814_v8, %v1818_v9  ;;  %v17133_v3 = vcombine.high %v1815_v10, %v1819_v11  ;;  %v1850_v63 = vld [vmem:[%s18438_s12 + $0x2f20] sm:$0xff]  ;;  %v1847_v0 = vld [vmem:[%s18438_s12 + $0x2f08] sm:$0xff] }
 0x355   : > { %13320 = vmatpush1.bf16.msra.mxu0 %v17090_v24  ;;  %13976 = vmatpush1.bf16.msra.mxu1 %v17092_v29  ;;  %v1827_v24 = vld [vmem:[%s18438_s12 + $0x2e68] sm:$0xff]  ;;  %v17130_v29 = vcombine.low %v1814_v8, %v1818_v9  ;;  %v1854_v9 = vld [vmem:[%s18438_s12 + $0x2f40] sm:$0xff] }
 0x356   : > { %13321 = vmatprep.subr.bf16.mxu0 %v17099_v30  ;;  %13977 = vmatprep.subr.bf16.mxu1 %v17101_v31  ;;  %v17132_v30 = vcombine.low %v1815_v10, %v1819_v11  ;;  %v17139_v31 = vcombine.high %v1822_v19, %v1826_v21  ;;  %v17141_v41 = vcombine.high %v1823_v23, %v1827_v24  ;;  %v1858_v10 = vld [vmem:[%s18438_s12 + $0x2f60] sm:$0xff]  ;;  %v1855_v11 = vld [vmem:[%s18438_s12 + $0x2f48] sm:$0xff] }
 0x359   : > { %13322 = vmatpush1.bf16.msra.mxu0 %v17098_v12  ;;  %13978 = vmatpush1.bf16.msra.mxu1 %v17100_v44  ;;  %v1835_v12 = vld [vmem:[%s18438_s12 + $0x2ea8] sm:$0xff]  ;;  %v17138_v44 = vcombine.low %v1822_v19, %v1826_v21  ;;  %v1862_v21 = vld [vmem:[%s18438_s12 + $0x2f80] sm:$0xff] }
 0x35a   : > { %13323 = vmatprep.subr.bf16.mxu0 %v17107_v45  ;;  %13979 = vmatprep.subr.bf16.mxu1 %v17109_v46  ;;  %v17140_v45 = vcombine.low %v1823_v23, %v1827_v24  ;;  %v17147_v46 = vcombine.high %v1830_v36, %v1834_v37  ;;  %v17149_v47 = vcombine.high %v1831_v62, %v1835_v12  ;;  %v1866_v23 = vld [vmem:[%s18438_s12 + $0x2fa0] sm:$0xff]  ;;  %v1863_v24 = vld [vmem:[%s18438_s12 + $0x2f88] sm:$0xff] }
 0x35d   : > { %13324 = vmatpush1.bf16.msra.mxu0 %v17106_v54  ;;  %13980 = vmatpush1.bf16.msra.mxu1 %v17108_v55  ;;  %v1843_v54 = vld [vmem:[%s18438_s12 + $0x2ee8] sm:$0xff]  ;;  %v17146_v55 = vcombine.low %v1830_v36, %v1834_v37  ;;  %v1870_v37 = vld [vmem:[%s18438_s12 + $0x2fc0] sm:$0xff] }
 0x35e   : > { %13325 = vmatprep.subr.bf16.mxu0 %v17115_v57  ;;  %13981 = vmatprep.subr.bf16.mxu1 %v17117_v58  ;;  %v17148_v57 = vcombine.low %v1831_v62, %v1835_v12  ;;  %v17155_v58 = vcombine.high %v1838_v50, %v1842_v49  ;;  %v17157_v59 = vcombine.high %v1839_v53, %v1843_v54  ;;  %v1874_v62 = vld [vmem:[%s18438_s12 + $0x2fe0] sm:$0xff]  ;;  %v1871_v12 = vld [vmem:[%s18438_s12 + $0x2fc8] sm:$0xff] }
 0x361   : > { %13326 = vmatpush1.bf16.msra.mxu0 %v17114_v32  ;;  %13982 = vmatpush1.bf16.msra.mxu1 %v17116_v2  ;;  %v1851_v32 = vld [vmem:[%s18438_s12 + $0x2f28] sm:$0xff]  ;;  %v17154_v2 = vcombine.low %v1838_v50, %v1842_v49  ;;  %v17187_v50 = vcombine.high %v1870_v37, %v1874_v62 }
 0x362   : > { %13327 = vmatprep.subr.bf16.mxu0 %v17123_v4  ;;  %13983 = vmatprep.subr.bf16.mxu1 %v17125_v5  ;;  %v17156_v4 = vcombine.low %v1839_v53, %v1843_v54  ;;  %v17163_v5 = vcombine.high %v1846_v18, %v1850_v63  ;;  %v17165_v8 = vcombine.high %v1847_v0, %v1851_v32  ;;  %v1878_v53 = vld [vmem:[%s18438_s12 + $0x3000] sm:$0xff] }
 0x363   : > { %v1882_v54 = vld [vmem:[%s18438_s12 + $0x3020] sm:$0xff] }
 0x365   : > { %13328 = vmatpush1.bf16.msra.mxu0 %v17122_v14  ;;  %13984 = vmatpush1.bf16.msra.mxu1 %v17124_v15  ;;  %v1859_v14 = vld [vmem:[%s18438_s12 + $0x2f68] sm:$0xff]  ;;  %v17162_v15 = vcombine.low %v1846_v18, %v1850_v63  ;;  %v17195_v63 = vcombine.high %v1878_v53, %v1882_v54 }
 0x366   : > { %13329 = vmatprep.subr.bf16.mxu0 %v17131_v16  ;;  %13985 = vmatprep.subr.bf16.mxu1 %v17133_v3  ;;  %v17164_v16 = vcombine.low %v1847_v0, %v1851_v32  ;;  %v17171_v3 = vcombine.high %v1854_v9, %v1858_v10  ;;  %v17173_v19 = vcombine.high %v1855_v11, %v1859_v14  ;;  %v1886_v32 = vld [vmem:[%s18438_s12 + $0x3040] sm:$0xff] }
 0x369   : > { %13330 = vmatpush1.bf16.msra.mxu0 %v17130_v29  ;;  %13986 = vmatpush1.bf16.msra.mxu1 %v17132_v30  ;;  %v1867_v29 = vld [vmem:[%s18438_s12 + $0x2fa8] sm:$0xff]  ;;  %v17170_v30 = vcombine.low %v1854_v9, %v1858_v10  ;;  %v17194_v10 = vcombine.low %v1878_v53, %v1882_v54 }
 0x36a   : > { %13331 = vmatprep.subr.bf16.mxu0 %v17139_v31  ;;  %13987 = vmatprep.subr.bf16.mxu1 %v17141_v41  ;;  %v17172_v31 = vcombine.low %v1855_v11, %v1859_v14  ;;  %v17179_v41 = vcombine.high %v1862_v21, %v1866_v23  ;;  %v17181_v36 = vcombine.high %v1863_v24, %v1867_v29  ;;  %v1891_v9 = vld [vmem:[%s18438_s12 + $0x3068] sm:$0xff] }
 0x36b   : > { %v1911_v53 = vld [vmem:[%s18438_s12 + $0x3108] sm:$0xff] }
 0x36c   : > { %v1915_v54 = vld [vmem:[%s18438_s12 + $0x3128] sm:$0xff] }
 0x36d   : > { %13332 = vmatpush1.bf16.msra.mxu0 %v17138_v44  ;;  %13988 = vmatpush1.bf16.msra.mxu1 %v17140_v45  ;;  %v1875_v44 = vld [vmem:[%s18438_s12 + $0x2fe8] sm:$0xff]  ;;  %v19403_v45 = vld [vmem:[%s18431_s30 + $0x18] sm:$0xff] }
 0x36e   : > { %13333 = vmatprep.subr.bf16.mxu0 %v17147_v46  ;;  %13989 = vmatprep.subr.bf16.mxu1 %v17149_v47  ;;  %v17178_v46 = vcombine.low %v1862_v21, %v1866_v23  ;;  %v17180_v47 = vcombine.low %v1863_v24, %v1867_v29  ;;  %v17189_v49 = vcombine.high %v1871_v12, %v1875_v44  ;;  %v1895_v21 = vld [vmem:[%s18438_s12 + $0x3088] sm:$0xff] }
 0x36f   : > { %v17188_v18 = vcombine.low %v1871_v12, %v1875_v44  ;;  %v1899_v23 = vld [vmem:[%s18438_s12 + $0x30a8] sm:$0xff] }
 0x370   : > { %v17212_v44 = vcombine.low %v1895_v21, %v1899_v23 }
 0x371   : > { %13334 = vmatpush1.bf16.msra.mxu0 %v17146_v55  ;;  %13990 = vmatpush1.bf16.msra.mxu1 %v17148_v57  ;;  %v19409_v55 = vrot.slane %v19403_v45, %v18478_v22  ;;  %v1879_v57 = vld [vmem:[%s18438_s12 + $0x3008] sm:$0xff] }
 0x372   : > { %13335 = vmatprep.subr.bf16.mxu0 %v17155_v58  ;;  %13991 = vmatprep.subr.bf16.mxu1 %v17157_v59  ;;  %v1883_v58 = vld [vmem:[%s18438_s12 + $0x3028] sm:$0xff]  ;;  %v17186_v59 = vcombine.low %v1870_v37, %v1874_v62 }
 0x373   : > { %v17197_v0 = vcombine.high %v1879_v57, %v1883_v58  ;;  %v17196_v11 = vcombine.low %v1879_v57, %v1883_v58  ;;  %v1903_v37 = vld [vmem:[%s18438_s12 + $0x30c8] sm:$0xff] }
 0x374   : > { %v1907_v62 = vld [vmem:[%s18438_s12 + $0x30e8] sm:$0xff] }
 0x375   : > { %13336 = vmatpush1.bf16.msra.mxu0 %v17154_v2  ;;  %13992 = vmatpush1.bf16.msra.mxu1 %v17156_v4  ;;  %v1890_v2 = vld [vmem:[%s18438_s12 + $0x3060] sm:$0xff]  ;;  %v2556_v4 = vcombine.high %v19409_v55, %v19409_v55  ;;  %v17220_v58 = vcombine.low %v1903_v37, %v1907_v62 }
 0x376   : > { %13337 = vmatprep.subr.bf16.mxu0 %v17163_v5  ;;  %13993 = vmatprep.subr.bf16.mxu1 %v17165_v8  ;;  %v19419_v5 = vcombine.high %v19334_v34, %v19334_v34  ;;  %v1887_v8 = vld [vmem:[%s18438_s12 + $0x3048] sm:$0xff]  ;;  %v17203_v14 = vcombine.high %v1886_v32, %v1890_v2  ;;  %v17202_v24 = vcombine.low %v1886_v32, %v1890_v2 }
 0x377   : > { %v17204_v29 = vcombine.low %v1887_v8, %v1891_v9  ;;  %v1919_v32 = vld [vmem:[%s18438_s12 + $0x3148] sm:$0xff] }
 0x378   : > { %v1923_v2 = vld [vmem:[%s18438_s12 + $0x3168] sm:$0xff] }
 0x379   : > { %13338 = vmatpush1.bf16.msra.mxu0 %v17162_v15  ;;  %13994 = vmatpush1.bf16.msra.mxu1 %v17164_v16  ;;  %v17205_v15 = vcombine.high %v1887_v8, %v1891_v9  ;;  %v1894_v16 = vld [vmem:[%s18438_s12 + $0x3080] sm:$0xff]  ;;  %v17228_v8 = vcombine.low %v1911_v53, %v1915_v54 }
 0x37a   : > { %13339 = vmatprep.subr.bf16.mxu0 %v17171_v3  ;;  %13995 = vmatprep.subr.bf16.mxu1 %v17173_v19  ;;  %v1898_v3 = vld [vmem:[%s18438_s12 + $0x30a0] sm:$0xff]  ;;  %v19426_v19 = vrot.slane %v2556_v4, %v18478_v22 }
 0x37b   : > { %v17210_v12 = vcombine.low %v1894_v16, %v1898_v3 }
 0x37d   : > { %13340 = vmatpush1.bf16.msra.mxu0 %v17170_v30  ;;  %13996 = vmatpush1.bf16.msra.mxu1 %v17172_v31  ;;  %v17211_v30 = vcombine.high %v1894_v16, %v1898_v3  ;;  %v17213_v31 = vcombine.high %v1895_v21, %v1899_v23  ;;  %v1931_v16 = vld [vmem:[%s18438_s12 + $0x31a8] sm:$0xff]  ;;  %v17236_v21 = vcombine.low %v1919_v32, %v1923_v2 }
 0x37e   : > { %13341 = vmatprep.subr.bf16.mxu0 %v17179_v41  ;;  %13997 = vmatprep.subr.bf16.mxu1 %v17181_v36  ;;  %v1902_v41 = vld [vmem:[%s18438_s12 + $0x30c0] sm:$0xff] }
 0x37f   : > { %v1906_v36 = vld [vmem:[%s18438_s12 + $0x30e0] sm:$0xff] }
 0x380   : > { %v17218_v57 = vcombine.low %v1902_v41, %v1906_v36 }
 0x381   : > { %13342 = vmatpush1.bf16.msra.mxu0 %v17178_v46  ;;  %13998 = vmatpush1.bf16.msra.mxu1 %v17180_v47  ;;  %v17219_v46 = vcombine.high %v1902_v41, %v1906_v36  ;;  %v17221_v47 = vcombine.high %v1903_v37, %v1907_v62  ;;  %v1939_v41 = vld [vmem:[%s18438_s12 + $0x31e8] sm:$0xff] }
 0x382   : > { %13343 = vmatprep.subr.bf16.mxu0 %v17187_v50  ;;  %13999 = vmatprep.subr.bf16.mxu1 %v17189_v49  ;;  %v1910_v50 = vld [vmem:[%s18438_s12 + $0x3100] sm:$0xff] }
 0x383   : > { %v1914_v49 = vld [vmem:[%s18438_s12 + $0x3120] sm:$0xff] }
 0x384   : > { %v17226_v4 = vcombine.low %v1910_v50, %v1914_v49 }
 0x385   : > { %13344 = vmatpush1.bf16.msra.mxu0 %v17186_v59  ;;  %14000 = vmatpush1.bf16.msra.mxu1 %v17188_v18  ;;  %v17227_v59 = vcombine.high %v1910_v50, %v1914_v49  ;;  %v17229_v18 = vcombine.high %v1911_v53, %v1915_v54  ;;  %v1947_v50 = vld [vmem:[%s18438_s12 + $0x3228] sm:$0xff] }
 0x386   : > { %13354 = vmatprep.subr.bf16.mxu0 %v17195_v63  ;;  %14010 = vmatprep.subr.bf16.mxu1 %v17197_v0  ;;  %v1918_v63 = vld [vmem:[%s18438_s12 + $0x3140] sm:$0xff] }
 0x387   : > { %v1922_v0 = vld [vmem:[%s18438_s12 + $0x3160] sm:$0xff] }
 0x388   : > { %13346 = vmatmul.mubr.bf16.vlgmr.msra.gmra.mrb[0].mxu0 %v19419_v5  ;;  %14002 = vmatmul.mubr.bf16.vlgmr.msra.gmra.mrb[0].mxu1 %v19419_v5  ;;  %v17235_v9 = vcombine.high %v1918_v63, %v1922_v0  ;;  %v17234_v3 = vcombine.low %v1918_v63, %v1922_v0  ;;  %v1955_v63 = vld [vmem:[%s18438_s12 + $0x3268] sm:$0xff] }
 0x389   : > { %13355 = vmatpush1.bf16.msra.mxu0 %v17194_v10  ;;  %14011 = vmatpush1.bf16.msra.mxu1 %v17196_v11  ;;  %v17237_v10 = vcombine.high %v1919_v32, %v1923_v2  ;;  %v1926_v11 = vld [vmem:[%s18438_s12 + $0x3180] sm:$0xff] }
 0x38a   : > { %13356 = vmatprep.subr.bf16.mxu0 %v17203_v14  ;;  %14012 = vmatprep.subr.bf16.mxu1 %v17205_v15  ;;  %v1930_v14 = vld [vmem:[%s18438_s12 + $0x31a0] sm:$0xff]  ;;  %v1927_v15 = vld [vmem:[%s18438_s12 + $0x3188] sm:$0xff] }
 0x38b   : > { %13386 = vmatprep.mubr.bf16.mxu0 %v19426_v19  ;;  %14042 = vmatprep.mubr.bf16.mxu1 %v19426_v19  ;;  %v17243_v23 = vcombine.high %v1926_v11, %v1930_v14  ;;  %v17242_v36 = vcombine.low %v1926_v11, %v1930_v14  ;;  %v17244_v37 = vcombine.low %v1927_v15, %v1931_v16  ;;  %v1963_v11 = vld [vmem:[%s18438_s12 + $0x32a8] sm:$0xff] }
 0x38d   : > { %13357 = vmatpush1.bf16.msra.mxu0 %v17202_v24  ;;  %14013 = vmatpush1.bf16.msra.mxu1 %v17204_v29  ;;  %v17245_v24 = vcombine.high %v1927_v15, %v1931_v16  ;;  %v1934_v29 = vld [vmem:[%s18438_s12 + $0x31c0] sm:$0xff] }
 0x38e   : > { %13358 = vmatprep.subr.bf16.mxu0 %v17211_v30  ;;  %14014 = vmatprep.subr.bf16.mxu1 %v17213_v31  ;;  %v1938_v30 = vld [vmem:[%s18438_s12 + $0x31e0] sm:$0xff]  ;;  %v1935_v31 = vld [vmem:[%s18438_s12 + $0x31c8] sm:$0xff] }
 0x38f   : > { %v17251_v62 = vcombine.high %v1934_v29, %v1938_v30  ;;  %v17250_v49 = vcombine.low %v1934_v29, %v1938_v30  ;;  %v17252_v53 = vcombine.low %v1935_v31, %v1939_v41  ;;  %v1971_v29 = vld [vmem:[%s18438_s12 + $0x32e8] sm:$0xff] }
 0x391   : > { %13359 = vmatpush1.bf16.msra.mxu0 %v17210_v12  ;;  %14015 = vmatpush1.bf16.msra.mxu1 %v17212_v44  ;;  %v17253_v12 = vcombine.high %v1935_v31, %v1939_v41  ;;  %v1942_v44 = vld [vmem:[%s18438_s12 + $0x3200] sm:$0xff] }
 0x392   : > { %13360 = vmatprep.subr.bf16.mxu0 %v17219_v46  ;;  %14016 = vmatprep.subr.bf16.mxu1 %v17221_v47  ;;  %v1946_v46 = vld [vmem:[%s18438_s12 + $0x3220] sm:$0xff]  ;;  %v1943_v47 = vld [vmem:[%s18438_s12 + $0x3208] sm:$0xff] }
 0x393   : > { %v17259_v54 = vcombine.high %v1942_v44, %v1946_v46  ;;  %v17258_v0 = vcombine.low %v1942_v44, %v1946_v46  ;;  %v17260_v32 = vcombine.low %v1943_v47, %v1947_v50  ;;  %v1979_v44 = vld [vmem:[%s18438_s12 + $0x3328] sm:$0xff] }
 0x395   : > { %13361 = vmatpush1.bf16.msra.mxu0 %v17218_v57  ;;  %14017 = vmatpush1.bf16.msra.mxu1 %v17220_v58  ;;  %v17261_v57 = vcombine.high %v1943_v47, %v1947_v50  ;;  %v1950_v58 = vld [vmem:[%s18438_s12 + $0x3240] sm:$0xff] }
 0x396   : > { %13362 = vmatprep.subr.bf16.mxu0 %v17227_v59  ;;  %14018 = vmatprep.subr.bf16.mxu1 %v17229_v18  ;;  %v1954_v59 = vld [vmem:[%s18438_s12 + $0x3260] sm:$0xff]  ;;  %v1951_v18 = vld [vmem:[%s18438_s12 + $0x3248] sm:$0xff] }
 0x397   : > { %v17267_v2 = vcombine.high %v1950_v58, %v1954_v59  ;;  %v17266_v14 = vcombine.low %v1950_v58, %v1954_v59  ;;  %v17268_v15 = vcombine.low %v1951_v18, %v1955_v63  ;;  %v1987_v58 = vld [vmem:[%s18438_s12 + $0x3368] sm:$0xff] }
 0x399   : > { %13363 = vmatpush1.bf16.msra.mxu0 %v17226_v4  ;;  %14019 = vmatpush1.bf16.msra.mxu1 %v17228_v8  ;;  %v17269_v4 = vcombine.high %v1951_v18, %v1955_v63  ;;  %v1958_v8 = vld [vmem:[%s18438_s12 + $0x3280] sm:$0xff] }
 0x39a   : > { %13364 = vmatprep.subr.bf16.mxu0 %v17235_v9  ;;  %14020 = vmatprep.subr.bf16.mxu1 %v17237_v10  ;;  %v1962_v9 = vld [vmem:[%s18438_s12 + $0x32a0] sm:$0xff]  ;;  %v1959_v10 = vld [vmem:[%s18438_s12 + $0x3288] sm:$0xff] }
 0x39b   : > { %v17275_v16 = vcombine.high %v1958_v8, %v1962_v9  ;;  %v17274_v30 = vcombine.low %v1958_v8, %v1962_v9  ;;  %v17276_v31 = vcombine.low %v1959_v10, %v1963_v11  ;;  %v1995_v8 = vld [vmem:[%s18438_s12 + $0x33a8] sm:$0xff] }
 0x39d   : > { %13365 = vmatpush1.bf16.msra.mxu0 %v17234_v3  ;;  %14021 = vmatpush1.bf16.msra.mxu1 %v17236_v21  ;;  %v17277_v3 = vcombine.high %v1959_v10, %v1963_v11  ;;  %v1966_v21 = vld [vmem:[%s18438_s12 + $0x32c0] sm:$0xff] }
 0x39e   : > { %13366 = vmatprep.subr.bf16.mxu0 %v17243_v23  ;;  %14022 = vmatprep.subr.bf16.mxu1 %v17245_v24  ;;  %v1970_v23 = vld [vmem:[%s18438_s12 + $0x32e0] sm:$0xff]  ;;  %v1967_v24 = vld [vmem:[%s18438_s12 + $0x32c8] sm:$0xff] }
 0x39f   : > { %v17283_v41 = vcombine.high %v1966_v21, %v1970_v23  ;;  %v17282_v46 = vcombine.low %v1966_v21, %v1970_v23  ;;  %v17284_v47 = vcombine.low %v1967_v24, %v1971_v29  ;;  %v2003_v21 = vld [vmem:[%s18438_s12 + $0x33e8] sm:$0xff] }
 0x3a1   : > { %13367 = vmatpush1.bf16.msra.mxu0 %v17242_v36  ;;  %14023 = vmatpush1.bf16.msra.mxu1 %v17244_v37  ;;  %v17285_v36 = vcombine.high %v1967_v24, %v1971_v29  ;;  %v1974_v37 = vld [vmem:[%s18438_s12 + $0x3300] sm:$0xff] }
 0x3a2   : > { %13368 = vmatprep.subr.bf16.mxu0 %v17251_v62  ;;  %14024 = vmatprep.subr.bf16.mxu1 %v17253_v12  ;;  %v1978_v62 = vld [vmem:[%s18438_s12 + $0x3320] sm:$0xff]  ;;  %v1975_v12 = vld [vmem:[%s18438_s12 + $0x3308] sm:$0xff] }
 0x3a3   : > { %v17291_v50 = vcombine.high %v1974_v37, %v1978_v62  ;;  %v17290_v59 = vcombine.low %v1974_v37, %v1978_v62  ;;  %v17292_v18 = vcombine.low %v1975_v12, %v1979_v44  ;;  %v2011_v37 = vld [vmem:[%s18438_s12 + $0x3428] sm:$0xff] }
 0x3a5   : > { %13369 = vmatpush1.bf16.msra.mxu0 %v17250_v49  ;;  %14025 = vmatpush1.bf16.msra.mxu1 %v17252_v53  ;;  %v17293_v49 = vcombine.high %v1975_v12, %v1979_v44  ;;  %v1982_v53 = vld [vmem:[%s18438_s12 + $0x3340] sm:$0xff] }
 0x3a6   : > { %13370 = vmatprep.subr.bf16.mxu0 %v17259_v54  ;;  %14026 = vmatprep.subr.bf16.mxu1 %v17261_v57  ;;  %v1986_v54 = vld [vmem:[%s18438_s12 + $0x3360] sm:$0xff]  ;;  %v1983_v57 = vld [vmem:[%s18438_s12 + $0x3348] sm:$0xff] }
 0x3a7   : > { %v17299_v63 = vcombine.high %v1982_v53, %v1986_v54  ;;  %v17298_v9 = vcombine.low %v1982_v53, %v1986_v54  ;;  %v17300_v10 = vcombine.low %v1983_v57, %v1987_v58  ;;  %v2015_v53 = vld [vmem:[%s18438_s12 + $0x3448] sm:$0xff] }
 0x3a8   : > { %v2019_v54 = vld [vmem:[%s18438_s12 + $0x3468] sm:$0xff] }
 0x3a9   : > { %13371 = vmatpush1.bf16.msra.mxu0 %v17258_v0  ;;  %14027 = vmatpush1.bf16.msra.mxu1 %v17260_v32  ;;  %v17301_v0 = vcombine.high %v1983_v57, %v1987_v58  ;;  %v1990_v32 = vld [vmem:[%s18438_s12 + $0x3380] sm:$0xff] }
 0x3aa   : > { %13372 = vmatprep.subr.bf16.mxu0 %v17267_v2  ;;  %14028 = vmatprep.subr.bf16.mxu1 %v17269_v4  ;;  %v1994_v2 = vld [vmem:[%s18438_s12 + $0x33a0] sm:$0xff]  ;;  %v1991_v4 = vld [vmem:[%s18438_s12 + $0x3388] sm:$0xff] }
 0x3ab   : > { %v17307_v11 = vcombine.high %v1990_v32, %v1994_v2  ;;  %v17306_v23 = vcombine.low %v1990_v32, %v1994_v2  ;;  %v17308_v24 = vcombine.low %v1991_v4, %v1995_v8  ;;  %v19502_v32 = vcombine.high %v19426_v19, %v19426_v19  ;;  %v2027_v2 = vld [vmem:[%s18438_s12 + $0x34a8] sm:$0xff] }
 0x3ad   : > { %13373 = vmatpush1.bf16.msra.mxu0 %v17266_v14  ;;  %14029 = vmatpush1.bf16.msra.mxu1 %v17268_v15  ;;  %v17309_v14 = vcombine.high %v1991_v4, %v1995_v8  ;;  %v1998_v15 = vld [vmem:[%s18438_s12 + $0x33c0] sm:$0xff]  ;;  %v17332_v8 = vcombine.low %v2015_v53, %v2019_v54 }
 0x3ae   : > { %13374 = vmatprep.subr.bf16.mxu0 %v17275_v16  ;;  %14030 = vmatprep.subr.bf16.mxu1 %v17277_v3  ;;  %v2002_v16 = vld [vmem:[%s18438_s12 + $0x33e0] sm:$0xff]  ;;  %v1999_v3 = vld [vmem:[%s18438_s12 + $0x33c8] sm:$0xff] }
 0x3af   : > { %v17315_v29 = vcombine.high %v1998_v15, %v2002_v16  ;;  %v17314_v62 = vcombine.low %v1998_v15, %v2002_v16  ;;  %v17316_v12 = vcombine.low %v1999_v3, %v2003_v21  ;;  %v2031_v15 = vld [vmem:[%s18438_s12 + $0x34c8] sm:$0xff] }
 0x3b0   : > { %v2035_v16 = vld [vmem:[%s18438_s12 + $0x34e8] sm:$0xff] }
 0x3b1   : > { %13375 = vmatpush1.bf16.msra.mxu0 %v17274_v30  ;;  %14031 = vmatpush1.bf16.msra.mxu1 %v17276_v31  ;;  %v17317_v30 = vcombine.high %v1999_v3, %v2003_v21  ;;  %v2006_v31 = vld [vmem:[%s18438_s12 + $0x3400] sm:$0xff] }
 0x3b2   : > { %13376 = vmatprep.subr.bf16.mxu0 %v17283_v41  ;;  %14032 = vmatprep.subr.bf16.mxu1 %v17285_v36  ;;  %v2010_v41 = vld [vmem:[%s18438_s12 + $0x3420] sm:$0xff]  ;;  %v2007_v36 = vld [vmem:[%s18438_s12 + $0x3408] sm:$0xff] }
 0x3b3   : > { %v17323_v44 = vcombine.high %v2006_v31, %v2010_v41  ;;  %v17322_v57 = vcombine.low %v2006_v31, %v2010_v41  ;;  %v17324_v58 = vcombine.low %v2007_v36, %v2011_v37  ;;  %v2039_v31 = vld [vmem:[%s18438_s12 + $0x3508] sm:$0xff] }
 0x3b4   : > { %v2043_v41 = vld [vmem:[%s18438_s12 + $0x3528] sm:$0xff] }
 0x3b5   : > { %13377 = vmatpush1.bf16.msra.mxu0 %v17282_v46  ;;  %14033 = vmatpush1.bf16.msra.mxu1 %v17284_v47  ;;  %v17325_v46 = vcombine.high %v2007_v36, %v2011_v37  ;;  %v2014_v47 = vld [vmem:[%s18438_s12 + $0x3440] sm:$0xff]  ;;  %v17348_v37 = vcombine.low %v2031_v15, %v2035_v16 }
 0x3b6   : > { %13378 = vmatprep.subr.bf16.mxu0 %v17291_v50  ;;  %14034 = vmatprep.subr.bf16.mxu1 %v17293_v49  ;;  %v2018_v50 = vld [vmem:[%s18438_s12 + $0x3460] sm:$0xff]  ;;  %v19494_v49 = vrot.slane %v19409_v55, %v18478_v22  ;;  %v2023_v55 = vld [vmem:[%s18438_s12 + $0x3488] sm:$0xff] }
 0x3b7   : > { %v17330_v4 = vcombine.low %v2014_v47, %v2018_v50  ;;  %v17340_v21 = vcombine.low %v2023_v55, %v2027_v2 }
 0x3b9   : > { %13379 = vmatpush1.bf16.msra.mxu0 %v17290_v59  ;;  %14035 = vmatpush1.bf16.msra.mxu1 %v17292_v18  ;;  %v17331_v59 = vcombine.high %v2014_v47, %v2018_v50  ;;  %v17333_v18 = vcombine.high %v2015_v53, %v2019_v54  ;;  %v2047_v47 = vld [vmem:[%s18438_s12 + $0x3548] sm:$0xff]  ;;  %v17356_v54 = vcombine.low %v2039_v31, %v2043_v41 }
 0x3ba   : > { %13380 = vmatprep.subr.bf16.mxu0 %v17299_v63  ;;  %14036 = vmatprep.subr.bf16.mxu1 %v17301_v0  ;;  %v2022_v63 = vld [vmem:[%s18438_s12 + $0x3480] sm:$0xff]  ;;  %v2051_v50 = vld [vmem:[%s18438_s12 + $0x3568] sm:$0xff] }
 0x3bb   : > { %v2026_v0 = vld [vmem:[%s18438_s12 + $0x34a0] sm:$0xff] }
 0x3bc   : > { %v17338_v3 = vcombine.low %v2022_v63, %v2026_v0 }
 0x3bd   : > { %13381 = vmatpush1.bf16.msra.mxu0 %v17298_v9  ;;  %14037 = vmatpush1.bf16.msra.mxu1 %v17300_v10  ;;  %v17339_v9 = vcombine.high %v2022_v63, %v2026_v0  ;;  %v17341_v10 = vcombine.high %v2023_v55, %v2027_v2  ;;  %v2055_v63 = vld [vmem:[%s18438_s12 + $0x3588] sm:$0xff]  ;;  %v17364_v2 = vcombine.low %v2047_v47, %v2051_v50 }
 0x3be   : > { %13382 = vmatprep.subr.bf16.mxu0 %v17307_v11  ;;  %14038 = vmatprep.subr.bf16.mxu1 %v17309_v14  ;;  %v2030_v11 = vld [vmem:[%s18438_s12 + $0x34c0] sm:$0xff]  ;;  %v2059_v0 = vld [vmem:[%s18438_s12 + $0x35a8] sm:$0xff] }
 0x3bf   : > { %v2034_v14 = vld [vmem:[%s18438_s12 + $0x34e0] sm:$0xff] }
 0x3c0   : > { %v17346_v36 = vcombine.low %v2030_v11, %v2034_v14 }
 0x3c1   : > { %13383 = vmatpush1.bf16.msra.mxu0 %v17306_v23  ;;  %14039 = vmatpush1.bf16.msra.mxu1 %v17308_v24  ;;  %v17347_v23 = vcombine.high %v2030_v11, %v2034_v14  ;;  %v17349_v24 = vcombine.high %v2031_v15, %v2035_v16  ;;  %v2063_v11 = vld [vmem:[%s18438_s12 + $0x35c8] sm:$0xff]  ;;  %v17372_v16 = vcombine.low %v2055_v63, %v2059_v0 }
 0x3c2   : > { %13384 = vmatprep.subr.bf16.mxu0 %v17315_v29  ;;  %14040 = vmatprep.subr.bf16.mxu1 %v17317_v30  ;;  %v2038_v29 = vld [vmem:[%s18438_s12 + $0x3500] sm:$0xff]  ;;  %v2067_v14 = vld [vmem:[%s18438_s12 + $0x35e8] sm:$0xff] }
 0x3c3   : > { %v2042_v30 = vld [vmem:[%s18438_s12 + $0x3520] sm:$0xff] }
 0x3c4   : > { %v17354_v53 = vcombine.low %v2038_v29, %v2042_v30 }
 0x3c5   : > { %13385 = vmatpush1.bf16.msra.mxu0 %v17314_v62  ;;  %14041 = vmatpush1.bf16.msra.mxu1 %v17316_v12  ;;  %v17355_v62 = vcombine.high %v2038_v29, %v2042_v30  ;;  %v17357_v12 = vcombine.high %v2039_v31, %v2043_v41  ;;  %v2071_v29 = vld [vmem:[%s18438_s12 + $0x3608] sm:$0xff]  ;;  %v17380_v41 = vcombine.low %v2063_v11, %v2067_v14 }
 0x3c6   : > { %13395 = vmatprep.subr.bf16.mxu0 %v17323_v44  ;;  %14051 = vmatprep.subr.bf16.mxu1 %v17325_v46  ;;  %v2046_v44 = vld [vmem:[%s18438_s12 + $0x3540] sm:$0xff]  ;;  %v2075_v30 = vld [vmem:[%s18438_s12 + $0x3628] sm:$0xff] }
 0x3c7   : > { %v2050_v46 = vld [vmem:[%s18438_s12 + $0x3560] sm:$0xff] }
 0x3c8   : > { %13387 = vmatmul.mubr.bf16.vlgmr.msra.gmra.mrb[0].mxu0 %v19494_v49  ;;  %14043 = vmatmul.mubr.bf16.vlgmr.msra.gmra.mrb[0].mxu1 %v19494_v49  ;;  %v17362_v55 = vcombine.low %v2046_v44, %v2050_v46 }
 0x3c9   : > { %13396 = vmatpush1.bf16.msra.mxu0 %v17322_v57  ;;  %14052 = vmatpush1.bf16.msra.mxu1 %v17324_v58  ;;  %v17363_v57 = vcombine.high %v2046_v44, %v2050_v46  ;;  %v17365_v58 = vcombine.high %v2047_v47, %v2051_v50  ;;  %v2079_v44 = vld [vmem:[%s18438_s12 + $0x3648] sm:$0xff]  ;;  %v17388_v50 = vcombine.low %v2071_v29, %v2075_v30 }
 0x3ca   : > { %13397 = vmatprep.subr.bf16.mxu0 %v17331_v59  ;;  %14053 = vmatprep.subr.bf16.mxu1 %v17333_v18  ;;  %v2054_v59 = vld [vmem:[%s18438_s12 + $0x3580] sm:$0xff]  ;;  %v2083_v46 = vld [vmem:[%s18438_s12 + $0x3668] sm:$0xff] }
 0x3cb   : > { %13427 = vmatprep.mubr.bf16.mxu0 %v19502_v32  ;;  %14083 = vmatprep.mubr.bf16.mxu1 %v19502_v32  ;;  %v2058_v18 = vld [vmem:[%s18438_s12 + $0x35a0] sm:$0xff] }
 0x3cc   : > { %v17370_v15 = vcombine.low %v2054_v59, %v2058_v18 }
 0x3cd   : > { %13398 = vmatpush1.bf16.msra.mxu0 %v17330_v4  ;;  %14054 = vmatpush1.bf16.msra.mxu1 %v17332_v8  ;;  %v17371_v4 = vcombine.high %v2054_v59, %v2058_v18  ;;  %v17373_v8 = vcombine.high %v2055_v63, %v2059_v0  ;;  %v2087_v59 = vld [vmem:[%s18438_s12 + $0x3688] sm:$0xff]  ;;  %v17396_v0 = vcombine.low %v2079_v44, %v2083_v46 }
 0x3ce   : > { %13399 = vmatprep.subr.bf16.mxu0 %v17339_v9  ;;  %14055 = vmatprep.subr.bf16.mxu1 %v17341_v10  ;;  %v2062_v9 = vld [vmem:[%s18438_s12 + $0x35c0] sm:$0xff]  ;;  %v2091_v18 = vld [vmem:[%s18438_s12 + $0x36a8] sm:$0xff] }
 0x3cf   : > { %v2066_v10 = vld [vmem:[%s18438_s12 + $0x35e0] sm:$0xff] }
 0x3d0   : > { %v17378_v31 = vcombine.low %v2062_v9, %v2066_v10 }
 0x3d1   : > { %13400 = vmatpush1.bf16.msra.mxu0 %v17338_v3  ;;  %14056 = vmatpush1.bf16.msra.mxu1 %v17340_v21  ;;  %v17379_v3 = vcombine.high %v2062_v9, %v2066_v10  ;;  %v17381_v21 = vcombine.high %v2063_v11, %v2067_v14  ;;  %v2095_v9 = vld [vmem:[%s18438_s12 + $0x36c8] sm:$0xff]  ;;  %v17404_v14 = vcombine.low %v2087_v59, %v2091_v18 }
 0x3d2   : > { %13401 = vmatprep.subr.bf16.mxu0 %v17347_v23  ;;  %14057 = vmatprep.subr.bf16.mxu1 %v17349_v24  ;;  %v2070_v23 = vld [vmem:[%s18438_s12 + $0x3600] sm:$0xff]  ;;  %v2099_v10 = vld [vmem:[%s18438_s12 + $0x36e8] sm:$0xff] }
 0x3d3   : > { %v2074_v24 = vld [vmem:[%s18438_s12 + $0x3620] sm:$0xff] }
 0x3d4   : > { %v17386_v47 = vcombine.low %v2070_v23, %v2074_v24 }
 0x3d5   : > { %13402 = vmatpush1.bf16.msra.mxu0 %v17346_v36  ;;  %14058 = vmatpush1.bf16.msra.mxu1 %v17348_v37  ;;  %v17387_v36 = vcombine.high %v2070_v23, %v2074_v24  ;;  %v17389_v37 = vcombine.high %v2071_v29, %v2075_v30  ;;  %v2103_v23 = vld [vmem:[%s18438_s12 + $0x3708] sm:$0xff]  ;;  %v17412_v30 = vcombine.low %v2095_v9, %v2099_v10 }
 0x3d6   : > { %13403 = vmatprep.subr.bf16.mxu0 %v17355_v62  ;;  %14059 = vmatprep.subr.bf16.mxu1 %v17357_v12  ;;  %v2078_v62 = vld [vmem:[%s18438_s12 + $0x3640] sm:$0xff]  ;;  %v2107_v24 = vld [vmem:[%s18438_s12 + $0x3728] sm:$0xff] }
 0x3d7   : > { %v2082_v12 = vld [vmem:[%s18438_s12 + $0x3660] sm:$0xff] }
 0x3d8   : > { %v17394_v63 = vcombine.low %v2078_v62, %v2082_v12 }
 0x3d9   : > { %13404 = vmatpush1.bf16.msra.mxu0 %v17354_v53  ;;  %14060 = vmatpush1.bf16.msra.mxu1 %v17356_v54  ;;  %v17395_v53 = vcombine.high %v2078_v62, %v2082_v12  ;;  %v17397_v54 = vcombine.high %v2079_v44, %v2083_v46  ;;  %v2111_v62 = vld [vmem:[%s18438_s12 + $0x3748] sm:$0xff]  ;;  %v17420_v46 = vcombine.low %v2103_v23, %v2107_v24 }
 0x3da   : > { %13405 = vmatprep.subr.bf16.mxu0 %v17363_v57  ;;  %14061 = vmatprep.subr.bf16.mxu1 %v17365_v58  ;;  %v2086_v57 = vld [vmem:[%s18438_s12 + $0x3680] sm:$0xff]  ;;  %v2115_v12 = vld [vmem:[%s18438_s12 + $0x3768] sm:$0xff] }
 0x3db   : > { %v2090_v58 = vld [vmem:[%s18438_s12 + $0x36a0] sm:$0xff] }
 0x3dc   : > { %v17402_v11 = vcombine.low %v2086_v57, %v2090_v58 }
 0x3dd   : > { %13406 = vmatpush1.bf16.msra.mxu0 %v17362_v55  ;;  %14062 = vmatpush1.bf16.msra.mxu1 %v17364_v2  ;;  %v17403_v55 = vcombine.high %v2086_v57, %v2090_v58  ;;  %v17405_v2 = vcombine.high %v2087_v59, %v2091_v18  ;;  %v2119_v57 = vld [vmem:[%s18438_s12 + $0x3788] sm:$0xff]  ;;  %v17428_v18 = vcombine.low %v2111_v62, %v2115_v12 }
 0x3de   : > { %13407 = vmatprep.subr.bf16.mxu0 %v17371_v4  ;;  %14063 = vmatprep.subr.bf16.mxu1 %v17373_v8  ;;  %v2094_v4 = vld [vmem:[%s18438_s12 + $0x36c0] sm:$0xff]  ;;  %v2123_v58 = vld [vmem:[%s18438_s12 + $0x37a8] sm:$0xff] }
 0x3df   : > { %v2098_v8 = vld [vmem:[%s18438_s12 + $0x36e0] sm:$0xff] }
 0x3e0   : > { %v17410_v29 = vcombine.low %v2094_v4, %v2098_v8 }
 0x3e1   : > { %13408 = vmatpush1.bf16.msra.mxu0 %v17370_v15  ;;  %14064 = vmatpush1.bf16.msra.mxu1 %v17372_v16  ;;  %v17411_v15 = vcombine.high %v2094_v4, %v2098_v8  ;;  %v17413_v16 = vcombine.high %v2095_v9, %v2099_v10  ;;  %v2541_v4 = vcombine.high %v19403_v45, %v19403_v45  ;;  %v2127_v8 = vld [vmem:[%s18438_s12 + $0x37c8] sm:$0xff] }
 0x3e2   : > { %13409 = vmatprep.subr.bf16.mxu0 %v17379_v3  ;;  %14065 = vmatprep.subr.bf16.mxu1 %v17381_v21  ;;  %v2102_v3 = vld [vmem:[%s18438_s12 + $0x3700] sm:$0xff]  ;;  %v2131_v9 = vld [vmem:[%s18438_s12 + $0x37e8] sm:$0xff] }
 0x3e3   : > { %v2106_v21 = vld [vmem:[%s18438_s12 + $0x3720] sm:$0xff]  ;;  %v2135_v45 = vld [vmem:[%s18438_s12 + $0x3808] sm:$0xff] }
 0x3e4   : > { %v17418_v44 = vcombine.low %v2102_v3, %v2106_v21 }
 0x3e5   : > { %13410 = vmatpush1.bf16.msra.mxu0 %v17378_v31  ;;  %14066 = vmatpush1.bf16.msra.mxu1 %v17380_v41  ;;  %v17419_v31 = vcombine.high %v2102_v3, %v2106_v21  ;;  %v17421_v41 = vcombine.high %v2103_v23, %v2107_v24  ;;  %v2138_v3 = vld [vmem:[%s18438_s12 + $0x3820] sm:$0xff]  ;;  %v19567_v21 = vrot.slane %v2541_v4, %v18478_v22  ;;  %v2139_v23 = vld [vmem:[%s18438_s12 + $0x3828] sm:$0xff] }
 0x3e6   : > { %13411 = vmatprep.subr.bf16.mxu0 %v17387_v36  ;;  %14067 = vmatprep.subr.bf16.mxu1 %v17389_v37  ;;  %v2110_v36 = vld [vmem:[%s18438_s12 + $0x3740] sm:$0xff] }
 0x3e7   : > { %v2114_v37 = vld [vmem:[%s18438_s12 + $0x3760] sm:$0xff] }
 0x3e8   : > { %v17426_v59 = vcombine.low %v2110_v36, %v2114_v37  ;;  %v2158_v4 = vld [vmem:[%s18438_s12 + $0x38c0] sm:$0xff] }
 0x3e9   : > { %13412 = vmatpush1.bf16.msra.mxu0 %v17386_v47  ;;  %14068 = vmatpush1.bf16.msra.mxu1 %v17388_v50  ;;  %v17427_v47 = vcombine.high %v2110_v36, %v2114_v37  ;;  %v17429_v50 = vcombine.high %v2111_v62, %v2115_v12  ;;  %v2146_v36 = vld [vmem:[%s18438_s12 + $0x3860] sm:$0xff]  ;;  %v2557_v37 = vcombine.high %v19567_v21, %v19567_v21  ;;  %v2143_v12 = vld [vmem:[%s18438_s12 + $0x3848] sm:$0xff] }
 0x3ea   : > { %13413 = vmatprep.subr.bf16.mxu0 %v17395_v53  ;;  %14069 = vmatprep.subr.bf16.mxu1 %v17397_v54  ;;  %v2118_v53 = vld [vmem:[%s18438_s12 + $0x3780] sm:$0xff]  ;;  %v19577_v62 = vcombine.high %v19494_v49, %v19494_v49 }
 0x3eb   : > { %v2122_v54 = vld [vmem:[%s18438_s12 + $0x37a0] sm:$0xff] }
 0x3ec   : > { %v17434_v10 = vcombine.low %v2118_v53, %v2122_v54 }
 0x3ed   : > { %13414 = vmatpush1.bf16.msra.mxu0 %v17394_v63  ;;  %14070 = vmatpush1.bf16.msra.mxu1 %v17396_v0  ;;  %v17435_v63 = vcombine.high %v2118_v53, %v2122_v54  ;;  %v17437_v0 = vcombine.high %v2119_v57, %v2123_v58  ;;  %v2150_v54 = vld [vmem:[%s18438_s12 + $0x3880] sm:$0xff] }
 0x3ee   : > { %13415 = vmatprep.subr.bf16.mxu0 %v17403_v55  ;;  %14071 = vmatprep.subr.bf16.mxu1 %v17405_v2  ;;  %v2126_v55 = vld [vmem:[%s18438_s12 + $0x37c0] sm:$0xff] }
 0x3ef   : > { %v2130_v2 = vld [vmem:[%s18438_s12 + $0x37e0] sm:$0xff] }
 0x3f0   : > { %v17442_v24 = vcombine.low %v2126_v55, %v2130_v2 }
 0x3f1   : > { %13416 = vmatpush1.bf16.msra.mxu0 %v17402_v11  ;;  %14072 = vmatpush1.bf16.msra.mxu1 %v17404_v14  ;;  %v17436_v11 = vcombine.low %v2119_v57, %v2123_v58  ;;  %v17443_v14 = vcombine.high %v2126_v55, %v2130_v2  ;;  %v2154_v57 = vld [vmem:[%s18438_s12 + $0x38a0] sm:$0xff]  ;;  %v19584_v58 = vrot.slane %v2557_v37, %v18478_v22 }
 0x3f2   : > { %13417 = vmatprep.subr.bf16.mxu0 %v17411_v15  ;;  %14073 = vmatprep.subr.bf16.mxu1 %v17413_v16  ;;  %v17445_v15 = vcombine.high %v2127_v8, %v2131_v9  ;;  %v2134_v16 = vld [vmem:[%s18438_s12 + $0x3800] sm:$0xff]  ;;  %v17467_v55 = vcombine.high %v2150_v54, %v2154_v57 }
 0x3f3   : > { %v2178_v37 = vld [vmem:[%s18438_s12 + $0x3960] sm:$0xff] }
 0x3f5   : > { %13418 = vmatpush1.bf16.msra.mxu0 %v17410_v29  ;;  %14074 = vmatpush1.bf16.msra.mxu1 %v17412_v30  ;;  %v17444_v29 = vcombine.low %v2127_v8, %v2131_v9  ;;  %v17451_v30 = vcombine.high %v2134_v16, %v2138_v3  ;;  %v2162_v8 = vld [vmem:[%s18438_s12 + $0x38e0] sm:$0xff]  ;;  %v2159_v9 = vld [vmem:[%s18438_s12 + $0x38c8] sm:$0xff] }
 0x3f6   : > { %13419 = vmatprep.subr.bf16.mxu0 %v17419_v31  ;;  %14075 = vmatprep.subr.bf16.mxu1 %v17421_v41  ;;  %v17453_v31 = vcombine.high %v2135_v45, %v2139_v23  ;;  %v2142_v41 = vld [vmem:[%s18438_s12 + $0x3840] sm:$0xff] }
 0x3f9   : > { %13420 = vmatpush1.bf16.msra.mxu0 %v17418_v44  ;;  %14076 = vmatpush1.bf16.msra.mxu1 %v17420_v46  ;;  %v2147_v44 = vld [vmem:[%s18438_s12 + $0x3868] sm:$0xff]  ;;  %v17450_v46 = vcombine.low %v2134_v16, %v2138_v3  ;;  %v2166_v3 = vld [vmem:[%s18438_s12 + $0x3900] sm:$0xff] }
 0x3fa   : > { %13421 = vmatprep.subr.bf16.mxu0 %v17427_v47  ;;  %14077 = vmatprep.subr.bf16.mxu1 %v17429_v50  ;;  %v17452_v47 = vcombine.low %v2135_v45, %v2139_v23  ;;  %v17459_v50 = vcombine.high %v2142_v41, %v2146_v36  ;;  %v17461_v53 = vcombine.high %v2143_v12, %v2147_v44  ;;  %v2170_v45 = vld [vmem:[%s18438_s12 + $0x3920] sm:$0xff]  ;;  %v2167_v23 = vld [vmem:[%s18438_s12 + $0x3908] sm:$0xff] }
 0x3fd   : > { %13422 = vmatpush1.bf16.msra.mxu0 %v17426_v59  ;;  %14078 = vmatpush1.bf16.msra.mxu1 %v17428_v18  ;;  %v2151_v59 = vld [vmem:[%s18438_s12 + $0x3888] sm:$0xff] }
 0x3fe   : > { %13423 = vmatprep.subr.bf16.mxu0 %v17435_v63  ;;  %14079 = vmatprep.subr.bf16.mxu1 %v17437_v0  ;;  %v2155_v18 = vld [vmem:[%s18438_s12 + $0x38a8] sm:$0xff]  ;;  %v17458_v63 = vcombine.low %v2142_v41, %v2146_v36  ;;  %v17460_v0 = vcombine.low %v2143_v12, %v2147_v44  ;;  %v2174_v36 = vld [vmem:[%s18438_s12 + $0x3940] sm:$0xff] }
 0x3ff   : > { %v17469_v2 = vcombine.high %v2151_v59, %v2155_v18  ;;  %v2175_v12 = vld [vmem:[%s18438_s12 + $0x3948] sm:$0xff] }
 0x400   : > { %v2179_v44 = vld [vmem:[%s18438_s12 + $0x3968] sm:$0xff] }
 0x401   : > { %13424 = vmatpush1.bf16.msra.mxu0 %v17434_v10  ;;  %14080 = vmatpush1.bf16.msra.mxu1 %v17436_v11  ;;  %v2163_v10 = vld [vmem:[%s18438_s12 + $0x38e8] sm:$0xff]  ;;  %v17466_v11 = vcombine.low %v2150_v54, %v2154_v57  ;;  %v2182_v54 = vld [vmem:[%s18438_s12 + $0x3980] sm:$0xff] }
 0x402   : > { %13425 = vmatprep.subr.bf16.mxu0 %v17443_v14  ;;  %14081 = vmatprep.subr.bf16.mxu1 %v17445_v15  ;;  %v17468_v14 = vcombine.low %v2151_v59, %v2155_v18  ;;  %v17475_v15 = vcombine.high %v2158_v4, %v2162_v8  ;;  %v17477_v16 = vcombine.high %v2159_v9, %v2163_v10  ;;  %v2186_v57 = vld [vmem:[%s18438_s12 + $0x39a0] sm:$0xff]  ;;  %v2183_v59 = vld [vmem:[%s18438_s12 + $0x3988] sm:$0xff] }
 0x403   : > { %v2187_v18 = vld [vmem:[%s18438_s12 + $0x39a8] sm:$0xff] }
 0x405   : > { %13426 = vmatpush1.bf16.msra.mxu0 %v17442_v24  ;;  %14082 = vmatpush1.bf16.msra.mxu1 %v17444_v29  ;;  %v2171_v24 = vld [vmem:[%s18438_s12 + $0x3928] sm:$0xff]  ;;  %v17474_v29 = vcombine.low %v2158_v4, %v2162_v8  ;;  %v2190_v4 = vld [vmem:[%s18438_s12 + $0x39c0] sm:$0xff] }
 0x406   : > { %13436 = vmatprep.subr.bf16.mxu0 %v17451_v30  ;;  %14092 = vmatprep.subr.bf16.mxu1 %v17453_v31  ;;  %v17476_v30 = vcombine.low %v2159_v9, %v2163_v10  ;;  %v17483_v31 = vcombine.high %v2166_v3, %v2170_v45  ;;  %v17485_v41 = vcombine.high %v2167_v23, %v2171_v24  ;;  %v2194_v8 = vld [vmem:[%s18438_s12 + $0x39e0] sm:$0xff]  ;;  %v2191_v9 = vld [vmem:[%s18438_s12 + $0x39c8] sm:$0xff] }
 0x407   : > { %v2195_v10 = vld [vmem:[%s18438_s12 + $0x39e8] sm:$0xff] }
 0x408   : > { %13428 = vmatmul.mubr.bf16.vlgmr.msra.gmra.mrb[0].mxu0 %v19577_v62  ;;  %14084 = vmatmul.mubr.bf16.vlgmr.msra.gmra.mrb[0].mxu1 %v19577_v62 }
 0x409   : > { %13437 = vmatpush1.bf16.msra.mxu0 %v17450_v46  ;;  %14093 = vmatpush1.bf16.msra.mxu1 %v17452_v47  ;;  %v17482_v46 = vcombine.low %v2166_v3, %v2170_v45  ;;  %v17484_v47 = vcombine.low %v2167_v23, %v2171_v24  ;;  %v2198_v3 = vld [vmem:[%s18438_s12 + $0x3a00] sm:$0xff]  ;;  %v2199_v23 = vld [vmem:[%s18438_s12 + $0x3a08] sm:$0xff] }
 0x40a   : > { %13438 = vmatprep.subr.bf16.mxu0 %v17459_v50  ;;  %14094 = vmatprep.subr.bf16.mxu1 %v17461_v53  ;;  %v17491_v50 = vcombine.high %v2174_v36, %v2178_v37  ;;  %v17493_v53 = vcombine.high %v2175_v12, %v2179_v44  ;;  %v2202_v45 = vld [vmem:[%s18438_s12 + $0x3a20] sm:$0xff]  ;;  %v2203_v24 = vld [vmem:[%s18438_s12 + $0x3a28] sm:$0xff] }
 0x40b   : > { %13468 = vmatprep.mubr.bf16.mxu0 %v19584_v58  ;;  %14124 = vmatprep.mubr.bf16.mxu1 %v19584_v58 }
 0x40d   : > { %13439 = vmatpush1.bf16.msra.mxu0 %v17458_v63  ;;  %14095 = vmatpush1.bf16.msra.mxu1 %v17460_v0  ;;  %v17490_v63 = vcombine.low %v2174_v36, %v2178_v37  ;;  %v17492_v0 = vcombine.low %v2175_v12, %v2179_v44  ;;  %v2206_v36 = vld [vmem:[%s18438_s12 + $0x3a40] sm:$0xff]  ;;  %v2207_v12 = vld [vmem:[%s18438_s12 + $0x3a48] sm:$0xff] }
 0x40e   : > { %13440 = vmatprep.subr.bf16.mxu0 %v17467_v55  ;;  %14096 = vmatprep.subr.bf16.mxu1 %v17469_v2  ;;  %v17499_v55 = vcombine.high %v2182_v54, %v2186_v57  ;;  %v17501_v2 = vcombine.high %v2183_v59, %v2187_v18  ;;  %v2210_v37 = vld [vmem:[%s18438_s12 + $0x3a60] sm:$0xff]  ;;  %v2211_v44 = vld [vmem:[%s18438_s12 + $0x3a68] sm:$0xff] }
 0x411   : > { %13441 = vmatpush1.bf16.msra.mxu0 %v17466_v11  ;;  %14097 = vmatpush1.bf16.msra.mxu1 %v17468_v14  ;;  %v17498_v11 = vcombine.low %v2182_v54, %v2186_v57  ;;  %v17500_v14 = vcombine.low %v2183_v59, %v2187_v18  ;;  %v2214_v54 = vld [vmem:[%s18438_s12 + $0x3a80] sm:$0xff]  ;;  %v2215_v59 = vld [vmem:[%s18438_s12 + $0x3a88] sm:$0xff] }
 0x412   : > { %13442 = vmatprep.subr.bf16.mxu0 %v17475_v15  ;;  %14098 = vmatprep.subr.bf16.mxu1 %v17477_v16  ;;  %v17507_v15 = vcombine.high %v2190_v4, %v2194_v8  ;;  %v17509_v16 = vcombine.high %v2191_v9, %v2195_v10  ;;  %v2218_v57 = vld [vmem:[%s18438_s12 + $0x3aa0] sm:$0xff]  ;;  %v2219_v18 = vld [vmem:[%s18438_s12 + $0x3aa8] sm:$0xff] }
 0x415   : > { %13443 = vmatpush1.bf16.msra.mxu0 %v17474_v29  ;;  %14099 = vmatpush1.bf16.msra.mxu1 %v17476_v30  ;;  %v17506_v29 = vcombine.low %v2190_v4, %v2194_v8  ;;  %v17508_v30 = vcombine.low %v2191_v9, %v2195_v10  ;;  %v2222_v4 = vld [vmem:[%s18438_s12 + $0x3ac0] sm:$0xff]  ;;  %v2223_v9 = vld [vmem:[%s18438_s12 + $0x3ac8] sm:$0xff] }
 0x416   : > { %13444 = vmatprep.subr.bf16.mxu0 %v17483_v31  ;;  %14100 = vmatprep.subr.bf16.mxu1 %v17485_v41  ;;  %v17515_v31 = vcombine.high %v2198_v3, %v2202_v45  ;;  %v17517_v41 = vcombine.high %v2199_v23, %v2203_v24  ;;  %v2226_v8 = vld [vmem:[%s18438_s12 + $0x3ae0] sm:$0xff]  ;;  %v2227_v10 = vld [vmem:[%s18438_s12 + $0x3ae8] sm:$0xff] }
 0x419   : > { %13445 = vmatpush1.bf16.msra.mxu0 %v17482_v46  ;;  %14101 = vmatpush1.bf16.msra.mxu1 %v17484_v47  ;;  %v17514_v46 = vcombine.low %v2198_v3, %v2202_v45  ;;  %v17516_v47 = vcombine.low %v2199_v23, %v2203_v24  ;;  %v2230_v3 = vld [vmem:[%s18438_s12 + $0x3b00] sm:$0xff]  ;;  %v2231_v23 = vld [vmem:[%s18438_s12 + $0x3b08] sm:$0xff] }
 0x41a   : > { %13446 = vmatprep.subr.bf16.mxu0 %v17491_v50  ;;  %14102 = vmatprep.subr.bf16.mxu1 %v17493_v53  ;;  %v17523_v50 = vcombine.high %v2206_v36, %v2210_v37  ;;  %v17525_v53 = vcombine.high %v2207_v12, %v2211_v44  ;;  %v2234_v45 = vld [vmem:[%s18438_s12 + $0x3b20] sm:$0xff]  ;;  %v2235_v24 = vld [vmem:[%s18438_s12 + $0x3b28] sm:$0xff] }
 0x41d   : > { %13447 = vmatpush1.bf16.msra.mxu0 %v17490_v63  ;;  %14103 = vmatpush1.bf16.msra.mxu1 %v17492_v0  ;;  %v17522_v63 = vcombine.low %v2206_v36, %v2210_v37  ;;  %v17524_v0 = vcombine.low %v2207_v12, %v2211_v44  ;;  %v2238_v36 = vld [vmem:[%s18438_s12 + $0x3b40] sm:$0xff]  ;;  %v2239_v12 = vld [vmem:[%s18438_s12 + $0x3b48] sm:$0xff] }
 0x41e   : > { %13448 = vmatprep.subr.bf16.mxu0 %v17499_v55  ;;  %14104 = vmatprep.subr.bf16.mxu1 %v17501_v2  ;;  %v17531_v55 = vcombine.high %v2214_v54, %v2218_v57  ;;  %v17533_v2 = vcombine.high %v2215_v59, %v2219_v18  ;;  %v2242_v37 = vld [vmem:[%s18438_s12 + $0x3b60] sm:$0xff]  ;;  %v2243_v44 = vld [vmem:[%s18438_s12 + $0x3b68] sm:$0xff] }
 0x421   : > { %13449 = vmatpush1.bf16.msra.mxu0 %v17498_v11  ;;  %14105 = vmatpush1.bf16.msra.mxu1 %v17500_v14  ;;  %v17530_v11 = vcombine.low %v2214_v54, %v2218_v57  ;;  %v17532_v14 = vcombine.low %v2215_v59, %v2219_v18  ;;  %v2246_v54 = vld [vmem:[%s18438_s12 + $0x3b80] sm:$0xff]  ;;  %v2247_v59 = vld [vmem:[%s18438_s12 + $0x3b88] sm:$0xff] }
 0x422   : > { %13450 = vmatprep.subr.bf16.mxu0 %v17507_v15  ;;  %14106 = vmatprep.subr.bf16.mxu1 %v17509_v16  ;;  %v17539_v15 = vcombine.high %v2222_v4, %v2226_v8  ;;  %v17541_v16 = vcombine.high %v2223_v9, %v2227_v10  ;;  %v2250_v57 = vld [vmem:[%s18438_s12 + $0x3ba0] sm:$0xff]  ;;  %v2251_v18 = vld [vmem:[%s18438_s12 + $0x3ba8] sm:$0xff] }
 0x425   : > { %13451 = vmatpush1.bf16.msra.mxu0 %v17506_v29  ;;  %14107 = vmatpush1.bf16.msra.mxu1 %v17508_v30  ;;  %v17538_v29 = vcombine.low %v2222_v4, %v2226_v8  ;;  %v17540_v30 = vcombine.low %v2223_v9, %v2227_v10  ;;  %v2254_v4 = vld [vmem:[%s18438_s12 + $0x3bc0] sm:$0xff]  ;;  %v2255_v9 = vld [vmem:[%s18438_s12 + $0x3bc8] sm:$0xff] }
 0x426   : > { %13452 = vmatprep.subr.bf16.mxu0 %v17515_v31  ;;  %14108 = vmatprep.subr.bf16.mxu1 %v17517_v41  ;;  %v17547_v31 = vcombine.high %v2230_v3, %v2234_v45  ;;  %v17549_v41 = vcombine.high %v2231_v23, %v2235_v24  ;;  %v2258_v8 = vld [vmem:[%s18438_s12 + $0x3be0] sm:$0xff]  ;;  %v2259_v10 = vld [vmem:[%s18438_s12 + $0x3be8] sm:$0xff] }
 0x429   : > { %13453 = vmatpush1.bf16.msra.mxu0 %v17514_v46  ;;  %14109 = vmatpush1.bf16.msra.mxu1 %v17516_v47  ;;  %v17546_v46 = vcombine.low %v2230_v3, %v2234_v45  ;;  %v17548_v47 = vcombine.low %v2231_v23, %v2235_v24  ;;  %v2262_v3 = vld [vmem:[%s18438_s12 + $0x3c00] sm:$0xff]  ;;  %v2263_v23 = vld [vmem:[%s18438_s12 + $0x3c08] sm:$0xff] }
 0x42a   : > { %13454 = vmatprep.subr.bf16.mxu0 %v17523_v50  ;;  %14110 = vmatprep.subr.bf16.mxu1 %v17525_v53  ;;  %v17555_v50 = vcombine.high %v2238_v36, %v2242_v37  ;;  %v17557_v53 = vcombine.high %v2239_v12, %v2243_v44  ;;  %v2266_v45 = vld [vmem:[%s18438_s12 + $0x3c20] sm:$0xff]  ;;  %v2267_v24 = vld [vmem:[%s18438_s12 + $0x3c28] sm:$0xff] }
 0x42d   : > { %13455 = vmatpush1.bf16.msra.mxu0 %v17522_v63  ;;  %14111 = vmatpush1.bf16.msra.mxu1 %v17524_v0  ;;  %v17554_v63 = vcombine.low %v2238_v36, %v2242_v37  ;;  %v17556_v0 = vcombine.low %v2239_v12, %v2243_v44  ;;  %v2270_v36 = vld [vmem:[%s18438_s12 + $0x3c40] sm:$0xff]  ;;  %v19652_v12 = vrot.slane %v19567_v21, %v18478_v22  ;;  %v2271_v44 = vld [vmem:[%s18438_s12 + $0x3c48] sm:$0xff] }
 0x42e   : > { %13456 = vmatprep.subr.bf16.mxu0 %v17531_v55  ;;  %14112 = vmatprep.subr.bf16.mxu1 %v17533_v2  ;;  %v17563_v55 = vcombine.high %v2246_v54, %v2250_v57  ;;  %v17565_v2 = vcombine.high %v2247_v59, %v2251_v18  ;;  %v2274_v37 = vld [vmem:[%s18438_s12 + $0x3c60] sm:$0xff]  ;;  %v2279_v22 = vld [vmem:[%s18438_s12 + $0x3c88] sm:$0xff] }
 0x42f   : > { %v2283_v21 = vld [vmem:[%s18438_s12 + $0x3ca8] sm:$0xff] }
 0x431   : > { %13457 = vmatpush1.bf16.msra.mxu0 %v17530_v11  ;;  %14113 = vmatpush1.bf16.msra.mxu1 %v17532_v14  ;;  %v17562_v11 = vcombine.low %v2246_v54, %v2250_v57  ;;  %v17564_v14 = vcombine.low %v2247_v59, %v2251_v18  ;;  %v2278_v57 = vld [vmem:[%s18438_s12 + $0x3c80] sm:$0xff]  ;;  %v19660_v18 = vcombine.high %v19584_v58, %v19584_v58 }
 0x432   : > { %13458 = vmatprep.subr.bf16.mxu0 %v17539_v15  ;;  %14114 = vmatprep.subr.bf16.mxu1 %v17541_v16  ;;  %v17571_v15 = vcombine.high %v2254_v4, %v2258_v8  ;;  %v17573_v16 = vcombine.high %v2255_v9, %v2259_v10  ;;  %v2282_v59 = vld [vmem:[%s18438_s12 + $0x3ca0] sm:$0xff] }
 0x435   : > { %13459 = vmatpush1.bf16.msra.mxu0 %v17538_v29  ;;  %14115 = vmatpush1.bf16.msra.mxu1 %v17540_v30  ;;  %v17570_v29 = vcombine.low %v2254_v4, %v2258_v8  ;;  %v17572_v30 = vcombine.low %v2255_v9, %v2259_v10  ;;  %v2286_v4 = vld [vmem:[%s18438_s12 + $0x3cc0] sm:$0xff]  ;;  %v2287_v9 = vld [vmem:[%s18438_s12 + $0x3cc8] sm:$0xff] }
 0x436   : > { %13460 = vmatprep.subr.bf16.mxu0 %v17547_v31  ;;  %14116 = vmatprep.subr.bf16.mxu1 %v17549_v41  ;;  %v17579_v31 = vcombine.high %v2262_v3, %v2266_v45  ;;  %v17581_v41 = vcombine.high %v2263_v23, %v2267_v24  ;;  %v2290_v8 = vld [vmem:[%s18438_s12 + $0x3ce0] sm:$0xff]  ;;  %v2291_v10 = vld [vmem:[%s18438_s12 + $0x3ce8] sm:$0xff] }
 0x439   : > { %13461 = vmatpush1.bf16.msra.mxu0 %v17546_v46  ;;  %14117 = vmatpush1.bf16.msra.mxu1 %v17548_v47  ;;  %v2275_v46 = vld [vmem:[%s18438_s12 + $0x3c68] sm:$0xff]  ;;  %v17578_v47 = vcombine.low %v2262_v3, %v2266_v45  ;;  %v2294_v3 = vld [vmem:[%s18438_s12 + $0x3d00] sm:$0xff] }
 0x43a   : > { %13462 = vmatprep.subr.bf16.mxu0 %v17555_v50  ;;  %14118 = vmatprep.subr.bf16.mxu1 %v17557_v53  ;;  %v17580_v50 = vcombine.low %v2263_v23, %v2267_v24  ;;  %v17587_v53 = vcombine.high %v2270_v36, %v2274_v37  ;;  %v17589_v54 = vcombine.high %v2271_v44, %v2275_v46  ;;  %v2298_v45 = vld [vmem:[%s18438_s12 + $0x3d20] sm:$0xff]  ;;  %v2295_v23 = vld [vmem:[%s18438_s12 + $0x3d08] sm:$0xff] }
 0x43b   : > { %v2299_v24 = vld [vmem:[%s18438_s12 + $0x3d28] sm:$0xff] }
 0x43d   : > { %13463 = vmatpush1.bf16.msra.mxu0 %v17554_v63  ;;  %14119 = vmatpush1.bf16.msra.mxu1 %v17556_v0  ;;  %v17586_v63 = vcombine.low %v2270_v36, %v2274_v37  ;;  %v17588_v0 = vcombine.low %v2271_v44, %v2275_v46  ;;  %v2302_v36 = vld [vmem:[%s18438_s12 + $0x3d40] sm:$0xff]  ;;  %v2303_v44 = vld [vmem:[%s18438_s12 + $0x3d48] sm:$0xff] }
 0x43e   : > { %13464 = vmatprep.subr.bf16.mxu0 %v17563_v55  ;;  %14120 = vmatprep.subr.bf16.mxu1 %v17565_v2  ;;  %v17595_v55 = vcombine.high %v2278_v57, %v2282_v59  ;;  %v17597_v2 = vcombine.high %v2279_v22, %v2283_v21  ;;  %v2306_v37 = vld [vmem:[%s18438_s12 + $0x3d60] sm:$0xff]  ;;  %v2307_v46 = vld [vmem:[%s18438_s12 + $0x3d68] sm:$0xff] }
 0x441   : > { %13465 = vmatpush1.bf16.msra.mxu0 %v17562_v11  ;;  %14121 = vmatpush1.bf16.msra.mxu1 %v17564_v14  ;;  %v17594_v11 = vcombine.low %v2278_v57, %v2282_v59  ;;  %v17596_v14 = vcombine.low %v2279_v22, %v2283_v21  ;;  %v2310_v57 = vld [vmem:[%s18438_s12 + $0x3d80] sm:$0xff]  ;;  %v2311_v22 = vld [vmem:[%s18438_s12 + $0x3d88] sm:$0xff] }
 0x442   : > { %13466 = vmatprep.subr.bf16.mxu0 %v17571_v15  ;;  %14122 = vmatprep.subr.bf16.mxu1 %v17573_v16  ;;  %v17603_v15 = vcombine.high %v2286_v4, %v2290_v8  ;;  %v17605_v16 = vcombine.high %v2287_v9, %v2291_v10  ;;  %v2314_v59 = vld [vmem:[%s18438_s12 + $0x3da0] sm:$0xff]  ;;  %v2315_v21 = vld [vmem:[%s18438_s12 + $0x3da8] sm:$0xff] }
 0x445   : > { %13467 = vmatpush1.bf16.msra.mxu0 %v17570_v29  ;;  %14123 = vmatpush1.bf16.msra.mxu1 %v17572_v30  ;;  %v17602_v29 = vcombine.low %v2286_v4, %v2290_v8  ;;  %v17604_v30 = vcombine.low %v2287_v9, %v2291_v10  ;;  %v2318_v4 = vld [vmem:[%s18438_s12 + $0x3dc0] sm:$0xff]  ;;  %v2319_v9 = vld [vmem:[%s18438_s12 + $0x3dc8] sm:$0xff] }
 0x446   : > { %13477 = vmatprep.subr.bf16.mxu0 %v17579_v31  ;;  %14133 = vmatprep.subr.bf16.mxu1 %v17581_v41  ;;  %v17611_v31 = vcombine.high %v2294_v3, %v2298_v45  ;;  %v17613_v41 = vcombine.high %v2295_v23, %v2299_v24  ;;  %v2322_v8 = vld [vmem:[%s18438_s12 + $0x3de0] sm:$0xff]  ;;  %v2323_v10 = vld [vmem:[%s18438_s12 + $0x3de8] sm:$0xff] }
 0x448   : > { %13469 = vmatmul.mubr.bf16.vlgmr.msra.gmra.mrb[0].mxu0 %v19652_v12  ;;  %14125 = vmatmul.mubr.bf16.vlgmr.msra.gmra.mrb[0].mxu1 %v19652_v12 }
 0x449   : > { %13478 = vmatpush1.bf16.msra.mxu0 %v17578_v47  ;;  %14134 = vmatpush1.bf16.msra.mxu1 %v17580_v50  ;;  %v17610_v47 = vcombine.low %v2294_v3, %v2298_v45  ;;  %v17612_v50 = vcombine.low %v2295_v23, %v2299_v24  ;;  %v2326_v3 = vld [vmem:[%s18438_s12 + $0x3e00] sm:$0xff]  ;;  %v2327_v23 = vld [vmem:[%s18438_s12 + $0x3e08] sm:$0xff] }
 0x44a   : > { %13479 = vmatprep.subr.bf16.mxu0 %v17587_v53  ;;  %14135 = vmatprep.subr.bf16.mxu1 %v17589_v54  ;;  %v17619_v53 = vcombine.high %v2302_v36, %v2306_v37  ;;  %v17621_v54 = vcombine.high %v2303_v44, %v2307_v46  ;;  %v2330_v45 = vld [vmem:[%s18438_s12 + $0x3e20] sm:$0xff]  ;;  %v2331_v24 = vld [vmem:[%s18438_s12 + $0x3e28] sm:$0xff] }
 0x44b   : > { %13509 = vmatprep.mubr.bf16.mxu0 %v19660_v18  ;;  %14165 = vmatprep.mubr.bf16.mxu1 %v19660_v18 }
 0x44d   : > { %13480 = vmatpush1.bf16.msra.mxu0 %v17586_v63  ;;  %14136 = vmatpush1.bf16.msra.mxu1 %v17588_v0  ;;  %v17618_v63 = vcombine.low %v2302_v36, %v2306_v37  ;;  %v17620_v0 = vcombine.low %v2303_v44, %v2307_v46  ;;  %v2334_v36 = vld [vmem:[%s18438_s12 + $0x3e40] sm:$0xff]  ;;  %v2335_v44 = vld [vmem:[%s18438_s12 + $0x3e48] sm:$0xff] }
 0x44e   : > { %13481 = vmatprep.subr.bf16.mxu0 %v17595_v55  ;;  %14137 = vmatprep.subr.bf16.mxu1 %v17597_v2  ;;  %v17627_v55 = vcombine.high %v2310_v57, %v2314_v59  ;;  %v17629_v2 = vcombine.high %v2311_v22, %v2315_v21  ;;  %v2338_v37 = vld [vmem:[%s18438_s12 + $0x3e60] sm:$0xff]  ;;  %v2339_v46 = vld [vmem:[%s18438_s12 + $0x3e68] sm:$0xff] }
 0x451   : > { %13482 = vmatpush1.bf16.msra.mxu0 %v17594_v11  ;;  %14138 = vmatpush1.bf16.msra.mxu1 %v17596_v14  ;;  %v17626_v11 = vcombine.low %v2310_v57, %v2314_v59  ;;  %v17628_v14 = vcombine.low %v2311_v22, %v2315_v21  ;;  %v2342_v57 = vld [vmem:[%s18438_s12 + $0x3e80] sm:$0xff]  ;;  %v2343_v22 = vld [vmem:[%s18438_s12 + $0x3e88] sm:$0xff] }
 0x452   : > { %13483 = vmatprep.subr.bf16.mxu0 %v17603_v15  ;;  %14139 = vmatprep.subr.bf16.mxu1 %v17605_v16  ;;  %v17635_v15 = vcombine.high %v2318_v4, %v2322_v8  ;;  %v17637_v16 = vcombine.high %v2319_v9, %v2323_v10  ;;  %v2346_v59 = vld [vmem:[%s18438_s12 + $0x3ea0] sm:$0xff]  ;;  %v2347_v21 = vld [vmem:[%s18438_s12 + $0x3ea8] sm:$0xff] }
 0x455   : > { %13484 = vmatpush1.bf16.msra.mxu0 %v17602_v29  ;;  %14140 = vmatpush1.bf16.msra.mxu1 %v17604_v30  ;;  %v17634_v29 = vcombine.low %v2318_v4, %v2322_v8  ;;  %v17636_v30 = vcombine.low %v2319_v9, %v2323_v10  ;;  %v2350_v4 = vld [vmem:[%s18438_s12 + $0x3ec0] sm:$0xff]  ;;  %v2351_v9 = vld [vmem:[%s18438_s12 + $0x3ec8] sm:$0xff] }
 0x456   : > { %13485 = vmatprep.subr.bf16.mxu0 %v17611_v31  ;;  %14141 = vmatprep.subr.bf16.mxu1 %v17613_v41  ;;  %v17643_v31 = vcombine.high %v2326_v3, %v2330_v45  ;;  %v17645_v41 = vcombine.high %v2327_v23, %v2331_v24  ;;  %v2354_v8 = vld [vmem:[%s18438_s12 + $0x3ee0] sm:$0xff]  ;;  %v2355_v10 = vld [vmem:[%s18438_s12 + $0x3ee8] sm:$0xff] }
 0x459   : > { %13486 = vmatpush1.bf16.msra.mxu0 %v17610_v47  ;;  %14142 = vmatpush1.bf16.msra.mxu1 %v17612_v50  ;;  %v17642_v47 = vcombine.low %v2326_v3, %v2330_v45  ;;  %v17644_v50 = vcombine.low %v2327_v23, %v2331_v24  ;;  %v2358_v3 = vld [vmem:[%s18438_s12 + $0x3f00] sm:$0xff]  ;;  %v2359_v23 = vld [vmem:[%s18438_s12 + $0x3f08] sm:$0xff] }
 0x45a   : > { %13487 = vmatprep.subr.bf16.mxu0 %v17619_v53  ;;  %14143 = vmatprep.subr.bf16.mxu1 %v17621_v54  ;;  %v17651_v53 = vcombine.high %v2334_v36, %v2338_v37  ;;  %v17653_v54 = vcombine.high %v2335_v44, %v2339_v46  ;;  %v2362_v45 = vld [vmem:[%s18438_s12 + $0x3f20] sm:$0xff]  ;;  %v2363_v24 = vld [vmem:[%s18438_s12 + $0x3f28] sm:$0xff] }
 0x45d   : > { %13488 = vmatpush1.bf16.msra.mxu0 %v17618_v63  ;;  %14144 = vmatpush1.bf16.msra.mxu1 %v17620_v0  ;;  %v17650_v63 = vcombine.low %v2334_v36, %v2338_v37  ;;  %v17652_v0 = vcombine.low %v2335_v44, %v2339_v46  ;;  %v2366_v36 = vld [vmem:[%s18438_s12 + $0x3f40] sm:$0xff]  ;;  %v2367_v44 = vld [vmem:[%s18438_s12 + $0x3f48] sm:$0xff] }
 0x45e   : > { %13489 = vmatprep.subr.bf16.mxu0 %v17627_v55  ;;  %14145 = vmatprep.subr.bf16.mxu1 %v17629_v2  ;;  %v17659_v55 = vcombine.high %v2342_v57, %v2346_v59  ;;  %v17661_v2 = vcombine.high %v2343_v22, %v2347_v21  ;;  %v2370_v37 = vld [vmem:[%s18438_s12 + $0x3f60] sm:$0xff]  ;;  %v2371_v46 = vld [vmem:[%s18438_s12 + $0x3f68] sm:$0xff] }
 0x461   : > { %13490 = vmatpush1.bf16.msra.mxu0 %v17626_v11  ;;  %14146 = vmatpush1.bf16.msra.mxu1 %v17628_v14  ;;  %v17658_v11 = vcombine.low %v2342_v57, %v2346_v59  ;;  %v17660_v14 = vcombine.low %v2343_v22, %v2347_v21  ;;  %v2374_v57 = vld [vmem:[%s18438_s12 + $0x3f80] sm:$0xff]  ;;  %v2375_v22 = vld [vmem:[%s18438_s12 + $0x3f88] sm:$0xff] }
 0x462   : > { %13491 = vmatprep.subr.bf16.mxu0 %v17635_v15  ;;  %14147 = vmatprep.subr.bf16.mxu1 %v17637_v16  ;;  %v17667_v15 = vcombine.high %v2350_v4, %v2354_v8  ;;  %v17669_v16 = vcombine.high %v2351_v9, %v2355_v10  ;;  %v2378_v59 = vld [vmem:[%s18438_s12 + $0x3fa0] sm:$0xff]  ;;  %v2379_v21 = vld [vmem:[%s18438_s12 + $0x3fa8] sm:$0xff] }
 0x465   : > { %13492 = vmatpush1.bf16.msra.mxu0 %v17634_v29  ;;  %14148 = vmatpush1.bf16.msra.mxu1 %v17636_v30  ;;  %v17666_v29 = vcombine.low %v2350_v4, %v2354_v8  ;;  %v17668_v30 = vcombine.low %v2351_v9, %v2355_v10  ;;  %v2382_v4 = vld [vmem:[%s18438_s12 + $0x3fc0] sm:$0xff]  ;;  %v2383_v9 = vld [vmem:[%s18438_s12 + $0x3fc8] sm:$0xff] }
 0x466   : > { %13493 = vmatprep.subr.bf16.mxu0 %v17643_v31  ;;  %14149 = vmatprep.subr.bf16.mxu1 %v17645_v41  ;;  %v17675_v31 = vcombine.high %v2358_v3, %v2362_v45  ;;  %v17677_v41 = vcombine.high %v2359_v23, %v2363_v24  ;;  %v2386_v8 = vld [vmem:[%s18438_s12 + $0x3fe0] sm:$0xff]  ;;  %v2387_v10 = vld [vmem:[%s18438_s12 + $0x3fe8] sm:$0xff] }
 0x469   : > { %13494 = vmatpush1.bf16.msra.mxu0 %v17642_v47  ;;  %14150 = vmatpush1.bf16.msra.mxu1 %v17644_v50  ;;  %v17674_v47 = vcombine.low %v2358_v3, %v2362_v45  ;;  %v17676_v50 = vcombine.low %v2359_v23, %v2363_v24  ;;  %v344_v3 = vld [vmem:[%s18438_s12 + $0x10] sm:$0xff]  ;;  %v345_v23 = vld [vmem:[%s18438_s12 + $0x18] sm:$0xff] }
 0x46a   : > { %13495 = vmatprep.subr.bf16.mxu0 %v17651_v53  ;;  %14151 = vmatprep.subr.bf16.mxu1 %v17653_v54  ;;  %v17683_v53 = vcombine.high %v2366_v36, %v2370_v37  ;;  %v17685_v54 = vcombine.high %v2367_v44, %v2371_v46  ;;  %v348_v45 = vld [vmem:[%s18438_s12 + $0x30] sm:$0xff]  ;;  %v349_v24 = vld [vmem:[%s18438_s12 + $0x38] sm:$0xff] }
 0x46d   : > { %13496 = vmatpush1.bf16.msra.mxu0 %v17650_v63  ;;  %14152 = vmatpush1.bf16.msra.mxu1 %v17652_v0  ;;  %v17682_v63 = vcombine.low %v2366_v36, %v2370_v37  ;;  %v17684_v0 = vcombine.low %v2367_v44, %v2371_v46  ;;  %v352_v36 = vld [vmem:[%s18438_s12 + $0x50] sm:$0xff]  ;;  %v19728_v44 = vcombine.high %v19652_v12, %v19652_v12  ;;  %v353_v46 = vld [vmem:[%s18438_s12 + $0x58] sm:$0xff] }
 0x46e   : > { %13497 = vmatprep.subr.bf16.mxu0 %v17659_v55  ;;  %14153 = vmatprep.subr.bf16.mxu1 %v17661_v2  ;;  %v17691_v55 = vcombine.high %v2374_v57, %v2378_v59  ;;  %v17693_v2 = vcombine.high %v2375_v22, %v2379_v21  ;;  %v356_v37 = vld [vmem:[%s18438_s12 + $0x70] sm:$0xff] }
 0x471   : > { %13498 = vmatpush1.bf16.msra.mxu0 %v17658_v11  ;;  %14154 = vmatpush1.bf16.msra.mxu1 %v17660_v14  ;;  %v17690_v11 = vcombine.low %v2374_v57, %v2378_v59  ;;  %v17692_v14 = vcombine.low %v2375_v22, %v2379_v21  ;;  %v360_v59 = vld [vmem:[%s18438_s12 + $0x90] sm:$0xff]  ;;  %v361_v21 = vld [vmem:[%s18438_s12 + $0x98] sm:$0xff] }
 0x472   : > { %13499 = vmatprep.subr.bf16.mxu0 %v17667_v15  ;;  %14155 = vmatprep.subr.bf16.mxu1 %v17669_v16  ;;  %v17699_v15 = vcombine.high %v2382_v4, %v2386_v8  ;;  %v17701_v16 = vcombine.high %v2383_v9, %v2387_v10  ;;  %v364_v22 = vld [vmem:[%s18438_s12 + $0xb0] sm:$0xff] }
 0x475   : > { %13500 = vmatpush1.bf16.msra.mxu0 %v17666_v29  ;;  %14156 = vmatpush1.bf16.msra.mxu1 %v17668_v30  ;;  %v17698_v29 = vcombine.low %v2382_v4, %v2386_v8  ;;  %v17700_v30 = vcombine.low %v2383_v9, %v2387_v10  ;;  %v368_v8 = vld [vmem:[%s18438_s12 + $0xd0] sm:$0xff]  ;;  %v369_v10 = vld [vmem:[%s18438_s12 + $0xd8] sm:$0xff] }
 0x476   : > { %13501 = vmatprep.subr.bf16.mxu0 %v17675_v31  ;;  %14157 = vmatprep.subr.bf16.mxu1 %v17677_v41  ;;  %v15663_v31 = vcombine.high %v344_v3, %v348_v45  ;;  %v15665_v41 = vcombine.high %v345_v23, %v349_v24  ;;  %v372_v9 = vld [vmem:[%s18438_s12 + $0xf0] sm:$0xff] }
 0x479   : > { %13502 = vmatpush1.bf16.msra.mxu0 %v17674_v47  ;;  %14158 = vmatpush1.bf16.msra.mxu1 %v17676_v50  ;;  %v357_v47 = vld [vmem:[%s18438_s12 + $0x78] sm:$0xff]  ;;  %v15662_v50 = vcombine.low %v344_v3, %v348_v45  ;;  %v376_v45 = vld [vmem:[%s18438_s12 + $0x110] sm:$0xff] }
 0x47a   : > { %13503 = vmatprep.subr.bf16.mxu0 %v17683_v53  ;;  %14159 = vmatprep.subr.bf16.mxu1 %v17685_v54  ;;  %v15664_v53 = vcombine.low %v345_v23, %v349_v24  ;;  %v15671_v54 = vcombine.high %v352_v36, %v356_v37  ;;  %v15673_v57 = vcombine.high %v353_v46, %v357_v47  ;;  %v380_v23 = vld [vmem:[%s18438_s12 + $0x130] sm:$0xff]  ;;  %v377_v24 = vld [vmem:[%s18438_s12 + $0x118] sm:$0xff] }
 0x47d   : > { %13504 = vmatpush1.bf16.msra.mxu0 %v17682_v63  ;;  %14160 = vmatpush1.bf16.msra.mxu1 %v17684_v0  ;;  %v365_v63 = vld [vmem:[%s18438_s12 + $0xb8] sm:$0xff]  ;;  %v15670_v0 = vcombine.low %v352_v36, %v356_v37  ;;  %v384_v36 = vld [vmem:[%s18438_s12 + $0x150] sm:$0xff] }
 0x47e   : > { %13505 = vmatprep.subr.bf16.mxu0 %v17691_v55  ;;  %14161 = vmatprep.subr.bf16.mxu1 %v17693_v2  ;;  %v15672_v55 = vcombine.low %v353_v46, %v357_v47  ;;  %v15679_v2 = vcombine.high %v360_v59, %v364_v22  ;;  %v15681_v4 = vcombine.high %v361_v21, %v365_v63  ;;  %v388_v37 = vld [vmem:[%s18438_s12 + $0x170] sm:$0xff]  ;;  %v385_v46 = vld [vmem:[%s18438_s12 + $0x158] sm:$0xff] }
 0x47f   : > { %v389_v47 = vld [vmem:[%s18438_s12 + $0x178] sm:$0xff] }
 0x481   : > { %13506 = vmatpush1.bf16.msra.mxu0 %v17690_v11  ;;  %14162 = vmatpush1.bf16.msra.mxu1 %v17692_v14  ;;  %v373_v11 = vld [vmem:[%s18438_s12 + $0xf8] sm:$0xff]  ;;  %v15678_v14 = vcombine.low %v360_v59, %v364_v22  ;;  %v392_v59 = vld [vmem:[%s18438_s12 + $0x190] sm:$0xff] }
 0x482   : > { %13507 = vmatprep.subr.bf16.mxu0 %v17699_v15  ;;  %14163 = vmatprep.subr.bf16.mxu1 %v17701_v16  ;;  %v15680_v15 = vcombine.low %v361_v21, %v365_v63  ;;  %v15687_v16 = vcombine.high %v368_v8, %v372_v9  ;;  %v15689_v3 = vcombine.high %v369_v10, %v373_v11  ;;  %v396_v22 = vld [vmem:[%s18438_s12 + $0x1b0] sm:$0xff]  ;;  %v393_v21 = vld [vmem:[%s18438_s12 + $0x198] sm:$0xff] }
 0x483   : > { %v397_v63 = vld [vmem:[%s18438_s12 + $0x1b8] sm:$0xff] }
 0x485   : > { %13508 = vmatpush1.bf16.msra.mxu0 %v17698_v29  ;;  %14164 = vmatpush1.bf16.msra.mxu1 %v17700_v30  ;;  %v381_v29 = vld [vmem:[%s18438_s12 + $0x138] sm:$0xff]  ;;  %v15686_v30 = vcombine.low %v368_v8, %v372_v9  ;;  %v400_v8 = vld [vmem:[%s18438_s12 + $0x1d0] sm:$0xff] }
 0x486   : > { %14174 = vmatprep.subr.bf16.mxu0 %v15663_v31  ;;  %14830 = vmatprep.subr.bf16.mxu1 %v15665_v41  ;;  %v15695_v31 = vcombine.high %v376_v45, %v380_v23  ;;  %v15697_v41 = vcombine.high %v377_v24, %v381_v29  ;;  %v404_v9 = vld [vmem:[%s18438_s12 + $0x1f0] sm:$0xff] }
 0x488   : > { %13510 = vmatmul.mubr.bf16.vlgmr.msra.gmra.mrb[0].mxu0 %v19728_v44  ;;  %14166 = vmatmul.mubr.bf16.vlgmr.msra.gmra.mrb[0].mxu1 %v19728_v44 }
 0x489   : > { %14175 = vmatpush1.bf16.msra.mxu0 %v15662_v50  ;;  %14831 = vmatpush1.bf16.msra.mxu1 %v15664_v53  ;;  %v15694_v50 = vcombine.low %v376_v45, %v380_v23  ;;  %v15696_v53 = vcombine.low %v377_v24, %v381_v29  ;;  %v408_v45 = vld [vmem:[%s18438_s12 + $0x210] sm:$0xff]  ;;  %v409_v24 = vld [vmem:[%s18438_s12 + $0x218] sm:$0xff] }
 0x48a   : > { %14176 = vmatprep.subr.bf16.mxu0 %v15671_v54  ;;  %14832 = vmatprep.subr.bf16.mxu1 %v15673_v57  ;;  %v15703_v54 = vcombine.high %v384_v36, %v388_v37  ;;  %v15705_v57 = vcombine.high %v385_v46, %v389_v47  ;;  %v412_v23 = vld [vmem:[%s18438_s12 + $0x230] sm:$0xff]  ;;  %v413_v29 = vld [vmem:[%s18438_s12 + $0x238] sm:$0xff] }
 0x48b   : > { %14206 = vmatprep.mubr.bf16.mxu0 %v18498_v42  ;;  %14862 = vmatprep.mubr.bf16.mxu1 %v18498_v42  ;;  %v15688_v42 = vcombine.low %v369_v10, %v373_v11  ;;  %v401_v10 = vld [vmem:[%s18438_s12 + $0x1d8] sm:$0xff] }
 0x48c   : > { %v405_v11 = vld [vmem:[%s18438_s12 + $0x1f8] sm:$0xff] }
 0x48d   : > { %14177 = vmatpush1.bf16.msra.mxu0 %v15670_v0  ;;  %14833 = vmatpush1.bf16.msra.mxu1 %v15672_v55  ;;  %v15702_v0 = vcombine.low %v384_v36, %v388_v37  ;;  %v15704_v55 = vcombine.low %v385_v46, %v389_v47  ;;  %v416_v36 = vld [vmem:[%s18438_s12 + $0x250] sm:$0xff]  ;;  %v417_v46 = vld [vmem:[%s18438_s12 + $0x258] sm:$0xff] }
 0x48e   : > { %14178 = vmatprep.subr.bf16.mxu0 %v15679_v2  ;;  %14834 = vmatprep.subr.bf16.mxu1 %v15681_v4  ;;  %v15711_v2 = vcombine.high %v392_v59, %v396_v22  ;;  %v15713_v4 = vcombine.high %v393_v21, %v397_v63  ;;  %v420_v37 = vld [vmem:[%s18438_s12 + $0x270] sm:$0xff]  ;;  %v421_v47 = vld [vmem:[%s18438_s12 + $0x278] sm:$0xff] }
 0x491   : > { %14179 = vmatpush1.bf16.msra.mxu0 %v15678_v14  ;;  %14835 = vmatpush1.bf16.msra.mxu1 %v15680_v15  ;;  %v15710_v14 = vcombine.low %v392_v59, %v396_v22  ;;  %v15712_v15 = vcombine.low %v393_v21, %v397_v63  ;;  %v424_v59 = vld [vmem:[%s18438_s12 + $0x290] sm:$0xff]  ;;  %v425_v21 = vld [vmem:[%s18438_s12 + $0x298] sm:$0xff] }
 0x492   : > { %14180 = vmatprep.subr.bf16.mxu0 %v15687_v16  ;;  %14836 = vmatprep.subr.bf16.mxu1 %v15689_v3  ;;  %v15719_v16 = vcombine.high %v400_v8, %v404_v9  ;;  %v15721_v3 = vcombine.high %v401_v10, %v405_v11  ;;  %v428_v22 = vld [vmem:[%s18438_s12 + $0x2b0] sm:$0xff]  ;;  %v429_v63 = vld [vmem:[%s18438_s12 + $0x2b8] sm:$0xff] }
 0x495   : > { %14181 = vmatpush1.bf16.msra.mxu0 %v15686_v30  ;;  %14837 = vmatpush1.bf16.msra.mxu1 %v15688_v42  ;;  %v15718_v30 = vcombine.low %v400_v8, %v404_v9  ;;  %v15720_v42 = vcombine.low %v401_v10, %v405_v11  ;;  %v432_v8 = vld [vmem:[%s18438_s12 + $0x2d0] sm:$0xff]  ;;  %v433_v10 = vld [vmem:[%s18438_s12 + $0x2d8] sm:$0xff] }
 0x496   : > { %14182 = vmatprep.subr.bf16.mxu0 %v15695_v31  ;;  %14838 = vmatprep.subr.bf16.mxu1 %v15697_v41  ;;  %v15727_v31 = vcombine.high %v408_v45, %v412_v23  ;;  %v15729_v41 = vcombine.high %v409_v24, %v413_v29  ;;  %v436_v9 = vld [vmem:[%s18438_s12 + $0x2f0] sm:$0xff]  ;;  %v437_v11 = vld [vmem:[%s18438_s12 + $0x2f8] sm:$0xff] }
 0x499   : > { %14183 = vmatpush1.bf16.msra.mxu0 %v15694_v50  ;;  %14839 = vmatpush1.bf16.msra.mxu1 %v15696_v53  ;;  %v15726_v50 = vcombine.low %v408_v45, %v412_v23  ;;  %v15728_v53 = vcombine.low %v409_v24, %v413_v29  ;;  %v440_v45 = vld [vmem:[%s18438_s12 + $0x310] sm:$0xff]  ;;  %v441_v24 = vld [vmem:[%s18438_s12 + $0x318] sm:$0xff] }
 0x49a   : > { %14184 = vmatprep.subr.bf16.mxu0 %v15703_v54  ;;  %14840 = vmatprep.subr.bf16.mxu1 %v15705_v57  ;;  %v15735_v54 = vcombine.high %v416_v36, %v420_v37  ;;  %v15737_v57 = vcombine.high %v417_v46, %v421_v47  ;;  %v444_v23 = vld [vmem:[%s18438_s12 + $0x330] sm:$0xff]  ;;  %v445_v29 = vld [vmem:[%s18438_s12 + $0x338] sm:$0xff] }
 0x49d   : > { %14185 = vmatpush1.bf16.msra.mxu0 %v15702_v0  ;;  %14841 = vmatpush1.bf16.msra.mxu1 %v15704_v55  ;;  %v15734_v0 = vcombine.low %v416_v36, %v420_v37  ;;  %v15736_v55 = vcombine.low %v417_v46, %v421_v47  ;;  %v448_v36 = vld [vmem:[%s18438_s12 + $0x350] sm:$0xff]  ;;  %v449_v46 = vld [vmem:[%s18438_s12 + $0x358] sm:$0xff] }
 0x49e   : > { %14186 = vmatprep.subr.bf16.mxu0 %v15711_v2  ;;  %14842 = vmatprep.subr.bf16.mxu1 %v15713_v4  ;;  %v15743_v2 = vcombine.high %v424_v59, %v428_v22  ;;  %v15745_v4 = vcombine.high %v425_v21, %v429_v63  ;;  %v452_v37 = vld [vmem:[%s18438_s12 + $0x370] sm:$0xff]  ;;  %v453_v47 = vld [vmem:[%s18438_s12 + $0x378] sm:$0xff] }
 0x4a1   : > { %14187 = vmatpush1.bf16.msra.mxu0 %v15710_v14  ;;  %14843 = vmatpush1.bf16.msra.mxu1 %v15712_v15  ;;  %v15742_v14 = vcombine.low %v424_v59, %v428_v22  ;;  %v15744_v15 = vcombine.low %v425_v21, %v429_v63  ;;  %v456_v59 = vld [vmem:[%s18438_s12 + $0x390] sm:$0xff]  ;;  %v457_v21 = vld [vmem:[%s18438_s12 + $0x398] sm:$0xff] }
 0x4a2   : > { %14188 = vmatprep.subr.bf16.mxu0 %v15719_v16  ;;  %14844 = vmatprep.subr.bf16.mxu1 %v15721_v3  ;;  %v15751_v16 = vcombine.high %v432_v8, %v436_v9  ;;  %v15753_v3 = vcombine.high %v433_v10, %v437_v11  ;;  %v460_v22 = vld [vmem:[%s18438_s12 + $0x3b0] sm:$0xff]  ;;  %v461_v63 = vld [vmem:[%s18438_s12 + $0x3b8] sm:$0xff] }
 0x4a5   : > { %14189 = vmatpush1.bf16.msra.mxu0 %v15718_v30  ;;  %14845 = vmatpush1.bf16.msra.mxu1 %v15720_v42  ;;  %v15750_v30 = vcombine.low %v432_v8, %v436_v9  ;;  %v15752_v42 = vcombine.low %v433_v10, %v437_v11  ;;  %v464_v8 = vld [vmem:[%s18438_s12 + $0x3d0] sm:$0xff]  ;;  %v465_v10 = vld [vmem:[%s18438_s12 + $0x3d8] sm:$0xff] }
 0x4a6   : > { %14190 = vmatprep.subr.bf16.mxu0 %v15727_v31  ;;  %14846 = vmatprep.subr.bf16.mxu1 %v15729_v41  ;;  %v15759_v31 = vcombine.high %v440_v45, %v444_v23  ;;  %v15761_v41 = vcombine.high %v441_v24, %v445_v29  ;;  %v468_v9 = vld [vmem:[%s18438_s12 + $0x3f0] sm:$0xff]  ;;  %v469_v11 = vld [vmem:[%s18438_s12 + $0x3f8] sm:$0xff] }
 0x4a9   : > { %14191 = vmatpush1.bf16.msra.mxu0 %v15726_v50  ;;  %14847 = vmatpush1.bf16.msra.mxu1 %v15728_v53  ;;  %v15758_v50 = vcombine.low %v440_v45, %v444_v23  ;;  %v15760_v53 = vcombine.low %v441_v24, %v445_v29  ;;  %v472_v45 = vld [vmem:[%s18438_s12 + $0x410] sm:$0xff]  ;;  %v473_v24 = vld [vmem:[%s18438_s12 + $0x418] sm:$0xff] }
 0x4aa   : > { %14192 = vmatprep.subr.bf16.mxu0 %v15735_v54  ;;  %14848 = vmatprep.subr.bf16.mxu1 %v15737_v57  ;;  %v15767_v54 = vcombine.high %v448_v36, %v452_v37  ;;  %v15769_v57 = vcombine.high %v449_v46, %v453_v47  ;;  %v476_v23 = vld [vmem:[%s18438_s12 + $0x430] sm:$0xff]  ;;  %v477_v29 = vld [vmem:[%s18438_s12 + $0x438] sm:$0xff] }
 0x4ad   : > { %14193 = vmatpush1.bf16.msra.mxu0 %v15734_v0  ;;  %14849 = vmatpush1.bf16.msra.mxu1 %v15736_v55  ;;  %v15766_v0 = vcombine.low %v448_v36, %v452_v37  ;;  %v15768_v55 = vcombine.low %v449_v46, %v453_v47  ;;  %v480_v36 = vld [vmem:[%s18438_s12 + $0x450] sm:$0xff]  ;;  %v481_v46 = vld [vmem:[%s18438_s12 + $0x458] sm:$0xff] }
 0x4ae   : > { %14194 = vmatprep.subr.bf16.mxu0 %v15743_v2  ;;  %14850 = vmatprep.subr.bf16.mxu1 %v15745_v4  ;;  %v15775_v2 = vcombine.high %v456_v59, %v460_v22  ;;  %v15777_v4 = vcombine.high %v457_v21, %v461_v63  ;;  %v484_v37 = vld [vmem:[%s18438_s12 + $0x470] sm:$0xff]  ;;  %v485_v47 = vld [vmem:[%s18438_s12 + $0x478] sm:$0xff] }
 0x4b1   : > { %14195 = vmatpush1.bf16.msra.mxu0 %v15742_v14  ;;  %14851 = vmatpush1.bf16.msra.mxu1 %v15744_v15  ;;  %v15774_v14 = vcombine.low %v456_v59, %v460_v22  ;;  %v15776_v15 = vcombine.low %v457_v21, %v461_v63  ;;  %v488_v59 = vld [vmem:[%s18438_s12 + $0x490] sm:$0xff]  ;;  %v489_v21 = vld [vmem:[%s18438_s12 + $0x498] sm:$0xff] }
 0x4b2   : > { %14196 = vmatprep.subr.bf16.mxu0 %v15751_v16  ;;  %14852 = vmatprep.subr.bf16.mxu1 %v15753_v3  ;;  %v15783_v16 = vcombine.high %v464_v8, %v468_v9  ;;  %v15785_v3 = vcombine.high %v465_v10, %v469_v11  ;;  %v492_v22 = vld [vmem:[%s18438_s12 + $0x4b0] sm:$0xff]  ;;  %v493_v63 = vld [vmem:[%s18438_s12 + $0x4b8] sm:$0xff] }
 0x4b5   : > { %14197 = vmatpush1.bf16.msra.mxu0 %v15750_v30  ;;  %14853 = vmatpush1.bf16.msra.mxu1 %v15752_v42  ;;  %v15782_v30 = vcombine.low %v464_v8, %v468_v9  ;;  %v15784_v42 = vcombine.low %v465_v10, %v469_v11  ;;  %v496_v8 = vld [vmem:[%s18438_s12 + $0x4d0] sm:$0xff]  ;;  %v497_v10 = vld [vmem:[%s18438_s12 + $0x4d8] sm:$0xff] }
 0x4b6   : > { %14198 = vmatprep.subr.bf16.mxu0 %v15759_v31  ;;  %14854 = vmatprep.subr.bf16.mxu1 %v15761_v41  ;;  %v15791_v31 = vcombine.high %v472_v45, %v476_v23  ;;  %v15793_v41 = vcombine.high %v473_v24, %v477_v29  ;;  %v500_v9 = vld [vmem:[%s18438_s12 + $0x4f0] sm:$0xff]  ;;  %v501_v11 = vld [vmem:[%s18438_s12 + $0x4f8] sm:$0xff] }
 0x4b9   : > { %14199 = vmatpush1.bf16.msra.mxu0 %v15758_v50  ;;  %14855 = vmatpush1.bf16.msra.mxu1 %v15760_v53  ;;  %v15790_v50 = vcombine.low %v472_v45, %v476_v23  ;;  %v15792_v53 = vcombine.low %v473_v24, %v477_v29  ;;  %v508_v45 = vld [vmem:[%s18438_s12 + $0x530] sm:$0xff]  ;;  %v505_v23 = vld [vmem:[%s18438_s12 + $0x518] sm:$0xff]  ;;  %v15814_v29 = vcombine.low %v496_v8, %v500_v9 }
 0x4ba   : > { %14200 = vmatprep.subr.bf16.mxu0 %v15767_v54  ;;  %14856 = vmatprep.subr.bf16.mxu1 %v15769_v57  ;;  %v15799_v54 = vcombine.high %v480_v36, %v484_v37  ;;  %v15801_v57 = vcombine.high %v481_v46, %v485_v47  ;;  %v509_v24 = vld [vmem:[%s18438_s12 + $0x538] sm:$0xff] }
 0x4bd   : > { %14201 = vmatpush1.bf16.msra.mxu0 %v15766_v0  ;;  %14857 = vmatpush1.bf16.msra.mxu1 %v15768_v55  ;;  %v15798_v0 = vcombine.low %v480_v36, %v484_v37  ;;  %v15800_v55 = vcombine.low %v481_v46, %v485_v47  ;;  %v513_v36 = vld [vmem:[%s18438_s12 + $0x558] sm:$0xff]  ;;  %v15824_v47 = vcombine.low %v505_v23, %v509_v24 }
 0x4be   : > { %14202 = vmatprep.subr.bf16.mxu0 %v15775_v2  ;;  %14858 = vmatprep.subr.bf16.mxu1 %v15777_v4  ;;  %v15807_v2 = vcombine.high %v488_v59, %v492_v22  ;;  %v15809_v4 = vcombine.high %v489_v21, %v493_v63  ;;  %v517_v37 = vld [vmem:[%s18438_s12 + $0x578] sm:$0xff] }
 0x4c1   : > { %14203 = vmatpush1.bf16.msra.mxu0 %v15774_v14  ;;  %14859 = vmatpush1.bf16.msra.mxu1 %v15776_v15  ;;  %v15808_v14 = vcombine.low %v489_v21, %v493_v63  ;;  %v15815_v15 = vcombine.high %v496_v8, %v500_v9  ;;  %v15832_v63 = vcombine.low %v513_v36, %v517_v37  ;;  %v529_v8 = vld [vmem:[%s18438_s12 + $0x5d8] sm:$0xff] }
 0x4c2   : > { %14204 = vmatprep.subr.bf16.mxu0 %v15783_v16  ;;  %14860 = vmatprep.subr.bf16.mxu1 %v15785_v3  ;;  %v15817_v16 = vcombine.high %v497_v10, %v501_v11  ;;  %v504_v3 = vld [vmem:[%s18438_s12 + $0x510] sm:$0xff]  ;;  %v533_v9 = vld [vmem:[%s18438_s12 + $0x5f8] sm:$0xff] }
 0x4c3   : > { %v15822_v46 = vcombine.low %v504_v3, %v508_v45 }
 0x4c5   : > { %14205 = vmatpush1.bf16.msra.mxu0 %v15782_v30  ;;  %14861 = vmatpush1.bf16.msra.mxu1 %v15784_v42  ;;  %v15823_v30 = vcombine.high %v504_v3, %v508_v45  ;;  %v15825_v42 = vcombine.high %v505_v23, %v509_v24  ;;  %v537_v3 = vld [vmem:[%s18438_s12 + $0x618] sm:$0xff]  ;;  %v15848_v24 = vcombine.low %v529_v8, %v533_v9 }
 0x4c6   : > { %14215 = vmatprep.subr.bf16.mxu0 %v15791_v31  ;;  %14871 = vmatprep.subr.bf16.mxu1 %v15793_v41  ;;  %v512_v31 = vld [vmem:[%s18438_s12 + $0x550] sm:$0xff]  ;;  %v541_v45 = vld [vmem:[%s18438_s12 + $0x638] sm:$0xff] }
 0x4c7   : > { %v516_v41 = vld [vmem:[%s18438_s12 + $0x570] sm:$0xff] }
 0x4c8   : > { %14207 = vmatmul.mubr.bf16.vlgmr.msra.gmra.mrb[4].mxu0 %v18540_v56  ;;  %14863 = vmatmul.mubr.bf16.vlgmr.msra.gmra.mrb[4].mxu1 %v18540_v56  ;;  %v15806_v56 = vcombine.low %v488_v59, %v492_v22  ;;  %v521_v59 = vld [vmem:[%s18438_s12 + $0x598] sm:$0xff]  ;;  %v15830_v21 = vcombine.low %v512_v31, %v516_v41 }
 0x4c9   : > { %14216 = vmatpush1.bf16.msra.mxu0 %v15790_v50  ;;  %14872 = vmatpush1.bf16.msra.mxu1 %v15792_v53  ;;  %v15831_v50 = vcombine.high %v512_v31, %v516_v41  ;;  %v15833_v53 = vcombine.high %v513_v36, %v517_v37  ;;  %v525_v22 = vld [vmem:[%s18438_s12 + $0x5b8] sm:$0xff]  ;;  %v15856_v37 = vcombine.low %v537_v3, %v541_v45 }
 0x4ca   : > { %14217 = vmatprep.subr.bf16.mxu0 %v15799_v54  ;;  %14873 = vmatprep.subr.bf16.mxu1 %v15801_v57  ;;  %v520_v54 = vld [vmem:[%s18438_s12 + $0x590] sm:$0xff]  ;;  %v545_v31 = vld [vmem:[%s18438_s12 + $0x658] sm:$0xff] }
 0x4cb   : > { %14247 = vmatprep.mubr.bf16.mxu0 %v18548_v1  ;;  %14903 = vmatprep.mubr.bf16.mxu1 %v18548_v1  ;;  %v15816_v1 = vcombine.low %v497_v10, %v501_v11  ;;  %v524_v57 = vld [vmem:[%s18438_s12 + $0x5b0] sm:$0xff]  ;;  %v15840_v11 = vcombine.low %v521_v59, %v525_v22  ;;  %v549_v41 = vld [vmem:[%s18438_s12 + $0x678] sm:$0xff] }
 0x4cc   : > { %v15838_v10 = vcombine.low %v520_v54, %v524_v57 }
 0x4cd   : > { %14218 = vmatpush1.bf16.msra.mxu0 %v15798_v0  ;;  %14874 = vmatpush1.bf16.msra.mxu1 %v15800_v55  ;;  %v15839_v0 = vcombine.high %v520_v54, %v524_v57  ;;  %v15841_v55 = vcombine.high %v521_v59, %v525_v22  ;;  %v553_v54 = vld [vmem:[%s18438_s12 + $0x698] sm:$0xff]  ;;  %v15864_v22 = vcombine.low %v545_v31, %v549_v41 }
 0x4ce   : > { %14219 = vmatprep.subr.bf16.mxu0 %v15807_v2  ;;  %14875 = vmatprep.subr.bf16.mxu1 %v15809_v4  ;;  %v528_v2 = vld [vmem:[%s18438_s12 + $0x5d0] sm:$0xff]  ;;  %v557_v57 = vld [vmem:[%s18438_s12 + $0x6b8] sm:$0xff] }
 0x4cf   : > { %v532_v4 = vld [vmem:[%s18438_s12 + $0x5f0] sm:$0xff] }
 0x4d0   : > { %v15846_v23 = vcombine.low %v528_v2, %v532_v4 }
 0x4d1   : > { %14220 = vmatpush1.bf16.msra.mxu0 %v15806_v56  ;;  %14876 = vmatpush1.bf16.msra.mxu1 %v15808_v14  ;;  %v15847_v56 = vcombine.high %v528_v2, %v532_v4  ;;  %v15849_v14 = vcombine.high %v529_v8, %v533_v9  ;;  %v561_v2 = vld [vmem:[%s18438_s12 + $0x6d8] sm:$0xff]  ;;  %v15872_v9 = vcombine.low %v553_v54, %v557_v57 }
 0x4d2   : > { %14221 = vmatprep.subr.bf16.mxu0 %v15815_v15  ;;  %14877 = vmatprep.subr.bf16.mxu1 %v15817_v16  ;;  %v536_v15 = vld [vmem:[%s18438_s12 + $0x610] sm:$0xff]  ;;  %v565_v4 = vld [vmem:[%s18438_s12 + $0x6f8] sm:$0xff] }
 0x4d3   : > { %v540_v16 = vld [vmem:[%s18438_s12 + $0x630] sm:$0xff] }
 0x4d4   : > { %v15854_v36 = vcombine.low %v536_v15, %v540_v16 }
 0x4d5   : > { %14222 = vmatpush1.bf16.msra.mxu0 %v15814_v29  ;;  %14878 = vmatpush1.bf16.msra.mxu1 %v15816_v1  ;;  %v15855_v29 = vcombine.high %v536_v15, %v540_v16  ;;  %v15857_v1 = vcombine.high %v537_v3, %v541_v45  ;;  %v569_v15 = vld [vmem:[%s18438_s12 + $0x718] sm:$0xff]  ;;  %v15880_v45 = vcombine.low %v561_v2, %v565_v4 }
 0x4d6   : > { %14223 = vmatprep.subr.bf16.mxu0 %v15823_v30  ;;  %14879 = vmatprep.subr.bf16.mxu1 %v15825_v42  ;;  %v544_v30 = vld [vmem:[%s18438_s12 + $0x650] sm:$0xff]  ;;  %v573_v16 = vld [vmem:[%s18438_s12 + $0x738] sm:$0xff] }
 0x4d7   : > { %v548_v42 = vld [vmem:[%s18438_s12 + $0x670] sm:$0xff] }
 0x4d8   : > { %v15862_v59 = vcombine.low %v544_v30, %v548_v42 }
 0x4d9   : > { %14224 = vmatpush1.bf16.msra.mxu0 %v15822_v46  ;;  %14880 = vmatpush1.bf16.msra.mxu1 %v15824_v47  ;;  %v15863_v46 = vcombine.high %v544_v30, %v548_v42  ;;  %v15865_v47 = vcombine.high %v545_v31, %v549_v41  ;;  %v577_v30 = vld [vmem:[%s18438_s12 + $0x758] sm:$0xff]  ;;  %v15888_v41 = vcombine.low %v569_v15, %v573_v16 }
 0x4da   : > { %14225 = vmatprep.subr.bf16.mxu0 %v15831_v50  ;;  %14881 = vmatprep.subr.bf16.mxu1 %v15833_v53  ;;  %v552_v50 = vld [vmem:[%s18438_s12 + $0x690] sm:$0xff]  ;;  %v581_v42 = vld [vmem:[%s18438_s12 + $0x778] sm:$0xff] }
 0x4db   : > { %v556_v53 = vld [vmem:[%s18438_s12 + $0x6b0] sm:$0xff] }
 0x4dc   : > { %v15870_v8 = vcombine.low %v552_v50, %v556_v53 }
 0x4dd   : > { %14226 = vmatpush1.bf16.msra.mxu0 %v15830_v21  ;;  %14882 = vmatpush1.bf16.msra.mxu1 %v15832_v63  ;;  %v15871_v21 = vcombine.high %v552_v50, %v556_v53  ;;  %v15873_v63 = vcombine.high %v553_v54, %v557_v57  ;;  %v585_v50 = vld [vmem:[%s18438_s12 + $0x798] sm:$0xff]  ;;  %v15896_v57 = vcombine.low %v577_v30, %v581_v42 }
 0x4de   : > { %14227 = vmatprep.subr.bf16.mxu0 %v15839_v0  ;;  %14883 = vmatprep.subr.bf16.mxu1 %v15841_v55  ;;  %v560_v0 = vld [vmem:[%s18438_s12 + $0x6d0] sm:$0xff]  ;;  %v589_v53 = vld [vmem:[%s18438_s12 + $0x7b8] sm:$0xff] }
 0x4df   : > { %v564_v55 = vld [vmem:[%s18438_s12 + $0x6f0] sm:$0xff] }
 0x4e0   : > { %v15878_v3 = vcombine.low %v560_v0, %v564_v55 }
 0x4e1   : > { %14228 = vmatpush1.bf16.msra.mxu0 %v15838_v10  ;;  %14884 = vmatpush1.bf16.msra.mxu1 %v15840_v11  ;;  %v15879_v10 = vcombine.high %v560_v0, %v564_v55  ;;  %v15881_v11 = vcombine.high %v561_v2, %v565_v4  ;;  %v593_v0 = vld [vmem:[%s18438_s12 + $0x7d8] sm:$0xff]  ;;  %v15904_v4 = vcombine.low %v585_v50, %v589_v53 }
 0x4e2   : > { %14229 = vmatprep.subr.bf16.mxu0 %v15847_v56  ;;  %14885 = vmatprep.subr.bf16.mxu1 %v15849_v14  ;;  %v568_v56 = vld [vmem:[%s18438_s12 + $0x710] sm:$0xff]  ;;  %v597_v55 = vld [vmem:[%s18438_s12 + $0x7f8] sm:$0xff] }
 0x4e3   : > { %v572_v14 = vld [vmem:[%s18438_s12 + $0x730] sm:$0xff] }
 0x4e4   : > { %v15886_v31 = vcombine.low %v568_v56, %v572_v14 }
 0x4e5   : > { %14230 = vmatpush1.bf16.msra.mxu0 %v15846_v23  ;;  %14886 = vmatpush1.bf16.msra.mxu1 %v15848_v24  ;;  %v15887_v23 = vcombine.high %v568_v56, %v572_v14  ;;  %v15889_v24 = vcombine.high %v569_v15, %v573_v16  ;;  %v601_v56 = vld [vmem:[%s18438_s12 + $0x818] sm:$0xff]  ;;  %v15912_v16 = vcombine.low %v593_v0, %v597_v55 }
 0x4e6   : > { %14231 = vmatprep.subr.bf16.mxu0 %v15855_v29  ;;  %14887 = vmatprep.subr.bf16.mxu1 %v15857_v1  ;;  %v576_v29 = vld [vmem:[%s18438_s12 + $0x750] sm:$0xff]  ;;  %v605_v14 = vld [vmem:[%s18438_s12 + $0x838] sm:$0xff] }
 0x4e7   : > { %v580_v1 = vld [vmem:[%s18438_s12 + $0x770] sm:$0xff] }
 0x4e8   : > { %v15894_v54 = vcombine.low %v576_v29, %v580_v1 }
 0x4e9   : > { %14232 = vmatpush1.bf16.msra.mxu0 %v15854_v36  ;;  %14888 = vmatpush1.bf16.msra.mxu1 %v15856_v37  ;;  %v15895_v36 = vcombine.high %v576_v29, %v580_v1  ;;  %v15897_v37 = vcombine.high %v577_v30, %v581_v42  ;;  %v609_v29 = vld [vmem:[%s18438_s12 + $0x858] sm:$0xff]  ;;  %v15920_v42 = vcombine.low %v601_v56, %v605_v14 }
 0x4ea   : > { %14233 = vmatprep.subr.bf16.mxu0 %v15863_v46  ;;  %14889 = vmatprep.subr.bf16.mxu1 %v15865_v47  ;;  %v584_v46 = vld [vmem:[%s18438_s12 + $0x790] sm:$0xff]  ;;  %v613_v1 = vld [vmem:[%s18438_s12 + $0x878] sm:$0xff] }
 0x4eb   : > { %v588_v47 = vld [vmem:[%s18438_s12 + $0x7b0] sm:$0xff] }
 0x4ec   : > { %v15902_v2 = vcombine.low %v584_v46, %v588_v47 }
 0x4ed   : > { %14234 = vmatpush1.bf16.msra.mxu0 %v15862_v59  ;;  %14890 = vmatpush1.bf16.msra.mxu1 %v15864_v22  ;;  %v15903_v59 = vcombine.high %v584_v46, %v588_v47  ;;  %v15905_v22 = vcombine.high %v585_v50, %v589_v53  ;;  %v617_v46 = vld [vmem:[%s18438_s12 + $0x898] sm:$0xff]  ;;  %v15928_v53 = vcombine.low %v609_v29, %v613_v1 }
 0x4ee   : > { %14235 = vmatprep.subr.bf16.mxu0 %v15871_v21  ;;  %14891 = vmatprep.subr.bf16.mxu1 %v15873_v63  ;;  %v592_v21 = vld [vmem:[%s18438_s12 + $0x7d0] sm:$0xff]  ;;  %v621_v47 = vld [vmem:[%s18438_s12 + $0x8b8] sm:$0xff] }
 0x4ef   : > { %v596_v63 = vld [vmem:[%s18438_s12 + $0x7f0] sm:$0xff] }
 0x4f0   : > { %v15910_v15 = vcombine.low %v592_v21, %v596_v63 }
 0x4f1   : > { %14236 = vmatpush1.bf16.msra.mxu0 %v15870_v8  ;;  %14892 = vmatpush1.bf16.msra.mxu1 %v15872_v9  ;;  %v15911_v8 = vcombine.high %v592_v21, %v596_v63  ;;  %v15913_v9 = vcombine.high %v593_v0, %v597_v55  ;;  %v625_v21 = vld [vmem:[%s18438_s12 + $0x8d8] sm:$0xff]  ;;  %v15936_v0 = vcombine.low %v617_v46, %v621_v47 }
 0x4f2   : > { %14237 = vmatprep.subr.bf16.mxu0 %v15879_v10  ;;  %14893 = vmatprep.subr.bf16.mxu1 %v15881_v11  ;;  %v600_v10 = vld [vmem:[%s18438_s12 + $0x810] sm:$0xff]  ;;  %v629_v63 = vld [vmem:[%s18438_s12 + $0x8f8] sm:$0xff] }
 0x4f3   : > { %v604_v11 = vld [vmem:[%s18438_s12 + $0x830] sm:$0xff] }
 0x4f4   : > { %v15918_v30 = vcombine.low %v600_v10, %v604_v11 }
 0x4f5   : > { %14238 = vmatpush1.bf16.msra.mxu0 %v15878_v3  ;;  %14894 = vmatpush1.bf16.msra.mxu1 %v15880_v45  ;;  %v15919_v3 = vcombine.high %v600_v10, %v604_v11  ;;  %v15921_v45 = vcombine.high %v601_v56, %v605_v14  ;;  %v637_v10 = vld [vmem:[%s18438_s12 + $0x938] sm:$0xff] }
 0x4f6   : > { %14239 = vmatprep.subr.bf16.mxu0 %v15887_v23  ;;  %14895 = vmatprep.subr.bf16.mxu1 %v15889_v24  ;;  %v608_v23 = vld [vmem:[%s18438_s12 + $0x850] sm:$0xff] }
 0x4f7   : > { %v612_v24 = vld [vmem:[%s18438_s12 + $0x870] sm:$0xff] }
 0x4f8   : > { %v15926_v50 = vcombine.low %v608_v23, %v612_v24 }
 0x4f9   : > { %14240 = vmatpush1.bf16.msra.mxu0 %v15886_v31  ;;  %14896 = vmatpush1.bf16.msra.mxu1 %v15888_v41  ;;  %v15927_v31 = vcombine.high %v608_v23, %v612_v24  ;;  %v15929_v41 = vcombine.high %v609_v29, %v613_v1 }
 0x4fa   : > { %14241 = vmatprep.subr.bf16.mxu0 %v15895_v36  ;;  %14897 = vmatprep.subr.bf16.mxu1 %v15897_v37  ;;  %v616_v36 = vld [vmem:[%s18438_s12 + $0x890] sm:$0xff] }
 0x4fb   : > { %v620_v37 = vld [vmem:[%s18438_s12 + $0x8b0] sm:$0xff] }
 0x4fd   : > { %14242 = vmatpush1.bf16.msra.mxu0 %v15894_v54  ;;  %14898 = vmatpush1.bf16.msra.mxu1 %v15896_v57  ;;  %v15935_v54 = vcombine.high %v616_v36, %v620_v37  ;;  %v15937_v57 = vcombine.high %v617_v46, %v621_v47 }
 0x4fe   : > { %14243 = vmatprep.subr.bf16.mxu0 %v15903_v59  ;;  %14899 = vmatprep.subr.bf16.mxu1 %v15905_v22  ;;  %v624_v59 = vld [vmem:[%s18438_s12 + $0x8d0] sm:$0xff] }
 0x4ff   : > { %v628_v22 = vld [vmem:[%s18438_s12 + $0x8f0] sm:$0xff] }
 0x500   : > { %v15943_v55 = vcombine.high %v624_v59, %v628_v22  ;;  %v15942_v11 = vcombine.low %v624_v59, %v628_v22 }
 0x501   : > { %14244 = vmatpush1.bf16.msra.mxu0 %v15902_v2  ;;  %14900 = vmatpush1.bf16.msra.mxu1 %v15904_v4  ;;  %v15945_v2 = vcombine.high %v625_v21, %v629_v63  ;;  %v632_v4 = vld [vmem:[%s18438_s12 + $0x910] sm:$0xff] }
 0x502   : > { %14245 = vmatprep.subr.bf16.mxu0 %v15911_v8  ;;  %14901 = vmatprep.subr.bf16.mxu1 %v15913_v9  ;;  %v636_v8 = vld [vmem:[%s18438_s12 + $0x930] sm:$0xff]  ;;  %v633_v9 = vld [vmem:[%s18438_s12 + $0x918] sm:$0xff] }
 0x503   : > { %v15951_v56 = vcombine.high %v632_v4, %v636_v8  ;;  %v15953_v14 = vcombine.high %v633_v9, %v637_v10  ;;  %v15950_v23 = vcombine.low %v632_v4, %v636_v8  ;;  %v15952_v24 = vcombine.low %v633_v9, %v637_v10 }
 0x505   : > { %14246 = vmatpush1.bf16.msra.mxu0 %v15910_v15  ;;  %14902 = vmatpush1.bf16.msra.mxu1 %v15912_v16  ;;  %v640_v15 = vld [vmem:[%s18438_s12 + $0x950] sm:$0xff] }
 0x506   : > { %14256 = vmatprep.subr.bf16.mxu0 %v15919_v3  ;;  %14912 = vmatprep.subr.bf16.mxu1 %v15921_v45  ;;  %v644_v16 = vld [vmem:[%s18438_s12 + $0x970] sm:$0xff]  ;;  %v641_v3 = vld [vmem:[%s18438_s12 + $0x958] sm:$0xff] }
 0x507   : > { %v645_v45 = vld [vmem:[%s18438_s12 + $0x978] sm:$0xff]  ;;  %v15959_v29 = vcombine.high %v640_v15, %v644_v16 }
 0x508   : > { %14248 = vmatmul.mubr.bf16.vlgmr.msra.gmra.mrb[4].mxu0 %v18623_v7  ;;  %14904 = vmatmul.mubr.bf16.vlgmr.msra.gmra.mrb[4].mxu1 %v18623_v7  ;;  %v15934_v7 = vcombine.low %v616_v36, %v620_v37  ;;  %v15961_v1 = vcombine.high %v641_v3, %v645_v45  ;;  %v15958_v36 = vcombine.low %v640_v15, %v644_v16 }
 0x509   : > { %14257 = vmatpush1.bf16.msra.mxu0 %v15918_v30  ;;  %14913 = vmatpush1.bf16.msra.mxu1 %v15920_v42  ;;  %v648_v30 = vld [vmem:[%s18438_s12 + $0x990] sm:$0xff]  ;;  %v15960_v37 = vcombine.low %v641_v3, %v645_v45 }
 0x50a   : > { %14258 = vmatprep.subr.bf16.mxu0 %v15927_v31  ;;  %14914 = vmatprep.subr.bf16.mxu1 %v15929_v41  ;;  %v652_v42 = vld [vmem:[%s18438_s12 + $0x9b0] sm:$0xff]  ;;  %v649_v31 = vld [vmem:[%s18438_s12 + $0x998] sm:$0xff] }
 0x50b   : > { %14288 = vmatprep.mubr.bf16.mxu0 %v18630_v17  ;;  %14944 = vmatprep.mubr.bf16.mxu1 %v18630_v17  ;;  %v15944_v17 = vcombine.low %v625_v21, %v629_v63  ;;  %v653_v41 = vld [vmem:[%s18438_s12 + $0x9b8] sm:$0xff]  ;;  %v15967_v46 = vcombine.high %v648_v30, %v652_v42  ;;  %v15966_v59 = vcombine.low %v648_v30, %v652_v42 }
 0x50c   : > { %v15969_v47 = vcombine.high %v649_v31, %v653_v41  ;;  %v15968_v22 = vcombine.low %v649_v31, %v653_v41 }
 0x50d   : > { %14259 = vmatpush1.bf16.msra.mxu0 %v15926_v50  ;;  %14915 = vmatpush1.bf16.msra.mxu1 %v15928_v53  ;;  %v656_v50 = vld [vmem:[%s18438_s12 + $0x9d0] sm:$0xff] }
 0x50e   : > { %14260 = vmatprep.subr.bf16.mxu0 %v15935_v54  ;;  %14916 = vmatprep.subr.bf16.mxu1 %v15937_v57  ;;  %v660_v53 = vld [vmem:[%s18438_s12 + $0x9f0] sm:$0xff]  ;;  %v657_v54 = vld [vmem:[%s18438_s12 + $0x9d8] sm:$0xff] }
 0x50f   : > { %v661_v57 = vld [vmem:[%s18438_s12 + $0x9f8] sm:$0xff]  ;;  %v15975_v21 = vcombine.high %v656_v50, %v660_v53  ;;  %v15974_v4 = vcombine.low %v656_v50, %v660_v53 }
 0x510   : > { %v15977_v63 = vcombine.high %v657_v54, %v661_v57  ;;  %v15976_v8 = vcombine.low %v657_v54, %v661_v57 }
 0x511   : > { %14261 = vmatpush1.bf16.msra.mxu0 %v15934_v7  ;;  %14917 = vmatpush1.bf16.msra.mxu1 %v15936_v0  ;;  %v664_v7 = vld [vmem:[%s18438_s12 + $0xa10] sm:$0xff] }
 0x512   : > { %14262 = vmatprep.subr.bf16.mxu0 %v15943_v55  ;;  %14918 = vmatprep.subr.bf16.mxu1 %v15945_v2  ;;  %v668_v0 = vld [vmem:[%s18438_s12 + $0xa30] sm:$0xff]  ;;  %v665_v55 = vld [vmem:[%s18438_s12 + $0xa18] sm:$0xff] }
 0x513   : > { %v669_v2 = vld [vmem:[%s18438_s12 + $0xa38] sm:$0xff]  ;;  %v15983_v9 = vcombine.high %v664_v7, %v668_v0  ;;  %v15982_v15 = vcombine.low %v664_v7, %v668_v0 }
 0x514   : > { %v15985_v10 = vcombine.high %v665_v55, %v669_v2  ;;  %v15984_v16 = vcombine.low %v665_v55, %v669_v2 }
 0x515   : > { %14263 = vmatpush1.bf16.msra.mxu0 %v15942_v11  ;;  %14919 = vmatpush1.bf16.msra.mxu1 %v15944_v17  ;;  %v672_v11 = vld [vmem:[%s18438_s12 + $0xa50] sm:$0xff] }
 0x516   : > { %14264 = vmatprep.subr.bf16.mxu0 %v15951_v56  ;;  %14920 = vmatprep.subr.bf16.mxu1 %v15953_v14  ;;  %v676_v17 = vld [vmem:[%s18438_s12 + $0xa70] sm:$0xff]  ;;  %v673_v56 = vld [vmem:[%s18438_s12 + $0xa58] sm:$0xff] }
 0x517   : > { %v677_v14 = vld [vmem:[%s18438_s12 + $0xa78] sm:$0xff]  ;;  %v15991_v3 = vcombine.high %v672_v11, %v676_v17  ;;  %v15990_v30 = vcombine.low %v672_v11, %v676_v17 }
 0x518   : > { %v15993_v45 = vcombine.high %v673_v56, %v677_v14  ;;  %v15992_v42 = vcombine.low %v673_v56, %v677_v14 }
 0x519   : > { %14265 = vmatpush1.bf16.msra.mxu0 %v15950_v23  ;;  %14921 = vmatpush1.bf16.msra.mxu1 %v15952_v24  ;;  %v680_v23 = vld [vmem:[%s18438_s12 + $0xa90] sm:$0xff] }
 0x51a   : > { %14266 = vmatprep.subr.bf16.mxu0 %v15959_v29  ;;  %14922 = vmatprep.subr.bf16.mxu1 %v15961_v1  ;;  %v684_v24 = vld [vmem:[%s18438_s12 + $0xab0] sm:$0xff]  ;;  %v681_v29 = vld [vmem:[%s18438_s12 + $0xa98] sm:$0xff] }
 0x51b   : > { %v685_v1 = vld [vmem:[%s18438_s12 + $0xab8] sm:$0xff]  ;;  %v15999_v31 = vcombine.high %v680_v23, %v684_v24  ;;  %v15998_v50 = vcombine.low %v680_v23, %v684_v24 }
 0x51c   : > { %v16001_v41 = vcombine.high %v681_v29, %v685_v1  ;;  %v16000_v53 = vcombine.low %v681_v29, %v685_v1 }
 0x51d   : > { %14267 = vmatpush1.bf16.msra.mxu0 %v15958_v36  ;;  %14923 = vmatpush1.bf16.msra.mxu1 %v15960_v37  ;;  %v688_v36 = vld [vmem:[%s18438_s12 + $0xad0] sm:$0xff] }
 0x51e   : > { %14268 = vmatprep.subr.bf16.mxu0 %v15967_v46  ;;  %14924 = vmatprep.subr.bf16.mxu1 %v15969_v47  ;;  %v692_v37 = vld [vmem:[%s18438_s12 + $0xaf0] sm:$0xff]  ;;  %v689_v46 = vld [vmem:[%s18438_s12 + $0xad8] sm:$0xff] }
 0x51f   : > { %v693_v47 = vld [vmem:[%s18438_s12 + $0xaf8] sm:$0xff]  ;;  %v16007_v54 = vcombine.high %v688_v36, %v692_v37  ;;  %v16006_v7 = vcombine.low %v688_v36, %v692_v37 }
 0x520   : > { %v16009_v57 = vcombine.high %v689_v46, %v693_v47  ;;  %v16008_v0 = vcombine.low %v689_v46, %v693_v47 }
 0x521   : > { %14269 = vmatpush1.bf16.msra.mxu0 %v15966_v59  ;;  %14925 = vmatpush1.bf16.msra.mxu1 %v15968_v22  ;;  %v696_v59 = vld [vmem:[%s18438_s12 + $0xb10] sm:$0xff] }
 0x522   : > { %14270 = vmatprep.subr.bf16.mxu0 %v15975_v21  ;;  %14926 = vmatprep.subr.bf16.mxu1 %v15977_v63  ;;  %v700_v22 = vld [vmem:[%s18438_s12 + $0xb30] sm:$0xff]  ;;  %v697_v21 = vld [vmem:[%s18438_s12 + $0xb18] sm:$0xff] }
 0x523   : > { %v701_v63 = vld [vmem:[%s18438_s12 + $0xb38] sm:$0xff]  ;;  %v16015_v55 = vcombine.high %v696_v59, %v700_v22  ;;  %v16014_v11 = vcombine.low %v696_v59, %v700_v22 }
 0x524   : > { %v16017_v2 = vcombine.high %v697_v21, %v701_v63  ;;  %v16016_v17 = vcombine.low %v697_v21, %v701_v63 }
 0x525   : > { %14271 = vmatpush1.bf16.msra.mxu0 %v15974_v4  ;;  %14927 = vmatpush1.bf16.msra.mxu1 %v15976_v8  ;;  %v704_v4 = vld [vmem:[%s18438_s12 + $0xb50] sm:$0xff] }
 0x526   : > { %14272 = vmatprep.subr.bf16.mxu0 %v15983_v9  ;;  %14928 = vmatprep.subr.bf16.mxu1 %v15985_v10  ;;  %v708_v8 = vld [vmem:[%s18438_s12 + $0xb70] sm:$0xff]  ;;  %v705_v9 = vld [vmem:[%s18438_s12 + $0xb58] sm:$0xff] }
 0x527   : > { %v709_v10 = vld [vmem:[%s18438_s12 + $0xb78] sm:$0xff]  ;;  %v16023_v56 = vcombine.high %v704_v4, %v708_v8  ;;  %v16022_v23 = vcombine.low %v704_v4, %v708_v8 }
 0x528   : > { %v16025_v14 = vcombine.high %v705_v9, %v709_v10  ;;  %v16024_v24 = vcombine.low %v705_v9, %v709_v10 }
 0x529   : > { %14273 = vmatpush1.bf16.msra.mxu0 %v15982_v15  ;;  %14929 = vmatpush1.bf16.msra.mxu1 %v15984_v16  ;;  %v712_v15 = vld [vmem:[%s18438_s12 + $0xb90] sm:$0xff] }
 0x52a   : > { %14274 = vmatprep.subr.bf16.mxu0 %v15991_v3  ;;  %14930 = vmatprep.subr.bf16.mxu1 %v15993_v45  ;;  %v716_v16 = vld [vmem:[%s18438_s12 + $0xbb0] sm:$0xff]  ;;  %v713_v3 = vld [vmem:[%s18438_s12 + $0xb98] sm:$0xff] }
 0x52b   : > { %v717_v45 = vld [vmem:[%s18438_s12 + $0xbb8] sm:$0xff]  ;;  %v16031_v29 = vcombine.high %v712_v15, %v716_v16  ;;  %v16030_v36 = vcombine.low %v712_v15, %v716_v16 }
 0x52c   : > { %v16033_v1 = vcombine.high %v713_v3, %v717_v45  ;;  %v16032_v37 = vcombine.low %v713_v3, %v717_v45 }
 0x52d   : > { %14275 = vmatpush1.bf16.msra.mxu0 %v15990_v30  ;;  %14931 = vmatpush1.bf16.msra.mxu1 %v15992_v42  ;;  %v720_v30 = vld [vmem:[%s18438_s12 + $0xbd0] sm:$0xff] }
 0x52e   : > { %14276 = vmatprep.subr.bf16.mxu0 %v15999_v31  ;;  %14932 = vmatprep.subr.bf16.mxu1 %v16001_v41  ;;  %v724_v42 = vld [vmem:[%s18438_s12 + $0xbf0] sm:$0xff]  ;;  %v721_v31 = vld [vmem:[%s18438_s12 + $0xbd8] sm:$0xff] }
 0x52f   : > { %v725_v41 = vld [vmem:[%s18438_s12 + $0xbf8] sm:$0xff]  ;;  %v16039_v46 = vcombine.high %v720_v30, %v724_v42  ;;  %v16038_v59 = vcombine.low %v720_v30, %v724_v42 }
 0x530   : > { %v16041_v47 = vcombine.high %v721_v31, %v725_v41  ;;  %v16040_v22 = vcombine.low %v721_v31, %v725_v41  ;;  %v760_v41 = vld [vmem:[%s18438_s12 + $0xd10] sm:$0xff] }
 0x531   : > { %14277 = vmatpush1.bf16.msra.mxu0 %v15998_v50  ;;  %14933 = vmatpush1.bf16.msra.mxu1 %v16000_v53  ;;  %v728_v50 = vld [vmem:[%s18438_s12 + $0xc10] sm:$0xff] }
 0x532   : > { %14278 = vmatprep.subr.bf16.mxu0 %v16007_v54  ;;  %14934 = vmatprep.subr.bf16.mxu1 %v16009_v57  ;;  %v732_v53 = vld [vmem:[%s18438_s12 + $0xc30] sm:$0xff]  ;;  %v729_v54 = vld [vmem:[%s18438_s12 + $0xc18] sm:$0xff] }
 0x533   : > { %v733_v57 = vld [vmem:[%s18438_s12 + $0xc38] sm:$0xff]  ;;  %v16047_v21 = vcombine.high %v728_v50, %v732_v53  ;;  %v16046_v4 = vcombine.low %v728_v50, %v732_v53 }
 0x534   : > { %v16049_v63 = vcombine.high %v729_v54, %v733_v57  ;;  %v16048_v8 = vcombine.low %v729_v54, %v733_v57  ;;  %v18225_v54 = vmov 1983009808  }
 0x535   : > { %14279 = vmatpush1.bf16.msra.mxu0 %v16006_v7  ;;  %14935 = vmatpush1.bf16.msra.mxu1 %v16008_v0  ;;  %v736_v7 = vld [vmem:[%s18438_s12 + $0xc50] sm:$0xff]  ;;  %v15497_v57 = vunpack.c.l.s4 %v18225_v54 }
 0x536   : > { %14280 = vmatprep.subr.bf16.mxu0 %v16015_v55  ;;  %14936 = vmatprep.subr.bf16.mxu1 %v16017_v2  ;;  %v740_v0 = vld [vmem:[%s18438_s12 + $0xc70] sm:$0xff]  ;;  %v737_v55 = vld [vmem:[%s18438_s12 + $0xc58] sm:$0xff] }
 0x537   : > { %v741_v2 = vld [vmem:[%s18438_s12 + $0xc78] sm:$0xff]  ;;  %v16055_v9 = vcombine.high %v736_v7, %v740_v0  ;;  %v16054_v15 = vcombine.low %v736_v7, %v740_v0  ;;  %v792_v54 = vld [vmem:[%s18438_s12 + $0xe10] sm:$0xff] }
 0x538   : > { %v16057_v10 = vcombine.high %v737_v55, %v741_v2  ;;  %v16056_v16 = vcombine.low %v737_v55, %v741_v2  ;;  %v15498_v2 = vunpack.c.0.s8 %v15497_v57  ;;  %v796_v57 = vld [vmem:[%s18438_s12 + $0xe30] sm:$0xff] }
 0x539   : > { %14281 = vmatpush1.bf16.msra.mxu0 %v16014_v11  ;;  %14937 = vmatpush1.bf16.msra.mxu1 %v16016_v17  ;;  %v744_v11 = vld [vmem:[%s18438_s12 + $0xc90] sm:$0xff] }
 0x53a   : > { %14282 = vmatprep.subr.bf16.mxu0 %v16023_v56  ;;  %14938 = vmatprep.subr.bf16.mxu1 %v16025_v14  ;;  %v748_v17 = vld [vmem:[%s18438_s12 + $0xcb0] sm:$0xff]  ;;  %v745_v56 = vld [vmem:[%s18438_s12 + $0xc98] sm:$0xff] }
 0x53b   : > { %v749_v14 = vld [vmem:[%s18438_s12 + $0xcb8] sm:$0xff]  ;;  %v16063_v3 = vcombine.high %v744_v11, %v748_v17 }
 0x53c   : > { %v16065_v45 = vcombine.high %v745_v56, %v749_v14  ;;  %v16064_v30 = vcombine.low %v745_v56, %v749_v14 }
 0x53d   : > { %14283 = vmatpush1.bf16.msra.mxu0 %v16022_v23  ;;  %14939 = vmatpush1.bf16.msra.mxu1 %v16024_v24  ;;  %v752_v23 = vld [vmem:[%s18438_s12 + $0xcd0] sm:$0xff] }
 0x53e   : > { %14284 = vmatprep.subr.bf16.mxu0 %v16031_v29  ;;  %14940 = vmatprep.subr.bf16.mxu1 %v16033_v1  ;;  %v756_v24 = vld [vmem:[%s18438_s12 + $0xcf0] sm:$0xff]  ;;  %v753_v29 = vld [vmem:[%s18438_s12 + $0xcd8] sm:$0xff] }
 0x53f   : > { %v757_v1 = vld [vmem:[%s18438_s12 + $0xcf8] sm:$0xff]  ;;  %v16071_v42 = vcombine.high %v752_v23, %v756_v24 }
 0x540   : > { %v16073_v31 = vcombine.high %v753_v29, %v757_v1 }
 0x541   : > { %14285 = vmatpush1.bf16.msra.mxu0 %v16030_v36  ;;  %14941 = vmatpush1.bf16.msra.mxu1 %v16032_v37  ;;  %v764_v36 = vld [vmem:[%s18438_s12 + $0xd30] sm:$0xff]  ;;  %v761_v37 = vld [vmem:[%s18438_s12 + $0xd18] sm:$0xff] }
 0x542   : > { %14286 = vmatprep.subr.bf16.mxu0 %v16039_v46  ;;  %14942 = vmatprep.subr.bf16.mxu1 %v16041_v47  ;;  %v765_v46 = vld [vmem:[%s18438_s12 + $0xd38] sm:$0xff]  ;;  %v16070_v47 = vcombine.low %v752_v23, %v756_v24  ;;  %v16079_v50 = vcombine.high %v760_v41, %v764_v36  ;;  %v16078_v7 = vcombine.low %v760_v41, %v764_v36  ;;  %v788_v23 = vld [vmem:[%s18438_s12 + $0xdf0] sm:$0xff] }
 0x543   : > { %v16081_v53 = vcombine.high %v761_v37, %v765_v46  ;;  %v16080_v0 = vcombine.low %v761_v37, %v765_v46 }
 0x545   : > { %14287 = vmatpush1.bf16.msra.mxu0 %v16038_v59  ;;  %14943 = vmatpush1.bf16.msra.mxu1 %v16040_v22  ;;  %v768_v59 = vld [vmem:[%s18438_s12 + $0xd50] sm:$0xff] }
 0x546   : > { %14297 = vmatprep.subr.bf16.mxu0 %v16047_v21  ;;  %14953 = vmatprep.subr.bf16.mxu1 %v16049_v63  ;;  %v772_v22 = vld [vmem:[%s18438_s12 + $0xd70] sm:$0xff]  ;;  %v769_v21 = vld [vmem:[%s18438_s12 + $0xd58] sm:$0xff] }
 0x547   : > { %v773_v63 = vld [vmem:[%s18438_s12 + $0xd78] sm:$0xff]  ;;  %v16087_v55 = vcombine.high %v768_v59, %v772_v22 }
 0x548   : > { %14289 = vmatmul.mubr.bf16.vlgmr.msra.gmra.mrb[4].mxu0 %v18698_v27  ;;  %14945 = vmatmul.mubr.bf16.vlgmr.msra.gmra.mrb[4].mxu1 %v18698_v27  ;;  %v16062_v27 = vcombine.low %v744_v11, %v748_v17  ;;  %v781_v11 = vld [vmem:[%s18438_s12 + $0xdb8] sm:$0xff]  ;;  %v16086_v17 = vcombine.low %v768_v59, %v772_v22  ;;  %v16088_v56 = vcombine.low %v769_v21, %v773_v63 }
 0x549   : > { %14298 = vmatpush1.bf16.msra.mxu0 %v16046_v4  ;;  %14954 = vmatpush1.bf16.msra.mxu1 %v16048_v8  ;;  %v16089_v4 = vcombine.high %v769_v21, %v773_v63  ;;  %v776_v8 = vld [vmem:[%s18438_s12 + $0xd90] sm:$0xff]  ;;  %v793_v22 = vld [vmem:[%s18438_s12 + $0xe18] sm:$0xff] }
 0x54a   : > { %14299 = vmatprep.subr.bf16.mxu0 %v16055_v9  ;;  %14955 = vmatprep.subr.bf16.mxu1 %v16057_v10  ;;  %v780_v9 = vld [vmem:[%s18438_s12 + $0xdb0] sm:$0xff]  ;;  %v777_v10 = vld [vmem:[%s18438_s12 + $0xd98] sm:$0xff] }
 0x54b   : > { %14329 = vmatprep.mubr.bf16.mxu0 %v18706_v38  ;;  %14985 = vmatprep.mubr.bf16.mxu1 %v18706_v38  ;;  %v16072_v38 = vcombine.low %v753_v29, %v757_v1  ;;  %v16095_v14 = vcombine.high %v776_v8, %v780_v9  ;;  %v785_v1 = vld [vmem:[%s18438_s12 + $0xdd8] sm:$0xff]  ;;  %v16094_v41 = vcombine.low %v776_v8, %v780_v9  ;;  %v800_v8 = vld [vmem:[%s18438_s12 + $0xe50] sm:$0xff] }
 0x54c   : > { %v16096_v46 = vcombine.low %v777_v10, %v781_v11  ;;  %v797_v21 = vld [vmem:[%s18438_s12 + $0xe38] sm:$0xff]  ;;  %v804_v9 = vld [vmem:[%s18438_s12 + $0xe70] sm:$0xff] }
 0x54d   : > { %14300 = vmatpush1.bf16.msra.mxu0 %v16054_v15  ;;  %14956 = vmatpush1.bf16.msra.mxu1 %v16056_v16  ;;  %v19961_v16 = vsub.s32 %v15498_v2, %v18471_v13  ;;  %v16111_v2 = vcombine.high %v792_v54, %v796_v57 }
 0x54e   : > { %14301 = vmatprep.subr.bf16.mxu0 %v16063_v3  ;;  %14957 = vmatprep.subr.bf16.mxu1 %v16065_v45  ;;  %v16097_v3 = vcombine.high %v777_v10, %v781_v11  ;;  %v784_v45 = vld [vmem:[%s18438_s12 + $0xdd0] sm:$0xff]  ;;  %v801_v10 = vld [vmem:[%s18438_s12 + $0xe58] sm:$0xff] }
 0x54f   : > { %v16102_v63 = vcombine.low %v784_v45, %v788_v23  ;;  %v805_v11 = vld [vmem:[%s18438_s12 + $0xe78] sm:$0xff] }
 0x551   : > { %14302 = vmatpush1.bf16.msra.mxu0 %v16062_v27  ;;  %14958 = vmatpush1.bf16.msra.mxu1 %v16064_v30  ;;  %v789_v27 = vld [vmem:[%s18438_s12 + $0xdf8] sm:$0xff] }
 0x552   : > { %14303 = vmatprep.subr.bf16.mxu0 %v16071_v42  ;;  %14959 = vmatprep.subr.bf16.mxu1 %v16073_v31 }
 0x555   : > { %14304 = vmatpush1.bf16.msra.mxu0 %v16070_v47  ;;  %14960 = vmatpush1.bf16.msra.mxu1 %v16072_v38  ;;  %v16103_v47 = vcombine.high %v784_v45, %v788_v23  ;;  %v808_v45 = vld [vmem:[%s18438_s12 + $0xe90] sm:$0xff] }
 0x556   : > { %14305 = vmatprep.subr.bf16.mxu0 %v16079_v50  ;;  %14961 = vmatprep.subr.bf16.mxu1 %v16081_v53  ;;  %v16105_v53 = vcombine.high %v785_v1, %v789_v27  ;;  %v812_v23 = vld [vmem:[%s18438_s12 + $0xeb0] sm:$0xff] }
 0x559   : > { %14306 = vmatpush1.bf16.msra.mxu0 %v16078_v7  ;;  %14962 = vmatpush1.bf16.msra.mxu1 %v16080_v0  ;;  %v336_v7 = vld [vmem:[#allocation8] sm:$0xff] }
 0x55a   : > { %14307 = vmatprep.subr.bf16.mxu0 %v16087_v55  ;;  %14963 = vmatprep.subr.bf16.mxu1 %v16089_v4  ;;  %v16104_v55 = vcombine.low %v785_v1, %v789_v27  ;;  %v16113_v4 = vcombine.high %v793_v22, %v797_v21  ;;  %v16118_v1 = vcombine.low %v800_v8, %v804_v9 }
 0x55b   : > { %v13511_v15 = vpop.f32.mrb[0].mxu0  ;;  %v14167_v24 = vpop.f32.mrb[0].mxu1  ;;  %v16120_v27 = vcombine.low %v801_v10, %v805_v11 }
 0x55c   : > { %v13513_v29 = vpop.f32.mrb[1].mxu0  ;;  %v14169_v42 = vpop.f32.mrb[1].mxu1 }
 0x55d   : > { %v15494_v30 = vcombine.low %v13511_v15, %v13513_v29  ;;  %v13515_v31 = vpop.f32.mrb[2].mxu0  ;;  %14308 = vmatpush1.bf16.msra.mxu0 %v16086_v17  ;;  %v15495_v36 = vcombine.low %v14167_v24, %v14169_v42  ;;  %v14171_v13 = vpop.f32.mrb[2].mxu1  ;;  %14964 = vmatpush1.bf16.msra.mxu1 %v16088_v56  ;;  %v16110_v56 = vcombine.low %v792_v54, %v796_v57  ;;  %v809_v24 = vld [vmem:[%s18438_s12 + $0xe98] sm:$0xff] }
 0x55e   : > { %v13516_v37 = vpop.f32.mrb[3].mxu0  ;;  %14309 = vmatprep.subr.bf16.mxu0 %v16095_v14  ;;  %v14172_v50 = vpop.f32.mrb[3].mxu1  ;;  %14965 = vmatprep.subr.bf16.mxu1 %v16097_v3  ;;  %v16112_v14 = vcombine.low %v793_v22, %v797_v21  ;;  %v16119_v15 = vcombine.high %v800_v8, %v804_v9  ;;  %v16121_v3 = vcombine.high %v801_v10, %v805_v11  ;;  %v813_v29 = vld [vmem:[%s18438_s12 + $0xeb8] sm:$0xff]  ;;  %v816_v31 = vld [vmem:[%s18438_s12 + $0xed0] sm:$0xff] }
 0x55f   : > { %v15502_v38 = vrot.slane %v15494_v30, %v19961_v16  ;;  %v15509_v59 = vrot.slane %v15495_v36, %v19961_v16  ;;  %v16127_v30 = vcombine.high %v808_v45, %v812_v23  ;;  %v16129_v42 = vcombine.high %v809_v24, %v813_v29  ;;  %v817_v36 = vld [vmem:[%s18438_s12 + $0xed8] sm:$0xff]  ;;  %v824_v50 = vld [vmem:[%s18438_s12 + $0xf10] sm:$0xff] }
 0x560   : > { %v821_v13 = vld [vmem:[%s18438_s12 + $0xef8] sm:$0xff]  ;;  %v16126_v37 = vcombine.low %v808_v45, %v812_v23  ;;  %v840_v11 = vld [vmem:[%s18438_s12 + $0xf90] sm:$0xff] }
 0x561   : > { %14310 = vmatpush1.bf16.msra.mxu0 %v16094_v41  ;;  %v15510_v0 = vcombine.low %v15502_v38, %v15509_v59  ;;  %14966 = vmatpush1.bf16.msra.mxu1 %v16096_v46  ;;  %v820_v41 = vld [vmem:[%s18438_s12 + $0xef0] sm:$0xff]  ;;  %v16128_v46 = vcombine.low %v809_v24, %v813_v29  ;;  %v16137_v38 = vcombine.high %v817_v36, %v821_v13  ;;  %v825_v54 = vld [vmem:[%s18438_s12 + $0xf18] sm:$0xff] }
 0x562   : > { %14311 = vmatprep.subr.bf16.mxu0 %v16103_v47  ;;  %14967 = vmatprep.subr.bf16.mxu1 %v16105_v53  ;;  %v16135_v47 = vcombine.high %v816_v31, %v820_v41  ;;  %v828_v53 = vld [vmem:[%s18438_s12 + $0xf30] sm:$0xff]  ;;  %v829_v57 = vld [vmem:[%s18438_s12 + $0xf38] sm:$0xff]  ;;  %v16134_v59 = vcombine.low %v816_v31, %v820_v41  ;;  %v16136_v22 = vcombine.low %v817_v36, %v821_v13 }
 0x563   : > { %v15530_v17 = vadd.f32 %v15510_v0, %v336_v7  ;;  %v16143_v21 = vcombine.high %v824_v50, %v828_v53  ;;  %v832_v7 = vld [vmem:[%s18438_s12 + $0xf50] sm:$0xff]  ;;  %v16144_v8 = vcombine.low %v825_v54, %v829_v57 }
 0x564   : > { %v836_v0 = vld [vmem:[%s18438_s12 + $0xf70] sm:$0xff] }
 0x565   : > { %14312 = vmatpush1.bf16.msra.mxu0 %v16102_v63  ;;  %14968 = vmatpush1.bf16.msra.mxu1 %v16104_v55  ;;  %15532 = vst [vmem:[#allocation8] sm:$0xff] %v15530_v17  ;;  %v16145_v63 = vcombine.high %v825_v54, %v829_v57  ;;  %v833_v55 = vld [vmem:[%s18438_s12 + $0xf58] sm:$0xff]  ;;  %v16151_v9 = vcombine.high %v832_v7, %v836_v0  ;;  %v844_v17 = vld [vmem:[%s18438_s12 + $0xfb0] sm:$0xff] }
 0x566   : > { %14313 = vmatprep.subr.bf16.mxu0 %v16111_v2  ;;  %14969 = vmatprep.subr.bf16.mxu1 %v16113_v4  ;;  %v837_v2 = vld [vmem:[%s18438_s12 + $0xf78] sm:$0xff]  ;;  %v16142_v4 = vcombine.low %v824_v50, %v828_v53  ;;  %v16159_v45 = vcombine.high %v840_v11, %v844_v17  ;;  %v848_v24 = vld [vmem:[%s18438_s12 + $0xfd0] sm:$0xff] }
 0x567   : > { %v16153_v10 = vcombine.high %v833_v55, %v837_v2  ;;  %v852_v29 = vld [vmem:[%s18438_s12 + $0xff0] sm:$0xff] }
 0x568   : > { %v16167_v31 = vcombine.high %v848_v24, %v852_v29  ;;  %v856_v36 = vld [vmem:[%s18438_s12 + $0x1010] sm:$0xff] }
 0x569   : > { %14314 = vmatpush1.bf16.msra.mxu0 %v16110_v56  ;;  %14970 = vmatpush1.bf16.msra.mxu1 %v16112_v14  ;;  %v841_v56 = vld [vmem:[%s18438_s12 + $0xf98] sm:$0xff]  ;;  %v860_v13 = vld [vmem:[%s18438_s12 + $0x1030] sm:$0xff] }
 0x56a   : > { %14315 = vmatprep.subr.bf16.mxu0 %v16119_v15  ;;  %14971 = vmatprep.subr.bf16.mxu1 %v16121_v3  ;;  %v845_v14 = vld [vmem:[%s18438_s12 + $0xfb8] sm:$0xff]  ;;  %v16150_v15 = vcombine.low %v832_v7, %v836_v0  ;;  %v16152_v3 = vcombine.low %v833_v55, %v837_v2  ;;  %v16175_v50 = vcombine.high %v856_v36, %v860_v13  ;;  %v864_v54 = vld [vmem:[%s18438_s12 + $0x1050] sm:$0xff] }
 0x56b   : > { %v16161_v23 = vcombine.high %v841_v56, %v845_v14  ;;  %v868_v57 = vld [vmem:[%s18438_s12 + $0x1070] sm:$0xff] }
 0x56c   : > { %v16183_v7 = vcombine.high %v864_v54, %v868_v57  ;;  %v872_v55 = vld [vmem:[%s18438_s12 + $0x1090] sm:$0xff] }
 0x56d   : > { %14316 = vmatpush1.bf16.msra.mxu0 %v16118_v1  ;;  %14972 = vmatpush1.bf16.msra.mxu1 %v16120_v27  ;;  %v849_v1 = vld [vmem:[%s18438_s12 + $0xfd8] sm:$0xff]  ;;  %v876_v2 = vld [vmem:[%s18438_s12 + $0x10b0] sm:$0xff] }
 0x56e   : > { %14317 = vmatprep.subr.bf16.mxu0 %v16127_v30  ;;  %14973 = vmatprep.subr.bf16.mxu1 %v16129_v42  ;;  %v853_v27 = vld [vmem:[%s18438_s12 + $0xff8] sm:$0xff]  ;;  %v16158_v30 = vcombine.low %v840_v11, %v844_v17  ;;  %v16160_v42 = vcombine.low %v841_v56, %v845_v14  ;;  %v16191_v11 = vcombine.high %v872_v55, %v876_v2  ;;  %v880_v56 = vld [vmem:[%s18438_s12 + $0x10d0] sm:$0xff] }
 0x56f   : > { %v16169_v41 = vcombine.high %v849_v1, %v853_v27  ;;  %v884_v14 = vld [vmem:[%s18438_s12 + $0x10f0] sm:$0xff] }
 0x571   : > { %14318 = vmatpush1.bf16.msra.mxu0 %v16126_v37  ;;  %14974 = vmatpush1.bf16.msra.mxu1 %v16128_v46  ;;  %v857_v37 = vld [vmem:[%s18438_s12 + $0x1018] sm:$0xff] }
 0x572   : > { %14319 = vmatprep.subr.bf16.mxu0 %v16135_v47  ;;  %14975 = vmatprep.subr.bf16.mxu1 %v16137_v38  ;;  %v861_v46 = vld [vmem:[%s18438_s12 + $0x1038] sm:$0xff]  ;;  %v16166_v47 = vcombine.low %v848_v24, %v852_v29  ;;  %v16168_v38 = vcombine.low %v849_v1, %v853_v27  ;;  %v888_v29 = vld [vmem:[%s18438_s12 + $0x1110] sm:$0xff] }
 0x573   : > { %v16177_v53 = vcombine.high %v857_v37, %v861_v46  ;;  %v892_v1 = vld [vmem:[%s18438_s12 + $0x1130] sm:$0xff]  ;;  %v889_v27 = vld [vmem:[%s18438_s12 + $0x1118] sm:$0xff] }
 0x575   : > { %14320 = vmatpush1.bf16.msra.mxu0 %v16134_v59  ;;  %14976 = vmatpush1.bf16.msra.mxu1 %v16136_v22  ;;  %v865_v59 = vld [vmem:[%s18438_s12 + $0x1058] sm:$0xff] }
 0x576   : > { %14321 = vmatprep.subr.bf16.mxu0 %v16143_v21  ;;  %14977 = vmatprep.subr.bf16.mxu1 %v16145_v63  ;;  %v869_v22 = vld [vmem:[%s18438_s12 + $0x1078] sm:$0xff]  ;;  %v16174_v21 = vcombine.low %v856_v36, %v860_v13  ;;  %v16176_v63 = vcombine.low %v857_v37, %v861_v46  ;;  %v896_v36 = vld [vmem:[%s18438_s12 + $0x1150] sm:$0xff] }
 0x577   : > { %v16185_v0 = vcombine.high %v865_v59, %v869_v22  ;;  %v900_v13 = vld [vmem:[%s18438_s12 + $0x1170] sm:$0xff]  ;;  %v897_v37 = vld [vmem:[%s18438_s12 + $0x1158] sm:$0xff] }
 0x578   : > { %v901_v46 = vld [vmem:[%s18438_s12 + $0x1178] sm:$0xff] }
 0x579   : > { %14322 = vmatpush1.bf16.msra.mxu0 %v16142_v4  ;;  %14978 = vmatpush1.bf16.msra.mxu1 %v16144_v8  ;;  %v873_v4 = vld [vmem:[%s18438_s12 + $0x1098] sm:$0xff] }
 0x57a   : > { %14323 = vmatprep.subr.bf16.mxu0 %v16151_v9  ;;  %14979 = vmatprep.subr.bf16.mxu1 %v16153_v10  ;;  %v877_v8 = vld [vmem:[%s18438_s12 + $0x10b8] sm:$0xff]  ;;  %v16182_v9 = vcombine.low %v864_v54, %v868_v57  ;;  %v16184_v10 = vcombine.low %v865_v59, %v869_v22  ;;  %v904_v54 = vld [vmem:[%s18438_s12 + $0x1190] sm:$0xff] }
 0x57b   : > { %v16193_v17 = vcombine.high %v873_v4, %v877_v8  ;;  %v908_v57 = vld [vmem:[%s18438_s12 + $0x11b0] sm:$0xff]  ;;  %v905_v59 = vld [vmem:[%s18438_s12 + $0x1198] sm:$0xff] }
 0x57c   : > { %v909_v22 = vld [vmem:[%s18438_s12 + $0x11b8] sm:$0xff] }
 0x57d   : > { %14324 = vmatpush1.bf16.msra.mxu0 %v16150_v15  ;;  %14980 = vmatpush1.bf16.msra.mxu1 %v16152_v3  ;;  %v881_v15 = vld [vmem:[%s18438_s12 + $0x10d8] sm:$0xff] }
 0x57e   : > { %14325 = vmatprep.subr.bf16.mxu0 %v16159_v45  ;;  %14981 = vmatprep.subr.bf16.mxu1 %v16161_v23  ;;  %v885_v3 = vld [vmem:[%s18438_s12 + $0x10f8] sm:$0xff]  ;;  %v16192_v45 = vcombine.low %v873_v4, %v877_v8  ;;  %v16199_v23 = vcombine.high %v880_v56, %v884_v14 }
 0x57f   : > { %v16201_v24 = vcombine.high %v881_v15, %v885_v3  ;;  %v913_v4 = vld [vmem:[%s18438_s12 + $0x11d8] sm:$0xff] }
 0x580   : > { %v917_v8 = vld [vmem:[%s18438_s12 + $0x11f8] sm:$0xff] }
 0x581   : > { %14326 = vmatpush1.bf16.msra.mxu0 %v16158_v30  ;;  %14982 = vmatpush1.bf16.msra.mxu1 %v16160_v42  ;;  %v893_v30 = vld [vmem:[%s18438_s12 + $0x1138] sm:$0xff]  ;;  %v16198_v42 = vcombine.low %v880_v56, %v884_v14  ;;  %v920_v56 = vld [vmem:[%s18438_s12 + $0x1210] sm:$0xff] }
 0x582   : > { %14327 = vmatprep.subr.bf16.mxu0 %v16167_v31  ;;  %14983 = vmatprep.subr.bf16.mxu1 %v16169_v41  ;;  %v16207_v31 = vcombine.high %v888_v29, %v892_v1  ;;  %v16209_v41 = vcombine.high %v889_v27, %v893_v30  ;;  %v924_v14 = vld [vmem:[%s18438_s12 + $0x1230] sm:$0xff] }
 0x585   : > { %14328 = vmatpush1.bf16.msra.mxu0 %v16166_v47  ;;  %14984 = vmatpush1.bf16.msra.mxu1 %v16168_v38  ;;  %v16206_v47 = vcombine.low %v888_v29, %v892_v1  ;;  %v16208_v38 = vcombine.low %v889_v27, %v893_v30  ;;  %v928_v29 = vld [vmem:[%s18438_s12 + $0x1250] sm:$0xff]  ;;  %v929_v27 = vld [vmem:[%s18438_s12 + $0x1258] sm:$0xff] }
 0x586   : > { %14338 = vmatprep.subr.bf16.mxu0 %v16175_v50  ;;  %14994 = vmatprep.subr.bf16.mxu1 %v16177_v53  ;;  %v16215_v50 = vcombine.high %v896_v36, %v900_v13  ;;  %v16217_v53 = vcombine.high %v897_v37, %v901_v46  ;;  %v932_v1 = vld [vmem:[%s18438_s12 + $0x1270] sm:$0xff]  ;;  %v933_v30 = vld [vmem:[%s18438_s12 + $0x1278] sm:$0xff] }
 0x588   : > { %14330 = vmatmul.mubr.bf16.vlgmr.msra.gmra.mrb[4].mxu0 %v18783_v52  ;;  %14986 = vmatmul.mubr.bf16.vlgmr.msra.gmra.mrb[4].mxu1 %v18783_v52  ;;  %v16190_v52 = vcombine.low %v872_v55, %v876_v2  ;;  %v912_v55 = vld [vmem:[%s18438_s12 + $0x11d0] sm:$0xff] }
 0x589   : > { %14339 = vmatpush1.bf16.msra.mxu0 %v16174_v21  ;;  %14995 = vmatpush1.bf16.msra.mxu1 %v16176_v63  ;;  %v16214_v21 = vcombine.low %v896_v36, %v900_v13  ;;  %v16216_v63 = vcombine.low %v897_v37, %v901_v46  ;;  %v916_v2 = vld [vmem:[%s18438_s12 + $0x11f0] sm:$0xff]  ;;  %v937_v37 = vld [vmem:[%s18438_s12 + $0x1298] sm:$0xff] }
 0x58a   : > { %14340 = vmatprep.subr.bf16.mxu0 %v16183_v7  ;;  %14996 = vmatprep.subr.bf16.mxu1 %v16185_v0  ;;  %v16223_v7 = vcombine.high %v904_v54, %v908_v57  ;;  %v16225_v0 = vcombine.high %v905_v59, %v909_v22  ;;  %v936_v36 = vld [vmem:[%s18438_s12 + $0x1290] sm:$0xff]  ;;  %v941_v46 = vld [vmem:[%s18438_s12 + $0x12b8] sm:$0xff] }
 0x58b   : > { %14370 = vmatprep.mubr.bf16.mxu0 %v18790_v28  ;;  %15026 = vmatprep.mubr.bf16.mxu1 %v18790_v28  ;;  %v16200_v28 = vcombine.low %v881_v15, %v885_v3  ;;  %v921_v15 = vld [vmem:[%s18438_s12 + $0x1218] sm:$0xff]  ;;  %v940_v13 = vld [vmem:[%s18438_s12 + $0x12b0] sm:$0xff] }
 0x58c   : > { %v925_v3 = vld [vmem:[%s18438_s12 + $0x1238] sm:$0xff] }
 0x58d   : > { %14341 = vmatpush1.bf16.msra.mxu0 %v16182_v9  ;;  %14997 = vmatpush1.bf16.msra.mxu1 %v16184_v10  ;;  %v16222_v9 = vcombine.low %v904_v54, %v908_v57  ;;  %v16224_v10 = vcombine.low %v905_v59, %v909_v22  ;;  %v944_v54 = vld [vmem:[%s18438_s12 + $0x12d0] sm:$0xff]  ;;  %v945_v59 = vld [vmem:[%s18438_s12 + $0x12d8] sm:$0xff] }
 0x58e   : > { %14342 = vmatprep.subr.bf16.mxu0 %v16191_v11  ;;  %14998 = vmatprep.subr.bf16.mxu1 %v16193_v17  ;;  %v16231_v11 = vcombine.high %v912_v55, %v916_v2  ;;  %v16233_v17 = vcombine.high %v913_v4, %v917_v8  ;;  %v948_v57 = vld [vmem:[%s18438_s12 + $0x12f0] sm:$0xff]  ;;  %v949_v22 = vld [vmem:[%s18438_s12 + $0x12f8] sm:$0xff] }
 0x591   : > { %14343 = vmatpush1.bf16.msra.mxu0 %v16190_v52  ;;  %14999 = vmatpush1.bf16.msra.mxu1 %v16192_v45  ;;  %v16230_v52 = vcombine.low %v912_v55, %v916_v2  ;;  %v16232_v45 = vcombine.low %v913_v4, %v917_v8  ;;  %v952_v55 = vld [vmem:[%s18438_s12 + $0x1310] sm:$0xff]  ;;  %v953_v4 = vld [vmem:[%s18438_s12 + $0x1318] sm:$0xff] }
 0x592   : > { %14344 = vmatprep.subr.bf16.mxu0 %v16199_v23  ;;  %15000 = vmatprep.subr.bf16.mxu1 %v16201_v24  ;;  %v16239_v23 = vcombine.high %v920_v56, %v924_v14  ;;  %v16241_v24 = vcombine.high %v921_v15, %v925_v3  ;;  %v956_v2 = vld [vmem:[%s18438_s12 + $0x1330] sm:$0xff]  ;;  %v957_v8 = vld [vmem:[%s18438_s12 + $0x1338] sm:$0xff] }
 0x595   : > { %14345 = vmatpush1.bf16.msra.mxu0 %v16198_v42  ;;  %15001 = vmatpush1.bf16.msra.mxu1 %v16200_v28  ;;  %v16238_v42 = vcombine.low %v920_v56, %v924_v14  ;;  %v16240_v28 = vcombine.low %v921_v15, %v925_v3  ;;  %v960_v56 = vld [vmem:[%s18438_s12 + $0x1350] sm:$0xff]  ;;  %v961_v15 = vld [vmem:[%s18438_s12 + $0x1358] sm:$0xff] }
 0x596   : > { %14346 = vmatprep.subr.bf16.mxu0 %v16207_v31  ;;  %15002 = vmatprep.subr.bf16.mxu1 %v16209_v41  ;;  %v16247_v31 = vcombine.high %v928_v29, %v932_v1  ;;  %v16249_v41 = vcombine.high %v929_v27, %v933_v30  ;;  %v964_v14 = vld [vmem:[%s18438_s12 + $0x1370] sm:$0xff]  ;;  %v965_v3 = vld [vmem:[%s18438_s12 + $0x1378] sm:$0xff] }
 0x599   : > { %14347 = vmatpush1.bf16.msra.mxu0 %v16206_v47  ;;  %15003 = vmatpush1.bf16.msra.mxu1 %v16208_v38  ;;  %v16246_v47 = vcombine.low %v928_v29, %v932_v1  ;;  %v16248_v38 = vcombine.low %v929_v27, %v933_v30  ;;  %v968_v29 = vld [vmem:[%s18438_s12 + $0x1390] sm:$0xff]  ;;  %v969_v27 = vld [vmem:[%s18438_s12 + $0x1398] sm:$0xff] }
 0x59a   : > { %14348 = vmatprep.subr.bf16.mxu0 %v16215_v50  ;;  %15004 = vmatprep.subr.bf16.mxu1 %v16217_v53  ;;  %v16255_v50 = vcombine.high %v936_v36, %v940_v13  ;;  %v16257_v53 = vcombine.high %v937_v37, %v941_v46  ;;  %v972_v1 = vld [vmem:[%s18438_s12 + $0x13b0] sm:$0xff]  ;;  %v973_v30 = vld [vmem:[%s18438_s12 + $0x13b8] sm:$0xff] }
 0x59d   : > { %14349 = vmatpush1.bf16.msra.mxu0 %v16214_v21  ;;  %15005 = vmatpush1.bf16.msra.mxu1 %v16216_v63  ;;  %v16254_v21 = vcombine.low %v936_v36, %v940_v13  ;;  %v16256_v63 = vcombine.low %v937_v37, %v941_v46  ;;  %v976_v36 = vld [vmem:[%s18438_s12 + $0x13d0] sm:$0xff]  ;;  %v977_v37 = vld [vmem:[%s18438_s12 + $0x13d8] sm:$0xff] }
 0x59e   : > { %14350 = vmatprep.subr.bf16.mxu0 %v16223_v7  ;;  %15006 = vmatprep.subr.bf16.mxu1 %v16225_v0  ;;  %v16263_v7 = vcombine.high %v944_v54, %v948_v57  ;;  %v16265_v0 = vcombine.high %v945_v59, %v949_v22  ;;  %v980_v13 = vld [vmem:[%s18438_s12 + $0x13f0] sm:$0xff]  ;;  %v981_v46 = vld [vmem:[%s18438_s12 + $0x13f8] sm:$0xff] }
 0x5a1   : > { %14351 = vmatpush1.bf16.msra.mxu0 %v16222_v9  ;;  %15007 = vmatpush1.bf16.msra.mxu1 %v16224_v10  ;;  %v16262_v9 = vcombine.low %v944_v54, %v948_v57  ;;  %v16264_v10 = vcombine.low %v945_v59, %v949_v22  ;;  %v984_v54 = vld [vmem:[%s18438_s12 + $0x1410] sm:$0xff]  ;;  %v985_v59 = vld [vmem:[%s18438_s12 + $0x1418] sm:$0xff] }
 0x5a2   : > { %14352 = vmatprep.subr.bf16.mxu0 %v16231_v11  ;;  %15008 = vmatprep.subr.bf16.mxu1 %v16233_v17  ;;  %v16271_v11 = vcombine.high %v952_v55, %v956_v2  ;;  %v16273_v17 = vcombine.high %v953_v4, %v957_v8  ;;  %v988_v57 = vld [vmem:[%s18438_s12 + $0x1430] sm:$0xff]  ;;  %v989_v22 = vld [vmem:[%s18438_s12 + $0x1438] sm:$0xff] }
 0x5a5   : > { %14353 = vmatpush1.bf16.msra.mxu0 %v16230_v52  ;;  %15009 = vmatpush1.bf16.msra.mxu1 %v16232_v45  ;;  %v16270_v52 = vcombine.low %v952_v55, %v956_v2  ;;  %v16272_v45 = vcombine.low %v953_v4, %v957_v8  ;;  %v992_v55 = vld [vmem:[%s18438_s12 + $0x1450] sm:$0xff]  ;;  %v993_v4 = vld [vmem:[%s18438_s12 + $0x1458] sm:$0xff] }
 0x5a6   : > { %14354 = vmatprep.subr.bf16.mxu0 %v16239_v23  ;;  %15010 = vmatprep.subr.bf16.mxu1 %v16241_v24  ;;  %v16279_v23 = vcombine.high %v960_v56, %v964_v14  ;;  %v16281_v24 = vcombine.high %v961_v15, %v965_v3  ;;  %v996_v2 = vld [vmem:[%s18438_s12 + $0x1470] sm:$0xff]  ;;  %v997_v8 = vld [vmem:[%s18438_s12 + $0x1478] sm:$0xff] }
 0x5a9   : > { %14355 = vmatpush1.bf16.msra.mxu0 %v16238_v42  ;;  %15011 = vmatpush1.bf16.msra.mxu1 %v16240_v28  ;;  %v16278_v42 = vcombine.low %v960_v56, %v964_v14  ;;  %v16280_v28 = vcombine.low %v961_v15, %v965_v3  ;;  %v1000_v56 = vld [vmem:[%s18438_s12 + $0x1490] sm:$0xff]  ;;  %v1001_v15 = vld [vmem:[%s18438_s12 + $0x1498] sm:$0xff] }
 0x5aa   : > { %14356 = vmatprep.subr.bf16.mxu0 %v16247_v31  ;;  %15012 = vmatprep.subr.bf16.mxu1 %v16249_v41  ;;  %v16287_v31 = vcombine.high %v968_v29, %v972_v1  ;;  %v16289_v41 = vcombine.high %v969_v27, %v973_v30  ;;  %v1004_v14 = vld [vmem:[%s18438_s12 + $0x14b0] sm:$0xff]  ;;  %v1005_v3 = vld [vmem:[%s18438_s12 + $0x14b8] sm:$0xff] }
 0x5ad   : > { %14357 = vmatpush1.bf16.msra.mxu0 %v16246_v47  ;;  %15013 = vmatpush1.bf16.msra.mxu1 %v16248_v38  ;;  %v16286_v47 = vcombine.low %v968_v29, %v972_v1  ;;  %v16288_v38 = vcombine.low %v969_v27, %v973_v30  ;;  %v1008_v29 = vld [vmem:[%s18438_s12 + $0x14d0] sm:$0xff]  ;;  %v1009_v27 = vld [vmem:[%s18438_s12 + $0x14d8] sm:$0xff] }
 0x5ae   : > { %14358 = vmatprep.subr.bf16.mxu0 %v16255_v50  ;;  %15014 = vmatprep.subr.bf16.mxu1 %v16257_v53  ;;  %v16295_v50 = vcombine.high %v976_v36, %v980_v13  ;;  %v16297_v53 = vcombine.high %v977_v37, %v981_v46  ;;  %v1012_v1 = vld [vmem:[%s18438_s12 + $0x14f0] sm:$0xff]  ;;  %v1013_v30 = vld [vmem:[%s18438_s12 + $0x14f8] sm:$0xff] }
 0x5b1   : > { %14359 = vmatpush1.bf16.msra.mxu0 %v16254_v21  ;;  %15015 = vmatpush1.bf16.msra.mxu1 %v16256_v63  ;;  %v16294_v21 = vcombine.low %v976_v36, %v980_v13  ;;  %v16296_v63 = vcombine.low %v977_v37, %v981_v46  ;;  %v1020_v36 = vld [vmem:[%s18438_s12 + $0x1530] sm:$0xff]  ;;  %v1017_v13 = vld [vmem:[%s18438_s12 + $0x1518] sm:$0xff]  ;;  %v16326_v46 = vcombine.low %v1008_v29, %v1012_v1 }
 0x5b2   : > { %14360 = vmatprep.subr.bf16.mxu0 %v16263_v7  ;;  %15016 = vmatprep.subr.bf16.mxu1 %v16265_v0  ;;  %v16303_v7 = vcombine.high %v984_v54, %v988_v57  ;;  %v16305_v0 = vcombine.high %v985_v59, %v989_v22  ;;  %v1021_v37 = vld [vmem:[%s18438_s12 + $0x1538] sm:$0xff] }
 0x5b5   : > { %14361 = vmatpush1.bf16.msra.mxu0 %v16262_v9  ;;  %15017 = vmatpush1.bf16.msra.mxu1 %v16264_v10  ;;  %v16302_v9 = vcombine.low %v984_v54, %v988_v57  ;;  %v16304_v10 = vcombine.low %v985_v59, %v989_v22  ;;  %v1025_v54 = vld [vmem:[%s18438_s12 + $0x1558] sm:$0xff]  ;;  %v16336_v22 = vcombine.low %v1017_v13, %v1021_v37 }
 0x5b6   : > { %14362 = vmatprep.subr.bf16.mxu0 %v16271_v11  ;;  %15018 = vmatprep.subr.bf16.mxu1 %v16273_v17  ;;  %v16311_v11 = vcombine.high %v992_v55, %v996_v2  ;;  %v16313_v17 = vcombine.high %v993_v4, %v997_v8  ;;  %v1029_v57 = vld [vmem:[%s18438_s12 + $0x1578] sm:$0xff] }
 0x5b9   : > { %14363 = vmatpush1.bf16.msra.mxu0 %v16270_v52  ;;  %15019 = vmatpush1.bf16.msra.mxu1 %v16272_v45  ;;  %v16310_v52 = vcombine.low %v992_v55, %v996_v2  ;;  %v16312_v45 = vcombine.low %v993_v4, %v997_v8  ;;  %v1033_v55 = vld [vmem:[%s18438_s12 + $0x1598] sm:$0xff]  ;;  %v16344_v8 = vcombine.low %v1025_v54, %v1029_v57 }
 0x5ba   : > { %14364 = vmatprep.subr.bf16.mxu0 %v16279_v23  ;;  %15020 = vmatprep.subr.bf16.mxu1 %v16281_v24  ;;  %v16319_v23 = vcombine.high %v1000_v56, %v1004_v14  ;;  %v16321_v24 = vcombine.high %v1001_v15, %v1005_v3  ;;  %v1037_v2 = vld [vmem:[%s18438_s12 + $0x15b8] sm:$0xff] }
 0x5bd   : > { %14365 = vmatpush1.bf16.msra.mxu0 %v16278_v42  ;;  %15021 = vmatpush1.bf16.msra.mxu1 %v16280_v28  ;;  %v16320_v42 = vcombine.low %v1001_v15, %v1005_v3  ;;  %v16327_v28 = vcombine.high %v1008_v29, %v1012_v1  ;;  %v16352_v3 = vcombine.low %v1033_v55, %v1037_v2  ;;  %v1049_v29 = vld [vmem:[%s18438_s12 + $0x1618] sm:$0xff] }
 0x5be   : > { %14366 = vmatprep.subr.bf16.mxu0 %v16287_v31  ;;  %15022 = vmatprep.subr.bf16.mxu1 %v16289_v41  ;;  %v16329_v31 = vcombine.high %v1009_v27, %v1013_v30  ;;  %v1016_v41 = vld [vmem:[%s18438_s12 + $0x1510] sm:$0xff]  ;;  %v1053_v1 = vld [vmem:[%s18438_s12 + $0x1638] sm:$0xff] }
 0x5bf   : > { %v16334_v59 = vcombine.low %v1016_v41, %v1020_v36 }
 0x5c1   : > { %14367 = vmatpush1.bf16.msra.mxu0 %v16286_v47  ;;  %15023 = vmatpush1.bf16.msra.mxu1 %v16288_v38  ;;  %v16335_v47 = vcombine.high %v1016_v41, %v1020_v36  ;;  %v16337_v38 = vcombine.high %v1017_v13, %v1021_v37  ;;  %v1057_v41 = vld [vmem:[%s18438_s12 + $0x1658] sm:$0xff]  ;;  %v16368_v37 = vcombine.low %v1049_v29, %v1053_v1 }
 0x5c2   : > { %14368 = vmatprep.subr.bf16.mxu0 %v16295_v50  ;;  %15024 = vmatprep.subr.bf16.mxu1 %v16297_v53  ;;  %v1024_v50 = vld [vmem:[%s18438_s12 + $0x1550] sm:$0xff]  ;;  %v1061_v36 = vld [vmem:[%s18438_s12 + $0x1678] sm:$0xff] }
 0x5c3   : > { %v1028_v53 = vld [vmem:[%s18438_s12 + $0x1570] sm:$0xff] }
 0x5c4   : > { %v16342_v4 = vcombine.low %v1024_v50, %v1028_v53 }
 0x5c5   : > { %14369 = vmatpush1.bf16.msra.mxu0 %v16294_v21  ;;  %15025 = vmatpush1.bf16.msra.mxu1 %v16296_v63  ;;  %v16343_v21 = vcombine.high %v1024_v50, %v1028_v53  ;;  %v16345_v63 = vcombine.high %v1025_v54, %v1029_v57  ;;  %v1065_v50 = vld [vmem:[%s18438_s12 + $0x1698] sm:$0xff]  ;;  %v16376_v57 = vcombine.low %v1057_v41, %v1061_v36 }
 0x5c6   : > { %14379 = vmatprep.subr.bf16.mxu0 %v16303_v7  ;;  %15035 = vmatprep.subr.bf16.mxu1 %v16305_v0  ;;  %v1032_v7 = vld [vmem:[%s18438_s12 + $0x1590] sm:$0xff]  ;;  %v1069_v53 = vld [vmem:[%s18438_s12 + $0x16b8] sm:$0xff] }
 0x5c7   : > { %v1036_v0 = vld [vmem:[%s18438_s12 + $0x15b0] sm:$0xff] }
 0x5c8   : > { %14371 = vmatmul.mubr.bf16.vlgmr.msra.gmra.mrb[4].mxu0 %v18858_v20  ;;  %15027 = vmatmul.mubr.bf16.vlgmr.msra.gmra.mrb[4].mxu1 %v18858_v20  ;;  %v16318_v20 = vcombine.low %v1000_v56, %v1004_v14  ;;  %v1041_v56 = vld [vmem:[%s18438_s12 + $0x15d8] sm:$0xff]  ;;  %v16350_v15 = vcombine.low %v1032_v7, %v1036_v0 }
 0x5c9   : > { %14380 = vmatpush1.bf16.msra.mxu0 %v16302_v9  ;;  %15036 = vmatpush1.bf16.msra.mxu1 %v16304_v10  ;;  %v16351_v9 = vcombine.high %v1032_v7, %v1036_v0  ;;  %v16353_v10 = vcombine.high %v1033_v55, %v1037_v2  ;;  %v1045_v14 = vld [vmem:[%s18438_s12 + $0x15f8] sm:$0xff]  ;;  %v16384_v2 = vcombine.low %v1065_v50, %v1069_v53 }
 0x5ca   : > { %14381 = vmatprep.subr.bf16.mxu0 %v16311_v11  ;;  %15037 = vmatprep.subr.bf16.mxu1 %v16313_v17  ;;  %v1040_v11 = vld [vmem:[%s18438_s12 + $0x15d0] sm:$0xff]  ;;  %v1073_v7 = vld [vmem:[%s18438_s12 + $0x16d8] sm:$0xff] }
 0x5cb   : > { %14411 = vmatprep.mubr.bf16.mxu0 %v18866_v33  ;;  %15067 = vmatprep.mubr.bf16.mxu1 %v18866_v33  ;;  %v16328_v33 = vcombine.low %v1009_v27, %v1013_v30  ;;  %v1044_v17 = vld [vmem:[%s18438_s12 + $0x15f0] sm:$0xff]  ;;  %v16360_v30 = vcombine.low %v1041_v56, %v1045_v14  ;;  %v1077_v0 = vld [vmem:[%s18438_s12 + $0x16f8] sm:$0xff] }
 0x5cc   : > { %v16358_v27 = vcombine.low %v1040_v11, %v1044_v17 }
 0x5cd   : > { %14382 = vmatpush1.bf16.msra.mxu0 %v16310_v52  ;;  %15038 = vmatpush1.bf16.msra.mxu1 %v16312_v45  ;;  %v16359_v52 = vcombine.high %v1040_v11, %v1044_v17  ;;  %v16361_v45 = vcombine.high %v1041_v56, %v1045_v14  ;;  %v1081_v11 = vld [vmem:[%s18438_s12 + $0x1718] sm:$0xff]  ;;  %v16392_v14 = vcombine.low %v1073_v7, %v1077_v0 }
 0x5ce   : > { %14383 = vmatprep.subr.bf16.mxu0 %v16319_v23  ;;  %15039 = vmatprep.subr.bf16.mxu1 %v16321_v24  ;;  %v1048_v23 = vld [vmem:[%s18438_s12 + $0x1610] sm:$0xff]  ;;  %v1085_v17 = vld [vmem:[%s18438_s12 + $0x1738] sm:$0xff] }
 0x5cf   : > { %v1052_v24 = vld [vmem:[%s18438_s12 + $0x1630] sm:$0xff] }
 0x5d0   : > { %v16366_v13 = vcombine.low %v1048_v23, %v1052_v24 }
 0x5d1   : > { %14384 = vmatpush1.bf16.msra.mxu0 %v16318_v20  ;;  %15040 = vmatpush1.bf16.msra.mxu1 %v16320_v42  ;;  %v16367_v20 = vcombine.high %v1048_v23, %v1052_v24  ;;  %v16369_v42 = vcombine.high %v1049_v29, %v1053_v1  ;;  %v1089_v23 = vld [vmem:[%s18438_s12 + $0x1758] sm:$0xff]  ;;  %v16400_v1 = vcombine.low %v1081_v11, %v1085_v17 }
 0x5d2   : > { %14385 = vmatprep.subr.bf16.mxu0 %v16327_v28  ;;  %15041 = vmatprep.subr.bf16.mxu1 %v16329_v31  ;;  %v1056_v28 = vld [vmem:[%s18438_s12 + $0x1650] sm:$0xff]  ;;  %v1093_v24 = vld [vmem:[%s18438_s12 + $0x1778] sm:$0xff] }
 0x5d3   : > { %v1060_v31 = vld [vmem:[%s18438_s12 + $0x1670] sm:$0xff] }
 0x5d4   : > { %v16374_v54 = vcombine.low %v1056_v28, %v1060_v31 }
 0x5d5   : > { %14386 = vmatpush1.bf16.msra.mxu0 %v16326_v46  ;;  %15042 = vmatpush1.bf16.msra.mxu1 %v16328_v33  ;;  %v16375_v46 = vcombine.high %v1056_v28, %v1060_v31  ;;  %v16377_v33 = vcombine.high %v1057_v41, %v1061_v36  ;;  %v1097_v28 = vld [vmem:[%s18438_s12 + $0x1798] sm:$0xff]  ;;  %v16408_v36 = vcombine.low %v1089_v23, %v1093_v24 }
 0x5d6   : > { %14387 = vmatprep.subr.bf16.mxu0 %v16335_v47  ;;  %15043 = vmatprep.subr.bf16.mxu1 %v16337_v38  ;;  %v1064_v47 = vld [vmem:[%s18438_s12 + $0x1690] sm:$0xff]  ;;  %v1101_v31 = vld [vmem:[%s18438_s12 + $0x17b8] sm:$0xff] }
 0x5d7   : > { %v1068_v38 = vld [vmem:[%s18438_s12 + $0x16b0] sm:$0xff] }
 0x5d8   : > { %v16382_v55 = vcombine.low %v1064_v47, %v1068_v38 }
 0x5d9   : > { %14388 = vmatpush1.bf16.msra.mxu0 %v16334_v59  ;;  %15044 = vmatpush1.bf16.msra.mxu1 %v16336_v22  ;;  %v16383_v59 = vcombine.high %v1064_v47, %v1068_v38  ;;  %v16385_v22 = vcombine.high %v1065_v50, %v1069_v53  ;;  %v1105_v47 = vld [vmem:[%s18438_s12 + $0x17d8] sm:$0xff]  ;;  %v16416_v53 = vcombine.low %v1097_v28, %v1101_v31 }
 0x5da   : > { %14389 = vmatprep.subr.bf16.mxu0 %v16343_v21  ;;  %15045 = vmatprep.subr.bf16.mxu1 %v16345_v63  ;;  %v1072_v21 = vld [vmem:[%s18438_s12 + $0x16d0] sm:$0xff]  ;;  %v1109_v38 = vld [vmem:[%s18438_s12 + $0x17f8] sm:$0xff] }
 0x5db   : > { %v1076_v63 = vld [vmem:[%s18438_s12 + $0x16f0] sm:$0xff] }
 0x5dc   : > { %v16390_v56 = vcombine.low %v1072_v21, %v1076_v63 }
 0x5dd   : > { %14390 = vmatpush1.bf16.msra.mxu0 %v16342_v4  ;;  %15046 = vmatpush1.bf16.msra.mxu1 %v16344_v8  ;;  %v16391_v4 = vcombine.high %v1072_v21, %v1076_v63  ;;  %v16393_v8 = vcombine.high %v1073_v7, %v1077_v0  ;;  %v1113_v21 = vld [vmem:[%s18438_s12 + $0x1818] sm:$0xff]  ;;  %v16424_v0 = vcombine.low %v1105_v47, %v1109_v38 }
 0x5de   : > { %14391 = vmatprep.subr.bf16.mxu0 %v16351_v9  ;;  %15047 = vmatprep.subr.bf16.mxu1 %v16353_v10  ;;  %v1080_v9 = vld [vmem:[%s18438_s12 + $0x1710] sm:$0xff]  ;;  %v1117_v63 = vld [vmem:[%s18438_s12 + $0x1838] sm:$0xff] }
 0x5df   : > { %v1084_v10 = vld [vmem:[%s18438_s12 + $0x1730] sm:$0xff] }
 0x5e0   : > { %v16398_v29 = vcombine.low %v1080_v9, %v1084_v10 }
 0x5e1   : > { %14392 = vmatpush1.bf16.msra.mxu0 %v16350_v15  ;;  %15048 = vmatpush1.bf16.msra.mxu1 %v16352_v3  ;;  %v16399_v15 = vcombine.high %v1080_v9, %v1084_v10  ;;  %v16401_v3 = vcombine.high %v1081_v11, %v1085_v17  ;;  %v1121_v9 = vld [vmem:[%s18438_s12 + $0x1858] sm:$0xff]  ;;  %v16432_v17 = vcombine.low %v1113_v21, %v1117_v63 }
 0x5e2   : > { %14393 = vmatprep.subr.bf16.mxu0 %v16359_v52  ;;  %15049 = vmatprep.subr.bf16.mxu1 %v16361_v45  ;;  %v1088_v52 = vld [vmem:[%s18438_s12 + $0x1750] sm:$0xff]  ;;  %v1125_v10 = vld [vmem:[%s18438_s12 + $0x1878] sm:$0xff] }
 0x5e3   : > { %v1092_v45 = vld [vmem:[%s18438_s12 + $0x1770] sm:$0xff] }
 0x5e4   : > { %v16406_v41 = vcombine.low %v1088_v52, %v1092_v45 }
 0x5e5   : > { %14394 = vmatpush1.bf16.msra.mxu0 %v16358_v27  ;;  %15050 = vmatpush1.bf16.msra.mxu1 %v16360_v30  ;;  %v16407_v27 = vcombine.high %v1088_v52, %v1092_v45  ;;  %v16409_v30 = vcombine.high %v1089_v23, %v1093_v24  ;;  %v1129_v52 = vld [vmem:[%s18438_s12 + $0x1898] sm:$0xff]  ;;  %v16440_v24 = vcombine.low %v1121_v9, %v1125_v10 }
 0x5e6   : > { %14395 = vmatprep.subr.bf16.mxu0 %v16367_v20  ;;  %15051 = vmatprep.subr.bf16.mxu1 %v16369_v42  ;;  %v1096_v20 = vld [vmem:[%s18438_s12 + $0x1790] sm:$0xff]  ;;  %v1133_v45 = vld [vmem:[%s18438_s12 + $0x18b8] sm:$0xff] }
 0x5e7   : > { %v1100_v42 = vld [vmem:[%s18438_s12 + $0x17b0] sm:$0xff] }
 0x5e8   : > { %v16414_v50 = vcombine.low %v1096_v20, %v1100_v42 }
 0x5e9   : > { %14396 = vmatpush1.bf16.msra.mxu0 %v16366_v13  ;;  %15052 = vmatpush1.bf16.msra.mxu1 %v16368_v37  ;;  %v16415_v13 = vcombine.high %v1096_v20, %v1100_v42  ;;  %v16417_v37 = vcombine.high %v1097_v28, %v1101_v31  ;;  %v1137_v20 = vld [vmem:[%s18438_s12 + $0x18d8] sm:$0xff]  ;;  %v16448_v28 = vcombine.low %v1129_v52, %v1133_v45 }
 0x5ea   : > { %14397 = vmatprep.subr.bf16.mxu0 %v16375_v46  ;;  %15053 = vmatprep.subr.bf16.mxu1 %v16377_v33  ;;  %v1104_v46 = vld [vmem:[%s18438_s12 + $0x17d0] sm:$0xff]  ;;  %v1141_v42 = vld [vmem:[%s18438_s12 + $0x18f8] sm:$0xff] }
 0x5eb   : > { %v1108_v33 = vld [vmem:[%s18438_s12 + $0x17f0] sm:$0xff] }
 0x5ec   : > { %v16422_v7 = vcombine.low %v1104_v46, %v1108_v33 }
 0x5ed   : > { %14398 = vmatpush1.bf16.msra.mxu0 %v16374_v54  ;;  %15054 = vmatpush1.bf16.msra.mxu1 %v16376_v57  ;;  %v16423_v54 = vcombine.high %v1104_v46, %v1108_v33  ;;  %v16425_v57 = vcombine.high %v1105_v47, %v1109_v38  ;;  %v1149_v46 = vld [vmem:[%s18438_s12 + $0x1938] sm:$0xff] }
 0x5ee   : > { %14399 = vmatprep.subr.bf16.mxu0 %v16383_v59  ;;  %15055 = vmatprep.subr.bf16.mxu1 %v16385_v22  ;;  %v1112_v59 = vld [vmem:[%s18438_s12 + $0x1810] sm:$0xff] }
 0x5ef   : > { %v1116_v22 = vld [vmem:[%s18438_s12 + $0x1830] sm:$0xff] }
 0x5f0   : > { %v16430_v11 = vcombine.low %v1112_v59, %v1116_v22 }
 0x5f1   : > { %14400 = vmatpush1.bf16.msra.mxu0 %v16382_v55  ;;  %15056 = vmatpush1.bf16.msra.mxu1 %v16384_v2  ;;  %v16431_v55 = vcombine.high %v1112_v59, %v1116_v22  ;;  %v16433_v2 = vcombine.high %v1113_v21, %v1117_v63 }
 0x5f2   : > { %14401 = vmatprep.subr.bf16.mxu0 %v16391_v4  ;;  %15057 = vmatprep.subr.bf16.mxu1 %v16393_v8  ;;  %v1120_v4 = vld [vmem:[%s18438_s12 + $0x1850] sm:$0xff] }
 0x5f3   : > { %v1124_v8 = vld [vmem:[%s18438_s12 + $0x1870] sm:$0xff] }
 0x5f4   : > { %v16438_v23 = vcombine.low %v1120_v4, %v1124_v8 }
 0x5f5   : > { %14402 = vmatpush1.bf16.msra.mxu0 %v16390_v56  ;;  %15058 = vmatpush1.bf16.msra.mxu1 %v16392_v14  ;;  %v16439_v56 = vcombine.high %v1120_v4, %v1124_v8  ;;  %v16441_v14 = vcombine.high %v1121_v9, %v1125_v10 }
 0x5f6   : > { %14403 = vmatprep.subr.bf16.mxu0 %v16399_v15  ;;  %15059 = vmatprep.subr.bf16.mxu1 %v16401_v3  ;;  %v1128_v15 = vld [vmem:[%s18438_s12 + $0x1890] sm:$0xff] }
 0x5f7   : > { %v1132_v3 = vld [vmem:[%s18438_s12 + $0x18b0] sm:$0xff] }
 0x5f9   : > { %14404 = vmatpush1.bf16.msra.mxu0 %v16398_v29  ;;  %15060 = vmatpush1.bf16.msra.mxu1 %v16400_v1  ;;  %v16447_v29 = vcombine.high %v1128_v15, %v1132_v3  ;;  %v16449_v1 = vcombine.high %v1129_v52, %v1133_v45 }
 0x5fa   : > { %14405 = vmatprep.subr.bf16.mxu0 %v16407_v27  ;;  %15061 = vmatprep.subr.bf16.mxu1 %v16409_v30  ;;  %v1136_v27 = vld [vmem:[%s18438_s12 + $0x18d0] sm:$0xff] }
 0x5fb   : > { %v1140_v30 = vld [vmem:[%s18438_s12 + $0x18f0] sm:$0xff] }
 0x5fc   : > { %v16455_v31 = vcombine.high %v1136_v27, %v1140_v30  ;;  %v16454_v33 = vcombine.low %v1136_v27, %v1140_v30 }
 0x5fd   : > { %14406 = vmatpush1.bf16.msra.mxu0 %v16406_v41  ;;  %15062 = vmatpush1.bf16.msra.mxu1 %v16408_v36  ;;  %v16457_v41 = vcombine.high %v1137_v20, %v1141_v42  ;;  %v1144_v36 = vld [vmem:[%s18438_s12 + $0x1910] sm:$0xff] }
 0x5fe   : > { %14407 = vmatprep.subr.bf16.mxu0 %v16415_v13  ;;  %15063 = vmatprep.subr.bf16.mxu1 %v16417_v37  ;;  %v1148_v13 = vld [vmem:[%s18438_s12 + $0x1930] sm:$0xff]  ;;  %v1145_v37 = vld [vmem:[%s18438_s12 + $0x1918] sm:$0xff] }
 0x5ff   : > { %v16463_v47 = vcombine.high %v1144_v36, %v1148_v13  ;;  %v16465_v38 = vcombine.high %v1145_v37, %v1149_v46  ;;  %v16462_v59 = vcombine.low %v1144_v36, %v1148_v13  ;;  %v16464_v22 = vcombine.low %v1145_v37, %v1149_v46 }
 0x601   : > { %14408 = vmatpush1.bf16.msra.mxu0 %v16414_v50  ;;  %15064 = vmatpush1.bf16.msra.mxu1 %v16416_v53  ;;  %v1152_v50 = vld [vmem:[%s18438_s12 + $0x1950] sm:$0xff] }
 0x602   : > { %14409 = vmatprep.subr.bf16.mxu0 %v16423_v54  ;;  %15065 = vmatprep.subr.bf16.mxu1 %v16425_v57  ;;  %v1156_v53 = vld [vmem:[%s18438_s12 + $0x1970] sm:$0xff]  ;;  %v1153_v54 = vld [vmem:[%s18438_s12 + $0x1958] sm:$0xff] }
 0x603   : > { %v1157_v57 = vld [vmem:[%s18438_s12 + $0x1978] sm:$0xff]  ;;  %v16471_v21 = vcombine.high %v1152_v50, %v1156_v53  ;;  %v16470_v4 = vcombine.low %v1152_v50, %v1156_v53 }
 0x604   : > { %v16473_v63 = vcombine.high %v1153_v54, %v1157_v57  ;;  %v16472_v8 = vcombine.low %v1153_v54, %v1157_v57 }
 0x605   : > { %14410 = vmatpush1.bf16.msra.mxu0 %v16422_v7  ;;  %15066 = vmatpush1.bf16.msra.mxu1 %v16424_v0  ;;  %v1160_v7 = vld [vmem:[%s18438_s12 + $0x1990] sm:$0xff] }
 0x606   : > { %14420 = vmatprep.subr.bf16.mxu0 %v16431_v55  ;;  %15076 = vmatprep.subr.bf16.mxu1 %v16433_v2  ;;  %v1164_v0 = vld [vmem:[%s18438_s12 + $0x19b0] sm:$0xff]  ;;  %v1161_v55 = vld [vmem:[%s18438_s12 + $0x1998] sm:$0xff] }
 0x607   : > { %v1165_v2 = vld [vmem:[%s18438_s12 + $0x19b8] sm:$0xff]  ;;  %v16479_v9 = vcombine.high %v1160_v7, %v1164_v0 }
 0x608   : > { %14412 = vmatmul.mubr.bf16.vlgmr.msra.gmra.mrb[4].mxu0 %v18941_v60  ;;  %15068 = vmatmul.mubr.bf16.vlgmr.msra.gmra.mrb[4].mxu1 %v18941_v60  ;;  %v16446_v60 = vcombine.low %v1128_v15, %v1132_v3  ;;  %v16481_v10 = vcombine.high %v1161_v55, %v1165_v2  ;;  %v16478_v15 = vcombine.low %v1160_v7, %v1164_v0 }
 0x609   : > { %14421 = vmatpush1.bf16.msra.mxu0 %v16430_v11  ;;  %15077 = vmatpush1.bf16.msra.mxu1 %v16432_v17  ;;  %v1168_v11 = vld [vmem:[%s18438_s12 + $0x19d0] sm:$0xff]  ;;  %v16480_v3 = vcombine.low %v1161_v55, %v1165_v2 }
 0x60a   : > { %14422 = vmatprep.subr.bf16.mxu0 %v16439_v56  ;;  %15078 = vmatprep.subr.bf16.mxu1 %v16441_v14  ;;  %v1172_v17 = vld [vmem:[%s18438_s12 + $0x19f0] sm:$0xff]  ;;  %v1169_v56 = vld [vmem:[%s18438_s12 + $0x19d8] sm:$0xff] }
 0x60b   : > { %14452 = vmatprep.mubr.bf16.mxu0 %v18948_v6  ;;  %15108 = vmatprep.mubr.bf16.mxu1 %v18948_v6  ;;  %v16456_v6 = vcombine.low %v1137_v20, %v1141_v42  ;;  %v1173_v14 = vld [vmem:[%s18438_s12 + $0x19f8] sm:$0xff]  ;;  %v16487_v52 = vcombine.high %v1168_v11, %v1172_v17  ;;  %v16486_v27 = vcombine.low %v1168_v11, %v1172_v17 }
 0x60c   : > { %v16489_v45 = vcombine.high %v1169_v56, %v1173_v14  ;;  %v16488_v30 = vcombine.low %v1169_v56, %v1173_v14 }
 0x60d   : > { %14423 = vmatpush1.bf16.msra.mxu0 %v16438_v23  ;;  %15079 = vmatpush1.bf16.msra.mxu1 %v16440_v24  ;;  %v1176_v23 = vld [vmem:[%s18438_s12 + $0x1a10] sm:$0xff] }
 0x60e   : > { %14424 = vmatprep.subr.bf16.mxu0 %v16447_v29  ;;  %15080 = vmatprep.subr.bf16.mxu1 %v16449_v1  ;;  %v1180_v24 = vld [vmem:[%s18438_s12 + $0x1a30] sm:$0xff]  ;;  %v1177_v29 = vld [vmem:[%s18438_s12 + $0x1a18] sm:$0xff] }
 0x60f   : > { %v1181_v1 = vld [vmem:[%s18438_s12 + $0x1a38] sm:$0xff]  ;;  %v16495_v20 = vcombine.high %v1176_v23, %v1180_v24  ;;  %v16494_v36 = vcombine.low %v1176_v23, %v1180_v24 }
 0x610   : > { %v16497_v42 = vcombine.high %v1177_v29, %v1181_v1  ;;  %v16496_v13 = vcombine.low %v1177_v29, %v1181_v1 }
 0x611   : > { %14425 = vmatpush1.bf16.msra.mxu0 %v16446_v60  ;;  %15081 = vmatpush1.bf16.msra.mxu1 %v16448_v28  ;;  %v1184_v60 = vld [vmem:[%s18438_s12 + $0x1a50] sm:$0xff] }
 0x612   : > { %14426 = vmatprep.subr.bf16.mxu0 %v16455_v31  ;;  %15082 = vmatprep.subr.bf16.mxu1 %v16457_v41  ;;  %v1188_v28 = vld [vmem:[%s18438_s12 + $0x1a70] sm:$0xff]  ;;  %v1185_v31 = vld [vmem:[%s18438_s12 + $0x1a58] sm:$0xff] }
 0x613   : > { %v1189_v41 = vld [vmem:[%s18438_s12 + $0x1a78] sm:$0xff]  ;;  %v16503_v37 = vcombine.high %v1184_v60, %v1188_v28  ;;  %v16502_v50 = vcombine.low %v1184_v60, %v1188_v28 }
 0x614   : > { %v16505_v46 = vcombine.high %v1185_v31, %v1189_v41  ;;  %v16504_v53 = vcombine.low %v1185_v31, %v1189_v41 }
 0x615   : > { %14427 = vmatpush1.bf16.msra.mxu0 %v16454_v33  ;;  %15083 = vmatpush1.bf16.msra.mxu1 %v16456_v6  ;;  %v1192_v33 = vld [vmem:[%s18438_s12 + $0x1a90] sm:$0xff] }
 0x616   : > { %14428 = vmatprep.subr.bf16.mxu0 %v16463_v47  ;;  %15084 = vmatprep.subr.bf16.mxu1 %v16465_v38  ;;  %v1196_v6 = vld [vmem:[%s18438_s12 + $0x1ab0] sm:$0xff]  ;;  %v1193_v47 = vld [vmem:[%s18438_s12 + $0x1a98] sm:$0xff] }
 0x617   : > { %v1197_v38 = vld [vmem:[%s18438_s12 + $0x1ab8] sm:$0xff]  ;;  %v16511_v54 = vcombine.high %v1192_v33, %v1196_v6  ;;  %v16510_v7 = vcombine.low %v1192_v33, %v1196_v6 }
 0x618   : > { %v16513_v57 = vcombine.high %v1193_v47, %v1197_v38  ;;  %v16512_v0 = vcombine.low %v1193_v47, %v1197_v38 }
 0x619   : > { %14429 = vmatpush1.bf16.msra.mxu0 %v16462_v59  ;;  %15085 = vmatpush1.bf16.msra.mxu1 %v16464_v22  ;;  %v1200_v59 = vld [vmem:[%s18438_s12 + $0x1ad0] sm:$0xff] }
 0x61a   : > { %14430 = vmatprep.subr.bf16.mxu0 %v16471_v21  ;;  %15086 = vmatprep.subr.bf16.mxu1 %v16473_v63  ;;  %v1204_v22 = vld [vmem:[%s18438_s12 + $0x1af0] sm:$0xff]  ;;  %v1201_v21 = vld [vmem:[%s18438_s12 + $0x1ad8] sm:$0xff] }
 0x61b   : > { %v1205_v63 = vld [vmem:[%s18438_s12 + $0x1af8] sm:$0xff]  ;;  %v16519_v55 = vcombine.high %v1200_v59, %v1204_v22  ;;  %v16518_v11 = vcombine.low %v1200_v59, %v1204_v22 }
 0x61c   : > { %v16521_v2 = vcombine.high %v1201_v21, %v1205_v63  ;;  %v16520_v17 = vcombine.low %v1201_v21, %v1205_v63 }
 0x61d   : > { %14431 = vmatpush1.bf16.msra.mxu0 %v16470_v4  ;;  %15087 = vmatpush1.bf16.msra.mxu1 %v16472_v8  ;;  %v1208_v4 = vld [vmem:[%s18438_s12 + $0x1b10] sm:$0xff] }
 0x61e   : > { %14432 = vmatprep.subr.bf16.mxu0 %v16479_v9  ;;  %15088 = vmatprep.subr.bf16.mxu1 %v16481_v10  ;;  %v1212_v8 = vld [vmem:[%s18438_s12 + $0x1b30] sm:$0xff]  ;;  %v1209_v9 = vld [vmem:[%s18438_s12 + $0x1b18] sm:$0xff] }
 0x61f   : > { %v1213_v10 = vld [vmem:[%s18438_s12 + $0x1b38] sm:$0xff]  ;;  %v16527_v56 = vcombine.high %v1208_v4, %v1212_v8  ;;  %v16526_v23 = vcombine.low %v1208_v4, %v1212_v8 }
 0x620   : > { %v16529_v14 = vcombine.high %v1209_v9, %v1213_v10  ;;  %v16528_v24 = vcombine.low %v1209_v9, %v1213_v10 }
 0x621   : > { %14433 = vmatpush1.bf16.msra.mxu0 %v16478_v15  ;;  %15089 = vmatpush1.bf16.msra.mxu1 %v16480_v3  ;;  %v1216_v15 = vld [vmem:[%s18438_s12 + $0x1b50] sm:$0xff] }
 0x622   : > { %14434 = vmatprep.subr.bf16.mxu0 %v16487_v52  ;;  %15090 = vmatprep.subr.bf16.mxu1 %v16489_v45  ;;  %v1220_v3 = vld [vmem:[%s18438_s12 + $0x1b70] sm:$0xff]  ;;  %v1217_v52 = vld [vmem:[%s18438_s12 + $0x1b58] sm:$0xff] }
 0x623   : > { %v1221_v45 = vld [vmem:[%s18438_s12 + $0x1b78] sm:$0xff]  ;;  %v16535_v29 = vcombine.high %v1216_v15, %v1220_v3  ;;  %v16534_v60 = vcombine.low %v1216_v15, %v1220_v3 }
 0x624   : > { %v16537_v1 = vcombine.high %v1217_v52, %v1221_v45  ;;  %v16536_v28 = vcombine.low %v1217_v52, %v1221_v45 }
 0x625   : > { %14435 = vmatpush1.bf16.msra.mxu0 %v16486_v27  ;;  %15091 = vmatpush1.bf16.msra.mxu1 %v16488_v30  ;;  %v1224_v27 = vld [vmem:[%s18438_s12 + $0x1b90] sm:$0xff] }
 0x626   : > { %14436 = vmatprep.subr.bf16.mxu0 %v16495_v20  ;;  %15092 = vmatprep.subr.bf16.mxu1 %v16497_v42  ;;  %v1228_v30 = vld [vmem:[%s18438_s12 + $0x1bb0] sm:$0xff]  ;;  %v1225_v20 = vld [vmem:[%s18438_s12 + $0x1b98] sm:$0xff] }
 0x627   : > { %v1229_v42 = vld [vmem:[%s18438_s12 + $0x1bb8] sm:$0xff]  ;;  %v16543_v31 = vcombine.high %v1224_v27, %v1228_v30  ;;  %v16542_v33 = vcombine.low %v1224_v27, %v1228_v30 }
 0x628   : > { %v16545_v41 = vcombine.high %v1225_v20, %v1229_v42  ;;  %v16544_v6 = vcombine.low %v1225_v20, %v1229_v42  ;;  %v1272_v42 = vld [vmem:[%s18438_s12 + $0x1d10] sm:$0xff] }
 0x629   : > { %14437 = vmatpush1.bf16.msra.mxu0 %v16494_v36  ;;  %15093 = vmatpush1.bf16.msra.mxu1 %v16496_v13  ;;  %v1232_v36 = vld [vmem:[%s18438_s12 + $0x1bd0] sm:$0xff] }
 0x62a   : > { %14438 = vmatprep.subr.bf16.mxu0 %v16503_v37  ;;  %15094 = vmatprep.subr.bf16.mxu1 %v16505_v46  ;;  %v1236_v13 = vld [vmem:[%s18438_s12 + $0x1bf0] sm:$0xff]  ;;  %v1233_v37 = vld [vmem:[%s18438_s12 + $0x1bd8] sm:$0xff] }
 0x62b   : > { %v1237_v46 = vld [vmem:[%s18438_s12 + $0x1bf8] sm:$0xff]  ;;  %v16551_v47 = vcombine.high %v1232_v36, %v1236_v13  ;;  %v16550_v59 = vcombine.low %v1232_v36, %v1236_v13 }
 0x62c   : > { %v16553_v38 = vcombine.high %v1233_v37, %v1237_v46  ;;  %v16552_v22 = vcombine.low %v1233_v37, %v1237_v46  ;;  %v1280_v37 = vld [vmem:[%s18438_s12 + $0x1d50] sm:$0xff] }
 0x62d   : > { %14439 = vmatpush1.bf16.msra.mxu0 %v16502_v50  ;;  %15095 = vmatpush1.bf16.msra.mxu1 %v16504_v53  ;;  %v1240_v50 = vld [vmem:[%s18438_s12 + $0x1c10] sm:$0xff] }
 0x62e   : > { %14440 = vmatprep.subr.bf16.mxu0 %v16511_v54  ;;  %15096 = vmatprep.subr.bf16.mxu1 %v16513_v57  ;;  %v1244_v53 = vld [vmem:[%s18438_s12 + $0x1c30] sm:$0xff]  ;;  %v1241_v54 = vld [vmem:[%s18438_s12 + $0x1c18] sm:$0xff] }
 0x62f   : > { %v1245_v57 = vld [vmem:[%s18438_s12 + $0x1c38] sm:$0xff]  ;;  %v16559_v21 = vcombine.high %v1240_v50, %v1244_v53  ;;  %v16558_v4 = vcombine.low %v1240_v50, %v1244_v53  ;;  %v1284_v46 = vld [vmem:[%s18438_s12 + $0x1d70] sm:$0xff] }
 0x630   : > { %v16561_v63 = vcombine.high %v1241_v54, %v1245_v57  ;;  %v16560_v8 = vcombine.low %v1241_v54, %v1245_v57  ;;  %v16599_v50 = vcombine.high %v1280_v37, %v1284_v46  ;;  %v1288_v54 = vld [vmem:[%s18438_s12 + $0x1d90] sm:$0xff] }
 0x631   : > { %14441 = vmatpush1.bf16.msra.mxu0 %v16510_v7  ;;  %15097 = vmatpush1.bf16.msra.mxu1 %v16512_v0  ;;  %v1248_v7 = vld [vmem:[%s18438_s12 + $0x1c50] sm:$0xff] }
 0x632   : > { %14442 = vmatprep.subr.bf16.mxu0 %v16519_v55  ;;  %15098 = vmatprep.subr.bf16.mxu1 %v16521_v2  ;;  %v1252_v0 = vld [vmem:[%s18438_s12 + $0x1c70] sm:$0xff]  ;;  %v1249_v55 = vld [vmem:[%s18438_s12 + $0x1c58] sm:$0xff] }
 0x633   : > { %v1253_v2 = vld [vmem:[%s18438_s12 + $0x1c78] sm:$0xff]  ;;  %v16567_v9 = vcombine.high %v1248_v7, %v1252_v0  ;;  %v16566_v15 = vcombine.low %v1248_v7, %v1252_v0  ;;  %v1292_v57 = vld [vmem:[%s18438_s12 + $0x1db0] sm:$0xff] }
 0x634   : > { %v16569_v10 = vcombine.high %v1249_v55, %v1253_v2  ;;  %v16568_v3 = vcombine.low %v1249_v55, %v1253_v2  ;;  %v16607_v7 = vcombine.high %v1288_v54, %v1292_v57  ;;  %v1296_v55 = vld [vmem:[%s18438_s12 + $0x1dd0] sm:$0xff] }
 0x635   : > { %14443 = vmatpush1.bf16.msra.mxu0 %v16518_v11  ;;  %15099 = vmatpush1.bf16.msra.mxu1 %v16520_v17  ;;  %v1256_v11 = vld [vmem:[%s18438_s12 + $0x1c90] sm:$0xff] }
 0x636   : > { %14444 = vmatprep.subr.bf16.mxu0 %v16527_v56  ;;  %15100 = vmatprep.subr.bf16.mxu1 %v16529_v14  ;;  %v1260_v17 = vld [vmem:[%s18438_s12 + $0x1cb0] sm:$0xff]  ;;  %v1257_v56 = vld [vmem:[%s18438_s12 + $0x1c98] sm:$0xff] }
 0x637   : > { %v1261_v14 = vld [vmem:[%s18438_s12 + $0x1cb8] sm:$0xff]  ;;  %v16575_v52 = vcombine.high %v1256_v11, %v1260_v17  ;;  %v1300_v2 = vld [vmem:[%s18438_s12 + $0x1df0] sm:$0xff] }
 0x638   : > { %v16577_v45 = vcombine.high %v1257_v56, %v1261_v14  ;;  %v16576_v27 = vcombine.low %v1257_v56, %v1261_v14  ;;  %v1304_v56 = vld [vmem:[%s18438_s12 + $0x1e10] sm:$0xff] }
 0x639   : > { %14445 = vmatpush1.bf16.msra.mxu0 %v16526_v23  ;;  %15101 = vmatpush1.bf16.msra.mxu1 %v16528_v24  ;;  %v1264_v23 = vld [vmem:[%s18438_s12 + $0x1cd0] sm:$0xff] }
 0x63a   : > { %14446 = vmatprep.subr.bf16.mxu0 %v16535_v29  ;;  %15102 = vmatprep.subr.bf16.mxu1 %v16537_v1  ;;  %v1268_v24 = vld [vmem:[%s18438_s12 + $0x1cf0] sm:$0xff]  ;;  %v1265_v29 = vld [vmem:[%s18438_s12 + $0x1cd8] sm:$0xff] }
 0x63b   : > { %v1269_v1 = vld [vmem:[%s18438_s12 + $0x1cf8] sm:$0xff]  ;;  %v16583_v30 = vcombine.high %v1264_v23, %v1268_v24  ;;  %v1308_v14 = vld [vmem:[%s18438_s12 + $0x1e30] sm:$0xff] }
 0x63c   : > { %v16585_v20 = vcombine.high %v1265_v29, %v1269_v1 }
 0x63d   : > { %14447 = vmatpush1.bf16.msra.mxu0 %v16534_v60  ;;  %15103 = vmatpush1.bf16.msra.mxu1 %v16536_v28  ;;  %v1276_v60 = vld [vmem:[%s18438_s12 + $0x1d30] sm:$0xff]  ;;  %v1273_v28 = vld [vmem:[%s18438_s12 + $0x1d18] sm:$0xff] }
 0x63e   : > { %14448 = vmatprep.subr.bf16.mxu0 %v16543_v31  ;;  %15104 = vmatprep.subr.bf16.mxu1 %v16545_v41  ;;  %v1277_v31 = vld [vmem:[%s18438_s12 + $0x1d38] sm:$0xff]  ;;  %v16582_v41 = vcombine.low %v1264_v23, %v1268_v24  ;;  %v16591_v36 = vcombine.high %v1272_v42, %v1276_v60  ;;  %v16623_v23 = vcombine.high %v1304_v56, %v1308_v14 }
 0x63f   : > { %v16593_v13 = vcombine.high %v1273_v28, %v1277_v31 }
 0x641   : > { %14449 = vmatpush1.bf16.msra.mxu0 %v16542_v33  ;;  %15105 = vmatpush1.bf16.msra.mxu1 %v16544_v6  ;;  %v1281_v33 = vld [vmem:[%s18438_s12 + $0x1d58] sm:$0xff] }
 0x642   : > { %14450 = vmatprep.subr.bf16.mxu0 %v16551_v47  ;;  %15106 = vmatprep.subr.bf16.mxu1 %v16553_v38  ;;  %v1285_v6 = vld [vmem:[%s18438_s12 + $0x1d78] sm:$0xff]  ;;  %v16590_v47 = vcombine.low %v1272_v42, %v1276_v60  ;;  %v16592_v38 = vcombine.low %v1273_v28, %v1277_v31  ;;  %v1320_v28 = vld [vmem:[%s18438_s12 + $0x1e90] sm:$0xff] }
 0x643   : > { %v16601_v53 = vcombine.high %v1281_v33, %v1285_v6  ;;  %v1324_v31 = vld [vmem:[%s18438_s12 + $0x1eb0] sm:$0xff] }
 0x645   : > { %14451 = vmatpush1.bf16.msra.mxu0 %v16550_v59  ;;  %15107 = vmatpush1.bf16.msra.mxu1 %v16552_v22  ;;  %v1289_v59 = vld [vmem:[%s18438_s12 + $0x1d98] sm:$0xff] }
 0x646   : > { %14461 = vmatprep.subr.bf16.mxu0 %v16559_v21  ;;  %15117 = vmatprep.subr.bf16.mxu1 %v16561_v63  ;;  %v1293_v22 = vld [vmem:[%s18438_s12 + $0x1db8] sm:$0xff]  ;;  %v16598_v21 = vcombine.low %v1280_v37, %v1284_v46  ;;  %v16600_v63 = vcombine.low %v1281_v33, %v1285_v6  ;;  %v16639_v37 = vcombine.high %v1320_v28, %v1324_v31  ;;  %v1328_v33 = vld [vmem:[%s18438_s12 + $0x1ed0] sm:$0xff] }
 0x647   : > { %v16609_v0 = vcombine.high %v1289_v59, %v1293_v22  ;;  %v1332_v6 = vld [vmem:[%s18438_s12 + $0x1ef0] sm:$0xff] }
 0x648   : > { %14453 = vmatmul.mubr.bf16.vlgmr.msra.gmra.mrb[4].mxu0 %v19016_v40  ;;  %15109 = vmatmul.mubr.bf16.vlgmr.msra.gmra.mrb[4].mxu1 %v19016_v40  ;;  %v16574_v40 = vcombine.low %v1256_v11, %v1260_v17  ;;  %v16615_v11 = vcombine.high %v1296_v55, %v1300_v2 }
 0x649   : > { %14462 = vmatpush1.bf16.msra.mxu0 %v16558_v4  ;;  %15118 = vmatpush1.bf16.msra.mxu1 %v16560_v8  ;;  %v1297_v4 = vld [vmem:[%s18438_s12 + $0x1dd8] sm:$0xff] }
 0x64a   : > { %14463 = vmatprep.subr.bf16.mxu0 %v16567_v9  ;;  %15119 = vmatprep.subr.bf16.mxu1 %v16569_v10  ;;  %v1301_v8 = vld [vmem:[%s18438_s12 + $0x1df8] sm:$0xff]  ;;  %v16606_v9 = vcombine.low %v1288_v54, %v1292_v57  ;;  %v16608_v10 = vcombine.low %v1289_v59, %v1293_v22  ;;  %v16647_v54 = vcombine.high %v1328_v33, %v1332_v6  ;;  %v1336_v59 = vld [vmem:[%s18438_s12 + $0x1f10] sm:$0xff] }
 0x64b   : > { %14493 = vmatprep.mubr.bf16.mxu0 %v19024_v51  ;;  %15149 = vmatprep.mubr.bf16.mxu1 %v19024_v51  ;;  %v16584_v51 = vcombine.low %v1265_v29, %v1269_v1  ;;  %v16617_v17 = vcombine.high %v1297_v4, %v1301_v8  ;;  %v1312_v29 = vld [vmem:[%s18438_s12 + $0x1e50] sm:$0xff] }
 0x64c   : > { %v1316_v1 = vld [vmem:[%s18438_s12 + $0x1e70] sm:$0xff] }
 0x64d   : > { %14464 = vmatpush1.bf16.msra.mxu0 %v16566_v15  ;;  %15120 = vmatpush1.bf16.msra.mxu1 %v16568_v3  ;;  %v1305_v15 = vld [vmem:[%s18438_s12 + $0x1e18] sm:$0xff]  ;;  %v16631_v42 = vcombine.high %v1312_v29, %v1316_v1  ;;  %v1340_v22 = vld [vmem:[%s18438_s12 + $0x1f30] sm:$0xff] }
 0x64e   : > { %14465 = vmatprep.subr.bf16.mxu0 %v16575_v52  ;;  %15121 = vmatprep.subr.bf16.mxu1 %v16577_v45  ;;  %v1309_v3 = vld [vmem:[%s18438_s12 + $0x1e38] sm:$0xff]  ;;  %v16614_v52 = vcombine.low %v1296_v55, %v1300_v2  ;;  %v16616_v45 = vcombine.low %v1297_v4, %v1301_v8  ;;  %v16655_v55 = vcombine.high %v1336_v59, %v1340_v22  ;;  %v1344_v4 = vld [vmem:[%s18438_s12 + $0x1f50] sm:$0xff] }
 0x64f   : > { %v16625_v24 = vcombine.high %v1305_v15, %v1309_v3  ;;  %v1348_v8 = vld [vmem:[%s18438_s12 + $0x1f70] sm:$0xff] }
 0x651   : > { %14466 = vmatpush1.bf16.msra.mxu0 %v16574_v40  ;;  %15122 = vmatpush1.bf16.msra.mxu1 %v16576_v27  ;;  %v1313_v40 = vld [vmem:[%s18438_s12 + $0x1e58] sm:$0xff] }
 0x652   : > { %14467 = vmatprep.subr.bf16.mxu0 %v16583_v30  ;;  %15123 = vmatprep.subr.bf16.mxu1 %v16585_v20  ;;  %v1317_v27 = vld [vmem:[%s18438_s12 + $0x1e78] sm:$0xff]  ;;  %v16622_v30 = vcombine.low %v1304_v56, %v1308_v14  ;;  %v16624_v20 = vcombine.low %v1305_v15, %v1309_v3  ;;  %v16663_v56 = vcombine.high %v1344_v4, %v1348_v8  ;;  %v1352_v15 = vld [vmem:[%s18438_s12 + $0x1f90] sm:$0xff] }
 0x653   : > { %v16633_v60 = vcombine.high %v1313_v40, %v1317_v27  ;;  %v1356_v3 = vld [vmem:[%s18438_s12 + $0x1fb0] sm:$0xff] }
 0x655   : > { %14468 = vmatpush1.bf16.msra.mxu0 %v16582_v41  ;;  %15124 = vmatpush1.bf16.msra.mxu1 %v16584_v51  ;;  %v1321_v41 = vld [vmem:[%s18438_s12 + $0x1e98] sm:$0xff] }
 0x656   : > { %14469 = vmatprep.subr.bf16.mxu0 %v16591_v36  ;;  %15125 = vmatprep.subr.bf16.mxu1 %v16593_v13  ;;  %v1325_v51 = vld [vmem:[%s18438_s12 + $0x1eb8] sm:$0xff]  ;;  %v16630_v36 = vcombine.low %v1312_v29, %v1316_v1  ;;  %v16632_v13 = vcombine.low %v1313_v40, %v1317_v27  ;;  %v16671_v29 = vcombine.high %v1352_v15, %v1356_v3  ;;  %v1360_v40 = vld [vmem:[%s18438_s12 + $0x1fd0] sm:$0xff] }
 0x657   : > { %v16641_v46 = vcombine.high %v1321_v41, %v1325_v51  ;;  %v1364_v27 = vld [vmem:[%s18438_s12 + $0x1ff0] sm:$0xff] }
 0x659   : > { %14470 = vmatpush1.bf16.msra.mxu0 %v16590_v47  ;;  %15126 = vmatpush1.bf16.msra.mxu1 %v16592_v38  ;;  %v1329_v47 = vld [vmem:[%s18438_s12 + $0x1ed8] sm:$0xff] }
 0x65a   : > { %14471 = vmatprep.subr.bf16.mxu0 %v16599_v50  ;;  %15127 = vmatprep.subr.bf16.mxu1 %v16601_v53  ;;  %v1333_v38 = vld [vmem:[%s18438_s12 + $0x1ef8] sm:$0xff]  ;;  %v16638_v50 = vcombine.low %v1320_v28, %v1324_v31  ;;  %v16640_v53 = vcombine.low %v1321_v41, %v1325_v51  ;;  %v16679_v28 = vcombine.high %v1360_v40, %v1364_v27  ;;  %v1368_v41 = vld [vmem:[%s18438_s12 + $0x2010] sm:$0xff] }
 0x65b   : > { %v16649_v57 = vcombine.high %v1329_v47, %v1333_v38  ;;  %v1372_v51 = vld [vmem:[%s18438_s12 + $0x2030] sm:$0xff] }
 0x65d   : > { %14472 = vmatpush1.bf16.msra.mxu0 %v16598_v21  ;;  %15128 = vmatpush1.bf16.msra.mxu1 %v16600_v63  ;;  %v1337_v21 = vld [vmem:[%s18438_s12 + $0x1f18] sm:$0xff] }
 0x65e   : > { %14473 = vmatprep.subr.bf16.mxu0 %v16607_v7  ;;  %15129 = vmatprep.subr.bf16.mxu1 %v16609_v0  ;;  %v1341_v63 = vld [vmem:[%s18438_s12 + $0x1f38] sm:$0xff]  ;;  %v16646_v7 = vcombine.low %v1328_v33, %v1332_v6  ;;  %v16648_v0 = vcombine.low %v1329_v47, %v1333_v38  ;;  %v16687_v33 = vcombine.high %v1368_v41, %v1372_v51  ;;  %v1376_v47 = vld [vmem:[%s18438_s12 + $0x2050] sm:$0xff] }
 0x65f   : > { %v16657_v2 = vcombine.high %v1337_v21, %v1341_v63  ;;  %v1380_v38 = vld [vmem:[%s18438_s12 + $0x2070] sm:$0xff] }
 0x661   : > { %14474 = vmatpush1.bf16.msra.mxu0 %v16606_v9  ;;  %15130 = vmatpush1.bf16.msra.mxu1 %v16608_v10  ;;  %v1345_v9 = vld [vmem:[%s18438_s12 + $0x1f58] sm:$0xff] }
 0x662   : > { %14475 = vmatprep.subr.bf16.mxu0 %v16615_v11  ;;  %15131 = vmatprep.subr.bf16.mxu1 %v16617_v17  ;;  %v1349_v10 = vld [vmem:[%s18438_s12 + $0x1f78] sm:$0xff]  ;;  %v16654_v11 = vcombine.low %v1336_v59, %v1340_v22  ;;  %v16656_v17 = vcombine.low %v1337_v21, %v1341_v63  ;;  %v16695_v59 = vcombine.high %v1376_v47, %v1380_v38  ;;  %v1384_v21 = vld [vmem:[%s18438_s12 + $0x2090] sm:$0xff] }
 0x663   : > { %v16665_v14 = vcombine.high %v1345_v9, %v1349_v10  ;;  %v1388_v63 = vld [vmem:[%s18438_s12 + $0x20b0] sm:$0xff] }
 0x665   : > { %14476 = vmatpush1.bf16.msra.mxu0 %v16614_v52  ;;  %15132 = vmatpush1.bf16.msra.mxu1 %v16616_v45  ;;  %v1353_v52 = vld [vmem:[%s18438_s12 + $0x1f98] sm:$0xff] }
 0x666   : > { %14477 = vmatprep.subr.bf16.mxu0 %v16623_v23  ;;  %15133 = vmatprep.subr.bf16.mxu1 %v16625_v24  ;;  %v1357_v45 = vld [vmem:[%s18438_s12 + $0x1fb8] sm:$0xff]  ;;  %v16662_v23 = vcombine.low %v1344_v4, %v1348_v8  ;;  %v16664_v24 = vcombine.low %v1345_v9, %v1349_v10  ;;  %v16703_v4 = vcombine.high %v1384_v21, %v1388_v63  ;;  %v1392_v9 = vld [vmem:[%s18438_s12 + $0x20d0] sm:$0xff] }
 0x667   : > { %v16673_v1 = vcombine.high %v1353_v52, %v1357_v45  ;;  %v1396_v10 = vld [vmem:[%s18438_s12 + $0x20f0] sm:$0xff] }
 0x669   : > { %14478 = vmatpush1.bf16.msra.mxu0 %v16622_v30  ;;  %15134 = vmatpush1.bf16.msra.mxu1 %v16624_v20  ;;  %v1361_v30 = vld [vmem:[%s18438_s12 + $0x1fd8] sm:$0xff] }
 0x66a   : > { %14479 = vmatprep.subr.bf16.mxu0 %v16631_v42  ;;  %15135 = vmatprep.subr.bf16.mxu1 %v16633_v60  ;;  %v1365_v20 = vld [vmem:[%s18438_s12 + $0x1ff8] sm:$0xff]  ;;  %v16670_v42 = vcombine.low %v1352_v15, %v1356_v3  ;;  %v16672_v60 = vcombine.low %v1353_v52, %v1357_v45  ;;  %v1400_v3 = vld [vmem:[%s18438_s12 + $0x2110] sm:$0xff] }
 0x66b   : > { %v16681_v31 = vcombine.high %v1361_v30, %v1365_v20  ;;  %v1404_v52 = vld [vmem:[%s18438_s12 + $0x2130] sm:$0xff]  ;;  %v1401_v45 = vld [vmem:[%s18438_s12 + $0x2118] sm:$0xff] }
 0x66d   : > { %14480 = vmatpush1.bf16.msra.mxu0 %v16630_v36  ;;  %15136 = vmatpush1.bf16.msra.mxu1 %v16632_v13  ;;  %v1369_v36 = vld [vmem:[%s18438_s12 + $0x2018] sm:$0xff] }
 0x66e   : > { %14481 = vmatprep.subr.bf16.mxu0 %v16639_v37  ;;  %15137 = vmatprep.subr.bf16.mxu1 %v16641_v46  ;;  %v1373_v13 = vld [vmem:[%s18438_s12 + $0x2038] sm:$0xff]  ;;  %v16678_v37 = vcombine.low %v1360_v40, %v1364_v27  ;;  %v16680_v46 = vcombine.low %v1361_v30, %v1365_v20  ;;  %v1408_v40 = vld [vmem:[%s18438_s12 + $0x2150] sm:$0xff] }
 0x66f   : > { %v16689_v6 = vcombine.high %v1369_v36, %v1373_v13  ;;  %v1412_v27 = vld [vmem:[%s18438_s12 + $0x2170] sm:$0xff]  ;;  %v1409_v30 = vld [vmem:[%s18438_s12 + $0x2158] sm:$0xff] }
 0x670   : > { %v1413_v20 = vld [vmem:[%s18438_s12 + $0x2178] sm:$0xff] }
 0x671   : > { %14482 = vmatpush1.bf16.msra.mxu0 %v16638_v50  ;;  %15138 = vmatpush1.bf16.msra.mxu1 %v16640_v53  ;;  %v1377_v50 = vld [vmem:[%s18438_s12 + $0x2058] sm:$0xff] }
 0x672   : > { %14483 = vmatprep.subr.bf16.mxu0 %v16647_v54  ;;  %15139 = vmatprep.subr.bf16.mxu1 %v16649_v57  ;;  %v1381_v53 = vld [vmem:[%s18438_s12 + $0x2078] sm:$0xff]  ;;  %v16686_v54 = vcombine.low %v1368_v41, %v1372_v51  ;;  %v16688_v57 = vcombine.low %v1369_v36, %v1373_v13  ;;  %v1416_v41 = vld [vmem:[%s18438_s12 + $0x2190] sm:$0xff] }
 0x673   : > { %v16697_v22 = vcombine.high %v1377_v50, %v1381_v53  ;;  %v1420_v51 = vld [vmem:[%s18438_s12 + $0x21b0] sm:$0xff]  ;;  %v1417_v36 = vld [vmem:[%s18438_s12 + $0x2198] sm:$0xff] }
 0x674   : > { %v1421_v13 = vld [vmem:[%s18438_s12 + $0x21b8] sm:$0xff] }
 0x675   : > { %14484 = vmatpush1.bf16.msra.mxu0 %v16646_v7  ;;  %15140 = vmatpush1.bf16.msra.mxu1 %v16648_v0  ;;  %v1385_v7 = vld [vmem:[%s18438_s12 + $0x2098] sm:$0xff] }
 0x676   : > { %14485 = vmatprep.subr.bf16.mxu0 %v16655_v55  ;;  %15141 = vmatprep.subr.bf16.mxu1 %v16657_v2  ;;  %v1389_v0 = vld [vmem:[%s18438_s12 + $0x20b8] sm:$0xff]  ;;  %v16694_v55 = vcombine.low %v1376_v47, %v1380_v38  ;;  %v16696_v2 = vcombine.low %v1377_v50, %v1381_v53  ;;  %v1424_v47 = vld [vmem:[%s18438_s12 + $0x21d0] sm:$0xff] }
 0x677   : > { %v16705_v8 = vcombine.high %v1385_v7, %v1389_v0  ;;  %v1428_v38 = vld [vmem:[%s18438_s12 + $0x21f0] sm:$0xff]  ;;  %v1425_v50 = vld [vmem:[%s18438_s12 + $0x21d8] sm:$0xff] }
 0x678   : > { %v1429_v53 = vld [vmem:[%s18438_s12 + $0x21f8] sm:$0xff] }
 0x679   : > { %14486 = vmatpush1.bf16.msra.mxu0 %v16654_v11  ;;  %15142 = vmatpush1.bf16.msra.mxu1 %v16656_v17  ;;  %v1393_v11 = vld [vmem:[%s18438_s12 + $0x20d8] sm:$0xff] }
 0x67a   : > { %14487 = vmatprep.subr.bf16.mxu0 %v16663_v56  ;;  %15143 = vmatprep.subr.bf16.mxu1 %v16665_v14  ;;  %v1397_v17 = vld [vmem:[%s18438_s12 + $0x20f8] sm:$0xff]  ;;  %v16704_v56 = vcombine.low %v1385_v7, %v1389_v0  ;;  %v16711_v14 = vcombine.high %v1392_v9, %v1396_v10 }
 0x67b   : > { %v16713_v15 = vcombine.high %v1393_v11, %v1397_v17  ;;  %v1433_v7 = vld [vmem:[%s18438_s12 + $0x2218] sm:$0xff] }
 0x67c   : > { %v1437_v0 = vld [vmem:[%s18438_s12 + $0x2238] sm:$0xff] }
 0x67d   : > { %14488 = vmatpush1.bf16.msra.mxu0 %v16662_v23  ;;  %15144 = vmatpush1.bf16.msra.mxu1 %v16664_v24  ;;  %v1405_v23 = vld [vmem:[%s18438_s12 + $0x2138] sm:$0xff]  ;;  %v16710_v24 = vcombine.low %v1392_v9, %v1396_v10  ;;  %v1440_v9 = vld [vmem:[%s18438_s12 + $0x2250] sm:$0xff] }
 0x67e   : > { %14489 = vmatprep.subr.bf16.mxu0 %v16671_v29  ;;  %15145 = vmatprep.subr.bf16.mxu1 %v16673_v1  ;;  %v16719_v29 = vcombine.high %v1400_v3, %v1404_v52  ;;  %v16721_v1 = vcombine.high %v1401_v45, %v1405_v23  ;;  %v1444_v10 = vld [vmem:[%s18438_s12 + $0x2270] sm:$0xff] }
 0x681   : > { %14490 = vmatpush1.bf16.msra.mxu0 %v16670_v42  ;;  %15146 = vmatpush1.bf16.msra.mxu1 %v16672_v60  ;;  %v16718_v42 = vcombine.low %v1400_v3, %v1404_v52  ;;  %v16720_v60 = vcombine.low %v1401_v45, %v1405_v23  ;;  %v1448_v3 = vld [vmem:[%s18438_s12 + $0x2290] sm:$0xff]  ;;  %v1449_v45 = vld [vmem:[%s18438_s12 + $0x2298] sm:$0xff] }
 0x682   : > { %14491 = vmatprep.subr.bf16.mxu0 %v16679_v28  ;;  %15147 = vmatprep.subr.bf16.mxu1 %v16681_v31  ;;  %v16727_v28 = vcombine.high %v1408_v40, %v1412_v27  ;;  %v16729_v31 = vcombine.high %v1409_v30, %v1413_v20  ;;  %v1452_v52 = vld [vmem:[%s18438_s12 + $0x22b0] sm:$0xff]  ;;  %v1453_v23 = vld [vmem:[%s18438_s12 + $0x22b8] sm:$0xff] }
 0x685   : > { %14492 = vmatpush1.bf16.msra.mxu0 %v16678_v37  ;;  %15148 = vmatpush1.bf16.msra.mxu1 %v16680_v46  ;;  %v16726_v37 = vcombine.low %v1408_v40, %v1412_v27  ;;  %v16728_v46 = vcombine.low %v1409_v30, %v1413_v20  ;;  %v1456_v40 = vld [vmem:[%s18438_s12 + $0x22d0] sm:$0xff]  ;;  %v1457_v30 = vld [vmem:[%s18438_s12 + $0x22d8] sm:$0xff] }
 0x686   : > { %14502 = vmatprep.subr.bf16.mxu0 %v16687_v33  ;;  %15158 = vmatprep.subr.bf16.mxu1 %v16689_v6  ;;  %v16735_v33 = vcombine.high %v1416_v41, %v1420_v51  ;;  %v16737_v6 = vcombine.high %v1417_v36, %v1421_v13  ;;  %v1460_v27 = vld [vmem:[%s18438_s12 + $0x22f0] sm:$0xff]  ;;  %v1461_v20 = vld [vmem:[%s18438_s12 + $0x22f8] sm:$0xff] }
 0x688   : > { %14494 = vmatmul.mubr.bf16.vlgmr.msra.gmra.mrb[4].mxu0 %v19101_v26  ;;  %15150 = vmatmul.mubr.bf16.vlgmr.msra.gmra.mrb[4].mxu1 %v19101_v26  ;;  %v16702_v26 = vcombine.low %v1384_v21, %v1388_v63  ;;  %v1432_v21 = vld [vmem:[%s18438_s12 + $0x2210] sm:$0xff] }
 0x689   : > { %14503 = vmatpush1.bf16.msra.mxu0 %v16686_v54  ;;  %15159 = vmatpush1.bf16.msra.mxu1 %v16688_v57  ;;  %v16734_v54 = vcombine.low %v1416_v41, %v1420_v51  ;;  %v16736_v57 = vcombine.low %v1417_v36, %v1421_v13  ;;  %v1436_v63 = vld [vmem:[%s18438_s12 + $0x2230] sm:$0xff]  ;;  %v1465_v36 = vld [vmem:[%s18438_s12 + $0x2318] sm:$0xff] }
 0x68a   : > { %14504 = vmatprep.subr.bf16.mxu0 %v16695_v59  ;;  %15160 = vmatprep.subr.bf16.mxu1 %v16697_v22  ;;  %v16743_v59 = vcombine.high %v1424_v47, %v1428_v38  ;;  %v16745_v22 = vcombine.high %v1425_v50, %v1429_v53  ;;  %v1464_v41 = vld [vmem:[%s18438_s12 + $0x2310] sm:$0xff]  ;;  %v1469_v13 = vld [vmem:[%s18438_s12 + $0x2338] sm:$0xff] }
 0x68b   : > { %14534 = vmatprep.mubr.bf16.mxu0 %v19108_v39  ;;  %15190 = vmatprep.mubr.bf16.mxu1 %v19108_v39  ;;  %v16712_v39 = vcombine.low %v1393_v11, %v1397_v17  ;;  %v1441_v11 = vld [vmem:[%s18438_s12 + $0x2258] sm:$0xff]  ;;  %v1468_v51 = vld [vmem:[%s18438_s12 + $0x2330] sm:$0xff] }
 0x68c   : > { %v1445_v17 = vld [vmem:[%s18438_s12 + $0x2278] sm:$0xff] }
 0x68d   : > { %14505 = vmatpush1.bf16.msra.mxu0 %v16694_v55  ;;  %15161 = vmatpush1.bf16.msra.mxu1 %v16696_v2  ;;  %v16742_v55 = vcombine.low %v1424_v47, %v1428_v38  ;;  %v16744_v2 = vcombine.low %v1425_v50, %v1429_v53  ;;  %v1472_v47 = vld [vmem:[%s18438_s12 + $0x2350] sm:$0xff]  ;;  %v1473_v50 = vld [vmem:[%s18438_s12 + $0x2358] sm:$0xff] }
 0x68e   : > { %14506 = vmatprep.subr.bf16.mxu0 %v16703_v4  ;;  %15162 = vmatprep.subr.bf16.mxu1 %v16705_v8  ;;  %v16751_v4 = vcombine.high %v1432_v21, %v1436_v63  ;;  %v16753_v8 = vcombine.high %v1433_v7, %v1437_v0  ;;  %v1476_v38 = vld [vmem:[%s18438_s12 + $0x2370] sm:$0xff]  ;;  %v1477_v53 = vld [vmem:[%s18438_s12 + $0x2378] sm:$0xff] }
 0x691   : > { %14507 = vmatpush1.bf16.msra.mxu0 %v16702_v26  ;;  %15163 = vmatpush1.bf16.msra.mxu1 %v16704_v56  ;;  %v16750_v26 = vcombine.low %v1432_v21, %v1436_v63  ;;  %v16752_v56 = vcombine.low %v1433_v7, %v1437_v0  ;;  %v1480_v21 = vld [vmem:[%s18438_s12 + $0x2390] sm:$0xff]  ;;  %v1481_v7 = vld [vmem:[%s18438_s12 + $0x2398] sm:$0xff] }
 0x692   : > { %14508 = vmatprep.subr.bf16.mxu0 %v16711_v14  ;;  %15164 = vmatprep.subr.bf16.mxu1 %v16713_v15  ;;  %v16759_v14 = vcombine.high %v1440_v9, %v1444_v10  ;;  %v16761_v15 = vcombine.high %v1441_v11, %v1445_v17  ;;  %v1484_v63 = vld [vmem:[%s18438_s12 + $0x23b0] sm:$0xff]  ;;  %v1485_v0 = vld [vmem:[%s18438_s12 + $0x23b8] sm:$0xff] }
 0x695   : > { %14509 = vmatpush1.bf16.msra.mxu0 %v16710_v24  ;;  %15165 = vmatpush1.bf16.msra.mxu1 %v16712_v39  ;;  %v16758_v24 = vcombine.low %v1440_v9, %v1444_v10  ;;  %v16760_v39 = vcombine.low %v1441_v11, %v1445_v17  ;;  %v1488_v9 = vld [vmem:[%s18438_s12 + $0x23d0] sm:$0xff]  ;;  %v1489_v11 = vld [vmem:[%s18438_s12 + $0x23d8] sm:$0xff] }
 0x696   : > { %14510 = vmatprep.subr.bf16.mxu0 %v16719_v29  ;;  %15166 = vmatprep.subr.bf16.mxu1 %v16721_v1  ;;  %v16767_v29 = vcombine.high %v1448_v3, %v1452_v52  ;;  %v16769_v1 = vcombine.high %v1449_v45, %v1453_v23  ;;  %v1492_v10 = vld [vmem:[%s18438_s12 + $0x23f0] sm:$0xff]  ;;  %v1493_v17 = vld [vmem:[%s18438_s12 + $0x23f8] sm:$0xff] }
 0x699   : > { %14511 = vmatpush1.bf16.msra.mxu0 %v16718_v42  ;;  %15167 = vmatpush1.bf16.msra.mxu1 %v16720_v60  ;;  %v16766_v42 = vcombine.low %v1448_v3, %v1452_v52  ;;  %v16768_v60 = vcombine.low %v1449_v45, %v1453_v23  ;;  %v1496_v3 = vld [vmem:[%s18438_s12 + $0x2410] sm:$0xff]  ;;  %v1497_v45 = vld [vmem:[%s18438_s12 + $0x2418] sm:$0xff] }
 0x69a   : > { %14512 = vmatprep.subr.bf16.mxu0 %v16727_v28  ;;  %15168 = vmatprep.subr.bf16.mxu1 %v16729_v31  ;;  %v16775_v28 = vcombine.high %v1456_v40, %v1460_v27  ;;  %v16777_v31 = vcombine.high %v1457_v30, %v1461_v20  ;;  %v1500_v52 = vld [vmem:[%s18438_s12 + $0x2430] sm:$0xff]  ;;  %v1501_v23 = vld [vmem:[%s18438_s12 + $0x2438] sm:$0xff] }
 0x69d   : > { %14513 = vmatpush1.bf16.msra.mxu0 %v16726_v37  ;;  %15169 = vmatpush1.bf16.msra.mxu1 %v16728_v46  ;;  %v16774_v37 = vcombine.low %v1456_v40, %v1460_v27  ;;  %v16776_v46 = vcombine.low %v1457_v30, %v1461_v20  ;;  %v1504_v40 = vld [vmem:[%s18438_s12 + $0x2450] sm:$0xff]  ;;  %v1505_v30 = vld [vmem:[%s18438_s12 + $0x2458] sm:$0xff] }
 0x69e   : > { %14514 = vmatprep.subr.bf16.mxu0 %v16735_v33  ;;  %15170 = vmatprep.subr.bf16.mxu1 %v16737_v6  ;;  %v16783_v33 = vcombine.high %v1464_v41, %v1468_v51  ;;  %v16785_v6 = vcombine.high %v1465_v36, %v1469_v13  ;;  %v1508_v27 = vld [vmem:[%s18438_s12 + $0x2470] sm:$0xff]  ;;  %v1509_v20 = vld [vmem:[%s18438_s12 + $0x2478] sm:$0xff] }
 0x6a1   : > { %14515 = vmatpush1.bf16.msra.mxu0 %v16734_v54  ;;  %15171 = vmatpush1.bf16.msra.mxu1 %v16736_v57  ;;  %v16782_v54 = vcombine.low %v1464_v41, %v1468_v51  ;;  %v16784_v57 = vcombine.low %v1465_v36, %v1469_v13  ;;  %v1512_v41 = vld [vmem:[%s18438_s12 + $0x2490] sm:$0xff]  ;;  %v1513_v36 = vld [vmem:[%s18438_s12 + $0x2498] sm:$0xff] }
 0x6a2   : > { %14516 = vmatprep.subr.bf16.mxu0 %v16743_v59  ;;  %15172 = vmatprep.subr.bf16.mxu1 %v16745_v22  ;;  %v16791_v59 = vcombine.high %v1472_v47, %v1476_v38  ;;  %v16793_v22 = vcombine.high %v1473_v50, %v1477_v53  ;;  %v1516_v51 = vld [vmem:[%s18438_s12 + $0x24b0] sm:$0xff]  ;;  %v1517_v13 = vld [vmem:[%s18438_s12 + $0x24b8] sm:$0xff] }
 0x6a5   : > { %14517 = vmatpush1.bf16.msra.mxu0 %v16742_v55  ;;  %15173 = vmatpush1.bf16.msra.mxu1 %v16744_v2  ;;  %v16790_v55 = vcombine.low %v1472_v47, %v1476_v38  ;;  %v16792_v2 = vcombine.low %v1473_v50, %v1477_v53  ;;  %v1520_v47 = vld [vmem:[%s18438_s12 + $0x24d0] sm:$0xff]  ;;  %v1521_v50 = vld [vmem:[%s18438_s12 + $0x24d8] sm:$0xff] }
 0x6a6   : > { %14518 = vmatprep.subr.bf16.mxu0 %v16751_v4  ;;  %15174 = vmatprep.subr.bf16.mxu1 %v16753_v8  ;;  %v16799_v4 = vcombine.high %v1480_v21, %v1484_v63  ;;  %v16801_v8 = vcombine.high %v1481_v7, %v1485_v0  ;;  %v1524_v38 = vld [vmem:[%s18438_s12 + $0x24f0] sm:$0xff]  ;;  %v1525_v53 = vld [vmem:[%s18438_s12 + $0x24f8] sm:$0xff] }
 0x6a9   : > { %14519 = vmatpush1.bf16.msra.mxu0 %v16750_v26  ;;  %15175 = vmatpush1.bf16.msra.mxu1 %v16752_v56  ;;  %v16798_v26 = vcombine.low %v1480_v21, %v1484_v63  ;;  %v16800_v56 = vcombine.low %v1481_v7, %v1485_v0  ;;  %v1532_v21 = vld [vmem:[%s18438_s12 + $0x2530] sm:$0xff]  ;;  %v1529_v63 = vld [vmem:[%s18438_s12 + $0x2518] sm:$0xff]  ;;  %v16838_v0 = vcombine.low %v1520_v47, %v1524_v38 }
 0x6aa   : > { %14520 = vmatprep.subr.bf16.mxu0 %v16759_v14  ;;  %15176 = vmatprep.subr.bf16.mxu1 %v16761_v15  ;;  %v16807_v14 = vcombine.high %v1488_v9, %v1492_v10  ;;  %v16809_v15 = vcombine.high %v1489_v11, %v1493_v17  ;;  %v1533_v7 = vld [vmem:[%s18438_s12 + $0x2538] sm:$0xff] }
 0x6ad   : > { %14521 = vmatpush1.bf16.msra.mxu0 %v16758_v24  ;;  %15177 = vmatpush1.bf16.msra.mxu1 %v16760_v39  ;;  %v16806_v24 = vcombine.low %v1488_v9, %v1492_v10  ;;  %v16808_v39 = vcombine.low %v1489_v11, %v1493_v17  ;;  %v1537_v9 = vld [vmem:[%s18438_s12 + $0x2558] sm:$0xff]  ;;  %v16848_v17 = vcombine.low %v1529_v63, %v1533_v7 }
 0x6ae   : > { %14522 = vmatprep.subr.bf16.mxu0 %v16767_v29  ;;  %15178 = vmatprep.subr.bf16.mxu1 %v16769_v1  ;;  %v16815_v29 = vcombine.high %v1496_v3, %v1500_v52  ;;  %v16817_v1 = vcombine.high %v1497_v45, %v1501_v23  ;;  %v1541_v10 = vld [vmem:[%s18438_s12 + $0x2578] sm:$0xff] }
 0x6b1   : > { %14523 = vmatpush1.bf16.msra.mxu0 %v16766_v42  ;;  %15179 = vmatpush1.bf16.msra.mxu1 %v16768_v60  ;;  %v16814_v42 = vcombine.low %v1496_v3, %v1500_v52  ;;  %v16816_v60 = vcombine.low %v1497_v45, %v1501_v23  ;;  %v1545_v3 = vld [vmem:[%s18438_s12 + $0x2598] sm:$0xff]  ;;  %v16856_v23 = vcombine.low %v1537_v9, %v1541_v10 }
 0x6b2   : > { %14524 = vmatprep.subr.bf16.mxu0 %v16775_v28  ;;  %15180 = vmatprep.subr.bf16.mxu1 %v16777_v31  ;;  %v16823_v28 = vcombine.high %v1504_v40, %v1508_v27  ;;  %v16825_v31 = vcombine.high %v1505_v30, %v1509_v20  ;;  %v1549_v52 = vld [vmem:[%s18438_s12 + $0x25b8] sm:$0xff] }
 0x6b5   : > { %14525 = vmatpush1.bf16.msra.mxu0 %v16774_v37  ;;  %15181 = vmatpush1.bf16.msra.mxu1 %v16776_v46  ;;  %v16822_v37 = vcombine.low %v1504_v40, %v1508_v27  ;;  %v16824_v46 = vcombine.low %v1505_v30, %v1509_v20  ;;  %v1553_v40 = vld [vmem:[%s18438_s12 + $0x25d8] sm:$0xff]  ;;  %v16864_v20 = vcombine.low %v1545_v3, %v1549_v52 }
 0x6b6   : > { %14526 = vmatprep.subr.bf16.mxu0 %v16783_v33  ;;  %15182 = vmatprep.subr.bf16.mxu1 %v16785_v6  ;;  %v16831_v33 = vcombine.high %v1512_v41, %v1516_v51  ;;  %v16833_v6 = vcombine.high %v1513_v36, %v1517_v13  ;;  %v1557_v27 = vld [vmem:[%s18438_s12 + $0x25f8] sm:$0xff] }
 0x6b9   : > { %14527 = vmatpush1.bf16.msra.mxu0 %v16782_v54  ;;  %15183 = vmatpush1.bf16.msra.mxu1 %v16784_v57  ;;  %v16832_v54 = vcombine.low %v1513_v36, %v1517_v13  ;;  %v16839_v57 = vcombine.high %v1520_v47, %v1524_v38  ;;  %v16872_v13 = vcombine.low %v1553_v40, %v1557_v27  ;;  %v1569_v47 = vld [vmem:[%s18438_s12 + $0x2658] sm:$0xff] }
 0x6ba   : > { %14528 = vmatprep.subr.bf16.mxu0 %v16791_v59  ;;  %15184 = vmatprep.subr.bf16.mxu1 %v16793_v22  ;;  %v16841_v59 = vcombine.high %v1521_v50, %v1525_v53  ;;  %v1528_v22 = vld [vmem:[%s18438_s12 + $0x2510] sm:$0xff]  ;;  %v1573_v38 = vld [vmem:[%s18438_s12 + $0x2678] sm:$0xff] }
 0x6bb   : > { %v16846_v11 = vcombine.low %v1528_v22, %v1532_v21 }
 0x6bd   : > { %14529 = vmatpush1.bf16.msra.mxu0 %v16790_v55  ;;  %15185 = vmatpush1.bf16.msra.mxu1 %v16792_v2  ;;  %v16847_v55 = vcombine.high %v1528_v22, %v1532_v21  ;;  %v16849_v2 = vcombine.high %v1529_v63, %v1533_v7  ;;  %v1577_v22 = vld [vmem:[%s18438_s12 + $0x2698] sm:$0xff]  ;;  %v16888_v7 = vcombine.low %v1569_v47, %v1573_v38 }
 0x6be   : > { %14530 = vmatprep.subr.bf16.mxu0 %v16799_v4  ;;  %15186 = vmatprep.subr.bf16.mxu1 %v16801_v8  ;;  %v1536_v4 = vld [vmem:[%s18438_s12 + $0x2550] sm:$0xff]  ;;  %v1581_v21 = vld [vmem:[%s18438_s12 + $0x26b8] sm:$0xff] }
 0x6bf   : > { %v1540_v8 = vld [vmem:[%s18438_s12 + $0x2570] sm:$0xff] }
 0x6c0   : > { %v16854_v45 = vcombine.low %v1536_v4, %v1540_v8 }
 0x6c1   : > { %14531 = vmatpush1.bf16.msra.mxu0 %v16798_v26  ;;  %15187 = vmatpush1.bf16.msra.mxu1 %v16800_v56  ;;  %v16855_v26 = vcombine.high %v1536_v4, %v1540_v8  ;;  %v16857_v56 = vcombine.high %v1537_v9, %v1541_v10  ;;  %v1585_v4 = vld [vmem:[%s18438_s12 + $0x26d8] sm:$0xff]  ;;  %v16896_v10 = vcombine.low %v1577_v22, %v1581_v21 }
 0x6c2   : > { %14532 = vmatprep.subr.bf16.mxu0 %v16807_v14  ;;  %15188 = vmatprep.subr.bf16.mxu1 %v16809_v15  ;;  %v1544_v14 = vld [vmem:[%s18438_s12 + $0x2590] sm:$0xff]  ;;  %v1589_v8 = vld [vmem:[%s18438_s12 + $0x26f8] sm:$0xff] }
 0x6c3   : > { %v1548_v15 = vld [vmem:[%s18438_s12 + $0x25b0] sm:$0xff] }
 0x6c4   : > { %v16862_v30 = vcombine.low %v1544_v14, %v1548_v15 }
 0x6c5   : > { %14533 = vmatpush1.bf16.msra.mxu0 %v16806_v24  ;;  %15189 = vmatpush1.bf16.msra.mxu1 %v16808_v39  ;;  %v16863_v24 = vcombine.high %v1544_v14, %v1548_v15  ;;  %v16865_v39 = vcombine.high %v1545_v3, %v1549_v52  ;;  %v1593_v14 = vld [vmem:[%s18438_s12 + $0x2718] sm:$0xff]  ;;  %v16904_v52 = vcombine.low %v1585_v4, %v1589_v8 }
 0x6c6   : > { %14543 = vmatprep.subr.bf16.mxu0 %v16815_v29  ;;  %15199 = vmatprep.subr.bf16.mxu1 %v16817_v1  ;;  %v1552_v29 = vld [vmem:[%s18438_s12 + $0x25d0] sm:$0xff]  ;;  %v1597_v15 = vld [vmem:[%s18438_s12 + $0x2738] sm:$0xff] }
 0x6c7   : > { %v1556_v1 = vld [vmem:[%s18438_s12 + $0x25f0] sm:$0xff] }
 0x6c8   : > { %14535 = vmatmul.mubr.bf16.vlgmr.msra.gmra.mrb[4].mxu0 %v19176_v25  ;;  %15191 = vmatmul.mubr.bf16.vlgmr.msra.gmra.mrb[4].mxu1 %v19176_v25  ;;  %v16830_v25 = vcombine.low %v1512_v41, %v1516_v51  ;;  %v1561_v41 = vld [vmem:[%s18438_s12 + $0x2618] sm:$0xff]  ;;  %v16870_v36 = vcombine.low %v1552_v29, %v1556_v1 }
 0x6c9   : > { %14544 = vmatpush1.bf16.msra.mxu0 %v16814_v42  ;;  %15200 = vmatpush1.bf16.msra.mxu1 %v16816_v60  ;;  %v16871_v42 = vcombine.high %v1552_v29, %v1556_v1  ;;  %v16873_v60 = vcombine.high %v1553_v40, %v1557_v27  ;;  %v1565_v51 = vld [vmem:[%s18438_s12 + $0x2638] sm:$0xff]  ;;  %v16912_v27 = vcombine.low %v1593_v14, %v1597_v15 }
 0x6ca   : > { %14545 = vmatprep.subr.bf16.mxu0 %v16823_v28  ;;  %15201 = vmatprep.subr.bf16.mxu1 %v16825_v31  ;;  %v1560_v28 = vld [vmem:[%s18438_s12 + $0x2610] sm:$0xff]  ;;  %v1601_v29 = vld [vmem:[%s18438_s12 + $0x2758] sm:$0xff] }
 0x6cb   : > { %14575 = vmatprep.mubr.bf16.mxu0 %v19184_v43  ;;  %15231 = vmatprep.mubr.bf16.mxu1 %v19184_v43  ;;  %v16840_v43 = vcombine.low %v1521_v50, %v1525_v53  ;;  %v1564_v31 = vld [vmem:[%s18438_s12 + $0x2630] sm:$0xff]  ;;  %v16880_v53 = vcombine.low %v1561_v41, %v1565_v51  ;;  %v1605_v1 = vld [vmem:[%s18438_s12 + $0x2778] sm:$0xff] }
 0x6cc   : > { %v16878_v50 = vcombine.low %v1560_v28, %v1564_v31 }
 0x6cd   : > { %14546 = vmatpush1.bf16.msra.mxu0 %v16822_v37  ;;  %15202 = vmatpush1.bf16.msra.mxu1 %v16824_v46  ;;  %v16879_v37 = vcombine.high %v1560_v28, %v1564_v31  ;;  %v16881_v46 = vcombine.high %v1561_v41, %v1565_v51  ;;  %v1609_v28 = vld [vmem:[%s18438_s12 + $0x2798] sm:$0xff]  ;;  %v16920_v51 = vcombine.low %v1601_v29, %v1605_v1 }
 0x6ce   : > { %14547 = vmatprep.subr.bf16.mxu0 %v16831_v33  ;;  %15203 = vmatprep.subr.bf16.mxu1 %v16833_v6  ;;  %v1568_v33 = vld [vmem:[%s18438_s12 + $0x2650] sm:$0xff]  ;;  %v1613_v31 = vld [vmem:[%s18438_s12 + $0x27b8] sm:$0xff] }
 0x6cf   : > { %v1572_v6 = vld [vmem:[%s18438_s12 + $0x2670] sm:$0xff] }
 0x6d0   : > { %v16886_v63 = vcombine.low %v1568_v33, %v1572_v6 }
 0x6d1   : > { %14548 = vmatpush1.bf16.msra.mxu0 %v16830_v25  ;;  %15204 = vmatpush1.bf16.msra.mxu1 %v16832_v54  ;;  %v16887_v25 = vcombine.high %v1568_v33, %v1572_v6  ;;  %v16889_v54 = vcombine.high %v1569_v47, %v1573_v38  ;;  %v1617_v33 = vld [vmem:[%s18438_s12 + $0x27d8] sm:$0xff]  ;;  %v16928_v38 = vcombine.low %v1609_v28, %v1613_v31 }
 0x6d2   : > { %14549 = vmatprep.subr.bf16.mxu0 %v16839_v57  ;;  %15205 = vmatprep.subr.bf16.mxu1 %v16841_v59  ;;  %v1576_v57 = vld [vmem:[%s18438_s12 + $0x2690] sm:$0xff]  ;;  %v1621_v6 = vld [vmem:[%s18438_s12 + $0x27f8] sm:$0xff] }
 0x6d3   : > { %v1580_v59 = vld [vmem:[%s18438_s12 + $0x26b0] sm:$0xff] }
 0x6d4   : > { %v16894_v9 = vcombine.low %v1576_v57, %v1580_v59 }
 0x6d5   : > { %14550 = vmatpush1.bf16.msra.mxu0 %v16838_v0  ;;  %15206 = vmatpush1.bf16.msra.mxu1 %v16840_v43  ;;  %v16895_v0 = vcombine.high %v1576_v57, %v1580_v59  ;;  %v16897_v43 = vcombine.high %v1577_v22, %v1581_v21  ;;  %v1625_v57 = vld [vmem:[%s18438_s12 + $0x2818] sm:$0xff]  ;;  %v16936_v21 = vcombine.low %v1617_v33, %v1621_v6 }
 0x6d6   : > { %14551 = vmatprep.subr.bf16.mxu0 %v16847_v55  ;;  %15207 = vmatprep.subr.bf16.mxu1 %v16849_v2  ;;  %v1584_v55 = vld [vmem:[%s18438_s12 + $0x26d0] sm:$0xff]  ;;  %v1629_v59 = vld [vmem:[%s18438_s12 + $0x2838] sm:$0xff] }
 0x6d7   : > { %v1588_v2 = vld [vmem:[%s18438_s12 + $0x26f0] sm:$0xff] }
 0x6d8   : > { %v16902_v3 = vcombine.low %v1584_v55, %v1588_v2 }
 0x6d9   : > { %14552 = vmatpush1.bf16.msra.mxu0 %v16846_v11  ;;  %15208 = vmatpush1.bf16.msra.mxu1 %v16848_v17  ;;  %v16903_v11 = vcombine.high %v1584_v55, %v1588_v2  ;;  %v16905_v17 = vcombine.high %v1585_v4, %v1589_v8  ;;  %v1633_v55 = vld [vmem:[%s18438_s12 + $0x2858] sm:$0xff]  ;;  %v16944_v8 = vcombine.low %v1625_v57, %v1629_v59 }
 0x6da   : > { %14553 = vmatprep.subr.bf16.mxu0 %v16855_v26  ;;  %15209 = vmatprep.subr.bf16.mxu1 %v16857_v56  ;;  %v1592_v26 = vld [vmem:[%s18438_s12 + $0x2710] sm:$0xff]  ;;  %v1637_v2 = vld [vmem:[%s18438_s12 + $0x2878] sm:$0xff] }
 0x6db   : > { %v1596_v56 = vld [vmem:[%s18438_s12 + $0x2730] sm:$0xff] }
 0x6dc   : > { %v16910_v40 = vcombine.low %v1592_v26, %v1596_v56 }
 0x6dd   : > { %14554 = vmatpush1.bf16.msra.mxu0 %v16854_v45  ;;  %15210 = vmatpush1.bf16.msra.mxu1 %v16856_v23  ;;  %v16911_v45 = vcombine.high %v1592_v26, %v1596_v56  ;;  %v16913_v23 = vcombine.high %v1593_v14, %v1597_v15  ;;  %v1641_v26 = vld [vmem:[%s18438_s12 + $0x2898] sm:$0xff]  ;;  %v16952_v15 = vcombine.low %v1633_v55, %v1637_v2 }
 0x6de   : > { %14555 = vmatprep.subr.bf16.mxu0 %v16863_v24  ;;  %15211 = vmatprep.subr.bf16.mxu1 %v16865_v39  ;;  %v1600_v24 = vld [vmem:[%s18438_s12 + $0x2750] sm:$0xff]  ;;  %v1645_v56 = vld [vmem:[%s18438_s12 + $0x28b8] sm:$0xff] }
 0x6df   : > { %v1604_v39 = vld [vmem:[%s18438_s12 + $0x2770] sm:$0xff] }
 0x6e0   : > { %v16918_v41 = vcombine.low %v1600_v24, %v1604_v39 }
 0x6e1   : > { %14556 = vmatpush1.bf16.msra.mxu0 %v16862_v30  ;;  %15212 = vmatpush1.bf16.msra.mxu1 %v16864_v20  ;;  %v16919_v30 = vcombine.high %v1600_v24, %v1604_v39  ;;  %v16921_v20 = vcombine.high %v1601_v29, %v1605_v1  ;;  %v1649_v24 = vld [vmem:[%s18438_s12 + $0x28d8] sm:$0xff]  ;;  %v16960_v29 = vcombine.low %v1641_v26, %v1645_v56 }
 0x6e2   : > { %14557 = vmatprep.subr.bf16.mxu0 %v16871_v42  ;;  %15213 = vmatprep.subr.bf16.mxu1 %v16873_v60  ;;  %v1608_v42 = vld [vmem:[%s18438_s12 + $0x2790] sm:$0xff]  ;;  %v1653_v39 = vld [vmem:[%s18438_s12 + $0x28f8] sm:$0xff] }
 0x6e3   : > { %v1612_v60 = vld [vmem:[%s18438_s12 + $0x27b0] sm:$0xff] }
 0x6e4   : > { %v16926_v47 = vcombine.low %v1608_v42, %v1612_v60 }
 0x6e5   : > { %14558 = vmatpush1.bf16.msra.mxu0 %v16870_v36  ;;  %15214 = vmatpush1.bf16.msra.mxu1 %v16872_v13  ;;  %v16927_v36 = vcombine.high %v1608_v42, %v1612_v60  ;;  %v16929_v13 = vcombine.high %v1609_v28, %v1613_v31  ;;  %v1661_v42 = vld [vmem:[%s18438_s12 + $0x2938] sm:$0xff] }
 0x6e6   : > { %14559 = vmatprep.subr.bf16.mxu0 %v16879_v37  ;;  %15215 = vmatprep.subr.bf16.mxu1 %v16881_v46  ;;  %v1616_v37 = vld [vmem:[%s18438_s12 + $0x27d0] sm:$0xff] }
 0x6e7   : > { %v1620_v46 = vld [vmem:[%s18438_s12 + $0x27f0] sm:$0xff] }
 0x6e8   : > { %v16934_v22 = vcombine.low %v1616_v37, %v1620_v46 }
 0x6e9   : > { %14560 = vmatpush1.bf16.msra.mxu0 %v16878_v50  ;;  %15216 = vmatpush1.bf16.msra.mxu1 %v16880_v53  ;;  %v16935_v50 = vcombine.high %v1616_v37, %v1620_v46  ;;  %v16937_v53 = vcombine.high %v1617_v33, %v1621_v6 }
 0x6ea   : > { %14561 = vmatprep.subr.bf16.mxu0 %v16887_v25  ;;  %15217 = vmatprep.subr.bf16.mxu1 %v16889_v54  ;;  %v1624_v25 = vld [vmem:[%s18438_s12 + $0x2810] sm:$0xff] }
 0x6eb   : > { %v1628_v54 = vld [vmem:[%s18438_s12 + $0x2830] sm:$0xff] }
 0x6ec   : > { %v16942_v4 = vcombine.low %v1624_v25, %v1628_v54 }
 0x6ed   : > { %14562 = vmatpush1.bf16.msra.mxu0 %v16886_v63  ;;  %15218 = vmatpush1.bf16.msra.mxu1 %v16888_v7  ;;  %v16943_v63 = vcombine.high %v1624_v25, %v1628_v54  ;;  %v16945_v7 = vcombine.high %v1625_v57, %v1629_v59 }
 0x6ee   : > { %14563 = vmatprep.subr.bf16.mxu0 %v16895_v0  ;;  %15219 = vmatprep.subr.bf16.mxu1 %v16897_v43  ;;  %v1632_v0 = vld [vmem:[%s18438_s12 + $0x2850] sm:$0xff] }
 0x6ef   : > { %v1636_v43 = vld [vmem:[%s18438_s12 + $0x2870] sm:$0xff] }
 0x6f0   : > { %v16950_v14 = vcombine.low %v1632_v0, %v1636_v43 }
 0x6f1   : > { %14564 = vmatpush1.bf16.msra.mxu0 %v16894_v9  ;;  %15220 = vmatpush1.bf16.msra.mxu1 %v16896_v10  ;;  %v16951_v9 = vcombine.high %v1632_v0, %v1636_v43  ;;  %v16953_v10 = vcombine.high %v1633_v55, %v1637_v2 }
 0x6f2   : > { %14565 = vmatprep.subr.bf16.mxu0 %v16903_v11  ;;  %15221 = vmatprep.subr.bf16.mxu1 %v16905_v17  ;;  %v1640_v11 = vld [vmem:[%s18438_s12 + $0x2890] sm:$0xff] }
 0x6f3   : > { %v1644_v17 = vld [vmem:[%s18438_s12 + $0x28b0] sm:$0xff] }
 0x6f5   : > { %14566 = vmatpush1.bf16.msra.mxu0 %v16902_v3  ;;  %15222 = vmatpush1.bf16.msra.mxu1 %v16904_v52  ;;  %v16959_v3 = vcombine.high %v1640_v11, %v1644_v17  ;;  %v16961_v52 = vcombine.high %v1641_v26, %v1645_v56 }
 0x6f6   : > { %14567 = vmatprep.subr.bf16.mxu0 %v16911_v45  ;;  %15223 = vmatprep.subr.bf16.mxu1 %v16913_v23  ;;  %v1648_v45 = vld [vmem:[%s18438_s12 + $0x28d0] sm:$0xff] }
 0x6f7   : > { %v1652_v23 = vld [vmem:[%s18438_s12 + $0x28f0] sm:$0xff] }
 0x6f8   : > { %v16967_v1 = vcombine.high %v1648_v45, %v1652_v23  ;;  %v16966_v60 = vcombine.low %v1648_v45, %v1652_v23 }
 0x6f9   : > { %14568 = vmatpush1.bf16.msra.mxu0 %v16910_v40  ;;  %15224 = vmatpush1.bf16.msra.mxu1 %v16912_v27  ;;  %v16969_v40 = vcombine.high %v1649_v24, %v1653_v39  ;;  %v1656_v27 = vld [vmem:[%s18438_s12 + $0x2910] sm:$0xff] }
 0x6fa   : > { %14569 = vmatprep.subr.bf16.mxu0 %v16919_v30  ;;  %15225 = vmatprep.subr.bf16.mxu1 %v16921_v20  ;;  %v1660_v30 = vld [vmem:[%s18438_s12 + $0x2930] sm:$0xff]  ;;  %v1657_v20 = vld [vmem:[%s18438_s12 + $0x2918] sm:$0xff] }
 0x6fb   : > { %v16975_v28 = vcombine.high %v1656_v27, %v1660_v30  ;;  %v16977_v31 = vcombine.high %v1657_v20, %v1661_v42  ;;  %v16974_v37 = vcombine.low %v1656_v27, %v1660_v30  ;;  %v16976_v46 = vcombine.low %v1657_v20, %v1661_v42 }
 0x6fd   : > { %14570 = vmatpush1.bf16.msra.mxu0 %v16918_v41  ;;  %15226 = vmatpush1.bf16.msra.mxu1 %v16920_v51  ;;  %v1664_v41 = vld [vmem:[%s18438_s12 + $0x2950] sm:$0xff] }
 0x6fe   : > { %14571 = vmatprep.subr.bf16.mxu0 %v16927_v36  ;;  %15227 = vmatprep.subr.bf16.mxu1 %v16929_v13  ;;  %v1668_v51 = vld [vmem:[%s18438_s12 + $0x2970] sm:$0xff]  ;;  %v1665_v36 = vld [vmem:[%s18438_s12 + $0x2958] sm:$0xff] }
 0x6ff   : > { %v1669_v13 = vld [vmem:[%s18438_s12 + $0x2978] sm:$0xff]  ;;  %v16983_v33 = vcombine.high %v1664_v41, %v1668_v51  ;;  %v16982_v25 = vcombine.low %v1664_v41, %v1668_v51 }
 0x700   : > { %v16985_v6 = vcombine.high %v1665_v36, %v1669_v13  ;;  %v16984_v54 = vcombine.low %v1665_v36, %v1669_v13 }
 0x701   : > { %14572 = vmatpush1.bf16.msra.mxu0 %v16926_v47  ;;  %15228 = vmatpush1.bf16.msra.mxu1 %v16928_v38  ;;  %v1672_v47 = vld [vmem:[%s18438_s12 + $0x2990] sm:$0xff] }
 0x702   : > { %14573 = vmatprep.subr.bf16.mxu0 %v16935_v50  ;;  %15229 = vmatprep.subr.bf16.mxu1 %v16937_v53  ;;  %v1676_v38 = vld [vmem:[%s18438_s12 + $0x29b0] sm:$0xff]  ;;  %v1673_v50 = vld [vmem:[%s18438_s12 + $0x2998] sm:$0xff] }
 0x703   : > { %v1677_v53 = vld [vmem:[%s18438_s12 + $0x29b8] sm:$0xff]  ;;  %v16991_v57 = vcombine.high %v1672_v47, %v1676_v38  ;;  %v16990_v0 = vcombine.low %v1672_v47, %v1676_v38 }
 0x704   : > { %v16993_v59 = vcombine.high %v1673_v50, %v1677_v53  ;;  %v16992_v43 = vcombine.low %v1673_v50, %v1677_v53 }
 0x705   : > { %14574 = vmatpush1.bf16.msra.mxu0 %v16934_v22  ;;  %15230 = vmatpush1.bf16.msra.mxu1 %v16936_v21  ;;  %v1680_v22 = vld [vmem:[%s18438_s12 + $0x29d0] sm:$0xff] }
 0x706   : > { %14584 = vmatprep.subr.bf16.mxu0 %v16943_v63  ;;  %15240 = vmatprep.subr.bf16.mxu1 %v16945_v7  ;;  %v1684_v21 = vld [vmem:[%s18438_s12 + $0x29f0] sm:$0xff]  ;;  %v1681_v63 = vld [vmem:[%s18438_s12 + $0x29d8] sm:$0xff] }
 0x707   : > { %v1685_v7 = vld [vmem:[%s18438_s12 + $0x29f8] sm:$0xff]  ;;  %v16999_v55 = vcombine.high %v1680_v22, %v1684_v21 }
 0x708   : > { %14576 = vmatmul.mubr.bf16.vlgmr.msra.gmra.mrb[4].mxu0 %v19259_v35  ;;  %15232 = vmatmul.mubr.bf16.vlgmr.msra.gmra.mrb[4].mxu1 %v19259_v35  ;;  %v16958_v35 = vcombine.low %v1640_v11, %v1644_v17  ;;  %v17001_v2 = vcombine.high %v1681_v63, %v1685_v7  ;;  %v16998_v11 = vcombine.low %v1680_v22, %v1684_v21 }
 0x709   : > { %14585 = vmatpush1.bf16.msra.mxu0 %v16942_v4  ;;  %15241 = vmatpush1.bf16.msra.mxu1 %v16944_v8  ;;  %v1688_v4 = vld [vmem:[%s18438_s12 + $0x2a10] sm:$0xff]  ;;  %v17000_v17 = vcombine.low %v1681_v63, %v1685_v7 }
 0x70a   : > { %14586 = vmatprep.subr.bf16.mxu0 %v16951_v9  ;;  %15242 = vmatprep.subr.bf16.mxu1 %v16953_v10  ;;  %v1692_v8 = vld [vmem:[%s18438_s12 + $0x2a30] sm:$0xff]  ;;  %v1689_v9 = vld [vmem:[%s18438_s12 + $0x2a18] sm:$0xff] }
 0x70b   : > { %14616 = vmatprep.mubr.bf16.mxu0 %v19266_v48  ;;  %15272 = vmatprep.mubr.bf16.mxu1 %v19266_v48  ;;  %v16968_v48 = vcombine.low %v1649_v24, %v1653_v39  ;;  %v1693_v10 = vld [vmem:[%s18438_s12 + $0x2a38] sm:$0xff]  ;;  %v17007_v26 = vcombine.high %v1688_v4, %v1692_v8  ;;  %v17006_v45 = vcombine.low %v1688_v4, %v1692_v8 }
 0x70c   : > { %v17009_v56 = vcombine.high %v1689_v9, %v1693_v10  ;;  %v17008_v23 = vcombine.low %v1689_v9, %v1693_v10 }
 0x70d   : > { %14587 = vmatpush1.bf16.msra.mxu0 %v16950_v14  ;;  %15243 = vmatpush1.bf16.msra.mxu1 %v16952_v15  ;;  %v1696_v14 = vld [vmem:[%s18438_s12 + $0x2a50] sm:$0xff] }
 0x70e   : > { %14588 = vmatprep.subr.bf16.mxu0 %v16959_v3  ;;  %15244 = vmatprep.subr.bf16.mxu1 %v16961_v52  ;;  %v1700_v15 = vld [vmem:[%s18438_s12 + $0x2a70] sm:$0xff]  ;;  %v1697_v3 = vld [vmem:[%s18438_s12 + $0x2a58] sm:$0xff] }
 0x70f   : > { %v1701_v52 = vld [vmem:[%s18438_s12 + $0x2a78] sm:$0xff]  ;;  %v17015_v24 = vcombine.high %v1696_v14, %v1700_v15  ;;  %v17014_v27 = vcombine.low %v1696_v14, %v1700_v15 }
 0x710   : > { %v17017_v39 = vcombine.high %v1697_v3, %v1701_v52  ;;  %v17016_v30 = vcombine.low %v1697_v3, %v1701_v52 }
 0x711   : > { %14589 = vmatpush1.bf16.msra.mxu0 %v16958_v35  ;;  %15245 = vmatpush1.bf16.msra.mxu1 %v16960_v29  ;;  %v1704_v35 = vld [vmem:[%s18438_s12 + $0x2a90] sm:$0xff] }
 0x712   : > { %14590 = vmatprep.subr.bf16.mxu0 %v16967_v1  ;;  %15246 = vmatprep.subr.bf16.mxu1 %v16969_v40  ;;  %v1708_v29 = vld [vmem:[%s18438_s12 + $0x2ab0] sm:$0xff]  ;;  %v1705_v1 = vld [vmem:[%s18438_s12 + $0x2a98] sm:$0xff] }
 0x713   : > { %v1709_v40 = vld [vmem:[%s18438_s12 + $0x2ab8] sm:$0xff]  ;;  %v17023_v20 = vcombine.high %v1704_v35, %v1708_v29  ;;  %v17022_v41 = vcombine.low %v1704_v35, %v1708_v29 }
 0x714   : > { %v17025_v42 = vcombine.high %v1705_v1, %v1709_v40  ;;  %v17024_v51 = vcombine.low %v1705_v1, %v1709_v40 }
 0x715   : > { %14591 = vmatpush1.bf16.msra.mxu0 %v16966_v60  ;;  %15247 = vmatpush1.bf16.msra.mxu1 %v16968_v48  ;;  %v1712_v60 = vld [vmem:[%s18438_s12 + $0x2ad0] sm:$0xff] }
 0x716   : > { %14592 = vmatprep.subr.bf16.mxu0 %v16975_v28  ;;  %15248 = vmatprep.subr.bf16.mxu1 %v16977_v31  ;;  %v1716_v48 = vld [vmem:[%s18438_s12 + $0x2af0] sm:$0xff]  ;;  %v1713_v28 = vld [vmem:[%s18438_s12 + $0x2ad8] sm:$0xff] }
 0x717   : > { %v1717_v31 = vld [vmem:[%s18438_s12 + $0x2af8] sm:$0xff]  ;;  %v17031_v36 = vcombine.high %v1712_v60, %v1716_v48  ;;  %v17030_v47 = vcombine.low %v1712_v60, %v1716_v48 }
 0x718   : > { %v17033_v13 = vcombine.high %v1713_v28, %v1717_v31  ;;  %v17032_v38 = vcombine.low %v1713_v28, %v1717_v31 }
 0x719   : > { %14593 = vmatpush1.bf16.msra.mxu0 %v16974_v37  ;;  %15249 = vmatpush1.bf16.msra.mxu1 %v16976_v46  ;;  %v1720_v37 = vld [vmem:[%s18438_s12 + $0x2b10] sm:$0xff] }
 0x71a   : > { %14594 = vmatprep.subr.bf16.mxu0 %v16983_v33  ;;  %15250 = vmatprep.subr.bf16.mxu1 %v16985_v6  ;;  %v1724_v46 = vld [vmem:[%s18438_s12 + $0x2b30] sm:$0xff]  ;;  %v1721_v33 = vld [vmem:[%s18438_s12 + $0x2b18] sm:$0xff] }
 0x71b   : > { %v1725_v6 = vld [vmem:[%s18438_s12 + $0x2b38] sm:$0xff]  ;;  %v17039_v50 = vcombine.high %v1720_v37, %v1724_v46  ;;  %v17038_v22 = vcombine.low %v1720_v37, %v1724_v46 }
 0x71c   : > { %v17041_v53 = vcombine.high %v1721_v33, %v1725_v6  ;;  %v17040_v21 = vcombine.low %v1721_v33, %v1725_v6 }
 0x71d   : > { %14595 = vmatpush1.bf16.msra.mxu0 %v16982_v25  ;;  %15251 = vmatpush1.bf16.msra.mxu1 %v16984_v54  ;;  %v1728_v25 = vld [vmem:[%s18438_s12 + $0x2b50] sm:$0xff] }
 0x71e   : > { %14596 = vmatprep.subr.bf16.mxu0 %v16991_v57  ;;  %15252 = vmatprep.subr.bf16.mxu1 %v16993_v59  ;;  %v1732_v54 = vld [vmem:[%s18438_s12 + $0x2b70] sm:$0xff]  ;;  %v1729_v57 = vld [vmem:[%s18438_s12 + $0x2b58] sm:$0xff] }
 0x71f   : > { %v1733_v59 = vld [vmem:[%s18438_s12 + $0x2b78] sm:$0xff]  ;;  %v17047_v63 = vcombine.high %v1728_v25, %v1732_v54  ;;  %v17046_v4 = vcombine.low %v1728_v25, %v1732_v54 }
 0x720   : > { %v17049_v7 = vcombine.high %v1729_v57, %v1733_v59  ;;  %v17048_v8 = vcombine.low %v1729_v57, %v1733_v59  ;;  %v1784_v59 = vld [vmem:[%s18438_s12 + $0x2d10] sm:$0xff] }
 0x721   : > { %14597 = vmatpush1.bf16.msra.mxu0 %v16990_v0  ;;  %15253 = vmatpush1.bf16.msra.mxu1 %v16992_v43  ;;  %v1736_v0 = vld [vmem:[%s18438_s12 + $0x2b90] sm:$0xff] }
 0x722   : > { %14598 = vmatprep.subr.bf16.mxu0 %v16999_v55  ;;  %15254 = vmatprep.subr.bf16.mxu1 %v17001_v2  ;;  %v1740_v43 = vld [vmem:[%s18438_s12 + $0x2bb0] sm:$0xff]  ;;  %v1737_v55 = vld [vmem:[%s18438_s12 + $0x2b98] sm:$0xff] }
 0x723   : > { %v1741_v2 = vld [vmem:[%s18438_s12 + $0x2bb8] sm:$0xff]  ;;  %v17055_v9 = vcombine.high %v1736_v0, %v1740_v43  ;;  %v17054_v14 = vcombine.low %v1736_v0, %v1740_v43 }
 0x724   : > { %v17057_v10 = vcombine.high %v1737_v55, %v1741_v2  ;;  %v17056_v15 = vcombine.low %v1737_v55, %v1741_v2  ;;  %v1792_v55 = vld [vmem:[%s18438_s12 + $0x2d50] sm:$0xff] }
 0x725   : > { %14599 = vmatpush1.bf16.msra.mxu0 %v16998_v11  ;;  %15255 = vmatpush1.bf16.msra.mxu1 %v17000_v17  ;;  %v1744_v11 = vld [vmem:[%s18438_s12 + $0x2bd0] sm:$0xff] }
 0x726   : > { %14600 = vmatprep.subr.bf16.mxu0 %v17007_v26  ;;  %15256 = vmatprep.subr.bf16.mxu1 %v17009_v56  ;;  %v1748_v17 = vld [vmem:[%s18438_s12 + $0x2bf0] sm:$0xff]  ;;  %v1745_v26 = vld [vmem:[%s18438_s12 + $0x2bd8] sm:$0xff] }
 0x727   : > { %v1749_v56 = vld [vmem:[%s18438_s12 + $0x2bf8] sm:$0xff]  ;;  %v17063_v3 = vcombine.high %v1744_v11, %v1748_v17  ;;  %v17062_v35 = vcombine.low %v1744_v11, %v1748_v17  ;;  %v1796_v2 = vld [vmem:[%s18438_s12 + $0x2d70] sm:$0xff] }
 0x728   : > { %v17065_v52 = vcombine.high %v1745_v26, %v1749_v56  ;;  %v17064_v29 = vcombine.low %v1745_v26, %v1749_v56  ;;  %v17111_v11 = vcombine.high %v1792_v55, %v1796_v2  ;;  %v1800_v26 = vld [vmem:[%s18438_s12 + $0x2d90] sm:$0xff] }
 0x729   : > { %14601 = vmatpush1.bf16.msra.mxu0 %v17006_v45  ;;  %15257 = vmatpush1.bf16.msra.mxu1 %v17008_v23  ;;  %v1752_v45 = vld [vmem:[%s18438_s12 + $0x2c10] sm:$0xff] }
 0x72a   : > { %14602 = vmatprep.subr.bf16.mxu0 %v17015_v24  ;;  %15258 = vmatprep.subr.bf16.mxu1 %v17017_v39  ;;  %v1756_v23 = vld [vmem:[%s18438_s12 + $0x2c30] sm:$0xff]  ;;  %v1753_v24 = vld [vmem:[%s18438_s12 + $0x2c18] sm:$0xff] }
 0x72b   : > { %v1757_v39 = vld [vmem:[%s18438_s12 + $0x2c38] sm:$0xff]  ;;  %v17071_v1 = vcombine.high %v1752_v45, %v1756_v23  ;;  %v17070_v60 = vcombine.low %v1752_v45, %v1756_v23  ;;  %v1804_v56 = vld [vmem:[%s18438_s12 + $0x2db0] sm:$0xff] }
 0x72c   : > { %v17073_v40 = vcombine.high %v1753_v24, %v1757_v39  ;;  %v17072_v48 = vcombine.low %v1753_v24, %v1757_v39  ;;  %v17119_v45 = vcombine.high %v1800_v26, %v1804_v56  ;;  %v1808_v24 = vld [vmem:[%s18438_s12 + $0x2dd0] sm:$0xff] }
 0x72d   : > { %14603 = vmatpush1.bf16.msra.mxu0 %v17014_v27  ;;  %15259 = vmatpush1.bf16.msra.mxu1 %v17016_v30  ;;  %v1760_v27 = vld [vmem:[%s18438_s12 + $0x2c50] sm:$0xff] }
 0x72e   : > { %14604 = vmatprep.subr.bf16.mxu0 %v17023_v20  ;;  %15260 = vmatprep.subr.bf16.mxu1 %v17025_v42  ;;  %v1764_v30 = vld [vmem:[%s18438_s12 + $0x2c70] sm:$0xff]  ;;  %v1761_v20 = vld [vmem:[%s18438_s12 + $0x2c58] sm:$0xff] }
 0x72f   : > { %v1765_v42 = vld [vmem:[%s18438_s12 + $0x2c78] sm:$0xff]  ;;  %v17079_v28 = vcombine.high %v1760_v27, %v1764_v30  ;;  %v17078_v37 = vcombine.low %v1760_v27, %v1764_v30  ;;  %v1812_v39 = vld [vmem:[%s18438_s12 + $0x2df0] sm:$0xff] }
 0x730   : > { %v17081_v31 = vcombine.high %v1761_v20, %v1765_v42  ;;  %v17080_v46 = vcombine.low %v1761_v20, %v1765_v42  ;;  %v17127_v27 = vcombine.high %v1808_v24, %v1812_v39  ;;  %v1816_v20 = vld [vmem:[%s18438_s12 + $0x2e10] sm:$0xff] }
 0x731   : > { %14605 = vmatpush1.bf16.msra.mxu0 %v17022_v41  ;;  %15261 = vmatpush1.bf16.msra.mxu1 %v17024_v51  ;;  %v1768_v41 = vld [vmem:[%s18438_s12 + $0x2c90] sm:$0xff] }
 0x732   : > { %14606 = vmatprep.subr.bf16.mxu0 %v17031_v36  ;;  %15262 = vmatprep.subr.bf16.mxu1 %v17033_v13  ;;  %v1772_v51 = vld [vmem:[%s18438_s12 + $0x2cb0] sm:$0xff]  ;;  %v1769_v36 = vld [vmem:[%s18438_s12 + $0x2c98] sm:$0xff] }
 0x733   : > { %v1773_v13 = vld [vmem:[%s18438_s12 + $0x2cb8] sm:$0xff]  ;;  %v17087_v33 = vcombine.high %v1768_v41, %v1772_v51  ;;  %v1820_v42 = vld [vmem:[%s18438_s12 + $0x2e30] sm:$0xff] }
 0x734   : > { %v17089_v6 = vcombine.high %v1769_v36, %v1773_v13  ;;  %v17088_v25 = vcombine.low %v1769_v36, %v1773_v13  ;;  %v1824_v36 = vld [vmem:[%s18438_s12 + $0x2e50] sm:$0xff] }
 0x735   : > { %14607 = vmatpush1.bf16.msra.mxu0 %v17030_v47  ;;  %15263 = vmatpush1.bf16.msra.mxu1 %v17032_v38  ;;  %v1776_v47 = vld [vmem:[%s18438_s12 + $0x2cd0] sm:$0xff] }
 0x736   : > { %14608 = vmatprep.subr.bf16.mxu0 %v17039_v50  ;;  %15264 = vmatprep.subr.bf16.mxu1 %v17041_v53  ;;  %v1780_v38 = vld [vmem:[%s18438_s12 + $0x2cf0] sm:$0xff]  ;;  %v1777_v50 = vld [vmem:[%s18438_s12 + $0x2cd8] sm:$0xff] }
 0x737   : > { %v1781_v53 = vld [vmem:[%s18438_s12 + $0x2cf8] sm:$0xff]  ;;  %v17095_v54 = vcombine.high %v1776_v47, %v1780_v38  ;;  %v1828_v13 = vld [vmem:[%s18438_s12 + $0x2e70] sm:$0xff] }
 0x738   : > { %v17097_v57 = vcombine.high %v1777_v50, %v1781_v53 }
 0x739   : > { %14609 = vmatpush1.bf16.msra.mxu0 %v17038_v22  ;;  %15265 = vmatpush1.bf16.msra.mxu1 %v17040_v21  ;;  %v1788_v22 = vld [vmem:[%s18438_s12 + $0x2d30] sm:$0xff]  ;;  %v1785_v21 = vld [vmem:[%s18438_s12 + $0x2d18] sm:$0xff] }
 0x73a   : > { %14610 = vmatprep.subr.bf16.mxu0 %v17047_v63  ;;  %15266 = vmatprep.subr.bf16.mxu1 %v17049_v7  ;;  %v1789_v63 = vld [vmem:[%s18438_s12 + $0x2d38] sm:$0xff]  ;;  %v17094_v7 = vcombine.low %v1776_v47, %v1780_v38  ;;  %v17103_v0 = vcombine.high %v1784_v59, %v1788_v22  ;;  %v17143_v47 = vcombine.high %v1824_v36, %v1828_v13 }
 0x73b   : > { %v17105_v43 = vcombine.high %v1785_v21, %v1789_v63 }
 0x73d   : > { %14611 = vmatpush1.bf16.msra.mxu0 %v17046_v4  ;;  %15267 = vmatpush1.bf16.msra.mxu1 %v17048_v8  ;;  %v1793_v4 = vld [vmem:[%s18438_s12 + $0x2d58] sm:$0xff] }
 0x73e   : > { %14612 = vmatprep.subr.bf16.mxu0 %v17055_v9  ;;  %15268 = vmatprep.subr.bf16.mxu1 %v17057_v10  ;;  %v1797_v8 = vld [vmem:[%s18438_s12 + $0x2d78] sm:$0xff]  ;;  %v17102_v9 = vcombine.low %v1784_v59, %v1788_v22  ;;  %v17104_v10 = vcombine.low %v1785_v21, %v1789_v63  ;;  %v1840_v21 = vld [vmem:[%s18438_s12 + $0x2ed0] sm:$0xff] }
 0x73f   : > { %v17113_v17 = vcombine.high %v1793_v4, %v1797_v8  ;;  %v1844_v63 = vld [vmem:[%s18438_s12 + $0x2ef0] sm:$0xff] }
 0x741   : > { %14613 = vmatpush1.bf16.msra.mxu0 %v17054_v14  ;;  %15269 = vmatpush1.bf16.msra.mxu1 %v17056_v15  ;;  %v1801_v14 = vld [vmem:[%s18438_s12 + $0x2d98] sm:$0xff] }
 0x742   : > { %14614 = vmatprep.subr.bf16.mxu0 %v17063_v3  ;;  %15270 = vmatprep.subr.bf16.mxu1 %v17065_v52  ;;  %v1805_v15 = vld [vmem:[%s18438_s12 + $0x2db8] sm:$0xff]  ;;  %v17110_v3 = vcombine.low %v1792_v55, %v1796_v2  ;;  %v17112_v52 = vcombine.low %v1793_v4, %v1797_v8  ;;  %v17159_v55 = vcombine.high %v1840_v21, %v1844_v63  ;;  %v1848_v4 = vld [vmem:[%s18438_s12 + $0x2f10] sm:$0xff] }
 0x743   : > { %v17121_v23 = vcombine.high %v1801_v14, %v1805_v15  ;;  %v1852_v8 = vld [vmem:[%s18438_s12 + $0x2f30] sm:$0xff] }
 0x745   : > { %14615 = vmatpush1.bf16.msra.mxu0 %v17062_v35  ;;  %15271 = vmatpush1.bf16.msra.mxu1 %v17064_v29  ;;  %v1809_v35 = vld [vmem:[%s18438_s12 + $0x2dd8] sm:$0xff] }
 0x746   : > { %14625 = vmatprep.subr.bf16.mxu0 %v17071_v1  ;;  %15281 = vmatprep.subr.bf16.mxu1 %v17073_v40  ;;  %v1813_v29 = vld [vmem:[%s18438_s12 + $0x2df8] sm:$0xff]  ;;  %v17118_v1 = vcombine.low %v1800_v26, %v1804_v56  ;;  %v17120_v40 = vcombine.low %v1801_v14, %v1805_v15  ;;  %v17167_v26 = vcombine.high %v1848_v4, %v1852_v8  ;;  %v1856_v14 = vld [vmem:[%s18438_s12 + $0x2f50] sm:$0xff] }
 0x747   : > { %v17129_v30 = vcombine.high %v1809_v35, %v1813_v29  ;;  %v1860_v15 = vld [vmem:[%s18438_s12 + $0x2f70] sm:$0xff] }
 0x748   : > { %14617 = vmatmul.mubr.bf16.vlgmr.msra.gmra.mrb[4].mxu0 %v19334_v34  ;;  %15273 = vmatmul.mubr.bf16.vlgmr.msra.gmra.mrb[4].mxu1 %v19334_v34  ;;  %v17086_v34 = vcombine.low %v1768_v41, %v1772_v51  ;;  %v17135_v41 = vcombine.high %v1816_v20, %v1820_v42 }
 0x749   : > { %14626 = vmatpush1.bf16.msra.mxu0 %v17070_v60  ;;  %15282 = vmatpush1.bf16.msra.mxu1 %v17072_v48  ;;  %v1817_v60 = vld [vmem:[%s18438_s12 + $0x2e18] sm:$0xff] }
 0x74a   : > { %14627 = vmatprep.subr.bf16.mxu0 %v17079_v28  ;;  %15283 = vmatprep.subr.bf16.mxu1 %v17081_v31  ;;  %v1821_v48 = vld [vmem:[%s18438_s12 + $0x2e38] sm:$0xff]  ;;  %v17126_v28 = vcombine.low %v1808_v24, %v1812_v39  ;;  %v17128_v31 = vcombine.low %v1809_v35, %v1813_v29  ;;  %v17175_v24 = vcombine.high %v1856_v14, %v1860_v15  ;;  %v1864_v35 = vld [vmem:[%s18438_s12 + $0x2f90] sm:$0xff] }
 0x74b   : > { %14657 = vmatprep.mubr.bf16.mxu0 %v19342_v61  ;;  %15313 = vmatprep.mubr.bf16.mxu1 %v19342_v61  ;;  %v17096_v61 = vcombine.low %v1777_v50, %v1781_v53  ;;  %v17137_v51 = vcombine.high %v1817_v60, %v1821_v48  ;;  %v1832_v50 = vld [vmem:[%s18438_s12 + $0x2e90] sm:$0xff] }
 0x74c   : > { %v1836_v53 = vld [vmem:[%s18438_s12 + $0x2eb0] sm:$0xff] }
 0x74d   : > { %14628 = vmatpush1.bf16.msra.mxu0 %v17078_v37  ;;  %15284 = vmatpush1.bf16.msra.mxu1 %v17080_v46  ;;  %v1825_v37 = vld [vmem:[%s18438_s12 + $0x2e58] sm:$0xff]  ;;  %v17151_v59 = vcombine.high %v1832_v50, %v1836_v53  ;;  %v1868_v29 = vld [vmem:[%s18438_s12 + $0x2fb0] sm:$0xff] }
 0x74e   : > { %14629 = vmatprep.subr.bf16.mxu0 %v17087_v33  ;;  %15285 = vmatprep.subr.bf16.mxu1 %v17089_v6  ;;  %v1829_v46 = vld [vmem:[%s18438_s12 + $0x2e78] sm:$0xff]  ;;  %v17134_v33 = vcombine.low %v1816_v20, %v1820_v42  ;;  %v17136_v6 = vcombine.low %v1817_v60, %v1821_v48  ;;  %v17183_v20 = vcombine.high %v1864_v35, %v1868_v29  ;;  %v1872_v60 = vld [vmem:[%s18438_s12 + $0x2fd0] sm:$0xff] }
 0x74f   : > { %v17145_v38 = vcombine.high %v1825_v37, %v1829_v46  ;;  %v1876_v48 = vld [vmem:[%s18438_s12 + $0x2ff0] sm:$0xff] }
 0x751   : > { %14630 = vmatpush1.bf16.msra.mxu0 %v17086_v34  ;;  %15286 = vmatpush1.bf16.msra.mxu1 %v17088_v25  ;;  %v1833_v34 = vld [vmem:[%s18438_s12 + $0x2e98] sm:$0xff] }
 0x752   : > { %14631 = vmatprep.subr.bf16.mxu0 %v17095_v54  ;;  %15287 = vmatprep.subr.bf16.mxu1 %v17097_v57  ;;  %v1837_v25 = vld [vmem:[%s18438_s12 + $0x2eb8] sm:$0xff]  ;;  %v17142_v54 = vcombine.low %v1824_v36, %v1828_v13  ;;  %v17144_v57 = vcombine.low %v1825_v37, %v1829_v46  ;;  %v17191_v36 = vcombine.high %v1872_v60, %v1876_v48  ;;  %v1880_v37 = vld [vmem:[%s18438_s12 + $0x3010] sm:$0xff] }
 0x753   : > { %v17153_v22 = vcombine.high %v1833_v34, %v1837_v25  ;;  %v1884_v46 = vld [vmem:[%s18438_s12 + $0x3030] sm:$0xff] }
 0x755   : > { %14632 = vmatpush1.bf16.msra.mxu0 %v17094_v7  ;;  %15288 = vmatpush1.bf16.msra.mxu1 %v17096_v61  ;;  %v1841_v7 = vld [vmem:[%s18438_s12 + $0x2ed8] sm:$0xff] }
 0x756   : > { %14633 = vmatprep.subr.bf16.mxu0 %v17103_v0  ;;  %15289 = vmatprep.subr.bf16.mxu1 %v17105_v43  ;;  %v1845_v61 = vld [vmem:[%s18438_s12 + $0x2ef8] sm:$0xff]  ;;  %v17150_v0 = vcombine.low %v1832_v50, %v1836_v53  ;;  %v17152_v43 = vcombine.low %v1833_v34, %v1837_v25  ;;  %v17199_v50 = vcombine.high %v1880_v37, %v1884_v46  ;;  %v1888_v34 = vld [vmem:[%s18438_s12 + $0x3050] sm:$0xff] }
 0x757   : > { %v17161_v2 = vcombine.high %v1841_v7, %v1845_v61  ;;  %v1892_v25 = vld [vmem:[%s18438_s12 + $0x3070] sm:$0xff] }
 0x759   : > { %14634 = vmatpush1.bf16.msra.mxu0 %v17102_v9  ;;  %15290 = vmatpush1.bf16.msra.mxu1 %v17104_v10  ;;  %v1849_v9 = vld [vmem:[%s18438_s12 + $0x2f18] sm:$0xff] }
 0x75a   : > { %14635 = vmatprep.subr.bf16.mxu0 %v17111_v11  ;;  %15291 = vmatprep.subr.bf16.mxu1 %v17113_v17  ;;  %v1853_v10 = vld [vmem:[%s18438_s12 + $0x2f38] sm:$0xff]  ;;  %v17158_v11 = vcombine.low %v1840_v21, %v1844_v63  ;;  %v17160_v17 = vcombine.low %v1841_v7, %v1845_v61  ;;  %v17207_v21 = vcombine.high %v1888_v34, %v1892_v25  ;;  %v1896_v7 = vld [vmem:[%s18438_s12 + $0x3090] sm:$0xff] }
 0x75b   : > { %v17169_v56 = vcombine.high %v1849_v9, %v1853_v10  ;;  %v1900_v61 = vld [vmem:[%s18438_s12 + $0x30b0] sm:$0xff] }
 0x75d   : > { %14636 = vmatpush1.bf16.msra.mxu0 %v17110_v3  ;;  %15292 = vmatpush1.bf16.msra.mxu1 %v17112_v52  ;;  %v1857_v3 = vld [vmem:[%s18438_s12 + $0x2f58] sm:$0xff] }
 0x75e   : > { %14637 = vmatprep.subr.bf16.mxu0 %v17119_v45  ;;  %15293 = vmatprep.subr.bf16.mxu1 %v17121_v23  ;;  %v1861_v52 = vld [vmem:[%s18438_s12 + $0x2f78] sm:$0xff]  ;;  %v17166_v45 = vcombine.low %v1848_v4, %v1852_v8  ;;  %v17168_v23 = vcombine.low %v1849_v9, %v1853_v10  ;;  %v17215_v4 = vcombine.high %v1896_v7, %v1900_v61  ;;  %v1904_v9 = vld [vmem:[%s18438_s12 + $0x30d0] sm:$0xff] }
 0x75f   : > { %v17177_v39 = vcombine.high %v1857_v3, %v1861_v52  ;;  %v1908_v10 = vld [vmem:[%s18438_s12 + $0x30f0] sm:$0xff] }
 0x761   : > { %14638 = vmatpush1.bf16.msra.mxu0 %v17118_v1  ;;  %15294 = vmatpush1.bf16.msra.mxu1 %v17120_v40  ;;  %v1865_v1 = vld [vmem:[%s18438_s12 + $0x2f98] sm:$0xff] }
 0x762   : > { %14639 = vmatprep.subr.bf16.mxu0 %v17127_v27  ;;  %15295 = vmatprep.subr.bf16.mxu1 %v17129_v30  ;;  %v1869_v40 = vld [vmem:[%s18438_s12 + $0x2fb8] sm:$0xff]  ;;  %v17174_v27 = vcombine.low %v1856_v14, %v1860_v15  ;;  %v17176_v30 = vcombine.low %v1857_v3, %v1861_v52  ;;  %v1912_v15 = vld [vmem:[%s18438_s12 + $0x3110] sm:$0xff] }
 0x763   : > { %v17185_v42 = vcombine.high %v1865_v1, %v1869_v40  ;;  %v1916_v3 = vld [vmem:[%s18438_s12 + $0x3130] sm:$0xff]  ;;  %v1913_v52 = vld [vmem:[%s18438_s12 + $0x3118] sm:$0xff] }
 0x765   : > { %14640 = vmatpush1.bf16.msra.mxu0 %v17126_v28  ;;  %15296 = vmatpush1.bf16.msra.mxu1 %v17128_v31  ;;  %v1873_v28 = vld [vmem:[%s18438_s12 + $0x2fd8] sm:$0xff] }
 0x766   : > { %14641 = vmatprep.subr.bf16.mxu0 %v17135_v41  ;;  %15297 = vmatprep.subr.bf16.mxu1 %v17137_v51  ;;  %v1877_v31 = vld [vmem:[%s18438_s12 + $0x2ff8] sm:$0xff]  ;;  %v17182_v41 = vcombine.low %v1864_v35, %v1868_v29  ;;  %v17184_v51 = vcombine.low %v1865_v1, %v1869_v40  ;;  %v1920_v35 = vld [vmem:[%s18438_s12 + $0x3150] sm:$0xff] }
 0x767   : > { %v17193_v13 = vcombine.high %v1873_v28, %v1877_v31  ;;  %v1924_v29 = vld [vmem:[%s18438_s12 + $0x3170] sm:$0xff]  ;;  %v1921_v1 = vld [vmem:[%s18438_s12 + $0x3158] sm:$0xff] }
 0x768   : > { %v1925_v40 = vld [vmem:[%s18438_s12 + $0x3178] sm:$0xff] }
 0x769   : > { %14642 = vmatpush1.bf16.msra.mxu0 %v17134_v33  ;;  %15298 = vmatpush1.bf16.msra.mxu1 %v17136_v6  ;;  %v1881_v33 = vld [vmem:[%s18438_s12 + $0x3018] sm:$0xff] }
 0x76a   : > { %14643 = vmatprep.subr.bf16.mxu0 %v17143_v47  ;;  %15299 = vmatprep.subr.bf16.mxu1 %v17145_v38  ;;  %v1885_v6 = vld [vmem:[%s18438_s12 + $0x3038] sm:$0xff]  ;;  %v17190_v47 = vcombine.low %v1872_v60, %v1876_v48  ;;  %v17192_v38 = vcombine.low %v1873_v28, %v1877_v31  ;;  %v1928_v60 = vld [vmem:[%s18438_s12 + $0x3190] sm:$0xff] }
 0x76b   : > { %v17201_v53 = vcombine.high %v1881_v33, %v1885_v6  ;;  %v1932_v48 = vld [vmem:[%s18438_s12 + $0x31b0] sm:$0xff]  ;;  %v1929_v28 = vld [vmem:[%s18438_s12 + $0x3198] sm:$0xff] }
 0x76c   : > { %v1933_v31 = vld [vmem:[%s18438_s12 + $0x31b8] sm:$0xff] }
 0x76d   : > { %14644 = vmatpush1.bf16.msra.mxu0 %v17142_v54  ;;  %15300 = vmatpush1.bf16.msra.mxu1 %v17144_v57  ;;  %v1889_v54 = vld [vmem:[%s18438_s12 + $0x3058] sm:$0xff] }
 0x76e   : > { %14645 = vmatprep.subr.bf16.mxu0 %v17151_v59  ;;  %15301 = vmatprep.subr.bf16.mxu1 %v17153_v22  ;;  %v1893_v57 = vld [vmem:[%s18438_s12 + $0x3078] sm:$0xff]  ;;  %v17198_v59 = vcombine.low %v1880_v37, %v1884_v46  ;;  %v17200_v22 = vcombine.low %v1881_v33, %v1885_v6  ;;  %v1936_v37 = vld [vmem:[%s18438_s12 + $0x31d0] sm:$0xff] }
 0x76f   : > { %v17209_v63 = vcombine.high %v1889_v54, %v1893_v57  ;;  %v1940_v46 = vld [vmem:[%s18438_s12 + $0x31f0] sm:$0xff]  ;;  %v1937_v33 = vld [vmem:[%s18438_s12 + $0x31d8] sm:$0xff] }
 0x770   : > { %v1941_v6 = vld [vmem:[%s18438_s12 + $0x31f8] sm:$0xff] }
 0x771   : > { %14646 = vmatpush1.bf16.msra.mxu0 %v17150_v0  ;;  %15302 = vmatpush1.bf16.msra.mxu1 %v17152_v43  ;;  %v1897_v0 = vld [vmem:[%s18438_s12 + $0x3098] sm:$0xff] }
 0x772   : > { %14647 = vmatprep.subr.bf16.mxu0 %v17159_v55  ;;  %15303 = vmatprep.subr.bf16.mxu1 %v17161_v2  ;;  %v1901_v43 = vld [vmem:[%s18438_s12 + $0x30b8] sm:$0xff]  ;;  %v17206_v55 = vcombine.low %v1888_v34, %v1892_v25  ;;  %v17208_v2 = vcombine.low %v1889_v54, %v1893_v57  ;;  %v1944_v34 = vld [vmem:[%s18438_s12 + $0x3210] sm:$0xff] }
 0x773   : > { %v17217_v8 = vcombine.high %v1897_v0, %v1901_v43  ;;  %v1948_v25 = vld [vmem:[%s18438_s12 + $0x3230] sm:$0xff]  ;;  %v1945_v54 = vld [vmem:[%s18438_s12 + $0x3218] sm:$0xff] }
 0x774   : > { %v1949_v57 = vld [vmem:[%s18438_s12 + $0x3238] sm:$0xff] }
 0x775   : > { %14648 = vmatpush1.bf16.msra.mxu0 %v17158_v11  ;;  %15304 = vmatpush1.bf16.msra.mxu1 %v17160_v17  ;;  %v1905_v11 = vld [vmem:[%s18438_s12 + $0x30d8] sm:$0xff] }
 0x776   : > { %14649 = vmatprep.subr.bf16.mxu0 %v17167_v26  ;;  %15305 = vmatprep.subr.bf16.mxu1 %v17169_v56  ;;  %v1909_v17 = vld [vmem:[%s18438_s12 + $0x30f8] sm:$0xff]  ;;  %v17216_v26 = vcombine.low %v1897_v0, %v1901_v43  ;;  %v17223_v56 = vcombine.high %v1904_v9, %v1908_v10 }
 0x777   : > { %v17225_v14 = vcombine.high %v1905_v11, %v1909_v17  ;;  %v1953_v0 = vld [vmem:[%s18438_s12 + $0x3258] sm:$0xff] }
 0x778   : > { %v1957_v43 = vld [vmem:[%s18438_s12 + $0x3278] sm:$0xff] }
 0x779   : > { %14650 = vmatpush1.bf16.msra.mxu0 %v17166_v45  ;;  %15306 = vmatpush1.bf16.msra.mxu1 %v17168_v23  ;;  %v1917_v45 = vld [vmem:[%s18438_s12 + $0x3138] sm:$0xff]  ;;  %v17222_v23 = vcombine.low %v1904_v9, %v1908_v10  ;;  %v1960_v9 = vld [vmem:[%s18438_s12 + $0x3290] sm:$0xff] }
 0x77a   : > { %14651 = vmatprep.subr.bf16.mxu0 %v17175_v24  ;;  %15307 = vmatprep.subr.bf16.mxu1 %v17177_v39  ;;  %v17231_v24 = vcombine.high %v1912_v15, %v1916_v3  ;;  %v17233_v39 = vcombine.high %v1913_v52, %v1917_v45  ;;  %v1964_v10 = vld [vmem:[%s18438_s12 + $0x32b0] sm:$0xff] }
 0x77d   : > { %14652 = vmatpush1.bf16.msra.mxu0 %v17174_v27  ;;  %15308 = vmatpush1.bf16.msra.mxu1 %v17176_v30  ;;  %v17230_v27 = vcombine.low %v1912_v15, %v1916_v3  ;;  %v17232_v30 = vcombine.low %v1913_v52, %v1917_v45  ;;  %v1968_v15 = vld [vmem:[%s18438_s12 + $0x32d0] sm:$0xff]  ;;  %v1969_v52 = vld [vmem:[%s18438_s12 + $0x32d8] sm:$0xff] }
 0x77e   : > { %14653 = vmatprep.subr.bf16.mxu0 %v17183_v20  ;;  %15309 = vmatprep.subr.bf16.mxu1 %v17185_v42  ;;  %v17239_v20 = vcombine.high %v1920_v35, %v1924_v29  ;;  %v17241_v42 = vcombine.high %v1921_v1, %v1925_v40  ;;  %v1972_v3 = vld [vmem:[%s18438_s12 + $0x32f0] sm:$0xff]  ;;  %v1973_v45 = vld [vmem:[%s18438_s12 + $0x32f8] sm:$0xff] }
 0x781   : > { %14654 = vmatpush1.bf16.msra.mxu0 %v17182_v41  ;;  %15310 = vmatpush1.bf16.msra.mxu1 %v17184_v51  ;;  %v17238_v41 = vcombine.low %v1920_v35, %v1924_v29  ;;  %v17240_v51 = vcombine.low %v1921_v1, %v1925_v40  ;;  %v1976_v35 = vld [vmem:[%s18438_s12 + $0x3310] sm:$0xff]  ;;  %v1977_v1 = vld [vmem:[%s18438_s12 + $0x3318] sm:$0xff] }
 0x782   : > { %14655 = vmatprep.subr.bf16.mxu0 %v17191_v36  ;;  %15311 = vmatprep.subr.bf16.mxu1 %v17193_v13  ;;  %v17247_v36 = vcombine.high %v1928_v60, %v1932_v48  ;;  %v17249_v13 = vcombine.high %v1929_v28, %v1933_v31  ;;  %v1980_v29 = vld [vmem:[%s18438_s12 + $0x3330] sm:$0xff]  ;;  %v1981_v40 = vld [vmem:[%s18438_s12 + $0x3338] sm:$0xff] }
 0x785   : > { %14656 = vmatpush1.bf16.msra.mxu0 %v17190_v47  ;;  %15312 = vmatpush1.bf16.msra.mxu1 %v17192_v38  ;;  %v17246_v47 = vcombine.low %v1928_v60, %v1932_v48  ;;  %v17248_v38 = vcombine.low %v1929_v28, %v1933_v31  ;;  %v1984_v60 = vld [vmem:[%s18438_s12 + $0x3350] sm:$0xff]  ;;  %v1985_v28 = vld [vmem:[%s18438_s12 + $0x3358] sm:$0xff] }
 0x786   : > { %14666 = vmatprep.subr.bf16.mxu0 %v17199_v50  ;;  %15322 = vmatprep.subr.bf16.mxu1 %v17201_v53  ;;  %v17255_v50 = vcombine.high %v1936_v37, %v1940_v46  ;;  %v17257_v53 = vcombine.high %v1937_v33, %v1941_v6  ;;  %v1988_v48 = vld [vmem:[%s18438_s12 + $0x3370] sm:$0xff]  ;;  %v1989_v31 = vld [vmem:[%s18438_s12 + $0x3378] sm:$0xff] }
 0x788   : > { %14658 = vmatmul.mubr.bf16.vlgmr.msra.gmra.mrb[4].mxu0 %v19419_v5  ;;  %15314 = vmatmul.mubr.bf16.vlgmr.msra.gmra.mrb[4].mxu1 %v19419_v5  ;;  %v17214_v5 = vcombine.low %v1896_v7, %v1900_v61  ;;  %v1952_v7 = vld [vmem:[%s18438_s12 + $0x3250] sm:$0xff] }
 0x789   : > { %14667 = vmatpush1.bf16.msra.mxu0 %v17198_v59  ;;  %15323 = vmatpush1.bf16.msra.mxu1 %v17200_v22  ;;  %v17254_v59 = vcombine.low %v1936_v37, %v1940_v46  ;;  %v17256_v22 = vcombine.low %v1937_v33, %v1941_v6  ;;  %v1956_v61 = vld [vmem:[%s18438_s12 + $0x3270] sm:$0xff]  ;;  %v1993_v33 = vld [vmem:[%s18438_s12 + $0x3398] sm:$0xff] }
 0x78a   : > { %14668 = vmatprep.subr.bf16.mxu0 %v17207_v21  ;;  %15324 = vmatprep.subr.bf16.mxu1 %v17209_v63  ;;  %v17263_v21 = vcombine.high %v1944_v34, %v1948_v25  ;;  %v17265_v63 = vcombine.high %v1945_v54, %v1949_v57  ;;  %v1992_v37 = vld [vmem:[%s18438_s12 + $0x3390] sm:$0xff]  ;;  %v1997_v6 = vld [vmem:[%s18438_s12 + $0x33b8] sm:$0xff] }
 0x78b   : > { %14698 = vmatprep.mubr.bf16.mxu0 %v19426_v19  ;;  %15354 = vmatprep.mubr.bf16.mxu1 %v19426_v19  ;;  %v17224_v19 = vcombine.low %v1905_v11, %v1909_v17  ;;  %v1961_v11 = vld [vmem:[%s18438_s12 + $0x3298] sm:$0xff]  ;;  %v1996_v46 = vld [vmem:[%s18438_s12 + $0x33b0] sm:$0xff] }
 0x78c   : > { %v1965_v17 = vld [vmem:[%s18438_s12 + $0x32b8] sm:$0xff] }
 0x78d   : > { %14669 = vmatpush1.bf16.msra.mxu0 %v17206_v55  ;;  %15325 = vmatpush1.bf16.msra.mxu1 %v17208_v2  ;;  %v17262_v55 = vcombine.low %v1944_v34, %v1948_v25  ;;  %v17264_v2 = vcombine.low %v1945_v54, %v1949_v57  ;;  %v2000_v34 = vld [vmem:[%s18438_s12 + $0x33d0] sm:$0xff]  ;;  %v2001_v54 = vld [vmem:[%s18438_s12 + $0x33d8] sm:$0xff] }
 0x78e   : > { %14670 = vmatprep.subr.bf16.mxu0 %v17215_v4  ;;  %15326 = vmatprep.subr.bf16.mxu1 %v17217_v8  ;;  %v17271_v4 = vcombine.high %v1952_v7, %v1956_v61  ;;  %v17273_v8 = vcombine.high %v1953_v0, %v1957_v43  ;;  %v2004_v25 = vld [vmem:[%s18438_s12 + $0x33f0] sm:$0xff]  ;;  %v2005_v57 = vld [vmem:[%s18438_s12 + $0x33f8] sm:$0xff] }
 0x791   : > { %14671 = vmatpush1.bf16.msra.mxu0 %v17214_v5  ;;  %15327 = vmatpush1.bf16.msra.mxu1 %v17216_v26  ;;  %v17270_v5 = vcombine.low %v1952_v7, %v1956_v61  ;;  %v17272_v26 = vcombine.low %v1953_v0, %v1957_v43  ;;  %v2008_v7 = vld [vmem:[%s18438_s12 + $0x3410] sm:$0xff]  ;;  %v2009_v0 = vld [vmem:[%s18438_s12 + $0x3418] sm:$0xff] }
 0x792   : > { %14672 = vmatprep.subr.bf16.mxu0 %v17223_v56  ;;  %15328 = vmatprep.subr.bf16.mxu1 %v17225_v14  ;;  %v17279_v56 = vcombine.high %v1960_v9, %v1964_v10  ;;  %v17281_v14 = vcombine.high %v1961_v11, %v1965_v17  ;;  %v2012_v61 = vld [vmem:[%s18438_s12 + $0x3430] sm:$0xff]  ;;  %v2013_v43 = vld [vmem:[%s18438_s12 + $0x3438] sm:$0xff] }
 0x795   : > { %14673 = vmatpush1.bf16.msra.mxu0 %v17222_v23  ;;  %15329 = vmatpush1.bf16.msra.mxu1 %v17224_v19  ;;  %v17278_v23 = vcombine.low %v1960_v9, %v1964_v10  ;;  %v17280_v19 = vcombine.low %v1961_v11, %v1965_v17  ;;  %v2016_v9 = vld [vmem:[%s18438_s12 + $0x3450] sm:$0xff]  ;;  %v2017_v11 = vld [vmem:[%s18438_s12 + $0x3458] sm:$0xff] }
 0x796   : > { %14674 = vmatprep.subr.bf16.mxu0 %v17231_v24  ;;  %15330 = vmatprep.subr.bf16.mxu1 %v17233_v39  ;;  %v17287_v24 = vcombine.high %v1968_v15, %v1972_v3  ;;  %v17289_v39 = vcombine.high %v1969_v52, %v1973_v45  ;;  %v2020_v10 = vld [vmem:[%s18438_s12 + $0x3470] sm:$0xff]  ;;  %v2021_v17 = vld [vmem:[%s18438_s12 + $0x3478] sm:$0xff] }
 0x799   : > { %14675 = vmatpush1.bf16.msra.mxu0 %v17230_v27  ;;  %15331 = vmatpush1.bf16.msra.mxu1 %v17232_v30  ;;  %v17286_v27 = vcombine.low %v1968_v15, %v1972_v3  ;;  %v17288_v30 = vcombine.low %v1969_v52, %v1973_v45  ;;  %v2024_v15 = vld [vmem:[%s18438_s12 + $0x3490] sm:$0xff]  ;;  %v2025_v52 = vld [vmem:[%s18438_s12 + $0x3498] sm:$0xff] }
 0x79a   : > { %14676 = vmatprep.subr.bf16.mxu0 %v17239_v20  ;;  %15332 = vmatprep.subr.bf16.mxu1 %v17241_v42  ;;  %v17295_v20 = vcombine.high %v1976_v35, %v1980_v29  ;;  %v17297_v42 = vcombine.high %v1977_v1, %v1981_v40  ;;  %v2028_v3 = vld [vmem:[%s18438_s12 + $0x34b0] sm:$0xff]  ;;  %v2029_v45 = vld [vmem:[%s18438_s12 + $0x34b8] sm:$0xff] }
 0x79d   : > { %14677 = vmatpush1.bf16.msra.mxu0 %v17238_v41  ;;  %15333 = vmatpush1.bf16.msra.mxu1 %v17240_v51  ;;  %v17294_v41 = vcombine.low %v1976_v35, %v1980_v29  ;;  %v17296_v51 = vcombine.low %v1977_v1, %v1981_v40  ;;  %v2032_v35 = vld [vmem:[%s18438_s12 + $0x34d0] sm:$0xff]  ;;  %v2033_v1 = vld [vmem:[%s18438_s12 + $0x34d8] sm:$0xff] }
 0x79e   : > { %14678 = vmatprep.subr.bf16.mxu0 %v17247_v36  ;;  %15334 = vmatprep.subr.bf16.mxu1 %v17249_v13  ;;  %v17303_v36 = vcombine.high %v1984_v60, %v1988_v48  ;;  %v17305_v13 = vcombine.high %v1985_v28, %v1989_v31  ;;  %v2036_v29 = vld [vmem:[%s18438_s12 + $0x34f0] sm:$0xff]  ;;  %v2037_v40 = vld [vmem:[%s18438_s12 + $0x34f8] sm:$0xff] }
 0x7a1   : > { %14679 = vmatpush1.bf16.msra.mxu0 %v17246_v47  ;;  %15335 = vmatpush1.bf16.msra.mxu1 %v17248_v38  ;;  %v17302_v47 = vcombine.low %v1984_v60, %v1988_v48  ;;  %v17304_v38 = vcombine.low %v1985_v28, %v1989_v31  ;;  %v2044_v60 = vld [vmem:[%s18438_s12 + $0x3530] sm:$0xff]  ;;  %v2041_v48 = vld [vmem:[%s18438_s12 + $0x3518] sm:$0xff]  ;;  %v17350_v31 = vcombine.low %v2032_v35, %v2036_v29 }
 0x7a2   : > { %14680 = vmatprep.subr.bf16.mxu0 %v17255_v50  ;;  %15336 = vmatprep.subr.bf16.mxu1 %v17257_v53  ;;  %v17311_v50 = vcombine.high %v1992_v37, %v1996_v46  ;;  %v17313_v53 = vcombine.high %v1993_v33, %v1997_v6  ;;  %v2045_v28 = vld [vmem:[%s18438_s12 + $0x3538] sm:$0xff] }
 0x7a5   : > { %14681 = vmatpush1.bf16.msra.mxu0 %v17254_v59  ;;  %15337 = vmatpush1.bf16.msra.mxu1 %v17256_v22  ;;  %v17310_v59 = vcombine.low %v1992_v37, %v1996_v46  ;;  %v17312_v22 = vcombine.low %v1993_v33, %v1997_v6  ;;  %v2049_v37 = vld [vmem:[%s18438_s12 + $0x3558] sm:$0xff]  ;;  %v17360_v6 = vcombine.low %v2041_v48, %v2045_v28 }
 0x7a6   : > { %14682 = vmatprep.subr.bf16.mxu0 %v17263_v21  ;;  %15338 = vmatprep.subr.bf16.mxu1 %v17265_v63  ;;  %v17319_v21 = vcombine.high %v2000_v34, %v2004_v25  ;;  %v17321_v63 = vcombine.high %v2001_v54, %v2005_v57  ;;  %v2053_v46 = vld [vmem:[%s18438_s12 + $0x3578] sm:$0xff] }
 0x7a9   : > { %14683 = vmatpush1.bf16.msra.mxu0 %v17262_v55  ;;  %15339 = vmatpush1.bf16.msra.mxu1 %v17264_v2  ;;  %v17318_v55 = vcombine.low %v2000_v34, %v2004_v25  ;;  %v17320_v2 = vcombine.low %v2001_v54, %v2005_v57  ;;  %v2057_v34 = vld [vmem:[%s18438_s12 + $0x3598] sm:$0xff]  ;;  %v17368_v57 = vcombine.low %v2049_v37, %v2053_v46 }
 0x7aa   : > { %14684 = vmatprep.subr.bf16.mxu0 %v17271_v4  ;;  %15340 = vmatprep.subr.bf16.mxu1 %v17273_v8  ;;  %v17327_v4 = vcombine.high %v2008_v7, %v2012_v61  ;;  %v17329_v8 = vcombine.high %v2009_v0, %v2013_v43  ;;  %v2061_v25 = vld [vmem:[%s18438_s12 + $0x35b8] sm:$0xff] }
 0x7ad   : > { %14685 = vmatpush1.bf16.msra.mxu0 %v17270_v5  ;;  %15341 = vmatpush1.bf16.msra.mxu1 %v17272_v26  ;;  %v17326_v5 = vcombine.low %v2008_v7, %v2012_v61  ;;  %v17328_v26 = vcombine.low %v2009_v0, %v2013_v43  ;;  %v2065_v7 = vld [vmem:[%s18438_s12 + $0x35d8] sm:$0xff]  ;;  %v17376_v43 = vcombine.low %v2057_v34, %v2061_v25 }
 0x7ae   : > { %14686 = vmatprep.subr.bf16.mxu0 %v17279_v56  ;;  %15342 = vmatprep.subr.bf16.mxu1 %v17281_v14  ;;  %v17335_v56 = vcombine.high %v2016_v9, %v2020_v10  ;;  %v17337_v14 = vcombine.high %v2017_v11, %v2021_v17  ;;  %v2069_v61 = vld [vmem:[%s18438_s12 + $0x35f8] sm:$0xff] }
 0x7b1   : > { %14687 = vmatpush1.bf16.msra.mxu0 %v17278_v23  ;;  %15343 = vmatpush1.bf16.msra.mxu1 %v17280_v19  ;;  %v17334_v23 = vcombine.low %v2016_v9, %v2020_v10  ;;  %v17336_v19 = vcombine.low %v2017_v11, %v2021_v17  ;;  %v2073_v9 = vld [vmem:[%s18438_s12 + $0x3618] sm:$0xff]  ;;  %v17384_v17 = vcombine.low %v2065_v7, %v2069_v61 }
 0x7b2   : > { %14688 = vmatprep.subr.bf16.mxu0 %v17287_v24  ;;  %15344 = vmatprep.subr.bf16.mxu1 %v17289_v39  ;;  %v17343_v24 = vcombine.high %v2024_v15, %v2028_v3  ;;  %v17345_v39 = vcombine.high %v2025_v52, %v2029_v45  ;;  %v2077_v10 = vld [vmem:[%s18438_s12 + $0x3638] sm:$0xff] }
 0x7b5   : > { %14689 = vmatpush1.bf16.msra.mxu0 %v17286_v27  ;;  %15345 = vmatpush1.bf16.msra.mxu1 %v17288_v30  ;;  %v17344_v27 = vcombine.low %v2025_v52, %v2029_v45  ;;  %v17351_v30 = vcombine.high %v2032_v35, %v2036_v29  ;;  %v17392_v45 = vcombine.low %v2073_v9, %v2077_v10  ;;  %v2089_v35 = vld [vmem:[%s18438_s12 + $0x3698] sm:$0xff] }
 0x7b6   : > { %14690 = vmatprep.subr.bf16.mxu0 %v17295_v20  ;;  %15346 = vmatprep.subr.bf16.mxu1 %v17297_v42  ;;  %v17353_v20 = vcombine.high %v2033_v1, %v2037_v40  ;;  %v2040_v42 = vld [vmem:[%s18438_s12 + $0x3510] sm:$0xff]  ;;  %v2093_v29 = vld [vmem:[%s18438_s12 + $0x36b8] sm:$0xff] }
 0x7b7   : > { %v17358_v33 = vcombine.low %v2040_v42, %v2044_v60 }
 0x7b9   : > { %14691 = vmatpush1.bf16.msra.mxu0 %v17294_v41  ;;  %15347 = vmatpush1.bf16.msra.mxu1 %v17296_v51  ;;  %v17359_v41 = vcombine.high %v2040_v42, %v2044_v60  ;;  %v17361_v51 = vcombine.high %v2041_v48, %v2045_v28  ;;  %v2097_v42 = vld [vmem:[%s18438_s12 + $0x36d8] sm:$0xff]  ;;  %v17408_v28 = vcombine.low %v2089_v35, %v2093_v29 }
 0x7ba   : > { %14692 = vmatprep.subr.bf16.mxu0 %v17303_v36  ;;  %15348 = vmatprep.subr.bf16.mxu1 %v17305_v13  ;;  %v2048_v36 = vld [vmem:[%s18438_s12 + $0x3550] sm:$0xff]  ;;  %v2101_v60 = vld [vmem:[%s18438_s12 + $0x36f8] sm:$0xff] }
 0x7bb   : > { %v2052_v13 = vld [vmem:[%s18438_s12 + $0x3570] sm:$0xff] }
 0x7bc   : > { %v17366_v54 = vcombine.low %v2048_v36, %v2052_v13 }
 0x7bd   : > { %14693 = vmatpush1.bf16.msra.mxu0 %v17302_v47  ;;  %15349 = vmatpush1.bf16.msra.mxu1 %v17304_v38  ;;  %v17367_v47 = vcombine.high %v2048_v36, %v2052_v13  ;;  %v17369_v38 = vcombine.high %v2049_v37, %v2053_v46  ;;  %v2105_v36 = vld [vmem:[%s18438_s12 + $0x3718] sm:$0xff]  ;;  %v17416_v46 = vcombine.low %v2097_v42, %v2101_v60 }
 0x7be   : > { %14694 = vmatprep.subr.bf16.mxu0 %v17311_v50  ;;  %15350 = vmatprep.subr.bf16.mxu1 %v17313_v53  ;;  %v2056_v50 = vld [vmem:[%s18438_s12 + $0x3590] sm:$0xff]  ;;  %v2109_v13 = vld [vmem:[%s18438_s12 + $0x3738] sm:$0xff] }
 0x7bf   : > { %v2060_v53 = vld [vmem:[%s18438_s12 + $0x35b0] sm:$0xff] }
 0x7c0   : > { %v17374_v0 = vcombine.low %v2056_v50, %v2060_v53 }
 0x7c1   : > { %14695 = vmatpush1.bf16.msra.mxu0 %v17310_v59  ;;  %15351 = vmatpush1.bf16.msra.mxu1 %v17312_v22  ;;  %v17375_v59 = vcombine.high %v2056_v50, %v2060_v53  ;;  %v17377_v22 = vcombine.high %v2057_v34, %v2061_v25  ;;  %v2113_v50 = vld [vmem:[%s18438_s12 + $0x3758] sm:$0xff]  ;;  %v17424_v25 = vcombine.low %v2105_v36, %v2109_v13 }
 0x7c2   : > { %14696 = vmatprep.subr.bf16.mxu0 %v17319_v21  ;;  %15352 = vmatprep.subr.bf16.mxu1 %v17321_v63  ;;  %v2064_v21 = vld [vmem:[%s18438_s12 + $0x35d0] sm:$0xff]  ;;  %v2117_v53 = vld [vmem:[%s18438_s12 + $0x3778] sm:$0xff] }
 0x7c3   : > { %v2068_v63 = vld [vmem:[%s18438_s12 + $0x35f0] sm:$0xff] }
 0x7c4   : > { %v17382_v11 = vcombine.low %v2064_v21, %v2068_v63 }
 0x7c5   : > { %14697 = vmatpush1.bf16.msra.mxu0 %v17318_v55  ;;  %15353 = vmatpush1.bf16.msra.mxu1 %v17320_v2  ;;  %v17383_v55 = vcombine.high %v2064_v21, %v2068_v63  ;;  %v17385_v2 = vcombine.high %v2065_v7, %v2069_v61  ;;  %v2121_v21 = vld [vmem:[%s18438_s12 + $0x3798] sm:$0xff]  ;;  %v17432_v61 = vcombine.low %v2113_v50, %v2117_v53 }
 0x7c6   : > { %14707 = vmatprep.subr.bf16.mxu0 %v17327_v4  ;;  %15363 = vmatprep.subr.bf16.mxu1 %v17329_v8  ;;  %v2072_v4 = vld [vmem:[%s18438_s12 + $0x3610] sm:$0xff]  ;;  %v2125_v63 = vld [vmem:[%s18438_s12 + $0x37b8] sm:$0xff] }
 0x7c7   : > { %v2076_v8 = vld [vmem:[%s18438_s12 + $0x3630] sm:$0xff] }
 0x7c8   : > { %14699 = vmatmul.mubr.bf16.vlgmr.msra.gmra.mrb[4].mxu0 %v19494_v49  ;;  %15355 = vmatmul.mubr.bf16.vlgmr.msra.gmra.mrb[4].mxu1 %v19494_v49  ;;  %v17342_v49 = vcombine.low %v2024_v15, %v2028_v3  ;;  %v2081_v15 = vld [vmem:[%s18438_s12 + $0x3658] sm:$0xff]  ;;  %v17390_v52 = vcombine.low %v2072_v4, %v2076_v8 }
 0x7c9   : > { %14708 = vmatpush1.bf16.msra.mxu0 %v17326_v5  ;;  %15364 = vmatpush1.bf16.msra.mxu1 %v17328_v26  ;;  %v17391_v5 = vcombine.high %v2072_v4, %v2076_v8  ;;  %v17393_v26 = vcombine.high %v2073_v9, %v2077_v10  ;;  %v2085_v3 = vld [vmem:[%s18438_s12 + $0x3678] sm:$0xff]  ;;  %v17440_v10 = vcombine.low %v2121_v21, %v2125_v63 }
 0x7ca   : > { %14709 = vmatprep.subr.bf16.mxu0 %v17335_v56  ;;  %15365 = vmatprep.subr.bf16.mxu1 %v17337_v14  ;;  %v2080_v56 = vld [vmem:[%s18438_s12 + $0x3650] sm:$0xff]  ;;  %v2129_v4 = vld [vmem:[%s18438_s12 + $0x37d8] sm:$0xff] }
 0x7cb   : > { %14739 = vmatprep.mubr.bf16.mxu0 %v19502_v32  ;;  %15395 = vmatprep.mubr.bf16.mxu1 %v19502_v32  ;;  %v17352_v32 = vcombine.low %v2033_v1, %v2037_v40  ;;  %v2084_v14 = vld [vmem:[%s18438_s12 + $0x3670] sm:$0xff]  ;;  %v17400_v40 = vcombine.low %v2081_v15, %v2085_v3  ;;  %v2133_v8 = vld [vmem:[%s18438_s12 + $0x37f8] sm:$0xff] }
 0x7cc   : > { %v17398_v1 = vcombine.low %v2080_v56, %v2084_v14 }
 0x7cd   : > { %14710 = vmatpush1.bf16.msra.mxu0 %v17334_v23  ;;  %15366 = vmatpush1.bf16.msra.mxu1 %v17336_v19  ;;  %v17399_v23 = vcombine.high %v2080_v56, %v2084_v14  ;;  %v17401_v19 = vcombine.high %v2081_v15, %v2085_v3  ;;  %v2137_v56 = vld [vmem:[%s18438_s12 + $0x3818] sm:$0xff]  ;;  %v17448_v3 = vcombine.low %v2129_v4, %v2133_v8 }
 0x7ce   : > { %14711 = vmatprep.subr.bf16.mxu0 %v17343_v24  ;;  %15367 = vmatprep.subr.bf16.mxu1 %v17345_v39  ;;  %v2088_v24 = vld [vmem:[%s18438_s12 + $0x3690] sm:$0xff]  ;;  %v2141_v14 = vld [vmem:[%s18438_s12 + $0x3838] sm:$0xff] }
 0x7cf   : > { %v2092_v39 = vld [vmem:[%s18438_s12 + $0x36b0] sm:$0xff] }
 0x7d0   : > { %v17406_v48 = vcombine.low %v2088_v24, %v2092_v39 }
 0x7d1   : > { %14712 = vmatpush1.bf16.msra.mxu0 %v17342_v49  ;;  %15368 = vmatpush1.bf16.msra.mxu1 %v17344_v27  ;;  %v17407_v49 = vcombine.high %v2088_v24, %v2092_v39  ;;  %v17409_v27 = vcombine.high %v2089_v35, %v2093_v29  ;;  %v2145_v24 = vld [vmem:[%s18438_s12 + $0x3858] sm:$0xff]  ;;  %v17456_v29 = vcombine.low %v2137_v56, %v2141_v14 }
 0x7d2   : > { %14713 = vmatprep.subr.bf16.mxu0 %v17351_v30  ;;  %15369 = vmatprep.subr.bf16.mxu1 %v17353_v20  ;;  %v2096_v30 = vld [vmem:[%s18438_s12 + $0x36d0] sm:$0xff]  ;;  %v2149_v39 = vld [vmem:[%s18438_s12 + $0x3878] sm:$0xff] }
 0x7d3   : > { %v2100_v20 = vld [vmem:[%s18438_s12 + $0x36f0] sm:$0xff] }
 0x7d4   : > { %v17414_v37 = vcombine.low %v2096_v30, %v2100_v20 }
 0x7d5   : > { %14714 = vmatpush1.bf16.msra.mxu0 %v17350_v31  ;;  %15370 = vmatpush1.bf16.msra.mxu1 %v17352_v32  ;;  %v17415_v31 = vcombine.high %v2096_v30, %v2100_v20  ;;  %v17417_v32 = vcombine.high %v2097_v42, %v2101_v60  ;;  %v2153_v30 = vld [vmem:[%s18438_s12 + $0x3898] sm:$0xff]  ;;  %v17464_v60 = vcombine.low %v2145_v24, %v2149_v39 }
 0x7d6   : > { %14715 = vmatprep.subr.bf16.mxu0 %v17359_v41  ;;  %15371 = vmatprep.subr.bf16.mxu1 %v17361_v51  ;;  %v2104_v41 = vld [vmem:[%s18438_s12 + $0x3710] sm:$0xff]  ;;  %v2157_v20 = vld [vmem:[%s18438_s12 + $0x38b8] sm:$0xff] }
 0x7d7   : > { %v2108_v51 = vld [vmem:[%s18438_s12 + $0x3730] sm:$0xff] }
 0x7d8   : > { %v17422_v34 = vcombine.low %v2104_v41, %v2108_v51 }
 0x7d9   : > { %14716 = vmatpush1.bf16.msra.mxu0 %v17358_v33  ;;  %15372 = vmatpush1.bf16.msra.mxu1 %v17360_v6  ;;  %v17423_v33 = vcombine.high %v2104_v41, %v2108_v51  ;;  %v17425_v6 = vcombine.high %v2105_v36, %v2109_v13  ;;  %v2161_v41 = vld [vmem:[%s18438_s12 + $0x38d8] sm:$0xff]  ;;  %v17472_v36 = vcombine.low %v2153_v30, %v2157_v20 }
 0x7da   : > { %14717 = vmatprep.subr.bf16.mxu0 %v17367_v47  ;;  %15373 = vmatprep.subr.bf16.mxu1 %v17369_v38  ;;  %v2112_v47 = vld [vmem:[%s18438_s12 + $0x3750] sm:$0xff]  ;;  %v2165_v51 = vld [vmem:[%s18438_s12 + $0x38f8] sm:$0xff] }
 0x7db   : > { %v2116_v38 = vld [vmem:[%s18438_s12 + $0x3770] sm:$0xff] }
 0x7dc   : > { %v17430_v7 = vcombine.low %v2112_v47, %v2116_v38 }
 0x7dd   : > { %14718 = vmatpush1.bf16.msra.mxu0 %v17366_v54  ;;  %15374 = vmatpush1.bf16.msra.mxu1 %v17368_v57  ;;  %v17431_v54 = vcombine.high %v2112_v47, %v2116_v38  ;;  %v17433_v57 = vcombine.high %v2113_v50, %v2117_v53  ;;  %v2173_v47 = vld [vmem:[%s18438_s12 + $0x3938] sm:$0xff] }
 0x7de   : > { %14719 = vmatprep.subr.bf16.mxu0 %v17375_v59  ;;  %15375 = vmatprep.subr.bf16.mxu1 %v17377_v22  ;;  %v2120_v59 = vld [vmem:[%s18438_s12 + $0x3790] sm:$0xff] }
 0x7df   : > { %v2124_v22 = vld [vmem:[%s18438_s12 + $0x37b0] sm:$0xff] }
 0x7e0   : > { %v17438_v9 = vcombine.low %v2120_v59, %v2124_v22 }
 0x7e1   : > { %14720 = vmatpush1.bf16.msra.mxu0 %v17374_v0  ;;  %15376 = vmatpush1.bf16.msra.mxu1 %v17376_v43  ;;  %v17439_v0 = vcombine.high %v2120_v59, %v2124_v22  ;;  %v17441_v43 = vcombine.high %v2121_v21, %v2125_v63 }
 0x7e2   : > { %14721 = vmatprep.subr.bf16.mxu0 %v17383_v55  ;;  %15377 = vmatprep.subr.bf16.mxu1 %v17385_v2  ;;  %v2128_v55 = vld [vmem:[%s18438_s12 + $0x37d0] sm:$0xff] }
 0x7e3   : > { %v2132_v2 = vld [vmem:[%s18438_s12 + $0x37f0] sm:$0xff] }
 0x7e4   : > { %v17446_v15 = vcombine.low %v2128_v55, %v2132_v2 }
 0x7e5   : > { %14722 = vmatpush1.bf16.msra.mxu0 %v17382_v11  ;;  %15378 = vmatpush1.bf16.msra.mxu1 %v17384_v17  ;;  %v17447_v11 = vcombine.high %v2128_v55, %v2132_v2  ;;  %v17449_v17 = vcombine.high %v2129_v4, %v2133_v8 }
 0x7e6   : > { %14723 = vmatprep.subr.bf16.mxu0 %v17391_v5  ;;  %15379 = vmatprep.subr.bf16.mxu1 %v17393_v26  ;;  %v2136_v5 = vld [vmem:[%s18438_s12 + $0x3810] sm:$0xff] }
 0x7e7   : > { %v2140_v26 = vld [vmem:[%s18438_s12 + $0x3830] sm:$0xff] }
 0x7e8   : > { %v17454_v35 = vcombine.low %v2136_v5, %v2140_v26 }
 0x7e9   : > { %14724 = vmatpush1.bf16.msra.mxu0 %v17390_v52  ;;  %15380 = vmatpush1.bf16.msra.mxu1 %v17392_v45  ;;  %v17455_v52 = vcombine.high %v2136_v5, %v2140_v26  ;;  %v17457_v45 = vcombine.high %v2137_v56, %v2141_v14 }
 0x7ea   : > { %14725 = vmatprep.subr.bf16.mxu0 %v17399_v23  ;;  %15381 = vmatprep.subr.bf16.mxu1 %v17401_v19  ;;  %v2144_v23 = vld [vmem:[%s18438_s12 + $0x3850] sm:$0xff] }
 0x7eb   : > { %v2148_v19 = vld [vmem:[%s18438_s12 + $0x3870] sm:$0xff] }
 0x7ec   : > { %v17462_v42 = vcombine.low %v2144_v23, %v2148_v19 }
 0x7ed   : > { %14726 = vmatpush1.bf16.msra.mxu0 %v17398_v1  ;;  %15382 = vmatpush1.bf16.msra.mxu1 %v17400_v40  ;;  %v17463_v1 = vcombine.high %v2144_v23, %v2148_v19  ;;  %v17465_v40 = vcombine.high %v2145_v24, %v2149_v39 }
 0x7ee   : > { %14727 = vmatprep.subr.bf16.mxu0 %v17407_v49  ;;  %15383 = vmatprep.subr.bf16.mxu1 %v17409_v27  ;;  %v2152_v49 = vld [vmem:[%s18438_s12 + $0x3890] sm:$0xff] }
 0x7ef   : > { %v2156_v27 = vld [vmem:[%s18438_s12 + $0x38b0] sm:$0xff] }
 0x7f1   : > { %14728 = vmatpush1.bf16.msra.mxu0 %v17406_v48  ;;  %15384 = vmatpush1.bf16.msra.mxu1 %v17408_v28  ;;  %v17471_v48 = vcombine.high %v2152_v49, %v2156_v27  ;;  %v17473_v28 = vcombine.high %v2153_v30, %v2157_v20 }
 0x7f2   : > { %14729 = vmatprep.subr.bf16.mxu0 %v17415_v31  ;;  %15385 = vmatprep.subr.bf16.mxu1 %v17417_v32  ;;  %v2160_v31 = vld [vmem:[%s18438_s12 + $0x38d0] sm:$0xff] }
 0x7f3   : > { %v2164_v32 = vld [vmem:[%s18438_s12 + $0x38f0] sm:$0xff] }
 0x7f4   : > { %v17479_v13 = vcombine.high %v2160_v31, %v2164_v32  ;;  %v17478_v38 = vcombine.low %v2160_v31, %v2164_v32 }
 0x7f5   : > { %14730 = vmatpush1.bf16.msra.mxu0 %v17414_v37  ;;  %15386 = vmatpush1.bf16.msra.mxu1 %v17416_v46  ;;  %v17481_v37 = vcombine.high %v2161_v41, %v2165_v51  ;;  %v2168_v46 = vld [vmem:[%s18438_s12 + $0x3910] sm:$0xff] }
 0x7f6   : > { %14731 = vmatprep.subr.bf16.mxu0 %v17423_v33  ;;  %15387 = vmatprep.subr.bf16.mxu1 %v17425_v6  ;;  %v2172_v33 = vld [vmem:[%s18438_s12 + $0x3930] sm:$0xff]  ;;  %v2169_v6 = vld [vmem:[%s18438_s12 + $0x3918] sm:$0xff] }
 0x7f7   : > { %v17487_v50 = vcombine.high %v2168_v46, %v2172_v33  ;;  %v17489_v53 = vcombine.high %v2169_v6, %v2173_v47  ;;  %v17486_v59 = vcombine.low %v2168_v46, %v2172_v33  ;;  %v17488_v22 = vcombine.low %v2169_v6, %v2173_v47 }
 0x7f9   : > { %14732 = vmatpush1.bf16.msra.mxu0 %v17422_v34  ;;  %15388 = vmatpush1.bf16.msra.mxu1 %v17424_v25  ;;  %v2176_v34 = vld [vmem:[%s18438_s12 + $0x3950] sm:$0xff] }
 0x7fa   : > { %14733 = vmatprep.subr.bf16.mxu0 %v17431_v54  ;;  %15389 = vmatprep.subr.bf16.mxu1 %v17433_v57  ;;  %v2180_v25 = vld [vmem:[%s18438_s12 + $0x3970] sm:$0xff]  ;;  %v2177_v54 = vld [vmem:[%s18438_s12 + $0x3958] sm:$0xff] }
 0x7fb   : > { %v2181_v57 = vld [vmem:[%s18438_s12 + $0x3978] sm:$0xff]  ;;  %v17495_v21 = vcombine.high %v2176_v34, %v2180_v25  ;;  %v17494_v55 = vcombine.low %v2176_v34, %v2180_v25 }
 0x7fc   : > { %v17497_v63 = vcombine.high %v2177_v54, %v2181_v57  ;;  %v17496_v2 = vcombine.low %v2177_v54, %v2181_v57 }
 0x7fd   : > { %14734 = vmatpush1.bf16.msra.mxu0 %v17430_v7  ;;  %15390 = vmatpush1.bf16.msra.mxu1 %v17432_v61  ;;  %v2184_v7 = vld [vmem:[%s18438_s12 + $0x3990] sm:$0xff] }
 0x7fe   : > { %14735 = vmatprep.subr.bf16.mxu0 %v17439_v0  ;;  %15391 = vmatprep.subr.bf16.mxu1 %v17441_v43  ;;  %v2188_v61 = vld [vmem:[%s18438_s12 + $0x39b0] sm:$0xff]  ;;  %v2185_v0 = vld [vmem:[%s18438_s12 + $0x3998] sm:$0xff] }
 0x7ff   : > { %v2189_v43 = vld [vmem:[%s18438_s12 + $0x39b8] sm:$0xff]  ;;  %v17503_v4 = vcombine.high %v2184_v7, %v2188_v61  ;;  %v17502_v5 = vcombine.low %v2184_v7, %v2188_v61 }
 0x800   : > { %v17505_v8 = vcombine.high %v2185_v0, %v2189_v43  ;;  %v17504_v26 = vcombine.low %v2185_v0, %v2189_v43 }
 0x801   : > { %14736 = vmatpush1.bf16.msra.mxu0 %v17438_v9  ;;  %15392 = vmatpush1.bf16.msra.mxu1 %v17440_v10  ;;  %v2192_v9 = vld [vmem:[%s18438_s12 + $0x39d0] sm:$0xff] }
 0x802   : > { %14737 = vmatprep.subr.bf16.mxu0 %v17447_v11  ;;  %15393 = vmatprep.subr.bf16.mxu1 %v17449_v17  ;;  %v2196_v10 = vld [vmem:[%s18438_s12 + $0x39f0] sm:$0xff]  ;;  %v2193_v11 = vld [vmem:[%s18438_s12 + $0x39d8] sm:$0xff] }
 0x803   : > { %v2197_v17 = vld [vmem:[%s18438_s12 + $0x39f8] sm:$0xff]  ;;  %v17511_v56 = vcombine.high %v2192_v9, %v2196_v10  ;;  %v17510_v23 = vcombine.low %v2192_v9, %v2196_v10 }
 0x804   : > { %v17513_v14 = vcombine.high %v2193_v11, %v2197_v17  ;;  %v17512_v19 = vcombine.low %v2193_v11, %v2197_v17 }
 0x805   : > { %14738 = vmatpush1.bf16.msra.mxu0 %v17446_v15  ;;  %15394 = vmatpush1.bf16.msra.mxu1 %v17448_v3  ;;  %v2200_v15 = vld [vmem:[%s18438_s12 + $0x3a10] sm:$0xff] }
 0x806   : > { %14748 = vmatprep.subr.bf16.mxu0 %v17455_v52  ;;  %15404 = vmatprep.subr.bf16.mxu1 %v17457_v45  ;;  %v2204_v3 = vld [vmem:[%s18438_s12 + $0x3a30] sm:$0xff]  ;;  %v2201_v52 = vld [vmem:[%s18438_s12 + $0x3a18] sm:$0xff] }
 0x807   : > { %v2205_v45 = vld [vmem:[%s18438_s12 + $0x3a38] sm:$0xff]  ;;  %v17519_v24 = vcombine.high %v2200_v15, %v2204_v3 }
 0x808   : > { %14740 = vmatmul.mubr.bf16.vlgmr.msra.gmra.mrb[4].mxu0 %v19577_v62  ;;  %15396 = vmatmul.mubr.bf16.vlgmr.msra.gmra.mrb[4].mxu1 %v19577_v62  ;;  %v17470_v62 = vcombine.low %v2152_v49, %v2156_v27  ;;  %v17521_v39 = vcombine.high %v2201_v52, %v2205_v45  ;;  %v17518_v49 = vcombine.low %v2200_v15, %v2204_v3 }
 0x809   : > { %14749 = vmatpush1.bf16.msra.mxu0 %v17454_v35  ;;  %15405 = vmatpush1.bf16.msra.mxu1 %v17456_v29  ;;  %v2208_v35 = vld [vmem:[%s18438_s12 + $0x3a50] sm:$0xff]  ;;  %v17520_v27 = vcombine.low %v2201_v52, %v2205_v45 }
 0x80a   : > { %14750 = vmatprep.subr.bf16.mxu0 %v17463_v1  ;;  %15406 = vmatprep.subr.bf16.mxu1 %v17465_v40  ;;  %v2212_v29 = vld [vmem:[%s18438_s12 + $0x3a70] sm:$0xff]  ;;  %v2209_v1 = vld [vmem:[%s18438_s12 + $0x3a58] sm:$0xff] }
 0x80b   : > { %14780 = vmatprep.mubr.bf16.mxu0 %v19584_v58  ;;  %15436 = vmatprep.mubr.bf16.mxu1 %v19584_v58  ;;  %v17480_v58 = vcombine.low %v2161_v41, %v2165_v51  ;;  %v2213_v40 = vld [vmem:[%s18438_s12 + $0x3a78] sm:$0xff]  ;;  %v17527_v30 = vcombine.high %v2208_v35, %v2212_v29  ;;  %v17526_v31 = vcombine.low %v2208_v35, %v2212_v29 }
 0x80c   : > { %v17529_v20 = vcombine.high %v2209_v1, %v2213_v40  ;;  %v17528_v32 = vcombine.low %v2209_v1, %v2213_v40 }
 0x80d   : > { %14751 = vmatpush1.bf16.msra.mxu0 %v17462_v42  ;;  %15407 = vmatpush1.bf16.msra.mxu1 %v17464_v60  ;;  %v2216_v42 = vld [vmem:[%s18438_s12 + $0x3a90] sm:$0xff] }
 0x80e   : > { %14752 = vmatprep.subr.bf16.mxu0 %v17471_v48  ;;  %15408 = vmatprep.subr.bf16.mxu1 %v17473_v28  ;;  %v2220_v60 = vld [vmem:[%s18438_s12 + $0x3ab0] sm:$0xff]  ;;  %v2217_v48 = vld [vmem:[%s18438_s12 + $0x3a98] sm:$0xff] }
 0x80f   : > { %v2221_v28 = vld [vmem:[%s18438_s12 + $0x3ab8] sm:$0xff]  ;;  %v17535_v41 = vcombine.high %v2216_v42, %v2220_v60  ;;  %v17534_v46 = vcombine.low %v2216_v42, %v2220_v60 }
 0x810   : > { %v17537_v51 = vcombine.high %v2217_v48, %v2221_v28  ;;  %v17536_v33 = vcombine.low %v2217_v48, %v2221_v28 }
 0x811   : > { %14753 = vmatpush1.bf16.msra.mxu0 %v17470_v62  ;;  %15409 = vmatpush1.bf16.msra.mxu1 %v17472_v36  ;;  %v2224_v62 = vld [vmem:[%s18438_s12 + $0x3ad0] sm:$0xff] }
 0x812   : > { %14754 = vmatprep.subr.bf16.mxu0 %v17479_v13  ;;  %15410 = vmatprep.subr.bf16.mxu1 %v17481_v37  ;;  %v2228_v36 = vld [vmem:[%s18438_s12 + $0x3af0] sm:$0xff]  ;;  %v2225_v13 = vld [vmem:[%s18438_s12 + $0x3ad8] sm:$0xff] }
 0x813   : > { %v2229_v37 = vld [vmem:[%s18438_s12 + $0x3af8] sm:$0xff]  ;;  %v17543_v6 = vcombine.high %v2224_v62, %v2228_v36  ;;  %v17542_v34 = vcombine.low %v2224_v62, %v2228_v36 }
 0x814   : > { %v17545_v47 = vcombine.high %v2225_v13, %v2229_v37  ;;  %v17544_v25 = vcombine.low %v2225_v13, %v2229_v37 }
 0x815   : > { %14755 = vmatpush1.bf16.msra.mxu0 %v17478_v38  ;;  %15411 = vmatpush1.bf16.msra.mxu1 %v17480_v58  ;;  %v2232_v38 = vld [vmem:[%s18438_s12 + $0x3b10] sm:$0xff] }
 0x816   : > { %14756 = vmatprep.subr.bf16.mxu0 %v17487_v50  ;;  %15412 = vmatprep.subr.bf16.mxu1 %v17489_v53  ;;  %v2236_v58 = vld [vmem:[%s18438_s12 + $0x3b30] sm:$0xff]  ;;  %v2233_v50 = vld [vmem:[%s18438_s12 + $0x3b18] sm:$0xff] }
 0x817   : > { %v2237_v53 = vld [vmem:[%s18438_s12 + $0x3b38] sm:$0xff]  ;;  %v17551_v54 = vcombine.high %v2232_v38, %v2236_v58  ;;  %v17550_v7 = vcombine.low %v2232_v38, %v2236_v58 }
 0x818   : > { %v17553_v57 = vcombine.high %v2233_v50, %v2237_v53  ;;  %v17552_v61 = vcombine.low %v2233_v50, %v2237_v53  ;;  %v2296_v53 = vld [vmem:[%s18438_s12 + $0x3d10] sm:$0xff] }
 0x819   : > { %14757 = vmatpush1.bf16.msra.mxu0 %v17486_v59  ;;  %15413 = vmatpush1.bf16.msra.mxu1 %v17488_v22  ;;  %v2240_v59 = vld [vmem:[%s18438_s12 + $0x3b50] sm:$0xff] }
 0x81a   : > { %14758 = vmatprep.subr.bf16.mxu0 %v17495_v21  ;;  %15414 = vmatprep.subr.bf16.mxu1 %v17497_v63  ;;  %v2244_v22 = vld [vmem:[%s18438_s12 + $0x3b70] sm:$0xff]  ;;  %v2241_v21 = vld [vmem:[%s18438_s12 + $0x3b58] sm:$0xff] }
 0x81b   : > { %v2245_v63 = vld [vmem:[%s18438_s12 + $0x3b78] sm:$0xff]  ;;  %v17559_v0 = vcombine.high %v2240_v59, %v2244_v22  ;;  %v17558_v9 = vcombine.low %v2240_v59, %v2244_v22 }
 0x81c   : > { %v17561_v43 = vcombine.high %v2241_v21, %v2245_v63  ;;  %v17560_v10 = vcombine.low %v2241_v21, %v2245_v63  ;;  %v2304_v21 = vld [vmem:[%s18438_s12 + $0x3d50] sm:$0xff] }
 0x81d   : > { %14759 = vmatpush1.bf16.msra.mxu0 %v17494_v55  ;;  %15415 = vmatpush1.bf16.msra.mxu1 %v17496_v2  ;;  %v2248_v55 = vld [vmem:[%s18438_s12 + $0x3b90] sm:$0xff] }
 0x81e   : > { %14760 = vmatprep.subr.bf16.mxu0 %v17503_v4  ;;  %15416 = vmatprep.subr.bf16.mxu1 %v17505_v8  ;;  %v2252_v2 = vld [vmem:[%s18438_s12 + $0x3bb0] sm:$0xff]  ;;  %v2249_v4 = vld [vmem:[%s18438_s12 + $0x3b98] sm:$0xff] }
 0x81f   : > { %v2253_v8 = vld [vmem:[%s18438_s12 + $0x3bb8] sm:$0xff]  ;;  %v17567_v11 = vcombine.high %v2248_v55, %v2252_v2  ;;  %v17566_v15 = vcombine.low %v2248_v55, %v2252_v2  ;;  %v2308_v63 = vld [vmem:[%s18438_s12 + $0x3d70] sm:$0xff] }
 0x820   : > { %v17569_v17 = vcombine.high %v2249_v4, %v2253_v8  ;;  %v17568_v3 = vcombine.low %v2249_v4, %v2253_v8  ;;  %v17623_v55 = vcombine.high %v2304_v21, %v2308_v63  ;;  %v2312_v4 = vld [vmem:[%s18438_s12 + $0x3d90] sm:$0xff] }
 0x821   : > { %14761 = vmatpush1.bf16.msra.mxu0 %v17502_v5  ;;  %15417 = vmatpush1.bf16.msra.mxu1 %v17504_v26  ;;  %v2256_v5 = vld [vmem:[%s18438_s12 + $0x3bd0] sm:$0xff] }
 0x822   : > { %14762 = vmatprep.subr.bf16.mxu0 %v17511_v56  ;;  %15418 = vmatprep.subr.bf16.mxu1 %v17513_v14  ;;  %v2260_v26 = vld [vmem:[%s18438_s12 + $0x3bf0] sm:$0xff]  ;;  %v2257_v56 = vld [vmem:[%s18438_s12 + $0x3bd8] sm:$0xff] }
 0x823   : > { %v2261_v14 = vld [vmem:[%s18438_s12 + $0x3bf8] sm:$0xff]  ;;  %v17575_v52 = vcombine.high %v2256_v5, %v2260_v26  ;;  %v17574_v35 = vcombine.low %v2256_v5, %v2260_v26  ;;  %v2316_v8 = vld [vmem:[%s18438_s12 + $0x3db0] sm:$0xff] }
 0x824   : > { %v17577_v45 = vcombine.high %v2257_v56, %v2261_v14  ;;  %v17576_v29 = vcombine.low %v2257_v56, %v2261_v14  ;;  %v17631_v5 = vcombine.high %v2312_v4, %v2316_v8  ;;  %v2320_v56 = vld [vmem:[%s18438_s12 + $0x3dd0] sm:$0xff] }
 0x825   : > { %14763 = vmatpush1.bf16.msra.mxu0 %v17510_v23  ;;  %15419 = vmatpush1.bf16.msra.mxu1 %v17512_v19  ;;  %v2264_v23 = vld [vmem:[%s18438_s12 + $0x3c10] sm:$0xff] }
 0x826   : > { %14764 = vmatprep.subr.bf16.mxu0 %v17519_v24  ;;  %15420 = vmatprep.subr.bf16.mxu1 %v17521_v39  ;;  %v2268_v19 = vld [vmem:[%s18438_s12 + $0x3c30] sm:$0xff]  ;;  %v2265_v24 = vld [vmem:[%s18438_s12 + $0x3c18] sm:$0xff] }
 0x827   : > { %v2269_v39 = vld [vmem:[%s18438_s12 + $0x3c38] sm:$0xff]  ;;  %v17583_v1 = vcombine.high %v2264_v23, %v2268_v19  ;;  %v17582_v42 = vcombine.low %v2264_v23, %v2268_v19  ;;  %v2324_v14 = vld [vmem:[%s18438_s12 + $0x3df0] sm:$0xff] }
 0x828   : > { %v17585_v40 = vcombine.high %v2265_v24, %v2269_v39  ;;  %v17584_v60 = vcombine.low %v2265_v24, %v2269_v39  ;;  %v17639_v23 = vcombine.high %v2320_v56, %v2324_v14  ;;  %v2328_v24 = vld [vmem:[%s18438_s12 + $0x3e10] sm:$0xff] }
 0x829   : > { %14765 = vmatpush1.bf16.msra.mxu0 %v17518_v49  ;;  %15421 = vmatpush1.bf16.msra.mxu1 %v17520_v27  ;;  %v2272_v49 = vld [vmem:[%s18438_s12 + $0x3c50] sm:$0xff] }
 0x82a   : > { %14766 = vmatprep.subr.bf16.mxu0 %v17527_v30  ;;  %15422 = vmatprep.subr.bf16.mxu1 %v17529_v20  ;;  %v2276_v27 = vld [vmem:[%s18438_s12 + $0x3c70] sm:$0xff]  ;;  %v2273_v30 = vld [vmem:[%s18438_s12 + $0x3c58] sm:$0xff] }
 0x82b   : > { %v2277_v20 = vld [vmem:[%s18438_s12 + $0x3c78] sm:$0xff]  ;;  %v17591_v48 = vcombine.high %v2272_v49, %v2276_v27  ;;  %v17590_v62 = vcombine.low %v2272_v49, %v2276_v27  ;;  %v2332_v39 = vld [vmem:[%s18438_s12 + $0x3e30] sm:$0xff] }
 0x82c   : > { %v17593_v28 = vcombine.high %v2273_v30, %v2277_v20  ;;  %v17592_v36 = vcombine.low %v2273_v30, %v2277_v20  ;;  %v17647_v49 = vcombine.high %v2328_v24, %v2332_v39  ;;  %v2336_v30 = vld [vmem:[%s18438_s12 + $0x3e50] sm:$0xff] }
 0x82d   : > { %14767 = vmatpush1.bf16.msra.mxu0 %v17526_v31  ;;  %15423 = vmatpush1.bf16.msra.mxu1 %v17528_v32  ;;  %v2280_v31 = vld [vmem:[%s18438_s12 + $0x3c90] sm:$0xff] }
 0x82e   : > { %14768 = vmatprep.subr.bf16.mxu0 %v17535_v41  ;;  %15424 = vmatprep.subr.bf16.mxu1 %v17537_v51  ;;  %v2284_v32 = vld [vmem:[%s18438_s12 + $0x3cb0] sm:$0xff]  ;;  %v2281_v41 = vld [vmem:[%s18438_s12 + $0x3c98] sm:$0xff] }
 0x82f   : > { %v2285_v51 = vld [vmem:[%s18438_s12 + $0x3cb8] sm:$0xff]  ;;  %v17599_v13 = vcombine.high %v2280_v31, %v2284_v32  ;;  %v2340_v20 = vld [vmem:[%s18438_s12 + $0x3e70] sm:$0xff] }
 0x830   : > { %v17601_v37 = vcombine.high %v2281_v41, %v2285_v51  ;;  %v17600_v38 = vcombine.low %v2281_v41, %v2285_v51  ;;  %v2344_v41 = vld [vmem:[%s18438_s12 + $0x3e90] sm:$0xff] }
 0x831   : > { %14769 = vmatpush1.bf16.msra.mxu0 %v17534_v46  ;;  %15425 = vmatpush1.bf16.msra.mxu1 %v17536_v33  ;;  %v2288_v46 = vld [vmem:[%s18438_s12 + $0x3cd0] sm:$0xff] }
 0x832   : > { %14770 = vmatprep.subr.bf16.mxu0 %v17543_v6  ;;  %15426 = vmatprep.subr.bf16.mxu1 %v17545_v47  ;;  %v2292_v33 = vld [vmem:[%s18438_s12 + $0x3cf0] sm:$0xff]  ;;  %v2289_v6 = vld [vmem:[%s18438_s12 + $0x3cd8] sm:$0xff] }
 0x833   : > { %v2293_v47 = vld [vmem:[%s18438_s12 + $0x3cf8] sm:$0xff]  ;;  %v17607_v58 = vcombine.high %v2288_v46, %v2292_v33  ;;  %v2348_v51 = vld [vmem:[%s18438_s12 + $0x3eb0] sm:$0xff] }
 0x834   : > { %v17609_v50 = vcombine.high %v2289_v6, %v2293_v47 }
 0x835   : > { %14771 = vmatpush1.bf16.msra.mxu0 %v17542_v34  ;;  %15427 = vmatpush1.bf16.msra.mxu1 %v17544_v25  ;;  %v2300_v34 = vld [vmem:[%s18438_s12 + $0x3d30] sm:$0xff]  ;;  %v2297_v25 = vld [vmem:[%s18438_s12 + $0x3d18] sm:$0xff] }
 0x836   : > { %14772 = vmatprep.subr.bf16.mxu0 %v17551_v54  ;;  %15428 = vmatprep.subr.bf16.mxu1 %v17553_v57  ;;  %v2301_v54 = vld [vmem:[%s18438_s12 + $0x3d38] sm:$0xff]  ;;  %v17606_v57 = vcombine.low %v2288_v46, %v2292_v33  ;;  %v17615_v59 = vcombine.high %v2296_v53, %v2300_v34  ;;  %v17663_v46 = vcombine.high %v2344_v41, %v2348_v51 }
 0x837   : > { %v17617_v22 = vcombine.high %v2297_v25, %v2301_v54 }
 0x839   : > { %14773 = vmatpush1.bf16.msra.mxu0 %v17550_v7  ;;  %15429 = vmatpush1.bf16.msra.mxu1 %v17552_v61  ;;  %v2305_v7 = vld [vmem:[%s18438_s12 + $0x3d58] sm:$0xff] }
 0x83a   : > { %14774 = vmatprep.subr.bf16.mxu0 %v17559_v0  ;;  %15430 = vmatprep.subr.bf16.mxu1 %v17561_v43  ;;  %v2309_v61 = vld [vmem:[%s18438_s12 + $0x3d78] sm:$0xff]  ;;  %v17614_v0 = vcombine.low %v2296_v53, %v2300_v34  ;;  %v17616_v43 = vcombine.low %v2297_v25, %v2301_v54  ;;  %v2360_v25 = vld [vmem:[%s18438_s12 + $0x3f10] sm:$0xff] }
 0x83b   : > { %v17625_v2 = vcombine.high %v2305_v7, %v2309_v61  ;;  %v2364_v54 = vld [vmem:[%s18438_s12 + $0x3f30] sm:$0xff] }
 0x83d   : > { %14775 = vmatpush1.bf16.msra.mxu0 %v17558_v9  ;;  %15431 = vmatpush1.bf16.msra.mxu1 %v17560_v10  ;;  %v2313_v9 = vld [vmem:[%s18438_s12 + $0x3d98] sm:$0xff] }
 0x83e   : > { %14776 = vmatprep.subr.bf16.mxu0 %v17567_v11  ;;  %15432 = vmatprep.subr.bf16.mxu1 %v17569_v17  ;;  %v2317_v10 = vld [vmem:[%s18438_s12 + $0x3db8] sm:$0xff]  ;;  %v17622_v11 = vcombine.low %v2304_v21, %v2308_v63  ;;  %v17624_v17 = vcombine.low %v2305_v7, %v2309_v61  ;;  %v17679_v21 = vcombine.high %v2360_v25, %v2364_v54  ;;  %v2368_v7 = vld [vmem:[%s18438_s12 + $0x3f50] sm:$0xff] }
 0x83f   : > { %v17633_v26 = vcombine.high %v2313_v9, %v2317_v10  ;;  %v2372_v61 = vld [vmem:[%s18438_s12 + $0x3f70] sm:$0xff] }
 0x841   : > { %14777 = vmatpush1.bf16.msra.mxu0 %v17566_v15  ;;  %15433 = vmatpush1.bf16.msra.mxu1 %v17568_v3  ;;  %v2321_v15 = vld [vmem:[%s18438_s12 + $0x3dd8] sm:$0xff] }
 0x842   : > { %14778 = vmatprep.subr.bf16.mxu0 %v17575_v52  ;;  %15434 = vmatprep.subr.bf16.mxu1 %v17577_v45  ;;  %v2325_v3 = vld [vmem:[%s18438_s12 + $0x3df8] sm:$0xff]  ;;  %v17630_v52 = vcombine.low %v2312_v4, %v2316_v8  ;;  %v17632_v45 = vcombine.low %v2313_v9, %v2317_v10  ;;  %v17687_v4 = vcombine.high %v2368_v7, %v2372_v61  ;;  %v2376_v9 = vld [vmem:[%s18438_s12 + $0x3f90] sm:$0xff] }
 0x843   : > { %v17641_v19 = vcombine.high %v2321_v15, %v2325_v3  ;;  %v2380_v10 = vld [vmem:[%s18438_s12 + $0x3fb0] sm:$0xff] }
 0x845   : > { %14779 = vmatpush1.bf16.msra.mxu0 %v17574_v35  ;;  %15435 = vmatpush1.bf16.msra.mxu1 %v17576_v29  ;;  %v2329_v35 = vld [vmem:[%s18438_s12 + $0x3e18] sm:$0xff] }
 0x846   : > { %14789 = vmatprep.subr.bf16.mxu0 %v17583_v1  ;;  %15445 = vmatprep.subr.bf16.mxu1 %v17585_v40  ;;  %v2333_v29 = vld [vmem:[%s18438_s12 + $0x3e38] sm:$0xff]  ;;  %v17638_v1 = vcombine.low %v2320_v56, %v2324_v14  ;;  %v17640_v40 = vcombine.low %v2321_v15, %v2325_v3  ;;  %v17695_v56 = vcombine.high %v2376_v9, %v2380_v10  ;;  %v2384_v15 = vld [vmem:[%s18438_s12 + $0x3fd0] sm:$0xff] }
 0x847   : > { %v17649_v27 = vcombine.high %v2329_v35, %v2333_v29  ;;  %v2388_v3 = vld [vmem:[%s18438_s12 + $0x3ff0] sm:$0xff] }
 0x848   : > { %14781 = vmatmul.mubr.bf16.vlgmr.msra.gmra.mrb[4].mxu0 %v19652_v12  ;;  %15437 = vmatmul.mubr.bf16.vlgmr.msra.gmra.mrb[4].mxu1 %v19652_v12  ;;  %v17598_v12 = vcombine.low %v2280_v31, %v2284_v32  ;;  %v17655_v31 = vcombine.high %v2336_v30, %v2340_v20 }
 0x849   : > { %14790 = vmatpush1.bf16.msra.mxu0 %v17582_v42  ;;  %15446 = vmatpush1.bf16.msra.mxu1 %v17584_v60  ;;  %v2337_v42 = vld [vmem:[%s18438_s12 + $0x3e58] sm:$0xff] }
 0x84a   : > { %14791 = vmatprep.subr.bf16.mxu0 %v17591_v48  ;;  %15447 = vmatprep.subr.bf16.mxu1 %v17593_v28  ;;  %v2341_v60 = vld [vmem:[%s18438_s12 + $0x3e78] sm:$0xff]  ;;  %v17646_v48 = vcombine.low %v2328_v24, %v2332_v39  ;;  %v17648_v28 = vcombine.low %v2329_v35, %v2333_v29  ;;  %v17703_v24 = vcombine.high %v2384_v15, %v2388_v3 }
 0x84b   : > { %14821 = vmatprep.mubr.bf16.mxu0 %v19660_v18  ;;  %15477 = vmatprep.mubr.bf16.mxu1 %v19660_v18  ;;  %v17608_v18 = vcombine.low %v2289_v6, %v2293_v47  ;;  %v17657_v32 = vcombine.high %v2337_v42, %v2341_v60  ;;  %v2352_v6 = vld [vmem:[%s18438_s12 + $0x3ed0] sm:$0xff]  ;;  %v17702_v35 = vcombine.low %v2384_v15, %v2388_v3 }
 0x84c   : > { %v2356_v47 = vld [vmem:[%s18438_s12 + $0x3ef0] sm:$0xff] }
 0x84d   : > { %14792 = vmatpush1.bf16.msra.mxu0 %v17590_v62  ;;  %15448 = vmatpush1.bf16.msra.mxu1 %v17592_v36  ;;  %v2345_v62 = vld [vmem:[%s18438_s12 + $0x3e98] sm:$0xff]  ;;  %v17671_v53 = vcombine.high %v2352_v6, %v2356_v47 }
 0x84e   : > { %14793 = vmatprep.subr.bf16.mxu0 %v17599_v13  ;;  %15449 = vmatprep.subr.bf16.mxu1 %v17601_v37  ;;  %v2349_v36 = vld [vmem:[%s18438_s12 + $0x3eb8] sm:$0xff]  ;;  %v17654_v13 = vcombine.low %v2336_v30, %v2340_v20  ;;  %v17656_v37 = vcombine.low %v2337_v42, %v2341_v60 }
 0x84f   : > { %v17665_v33 = vcombine.high %v2345_v62, %v2349_v36 }
 0x851   : > { %14794 = vmatpush1.bf16.msra.mxu0 %v17598_v12  ;;  %15450 = vmatpush1.bf16.msra.mxu1 %v17600_v38  ;;  %v2353_v12 = vld [vmem:[%s18438_s12 + $0x3ed8] sm:$0xff] }
 0x852   : > { %14795 = vmatprep.subr.bf16.mxu0 %v17607_v58  ;;  %15451 = vmatprep.subr.bf16.mxu1 %v17609_v50  ;;  %v2357_v38 = vld [vmem:[%s18438_s12 + $0x3ef8] sm:$0xff]  ;;  %v17662_v58 = vcombine.low %v2344_v41, %v2348_v51  ;;  %v17664_v50 = vcombine.low %v2345_v62, %v2349_v36  ;;  %v337_v41 = vld [vmem:[#allocation8 + $0x8] sm:$0xff] }
 0x853   : > { %v17673_v34 = vcombine.high %v2353_v12, %v2357_v38 }
 0x855   : > { %14796 = vmatpush1.bf16.msra.mxu0 %v17606_v57  ;;  %15452 = vmatpush1.bf16.msra.mxu1 %v17608_v18  ;;  %v2361_v57 = vld [vmem:[%s18438_s12 + $0x3f18] sm:$0xff] }
 0x856   : > { %14797 = vmatprep.subr.bf16.mxu0 %v17615_v59  ;;  %15453 = vmatprep.subr.bf16.mxu1 %v17617_v22  ;;  %v2365_v18 = vld [vmem:[%s18438_s12 + $0x3f38] sm:$0xff]  ;;  %v17670_v59 = vcombine.low %v2352_v6, %v2356_v47  ;;  %v17672_v22 = vcombine.low %v2353_v12, %v2357_v38 }
 0x857   : > { %v17681_v63 = vcombine.high %v2361_v57, %v2365_v18 }
 0x859   : > { %14798 = vmatpush1.bf16.msra.mxu0 %v17614_v0  ;;  %15454 = vmatpush1.bf16.msra.mxu1 %v17616_v43  ;;  %v2369_v0 = vld [vmem:[%s18438_s12 + $0x3f58] sm:$0xff] }
 0x85a   : > { %14799 = vmatprep.subr.bf16.mxu0 %v17623_v55  ;;  %15455 = vmatprep.subr.bf16.mxu1 %v17625_v2  ;;  %v2373_v43 = vld [vmem:[%s18438_s12 + $0x3f78] sm:$0xff]  ;;  %v17678_v55 = vcombine.low %v2360_v25, %v2364_v54  ;;  %v17680_v2 = vcombine.low %v2361_v57, %v2365_v18 }
 0x85b   : > { %v17689_v8 = vcombine.high %v2369_v0, %v2373_v43 }
 0x85d   : > { %14800 = vmatpush1.bf16.msra.mxu0 %v17622_v11  ;;  %15456 = vmatpush1.bf16.msra.mxu1 %v17624_v17  ;;  %v2377_v11 = vld [vmem:[%s18438_s12 + $0x3f98] sm:$0xff] }
 0x85e   : > { %14801 = vmatprep.subr.bf16.mxu0 %v17631_v5  ;;  %15457 = vmatprep.subr.bf16.mxu1 %v17633_v26  ;;  %v2381_v17 = vld [vmem:[%s18438_s12 + $0x3fb8] sm:$0xff]  ;;  %v17686_v5 = vcombine.low %v2368_v7, %v2372_v61  ;;  %v17688_v26 = vcombine.low %v2369_v0, %v2373_v43 }
 0x85f   : > { %v17697_v14 = vcombine.high %v2377_v11, %v2381_v17 }
 0x861   : > { %14802 = vmatpush1.bf16.msra.mxu0 %v17630_v52  ;;  %15458 = vmatpush1.bf16.msra.mxu1 %v17632_v45  ;;  %v2385_v52 = vld [vmem:[%s18438_s12 + $0x3fd8] sm:$0xff] }
 0x862   : > { %14803 = vmatprep.subr.bf16.mxu0 %v17639_v23  ;;  %15459 = vmatprep.subr.bf16.mxu1 %v17641_v19  ;;  %v2389_v45 = vld [vmem:[%s18438_s12 + $0x3ff8] sm:$0xff]  ;;  %v17694_v23 = vcombine.low %v2376_v9, %v2380_v10  ;;  %v17696_v19 = vcombine.low %v2377_v11, %v2381_v17 }
 0x863   : > { %v17705_v39 = vcombine.high %v2385_v52, %v2389_v45  ;;  %v17704_v29 = vcombine.low %v2385_v52, %v2389_v45 }
 0x865   : > { %14804 = vmatpush1.bf16.msra.mxu0 %v17638_v1  ;;  %15460 = vmatpush1.bf16.msra.mxu1 %v17640_v40 }
 0x866   : > { %14805 = vmatprep.subr.bf16.mxu0 %v17647_v49  ;;  %15461 = vmatprep.subr.bf16.mxu1 %v17649_v27 }
 0x869   : > { %14806 = vmatpush1.bf16.msra.mxu0 %v17646_v48  ;;  %15462 = vmatpush1.bf16.msra.mxu1 %v17648_v28 }
 0x86a   : > { %14807 = vmatprep.subr.bf16.mxu0 %v17655_v31  ;;  %15463 = vmatprep.subr.bf16.mxu1 %v17657_v32 }
 0x86d   : > { %14808 = vmatpush1.bf16.msra.mxu0 %v17654_v13  ;;  %15464 = vmatpush1.bf16.msra.mxu1 %v17656_v37 }
 0x86e   : > { %14809 = vmatprep.subr.bf16.mxu0 %v17663_v46  ;;  %15465 = vmatprep.subr.bf16.mxu1 %v17665_v33 }
 0x871   : > { %14810 = vmatpush1.bf16.msra.mxu0 %v17662_v58  ;;  %15466 = vmatpush1.bf16.msra.mxu1 %v17664_v50 }
 0x872   : > { %14811 = vmatprep.subr.bf16.mxu0 %v17671_v53  ;;  %15467 = vmatprep.subr.bf16.mxu1 %v17673_v34 }
 0x875   : > { %14812 = vmatpush1.bf16.msra.mxu0 %v17670_v59  ;;  %15468 = vmatpush1.bf16.msra.mxu1 %v17672_v22 }
 0x876   : > { %14813 = vmatprep.subr.bf16.mxu0 %v17679_v21  ;;  %15469 = vmatprep.subr.bf16.mxu1 %v17681_v63 }
 0x879   : > { %14814 = vmatpush1.bf16.msra.mxu0 %v17678_v55  ;;  %15470 = vmatpush1.bf16.msra.mxu1 %v17680_v2 }
 0x87a   : > { %14815 = vmatprep.subr.bf16.mxu0 %v17687_v4  ;;  %15471 = vmatprep.subr.bf16.mxu1 %v17689_v8 }
 0x87d   : > { %14816 = vmatpush1.bf16.msra.mxu0 %v17686_v5  ;;  %15472 = vmatpush1.bf16.msra.mxu1 %v17688_v26 }
 0x87e   : > { %14817 = vmatprep.subr.bf16.mxu0 %v17695_v56  ;;  %15473 = vmatprep.subr.bf16.mxu1 %v17697_v14 }
 0x881   : > { %14818 = vmatpush1.bf16.msra.mxu0 %v17694_v23  ;;  %15474 = vmatpush1.bf16.msra.mxu1 %v17696_v19 }
 0x882   : > { %14819 = vmatprep.subr.bf16.mxu0 %v17703_v24  ;;  %15475 = vmatprep.subr.bf16.mxu1 %v17705_v39 }
 0x885   : > { %14820 = vmatpush1.bf16.msra.mxu0 %v17702_v35  ;;  %15476 = vmatpush1.bf16.msra.mxu1 %v17704_v29 }
 0x888   : > { %14822 = vmatmul.mubr.bf16.vlgmr.msra.gmra.mrb[4].mxu0 %v19728_v44  ;;  %15478 = vmatmul.mubr.bf16.vlgmr.msra.gmra.mrb[4].mxu1 %v19728_v44 }
 0x95b   : > { %v14823_v1 = vpop.f32.mrb[4].mxu0  ;;  %v15479_v40 = vpop.f32.mrb[4].mxu1 }
 0x95c   : > { %v14825_v49 = vpop.f32.mrb[5].mxu0  ;;  %v15481_v30 = vpop.f32.mrb[5].mxu1 }
 0x95d   : > { %v15511_v27 = vcombine.low %v14823_v1, %v14825_v49  ;;  %v14827_v20 = vpop.f32.mrb[6].mxu0  ;;  %v15512_v42 = vcombine.low %v15479_v40, %v15481_v30  ;;  %v15483_v60 = vpop.f32.mrb[6].mxu1 }
 0x95e   : > { %v14828_v48 = vpop.f32.mrb[7].mxu0  ;;  %v15484_v31 = vpop.f32.mrb[7].mxu1 }
 0x95f   : > { %v15519_v28 = vrot.slane %v15511_v27, %v19961_v16  ;;  %v15526_v32 = vrot.slane %v15512_v42, %v19961_v16 }
 0x961   : > { %v15527_v44 = vcombine.low %v15519_v28, %v15526_v32 }
 0x963   : > { %v15531_v51 = vadd.f32 %v15527_v44, %v337_v41 }
 0x965   : > { %15533 = vst [vmem:[#allocation8 + $0x8] sm:$0xff] %v15531_v51 }
 0x966   : > { %18141 = shalt.err (!%p18138_p8)
}
 0x967   : > { %s18142_s7 = scalar_lea.hbm %s20865_s3, 256 }
 0x968   : > { %p18143_p2 = scmp.ne.s32.totalorder %s20865_s3, %s18142_s7  ;;  %p18148_p10 = scmp.lt.u32.totalorder %s18142_s7, %s20865_s3 }
 0x96a   : > { %p18144_p12 = pnand %p18143_p2, %p17979_p9 }
 0x96c   : > { %p18145_p7 = pneg %p18144_p12 }
 0x96e   : > { %p18150_p5 = pnand %p18148_p10, %p18145_p7 }
 0x970   : > { %18153 = shalt.err (!%p18150_p5)
}
 0x971   : > { %17962 = dma.vmem_to_hbm [thread:$0]  (%p17979_p9), %s15545_s20, 256, %s20865_s3, [#allocation4]  }
 0x972   : > { %18191 = dma.done.wait (%p17979_p9), [#allocation4], 256  }
 0x973   : > { %18193 = vsyncadd (%p17979_p9), [#allocation4], 4294967040 }
 0x974 PF: > { %s20_s17 = sadd.s32 1, %s18216_s17   ;;  %s20882_s12 = smov %s18200_s13 }
 0x975   : > { %p17_p6 = scmp.ge.s32.totalorder %s20_s17, 4   ;;  %s20883_s13 = smov %s18204_s14 }
 0x976   : > { %s20884_s14 = smov %s18352_s23  ;;  %s20885_s15 = smov %s18212_s16 }
 0x977   : > { %s20886_s16 = smov %s20888_s25  ;;  %19 = sbr.rel (!%p17_p6) target bundleno = 7 (0x7), region = 92 }
 0x97e   :  { %15557 = vsyncpa [#allocation3], 1 }
 0x97f   :  { %15559 = vsyncpa [#allocation3 + $0x1], 1 }
 0x980   :  { %15560 = vsyncpa [#allocation6], 1 }
 0x981   :  { %15562 = vsyncpa [#allocation6 + $0x1], 1 }
 0x982   :  { %15563 = vsyncpa [#allocation4], 1 }
 0x983   :  { %15565 = vsyncpa [#allocation4 + $0x1], 1 }

</bundles_post_ra>
